<compile_context>
chip_gen: v7x
topology: tpu7x:2x2x1
jax: 0.10.0
libtpu: 0.0.40
codegen_flags: <defaults>
</compile_context>

<pallas_src>
import jax
import jax.numpy as jnp
from jax import lax
from jax.experimental import pallas as pl
from jax.experimental.pallas import tpu as pltpu

EPS = 1e-5       # nn.BatchNorm2d default eps
LANES = 128


def _round_up(x, m):
    return ((x + m - 1) // m) * m


def _level_kernel(x_ref, bn1_g_ref, bn1_b_ref, w1_ref, b1_ref,
                  t_ref, freq_ref, lw_ref, lb_ref,
                  bn2_g_ref, bn2_b_ref, w2_ref, b2_ref,
                  o_ref, xcol_ref):
    N, H, W, Cin = x_ref.shape
    C = w1_ref.shape[-1]          # lane-dense padded channel count (multiple of 128)
    OCH = o_ref.shape[-1]
    R = N * H * W
    inv_R = 1.0 / R

    # ---- zero only the two padded halo rows of the im2col scratch, once.
    #      Boundary-column zeros are folded into the full-width tap stores below
    #      and the interior rows are fully rewritten by each conv's im2col. ----
    zrow = jnp.zeros((N, 1, W, 3 * C), xcol_ref.dtype)
    xcol_ref[:, 0:1, :, :] = zrow                          # padded row h' = 0
    xcol_ref[:, H + 1:H + 2, :, :] = zrow                  # padded row h' = H+1

    # boundary column kept in-register (f32), reused by both convs
    zcol = jnp.zeros((N, H, 1, C), jnp.float32)

    def batchnorm(v, g_ref, b_ref):
        # training-mode BN, single pass over the activations:
        #   mu = E[x], var = E[x^2] - mu^2 (biased), y = x*scale + shift
        mu = jnp.sum(v, axis=0, keepdims=True) * inv_R
        ex2 = jnp.sum(v * v, axis=0, keepdims=True) * inv_R
        scale = g_ref[...] * lax.rsqrt(ex2 - mu * mu + EPS)
        shift = b_ref[...] - mu * scale
        return v * scale + shift

    def im2col(v):
        """v: (N, H, W, C) f32.  Builds xcol[n,h',w,dx*C+c] == x_pad[n,h'-1,w+dx-1,c].

        Three independent, full-width, fully aligned bf16 stores sourced from the
        in-register value (no read-back, no masked 1-wide boundary writes).
        """
        # centre tap (dx = 1)
        xcol_ref[:, 1:H + 1, :, C:2 * C] = v.astype(xcol_ref.dtype)
        # left tap (dx = 0): input column w-1 ; column 0 is the zero halo
        left = jnp.concatenate([zcol, v[:, :, 0:W - 1, :]], axis=2)
        xcol_ref[:, 1:H + 1, :, 0:C] = left.astype(xcol_ref.dtype)
        # right tap (dx = 2): input column w+1 ; column W-1 is the zero halo
        right = jnp.concatenate([v[:, :, 1:W, :], zcol], axis=2)
        xcol_ref[:, 1:H + 1, :, 2 * C:3 * C] = right.astype(xcol_ref.dtype)

    def conv3x3(w_ref, b_ref):
        # 3 lane-dense MXU matmuls (one per kernel row dy), bf16 operands, f32 acc.
        # Accumulator starts from the broadcast bias -> no separate epilogue add.
        acc = jnp.broadcast_to(b_ref[...], (R, C))
        for dy in range(3):
            lhs = xcol_ref[:, dy:dy + H, :, :].reshape(R, 3 * C)
            acc = acc + jnp.dot(lhs, w_ref[dy],
                                preferred_element_type=jnp.float32)
        return acc

    # ---------- BN1 -> conv1 -> ReLU ----------
    xv = x_ref[...].reshape(R, Cin)
    if Cin < C:   # lane-pad the compact HBM input in-register
        xv = jnp.concatenate([xv, jnp.zeros((R, C - Cin), jnp.float32)], axis=-1)
    xn = batchnorm(xv, bn1_g_ref, bn1_b_ref)
    im2col(xn.reshape(N, H, W, C))
    h = jnp.maximum(conv3x3(w1_ref, b1_ref), 0.0)

    # ---------- time embedding: sinusoidal -> Linear -> ReLU (tiny, kept in f32) ----------
    arg = t_ref[...] * freq_ref[...]                                # (N, dim//2)
    emb = jnp.concatenate([jnp.sin(arg), jnp.cos(arg)], axis=-1)    # (N, dim)
    emb = jnp.dot(emb, lw_ref[...], preferred_element_type=jnp.float32) + lb_ref[...]
    emb = jnp.maximum(emb, 0.0)                                     # (N, C)

    h = (h.reshape(N, H * W, C) + emb[:, None, :]).reshape(R, C)

    # ---------- BN2 -> conv2 -> ReLU ----------
    hn = batchnorm(h, bn2_g_ref, bn2_b_ref)
    im2col(hn.reshape(N, H, W, C))
    out = jnp.maximum(conv3x3(w2_ref, b2_ref), 0.0)
    # compact output writeback: only the real channels go back to HBM
    o_ref[...] = out[:, :OCH] if OCH < C else out


def level_forward(x_nchw, t, params):
    """x_nchw: (N, Cin, H, W) f32;  t: (N, 1) f32.  Returns (N, Och, H, W) f32."""
    N, Cin, H, W = x_nchw.shape
    och = params["conv1_w"].shape[-1]
    C = _round_up(max(Cin, och), LANES)        # lane-dense padded channel count

    # NCHW -> NHWC; channels stay COMPACT in HBM (padding happens in-kernel).
    x = jnp.transpose(x_nchw, (0, 2, 3, 1))

    def pad_row(v):                            # (1, c) -> (1, C)
        return jnp.pad(v, ((0, 0), (0, C - v.shape[-1])))

    def pad_conv_w(w):                         # (3, 3, ci, co) -> (3, 3*C, C), bf16
        w = jnp.pad(w, ((0, 0), (0, 0), (0, C - w.shape[2]), (0, C - w.shape[3])))
        return w.reshape(3, 3 * C, C).astype(jnp.bfloat16)

    w1 = pad_conv_w(params["conv1_w"])
    w2 = pad_conv_w(params["conv2_w"])
    lin_w = jnp.pad(params["lin_w"], ((0, 0), (0, C - och)))

    vmem = pl.BlockSpec(memory_space=pltpu.MemorySpace.VMEM)
    out = pl.pallas_call(
        _level_kernel,
        out_shape=jax.ShapeDtypeStruct((N * H * W, och), jnp.float32),
        in_specs=[vmem] * 13,
        out_specs=vmem,
        scratch_shapes=[pltpu.VMEM((N, H + 2, W, 3 * C), jnp.bfloat16)],
        compiler_params=pltpu.CompilerParams(
            # explicit so v5e's 16 MiB scoped default is not the silent ceiling;
            # re-derive per generation (v7x: 64 MiB physical) when this is tiled.
            vmem_limit_bytes=32 * 1024 * 1024),
    )(x,
      pad_row(params["bn1_g"]), pad_row(params["bn1_b"]),
      w1, pad_row(params["conv1_b"]),
      t, params["freq"], lin_w, pad_row(params["lin_b"]),
      pad_row(params["bn2_g"]), pad_row(params["bn2_b"]),
      w2, pad_row(params["conv2_b"]))

    # back to PyTorch layout
    return jnp.transpose(out.reshape(N, H, W, och), (0, 3, 1, 2))


def level_reference(x_nchw, t, params):
    """Pure-JAX f32 reference (mirrors the PyTorch forward)."""
    def bn(x, g, b):
        mu = x.mean(axis=(0, 2, 3), keepdims=True)
        var = ((x - mu) ** 2).mean(axis=(0, 2, 3), keepdims=True)
        return (x - mu) / jnp.sqrt(var + EPS) * g.reshape(1, -1, 1, 1) \
            + b.reshape(1, -1, 1, 1)

    def conv(x, w_hwio, b):
        y = lax.conv_general_dilated(
            x, w_hwio, window_strides=(1, 1), padding="SAME",
            dimension_numbers=("NCHW", "HWIO", "NCHW"))
        return y + b.reshape(1, -1, 1, 1)

    x = bn(x_nchw, params["bn1_g"][0], params["bn1_b"][0])
    x = jnp.maximum(conv(x, params["conv1_w"], params["conv1_b"][0]), 0.0)
    arg = t * params["freq"]
    emb = jnp.concatenate([jnp.sin(arg), jnp.cos(arg)], axis=-1)
    emb = jnp.maximum(emb @ params["lin_w"] + params["lin_b"], 0.0)
    x = x + emb[:, :, None, None]
    x = bn(x, params["bn2_g"][0], params["bn2_b"][0])
    x = jnp.maximum(conv(x, params["conv2_w"], params["conv2_b"][0]), 0.0)
    return x


def make_params(key, inch, och, dim):
    ks = jax.random.split(key, 10)
    half = dim // 2
    return {
        "bn1_g": 1.0 + 0.1 * jax.random.normal(ks[0], (1, inch), jnp.float32),
        "bn1_b": 0.1 * jax.random.normal(ks[1], (1, inch), jnp.float32),
        "conv1_w": 0.2 * jax.random.normal(ks[2], (3, 3, inch, och), jnp.float32),
        "conv1_b": 0.1 * jax.random.normal(ks[3], (1, och), jnp.float32),
        "freq": (10000.0 ** jnp.linspace(0.0, 1.0, half)).reshape(1, half)
                .astype(jnp.float32),
        "lin_w": 0.2 * jax.random.normal(ks[4], (dim, och), jnp.float32),
        "lin_b": 0.1 * jax.random.normal(ks[5], (1, och), jnp.float32),
        "bn2_g": 1.0 + 0.1 * jax.random.normal(ks[6], (1, och), jnp.float32),
        "bn2_b": 0.1 * jax.random.normal(ks[7], (1, och), jnp.float32),
        "conv2_w": 0.2 * jax.random.normal(ks[8], (3, 3, och, och), jnp.float32),
        "conv2_b": 0.1 * jax.random.normal(ks[9], (1, och), jnp.float32),
    }


if __name__ == "__main__":
    N, inch, och, dim, H, W = 2, 4, 8, 32, 16, 16

    root = jax.random.PRNGKey(0)
    kx, kt, kp = jax.random.split(root, 3)
    x = jax.random.normal(kx, (N, inch, H, W), jnp.float32)
    t = jax.random.uniform(kt, (N, 1), jnp.float32)            # timestep per batch
    params = make_params(kp, inch, och, dim)

    out = jax.block_until_ready(level_forward(x, t, params))
    ref = jax.block_until_ready(level_reference(x, t, params))

    assert out.shape == (N, och, H, W), out.shape
    assert bool(jnp.all(jnp.isfinite(out)))
    # Kernel uses bf16 MXU operands with f32 accumulation (v6e/v7x fast path), so the
    # tolerance vs. the pure-f32 reference is slightly looser than pure-f32 round-off.
    assert bool(jnp.allclose(out, ref, rtol=3e-2, atol=3e-2)), (
        "max abs diff = %g" % float(jnp.max(jnp.abs(out - ref))))
    print("KERNEL_OK")
</pallas_src>

<mosaic_0001>
module attributes {stable_mosaic.version = 11 : i64} {
  func.func @_level_kernel(%arg0: memref<2x16x16x4xf32, #tpu.memory_space<vmem>>, %arg1: memref<1x128xf32, #tpu.memory_space<vmem>>, %arg2: memref<1x128xf32, #tpu.memory_space<vmem>>, %arg3: memref<3x384x128xbf16, #tpu.memory_space<vmem>>, %arg4: memref<1x128xf32, #tpu.memory_space<vmem>>, %arg5: memref<2x1xf32, #tpu.memory_space<vmem>>, %arg6: memref<1x16xf32, #tpu.memory_space<vmem>>, %arg7: memref<32x128xf32, #tpu.memory_space<vmem>>, %arg8: memref<1x128xf32, #tpu.memory_space<vmem>>, %arg9: memref<1x128xf32, #tpu.memory_space<vmem>>, %arg10: memref<1x128xf32, #tpu.memory_space<vmem>>, %arg11: memref<3x384x128xbf16, #tpu.memory_space<vmem>>, %arg12: memref<1x128xf32, #tpu.memory_space<vmem>>, %arg13: memref<512x8xf32, #tpu.memory_space<vmem>>, %arg14: memref<2x18x16x384xbf16, #tpu.memory_space<vmem>>) attributes {dimension_semantics = [], scalar_prefetch = 0 : i64, scratch_operands = 1 : i64, tpu.core_type = #tpu.core_type<tc>} {
    %cst = arith.constant 0.000000e+00 : bf16
    %0 = vector.broadcast %cst : bf16 to vector<2x1x16x384xbf16>
    %c0 = arith.constant 0 : index
    %c0_0 = arith.constant 0 : index
    %c0_1 = arith.constant 0 : index
    %c0_2 = arith.constant 0 : index
    %1 = vector.load %arg14[%c0, %c0_0, %c0_1, %c0_2] : memref<2x18x16x384xbf16, #tpu.memory_space<vmem>>, vector<2x1x16x384xbf16>
    tpu.vector_store %arg14[%c0, %c0_0, %c0_1, %c0_2], %0 {strides = array<i32>} : memref<2x18x16x384xbf16, #tpu.memory_space<vmem>>, vector<2x1x16x384xbf16>,
    %c0_3 = arith.constant 0 : index
    %c17 = arith.constant 17 : index
    %c0_4 = arith.constant 0 : index
    %c0_5 = arith.constant 0 : index
    %2 = vector.load %arg14[%c0_3, %c17, %c0_4, %c0_5] : memref<2x18x16x384xbf16, #tpu.memory_space<vmem>>, vector<2x1x16x384xbf16>
    tpu.vector_store %arg14[%c0_3, %c17, %c0_4, %c0_5], %0 {strides = array<i32>} : memref<2x18x16x384xbf16, #tpu.memory_space<vmem>>, vector<2x1x16x384xbf16>,
    %cst_6 = arith.constant 0.000000e+00 : f32
    %3 = vector.broadcast %cst_6 : f32 to vector<2x16x1x128xf32>
    %c0_7 = arith.constant 0 : index
    %c0_8 = arith.constant 0 : index
    %c0_9 = arith.constant 0 : index
    %c0_10 = arith.constant 0 : index
    %4 = vector.load %arg0[%c0_7, %c0_8, %c0_9, %c0_10] : memref<2x16x16x4xf32, #tpu.memory_space<vmem>>, vector<2x16x16x4xf32>
    %5 = vector.shape_cast %4 : vector<2x16x16x4xf32> to vector<512x4xf32>
    %cst_11 = arith.constant 0.000000e+00 : f32
    %6 = vector.broadcast %cst_11 : f32 to vector<512x124xf32>
    %7 = tpu.concatenate %5, %6 in 1 : vector<512x4xf32>, vector<512x124xf32> -> vector<512x128xf32>
    %cst_12 = arith.constant dense<0.000000e+00> : vector<128xf32>
    %8 = vector.multi_reduction <add>, %7, %cst_12 [0] : vector<512x128xf32> to vector<128xf32>
    %9 = vector.shape_cast %8 : vector<128xf32> to vector<1x128xf32>
    %cst_13 = arith.constant 0.001953125 : f32
    %10 = vector.broadcast %cst_13 : f32 to vector<1x128xf32>
    %11 = arith.mulf %9, %10 : vector<1x128xf32>
    %12 = arith.mulf %7, %7 : vector<512x128xf32>
    %cst_14 = arith.constant dense<0.000000e+00> : vector<128xf32>
    %13 = vector.multi_reduction <add>, %12, %cst_14 [0] : vector<512x128xf32> to vector<128xf32>
    %14 = vector.shape_cast %13 : vector<128xf32> to vector<1x128xf32>
    %cst_15 = arith.constant 0.001953125 : f32
    %15 = vector.broadcast %cst_15 : f32 to vector<1x128xf32>
    %16 = arith.mulf %14, %15 : vector<1x128xf32>
    %c0_16 = arith.constant 0 : index
    %c0_17 = arith.constant 0 : index
    %17 = vector.load %arg1[%c0_16, %c0_17] : memref<1x128xf32, #tpu.memory_space<vmem>>, vector<1x128xf32>
    %18 = arith.mulf %11, %11 : vector<1x128xf32>
    %19 = arith.subf %16, %18 : vector<1x128xf32>
    %cst_18 = arith.constant 9.99999974E-6 : f32
    %20 = vector.broadcast %cst_18 : f32 to vector<1x128xf32>
    %21 = arith.addf %19, %20 : vector<1x128xf32>
    %22 = math.rsqrt %21 : vector<1x128xf32>
    %23 = arith.mulf %17, %22 : vector<1x128xf32>
    %c0_19 = arith.constant 0 : index
    %c0_20 = arith.constant 0 : index
    %24 = vector.load %arg2[%c0_19, %c0_20] : memref<1x128xf32, #tpu.memory_space<vmem>>, vector<1x128xf32>
    %25 = arith.mulf %11, %23 : vector<1x128xf32>
    %26 = arith.subf %24, %25 : vector<1x128xf32>
    %27 = vector.broadcast %23 : vector<1x128xf32> to vector<512x128xf32>
    %28 = arith.mulf %7, %27 : vector<512x128xf32>
    %29 = vector.broadcast %26 : vector<1x128xf32> to vector<512x128xf32>
    %30 = arith.addf %28, %29 : vector<512x128xf32>
    %31 = vector.shape_cast %30 : vector<512x128xf32> to vector<2x16x16x128xf32>
    %32 = arith.truncf %31 : vector<2x16x16x128xf32> to vector<2x16x16x128xbf16>
    %c0_21 = arith.constant 0 : index
    %c1 = arith.constant 1 : index
    %c0_22 = arith.constant 0 : index
    %c128 = arith.constant 128 : index
    %33 = vector.load %arg14[%c0_21, %c1, %c0_22, %c128] : memref<2x18x16x384xbf16, #tpu.memory_space<vmem>>, vector<2x16x16x128xbf16>
    tpu.vector_store %arg14[%c0_21, %c1, %c0_22, %c128], %32 {strides = array<i32>} : memref<2x18x16x384xbf16, #tpu.memory_space<vmem>>, vector<2x16x16x128xbf16>,
    %34 = vector.extract_strided_slice %31 {offsets = [0, 0, 0, 0], sizes = [2, 16, 15, 128], strides = [1, 1, 1, 1]} : vector<2x16x16x128xf32> to vector<2x16x15x128xf32>
    %35 = tpu.concatenate %3, %34 in 2 : vector<2x16x1x128xf32>, vector<2x16x15x128xf32> -> vector<2x16x16x128xf32>
    %36 = arith.truncf %35 : vector<2x16x16x128xf32> to vector<2x16x16x128xbf16>
    %c0_23 = arith.constant 0 : index
    %c1_24 = arith.constant 1 : index
    %c0_25 = arith.constant 0 : index
    %c0_26 = arith.constant 0 : index
    %37 = vector.load %arg14[%c0_23, %c1_24, %c0_25, %c0_26] : memref<2x18x16x384xbf16, #tpu.memory_space<vmem>>, vector<2x16x16x128xbf16>
    tpu.vector_store %arg14[%c0_23, %c1_24, %c0_25, %c0_26], %36 {strides = array<i32>} : memref<2x18x16x384xbf16, #tpu.memory_space<vmem>>, vector<2x16x16x128xbf16>,
    %38 = vector.extract_strided_slice %31 {offsets = [0, 0, 1, 0], sizes = [2, 16, 15, 128], strides = [1, 1, 1, 1]} : vector<2x16x16x128xf32> to vector<2x16x15x128xf32>
    %39 = tpu.concatenate %38, %3 in 2 : vector<2x16x15x128xf32>, vector<2x16x1x128xf32> -> vector<2x16x16x128xf32>
    %40 = arith.truncf %39 : vector<2x16x16x128xf32> to vector<2x16x16x128xbf16>
    %c0_27 = arith.constant 0 : index
    %c1_28 = arith.constant 1 : index
    %c0_29 = arith.constant 0 : index
    %c256 = arith.constant 256 : index
    %41 = vector.load %arg14[%c0_27, %c1_28, %c0_29, %c256] : memref<2x18x16x384xbf16, #tpu.memory_space<vmem>>, vector<2x16x16x128xbf16>
    tpu.vector_store %arg14[%c0_27, %c1_28, %c0_29, %c256], %40 {strides = array<i32>} : memref<2x18x16x384xbf16, #tpu.memory_space<vmem>>, vector<2x16x16x128xbf16>,
    %c0_30 = arith.constant 0 : index
    %c0_31 = arith.constant 0 : index
    %42 = vector.load %arg4[%c0_30, %c0_31] : memref<1x128xf32, #tpu.memory_space<vmem>>, vector<1x128xf32>
    %43 = vector.shape_cast %42 : vector<1x128xf32> to vector<1x128xf32>
    %44 = vector.broadcast %43 : vector<1x128xf32> to vector<512x128xf32>
    %c0_32 = arith.constant 0 : index
    %c0_33 = arith.constant 0 : index
    %c0_34 = arith.constant 0 : index
    %c0_35 = arith.constant 0 : index
    %45 = vector.load %arg14[%c0_32, %c0_33, %c0_34, %c0_35] : memref<2x18x16x384xbf16, #tpu.memory_space<vmem>>, vector<2x16x16x384xbf16>
    %46 = vector.shape_cast %45 : vector<2x16x16x384xbf16> to vector<512x384xbf16>
    %c0_36 = arith.constant 0 : index
    %c0_37 = arith.constant 0 : index
    %c0_38 = arith.constant 0 : index
    %47 = vector.load %arg3[%c0_36, %c0_37, %c0_38] : memref<3x384x128xbf16, #tpu.memory_space<vmem>>, vector<1x384x128xbf16>
    %48 = vector.shape_cast %47 : vector<1x384x128xbf16> to vector<384x128xbf16>
    %cst_39 = arith.constant dense<0.000000e+00> : vector<512x128xf32>
    %49 = tpu.matmul %46, %48, %cst_39 {dimension_numbers = #tpu.dot_dimension_numbers<[1], [0], [0], [1], [0, 0, 1, 1], [], []>} : vector<512x384xbf16>, vector<384x128xbf16>, vector<512x128xf32> -> vector<512x128xf32>
    %50 = arith.addf %44, %49 : vector<512x128xf32>
    %c0_40 = arith.constant 0 : index
    %c1_41 = arith.constant 1 : index
    %c0_42 = arith.constant 0 : index
    %c0_43 = arith.constant 0 : index
    %51 = vector.load %arg14[%c0_40, %c1_41, %c0_42, %c0_43] : memref<2x18x16x384xbf16, #tpu.memory_space<vmem>>, vector<2x16x16x384xbf16>
    %52 = vector.shape_cast %51 : vector<2x16x16x384xbf16> to vector<512x384xbf16>
    %c1_44 = arith.constant 1 : index
    %c0_45 = arith.constant 0 : index
    %c0_46 = arith.constant 0 : index
    %53 = vector.load %arg3[%c1_44, %c0_45, %c0_46] : memref<3x384x128xbf16, #tpu.memory_space<vmem>>, vector<1x384x128xbf16>
    %54 = vector.shape_cast %53 : vector<1x384x128xbf16> to vector<384x128xbf16>
    %cst_47 = arith.constant dense<0.000000e+00> : vector<512x128xf32>
    %55 = tpu.matmul %52, %54, %cst_47 {dimension_numbers = #tpu.dot_dimension_numbers<[1], [0], [0], [1], [0, 0, 1, 1], [], []>} : vector<512x384xbf16>, vector<384x128xbf16>, vector<512x128xf32> -> vector<512x128xf32>
    %56 = arith.addf %50, %55 : vector<512x128xf32>
    %c0_48 = arith.constant 0 : index
    %c2 = arith.constant 2 : index
    %c0_49 = arith.constant 0 : index
    %c0_50 = arith.constant 0 : index
    %57 = vector.load %arg14[%c0_48, %c2, %c0_49, %c0_50] : memref<2x18x16x384xbf16, #tpu.memory_space<vmem>>, vector<2x16x16x384xbf16>
    %58 = vector.shape_cast %57 : vector<2x16x16x384xbf16> to vector<512x384xbf16>
    %c2_51 = arith.constant 2 : index
    %c0_52 = arith.constant 0 : index
    %c0_53 = arith.constant 0 : index
    %59 = vector.load %arg3[%c2_51, %c0_52, %c0_53] : memref<3x384x128xbf16, #tpu.memory_space<vmem>>, vector<1x384x128xbf16>
    %60 = vector.shape_cast %59 : vector<1x384x128xbf16> to vector<384x128xbf16>
    %cst_54 = arith.constant dense<0.000000e+00> : vector<512x128xf32>
    %61 = tpu.matmul %58, %60, %cst_54 {dimension_numbers = #tpu.dot_dimension_numbers<[1], [0], [0], [1], [0, 0, 1, 1], [], []>} : vector<512x384xbf16>, vector<384x128xbf16>, vector<512x128xf32> -> vector<512x128xf32>
    %62 = arith.addf %56, %61 : vector<512x128xf32>
    %cst_55 = arith.constant 0.000000e+00 : f32
    %63 = vector.broadcast %cst_55 : f32 to vector<512x128xf32>
    %64 = arith.maximumf %62, %63 : vector<512x128xf32>
    %c0_56 = arith.constant 0 : index
    %c0_57 = arith.constant 0 : index
    %65 = vector.load %arg5[%c0_56, %c0_57] : memref<2x1xf32, #tpu.memory_space<vmem>>, vector<2x1xf32>
    %c0_58 = arith.constant 0 : index
    %c0_59 = arith.constant 0 : index
    %66 = vector.load %arg6[%c0_58, %c0_59] : memref<1x16xf32, #tpu.memory_space<vmem>>, vector<1x16xf32>
    %67 = vector.broadcast %65 : vector<2x1xf32> to vector<2x16xf32>
    %68 = vector.broadcast %66 : vector<1x16xf32> to vector<2x16xf32>
    %69 = arith.mulf %67, %68 : vector<2x16xf32>
    %70 = math.sin %69 : vector<2x16xf32>
    %71 = math.cos %69 : vector<2x16xf32>
    %72 = tpu.concatenate %70, %71 in 1 : vector<2x16xf32>, vector<2x16xf32> -> vector<2x32xf32>
    %c0_60 = arith.constant 0 : index
    %c0_61 = arith.constant 0 : index
    %73 = vector.load %arg7[%c0_60, %c0_61] : memref<32x128xf32, #tpu.memory_space<vmem>>, vector<32x128xf32>
    %cst_62 = arith.constant dense<0.000000e+00> : vector<2x128xf32>
    %74 = tpu.matmul %72, %73, %cst_62 {dimension_numbers = #tpu.dot_dimension_numbers<[1], [0], [0], [1], [0, 0, 1, 1], [], []>} : vector<2x32xf32>, vector<32x128xf32>, vector<2x128xf32> -> vector<2x128xf32>
    %c0_63 = arith.constant 0 : index
    %c0_64 = arith.constant 0 : index
    %75 = vector.load %arg8[%c0_63, %c0_64] : memref<1x128xf32, #tpu.memory_space<vmem>>, vector<1x128xf32>
    %76 = vector.broadcast %75 : vector<1x128xf32> to vector<2x128xf32>
    %77 = arith.addf %74, %76 : vector<2x128xf32>
    %cst_65 = arith.constant 0.000000e+00 : f32
    %78 = vector.broadcast %cst_65 : f32 to vector<2x128xf32>
    %79 = arith.maximumf %77, %78 : vector<2x128xf32>
    %80 = vector.shape_cast %64 : vector<512x128xf32> to vector<2x256x128xf32>
    %81 = vector.shape_cast %79 : vector<2x128xf32> to vector<2x1x128xf32>
    %82 = vector.broadcast %81 : vector<2x1x128xf32> to vector<2x256x128xf32>
    %83 = arith.addf %80, %82 : vector<2x256x128xf32>
    %84 = vector.shape_cast %83 : vector<2x256x128xf32> to vector<512x128xf32>
    %cst_66 = arith.constant dense<0.000000e+00> : vector<128xf32>
    %85 = vector.multi_reduction <add>, %84, %cst_66 [0] : vector<512x128xf32> to vector<128xf32>
    %86 = vector.shape_cast %85 : vector<128xf32> to vector<1x128xf32>
    %cst_67 = arith.constant 0.001953125 : f32
    %87 = vector.broadcast %cst_67 : f32 to vector<1x128xf32>
    %88 = arith.mulf %86, %87 : vector<1x128xf32>
    %89 = arith.mulf %84, %84 : vector<512x128xf32>
    %cst_68 = arith.constant dense<0.000000e+00> : vector<128xf32>
    %90 = vector.multi_reduction <add>, %89, %cst_68 [0] : vector<512x128xf32> to vector<128xf32>
    %91 = vector.shape_cast %90 : vector<128xf32> to vector<1x128xf32>
    %cst_69 = arith.constant 0.001953125 : f32
    %92 = vector.broadcast %cst_69 : f32 to vector<1x128xf32>
    %93 = arith.mulf %91, %92 : vector<1x128xf32>
    %c0_70 = arith.constant 0 : index
    %c0_71 = arith.constant 0 : index
    %94 = vector.load %arg9[%c0_70, %c0_71] : memref<1x128xf32, #tpu.memory_space<vmem>>, vector<1x128xf32>
    %95 = arith.mulf %88, %88 : vector<1x128xf32>
    %96 = arith.subf %93, %95 : vector<1x128xf32>
    %cst_72 = arith.constant 9.99999974E-6 : f32
    %97 = vector.broadcast %cst_72 : f32 to vector<1x128xf32>
    %98 = arith.addf %96, %97 : vector<1x128xf32>
    %99 = math.rsqrt %98 : vector<1x128xf32>
    %100 = arith.mulf %94, %99 : vector<1x128xf32>
    %c0_73 = arith.constant 0 : index
    %c0_74 = arith.constant 0 : index
    %101 = vector.load %arg10[%c0_73, %c0_74] : memref<1x128xf32, #tpu.memory_space<vmem>>, vector<1x128xf32>
    %102 = arith.mulf %88, %100 : vector<1x128xf32>
    %103 = arith.subf %101, %102 : vector<1x128xf32>
    %104 = vector.broadcast %100 : vector<1x128xf32> to vector<512x128xf32>
    %105 = arith.mulf %84, %104 : vector<512x128xf32>
    %106 = vector.broadcast %103 : vector<1x128xf32> to vector<512x128xf32>
    %107 = arith.addf %105, %106 : vector<512x128xf32>
    %108 = vector.shape_cast %107 : vector<512x128xf32> to vector<2x16x16x128xf32>
    %109 = arith.truncf %108 : vector<2x16x16x128xf32> to vector<2x16x16x128xbf16>
    %c0_75 = arith.constant 0 : index
    %c1_76 = arith.constant 1 : index
    %c0_77 = arith.constant 0 : index
    %c128_78 = arith.constant 128 : index
    %110 = vector.load %arg14[%c0_75, %c1_76, %c0_77, %c128_78] : memref<2x18x16x384xbf16, #tpu.memory_space<vmem>>, vector<2x16x16x128xbf16>
    tpu.vector_store %arg14[%c0_75, %c1_76, %c0_77, %c128_78], %109 {strides = array<i32>} : memref<2x18x16x384xbf16, #tpu.memory_space<vmem>>, vector<2x16x16x128xbf16>,
    %111 = vector.extract_strided_slice %108 {offsets = [0, 0, 0, 0], sizes = [2, 16, 15, 128], strides = [1, 1, 1, 1]} : vector<2x16x16x128xf32> to vector<2x16x15x128xf32>
    %112 = tpu.concatenate %3, %111 in 2 : vector<2x16x1x128xf32>, vector<2x16x15x128xf32> -> vector<2x16x16x128xf32>
    %113 = arith.truncf %112 : vector<2x16x16x128xf32> to vector<2x16x16x128xbf16>
    %c0_79 = arith.constant 0 : index
    %c1_80 = arith.constant 1 : index
    %c0_81 = arith.constant 0 : index
    %c0_82 = arith.constant 0 : index
    %114 = vector.load %arg14[%c0_79, %c1_80, %c0_81, %c0_82] : memref<2x18x16x384xbf16, #tpu.memory_space<vmem>>, vector<2x16x16x128xbf16>
    tpu.vector_store %arg14[%c0_79, %c1_80, %c0_81, %c0_82], %113 {strides = array<i32>} : memref<2x18x16x384xbf16, #tpu.memory_space<vmem>>, vector<2x16x16x128xbf16>,
    %115 = vector.extract_strided_slice %108 {offsets = [0, 0, 1, 0], sizes = [2, 16, 15, 128], strides = [1, 1, 1, 1]} : vector<2x16x16x128xf32> to vector<2x16x15x128xf32>
    %116 = tpu.concatenate %115, %3 in 2 : vector<2x16x15x128xf32>, vector<2x16x1x128xf32> -> vector<2x16x16x128xf32>
    %117 = arith.truncf %116 : vector<2x16x16x128xf32> to vector<2x16x16x128xbf16>
    %c0_83 = arith.constant 0 : index
    %c1_84 = arith.constant 1 : index
    %c0_85 = arith.constant 0 : index
    %c256_86 = arith.constant 256 : index
    %118 = vector.load %arg14[%c0_83, %c1_84, %c0_85, %c256_86] : memref<2x18x16x384xbf16, #tpu.memory_space<vmem>>, vector<2x16x16x128xbf16>
    tpu.vector_store %arg14[%c0_83, %c1_84, %c0_85, %c256_86], %117 {strides = array<i32>} : memref<2x18x16x384xbf16, #tpu.memory_space<vmem>>, vector<2x16x16x128xbf16>,
    %c0_87 = arith.constant 0 : index
    %c0_88 = arith.constant 0 : index
    %119 = vector.load %arg12[%c0_87, %c0_88] : memref<1x128xf32, #tpu.memory_space<vmem>>, vector<1x128xf32>
    %120 = vector.shape_cast %119 : vector<1x128xf32> to vector<1x128xf32>
    %121 = vector.broadcast %120 : vector<1x128xf32> to vector<512x128xf32>
    %c0_89 = arith.constant 0 : index
    %c0_90 = arith.constant 0 : index
    %c0_91 = arith.constant 0 : index
    %c0_92 = arith.constant 0 : index
    %122 = vector.load %arg14[%c0_89, %c0_90, %c0_91, %c0_92] : memref<2x18x16x384xbf16, #tpu.memory_space<vmem>>, vector<2x16x16x384xbf16>
    %123 = vector.shape_cast %122 : vector<2x16x16x384xbf16> to vector<512x384xbf16>
    %c0_93 = arith.constant 0 : index
    %c0_94 = arith.constant 0 : index
    %c0_95 = arith.constant 0 : index
    %124 = vector.load %arg11[%c0_93, %c0_94, %c0_95] : memref<3x384x128xbf16, #tpu.memory_space<vmem>>, vector<1x384x128xbf16>
    %125 = vector.shape_cast %124 : vector<1x384x128xbf16> to vector<384x128xbf16>
    %cst_96 = arith.constant dense<0.000000e+00> : vector<512x128xf32>
    %126 = tpu.matmul %123, %125, %cst_96 {dimension_numbers = #tpu.dot_dimension_numbers<[1], [0], [0], [1], [0, 0, 1, 1], [], []>} : vector<512x384xbf16>, vector<384x128xbf16>, vector<512x128xf32> -> vector<512x128xf32>
    %127 = arith.addf %121, %126 : vector<512x128xf32>
    %c0_97 = arith.constant 0 : index
    %c1_98 = arith.constant 1 : index
    %c0_99 = arith.constant 0 : index
    %c0_100 = arith.constant 0 : index
    %128 = vector.load %arg14[%c0_97, %c1_98, %c0_99, %c0_100] : memref<2x18x16x384xbf16, #tpu.memory_space<vmem>>, vector<2x16x16x384xbf16>
    %129 = vector.shape_cast %128 : vector<2x16x16x384xbf16> to vector<512x384xbf16>
    %c1_101 = arith.constant 1 : index
    %c0_102 = arith.constant 0 : index
    %c0_103 = arith.constant 0 : index
    %130 = vector.load %arg11[%c1_101, %c0_102, %c0_103] : memref<3x384x128xbf16, #tpu.memory_space<vmem>>, vector<1x384x128xbf16>
    %131 = vector.shape_cast %130 : vector<1x384x128xbf16> to vector<384x128xbf16>
    %cst_104 = arith.constant dense<0.000000e+00> : vector<512x128xf32>
    %132 = tpu.matmul %129, %131, %cst_104 {dimension_numbers = #tpu.dot_dimension_numbers<[1], [0], [0], [1], [0, 0, 1, 1], [], []>} : vector<512x384xbf16>, vector<384x128xbf16>, vector<512x128xf32> -> vector<512x128xf32>
    %133 = arith.addf %127, %132 : vector<512x128xf32>
    %c0_105 = arith.constant 0 : index
    %c2_106 = arith.constant 2 : index
    %c0_107 = arith.constant 0 : index
    %c0_108 = arith.constant 0 : index
    %134 = vector.load %arg14[%c0_105, %c2_106, %c0_107, %c0_108] : memref<2x18x16x384xbf16, #tpu.memory_space<vmem>>, vector<2x16x16x384xbf16>
    %135 = vector.shape_cast %134 : vector<2x16x16x384xbf16> to vector<512x384xbf16>
    %c2_109 = arith.constant 2 : index
    %c0_110 = arith.constant 0 : index
    %c0_111 = arith.constant 0 : index
    %136 = vector.load %arg11[%c2_109, %c0_110, %c0_111] : memref<3x384x128xbf16, #tpu.memory_space<vmem>>, vector<1x384x128xbf16>
    %137 = vector.shape_cast %136 : vector<1x384x128xbf16> to vector<384x128xbf16>
    %cst_112 = arith.constant dense<0.000000e+00> : vector<512x128xf32>
    %138 = tpu.matmul %135, %137, %cst_112 {dimension_numbers = #tpu.dot_dimension_numbers<[1], [0], [0], [1], [0, 0, 1, 1], [], []>} : vector<512x384xbf16>, vector<384x128xbf16>, vector<512x128xf32> -> vector<512x128xf32>
    %139 = arith.addf %133, %138 : vector<512x128xf32>
    %cst_113 = arith.constant 0.000000e+00 : f32
    %140 = vector.broadcast %cst_113 : f32 to vector<512x128xf32>
    %141 = arith.maximumf %139, %140 : vector<512x128xf32>
    %142 = vector.extract_strided_slice %141 {offsets = [0, 0], sizes = [512, 8], strides = [1, 1]} : vector<512x128xf32> to vector<512x8xf32>
    %c0_114 = arith.constant 0 : index
    %c0_115 = arith.constant 0 : index
    %143 = vector.load %arg13[%c0_114, %c0_115] : memref<512x8xf32, #tpu.memory_space<vmem>>, vector<512x8xf32>
    tpu.vector_store %arg13[%c0_114, %c0_115], %142 {strides = array<i32>} : memref<512x8xf32, #tpu.memory_space<vmem>>, vector<512x8xf32>,
    return
  }
}

</mosaic_0001>

<bundles_post_ra>
// kernel: tpu_custom_call.1
= control target key start
LH: loop header
LB: loop body
LE: loop exit
PB: predicated region body
PF: predicated region fallthrough
CT: control target
= control target key end

     0   :  { %18 = vsyncpa [#allocation4], 0  ;;  %s10877_s25 = smov [#allocation3]   ;;  %s17579_s0 = inlined_call_operand.vmem [shape: f32[2,16,16,4], index: 0, kind: input, shape index: {}]   ;;  %s17580_s1 = inlined_call_operand.vmem [shape: f32[1,128], index: 1, kind: input, shape index: {}]   ;;  %s17581_s2 = inlined_call_operand.vmem [shape: f32[1,128], index: 2, kind: input, shape index: {}]   ;;  %s17582_s3 = inlined_call_operand.vmem [shape: bf16[3,384,128], index: 3, kind: input, shape index: {}]   ;;  %s17583_s4 = inlined_call_operand.vmem [shape: f32[1,128], index: 4, kind: input, shape index: {}]   ;;  %s17584_s5 = inlined_call_operand.vmem [shape: f32[2,1], index: 5, kind: input, shape index: {}]   ;;  %s17585_s6 = inlined_call_operand.vmem [shape: f32[1,16], index: 6, kind: input, shape index: {}]   ;;  %s17586_s7 = inlined_call_operand.vmem [shape: f32[32,128], index: 7, kind: input, shape index: {}]   ;;  %s17587_s8 = inlined_call_operand.vmem [shape: f32[1,128], index: 8, kind: input, shape index: {}]   ;;  %s17588_s9 = inlined_call_operand.vmem [shape: f32[1,128], index: 9, kind: input, shape index: {}]   ;;  %s17589_s10 = inlined_call_operand.vmem [shape: f32[1,128], index: 10, kind: input, shape index: {}]   ;;  %s17590_s11 = inlined_call_operand.hbm [shape: bf16[3,384,128], index: 11, kind: input, shape index: {}]   ;;  %s17591_s12 = inlined_call_operand.vmem [shape: f32[1,128], index: 12, kind: input, shape index: {}]   ;;  %s17592_s13 = inlined_call_operand.vmem [shape: f32[512,8], index: 13, kind: output, shape index: {}]  }
   0x1   :  { %s46_s26 = sshll.u32 %s10877_s25, 4  ;;  %s10853_s29 = scalar_lea.hbm %s17590_s11, 9216  ;;  %s47_s26 = int_to_ptr.vmem [resolvable:$true] %s46_s26 }
   0x2   :  { %p10854_p0 = scmp.ne.s32.totalorder %s17590_s11, %s10853_s29  ;;  %p10857_p1 = scmp.lt.u32.totalorder %s10853_s29, %s17590_s11 }
   0x4   :  { %p10859_p2 = pnand %p10857_p1, %p10854_p0 }
   0x6   :  { %10862 = shalt.err (!%p10859_p2)
}
   0x7   :  { %s10863_s17 = scalar_lea.vmem %s47_s26, 9216  ;;  %p10868_p4 = scmp.lt.s32.totalorder %s47_s26, %s47_s26 }
   0x8   :  { %p10864_p3 = scmp.ne.s32.totalorder %s47_s26, %s10863_s17  ;;  %p10869_p5 = scmp.lt.s32.totalorder %s10863_s17, %s10863_s17 }
   0xa   :  { %p10870_p6 = por %p10869_p5, %p10868_p4 }
   0xc   :  { %p10871_p7 = pnand %p10870_p6, %p10864_p3 }
   0xe   :  { %10874 = shalt.err (!%p10871_p7)
}
   0xf   :  { %s10878_s18 = smov 64   ;;  %s10879_s19 = smov 4  }
  0x10   :  { %52 = dma.hbm_to_vmem [thread:$0]  %s17590_s11, 9216, %s47_s26, [#allocation4], %s10878_s18, %s10878_s18, %s10879_s19  }
  0x11   :  { %10875 = dma.done.wait [#allocation4], 9216  }
  0x12   :  { %10876 = vsyncadd [#allocation4], 4294958080  ;;  %v17593_v0 = vmov 0   ;;  %v10701_v1 = vld [vmem:[%s17582_s3] sm:$0xff]   ;;  %v10702_v2 = vld [vmem:[%s17582_s3 + $0x8] sm:$0xff]   ;;  %vm136_vm0 = vcmask 31744  }
  0x13   :  { %1492 = vmatprep.subr.bf16.mxu0 %v17593_v0  ;;  %1524 = vmatprep.mubr.bf16.mxu0 %v17593_v0  ;;  %v10703_v3 = vld [vmem:[%s17582_s3 + $0x10] sm:$0xff]   ;;  %v10704_v4 = vld [vmem:[%s17582_s3 + $0x18] sm:$0xff]   ;;  %v10711_v5 = vld [vmem:[%s17582_s3 + $0x80] sm:$0xff]   ;;  %vm683_vm1 = vcmask 1040384   ;;  %vm940_vm2 = vcmask 1046528   ;;  %vm10881_vm4 = vmmov 1  }
  0x14   :  { %10199 = vmatprep.mubr.bf16.mxu1 %v17593_v0  ;;  %10700 = vset.pattern.permute.xlu0 %v17593_v0  ;;  %v10713_v6 = vld [vmem:[%s17582_s3 + $0x88] sm:$0xff]   ;;  %v10705_v7 = vld [vmem:[%s17582_s3 + $0x20] sm:$0xff]   ;;  %v10715_v8 = vld [vmem:[%s17582_s3 + $0x90] sm:$0xff]   ;;  %s10888_s27 = smov 16  }
  0x15   :  { %1493 = vmatpush1.bf16.msra.mxu0 %v10701_v1  ;;  %10183 = vmatprep.subr.bf16.mxu1 %v10711_v5  ;;  %v10706_v9 = vld [vmem:[%s17582_s3 + $0x28] sm:$0xff]   ;;  %v10717_v10 = vld [vmem:[%s17582_s3 + $0x98] sm:$0xff]   ;;  %v10707_v11 = vld [vmem:[%s17582_s3 + $0x30] sm:$0xff]  }
  0x16   :  { %1494 = vmatprep.subr.bf16.mxu0 %v17593_v0  ;;  %10184 = vmatpush3.bf16.msra.mxu1 %v10711_v5  ;;  %v10719_v12 = vld [vmem:[%s17582_s3 + $0xa0] sm:$0xff]   ;;  %v73_v14 = vld [vmem:[%s17579_s0 + $0x8] sm:$0xff]  ;;  %v74_v15 = vld [vmem:[%s17579_s0 + $0x10] sm:$0xff] }
  0x17   :  { %10185 = vmatprep.subr.bf16.mxu1 %v10713_v6  ;;  %v72_v13 = vld [vmem:[%s17579_s0] sm:$0xff]  ;;  %v75_v16 = vld [vmem:[%s17579_s0 + $0x18] sm:$0xff]  ;;  %v11037_v18 = vsel %vm136_vm0, %v73_v14, 0.0  ;;  %v11040_v19 = vsel %vm136_vm0, %v74_v15, 0.0  ;;  %v10721_v21 = vld [vmem:[%s17582_s3 + $0xa8] sm:$0xff]  }
  0x18   :  { %v11034_v17 = vsel %vm136_vm0, %v72_v13, 0.0  ;;  %v10708_v20 = vld [vmem:[%s17582_s3 + $0x38] sm:$0xff]   ;;  %v76_v22 = vld [vmem:[%s17579_s0 + $0x20] sm:$0xff]  ;;  %v11055_v24 = vsel %vm136_vm0, %v75_v16, 0.0  ;;  %v77_v25 = vld [vmem:[%s17579_s0 + $0x28] sm:$0xff] }
  0x19   :  { %1495 = vmatpush1.bf16.msra.mxu0 %v10702_v2  ;;  %v201_v23 = vadd.f32 %v11037_v18, %v11034_v17  ;;  %v11062_v27 = vsel %vm136_vm0, %v76_v22, 0.0  ;;  %v10709_v28 = vld [vmem:[%s17582_s3 + $0x40] sm:$0xff]   ;;  %v10723_v29 = vld [vmem:[%s17582_s3 + $0xb0] sm:$0xff]   ;;  %v11076_v32 = vsel %vm136_vm0, %v77_v25, 0.0  ;;  %v79_v33 = vld [vmem:[%s17579_s0 + $0x38] sm:$0xff] }
  0x1a   :  { %1496 = vmatprep.subr.bf16.mxu0 %v17593_v0  ;;  %10186 = vmatpush3.bf16.msra.mxu1 %v10713_v6  ;;  %v78_v30 = vld [vmem:[%s17579_s0 + $0x30] sm:$0xff]  ;;  %v10710_v36 = vld [vmem:[%s17582_s3 + $0x48] sm:$0xff]   ;;  %v10724_v37 = vld [vmem:[%s17582_s3 + $0xb8] sm:$0xff]   ;;  %v11106_v43 = vsel %vm136_vm0, %v79_v33, 0.0 }
  0x1b   :  { %10187 = vmatprep.subr.bf16.mxu1 %v10715_v8  ;;  %v202_v26 = vadd.f32 %v201_v23, %v11040_v19  ;;  %v11083_v35 = vsel %vm136_vm0, %v78_v30, 0.0  ;;  %v80_v38 = vld [vmem:[%s17579_s0 + $0x40] sm:$0xff]  ;;  %v81_v40 = vld [vmem:[%s17579_s0 + $0x48] sm:$0xff]  ;;  %v82_v41 = vld [vmem:[%s17579_s0 + $0x50] sm:$0xff] }
  0x1c   :  { %v83_v42 = vld [vmem:[%s17579_s0 + $0x58] sm:$0xff]  ;;  %v10712_v44 = vld [vmem:[%s17582_s3 + $0x50] sm:$0xff]   ;;  %v84_v45 = vld [vmem:[%s17579_s0 + $0x60] sm:$0xff]  ;;  %v11131_v52 = vsel %vm136_vm0, %v80_v38, 0.0  ;;  %v11143_v56 = vsel %vm136_vm0, %v81_v40, 0.0  ;;  %v11157_v61 = vsel %vm136_vm0, %v82_v41, 0.0 }
  0x1d   :  { %1497 = vmatpush1.bf16.msra.mxu0 %v10703_v3  ;;  %v203_v31 = vadd.f32 %v202_v26, %v11055_v24  ;;  %v85_v46 = vld [vmem:[%s17579_s0 + $0x68] sm:$0xff]  ;;  %v86_v47 = vld [vmem:[%s17579_s0 + $0x70] sm:$0xff]  ;;  %v87_v49 = vld [vmem:[%s17579_s0 + $0x78] sm:$0xff]  ;;  %v11160_v62 = vsel %vm136_vm0, %v83_v42, 0.0  ;;  %v11163_v63 = vsel %vm136_vm0, %v84_v45, 0.0 }
  0x1e   :  { %1498 = vmatprep.subr.bf16.mxu0 %v17593_v0  ;;  %10188 = vmatpush3.bf16.msra.mxu1 %v10715_v8  ;;  %v88_v50 = vld [vmem:[%s17579_s0 + $0x80] sm:$0xff]  ;;  %v89_v51 = vld [vmem:[%s17579_s0 + $0x88] sm:$0xff]  ;;  %v90_v53 = vld [vmem:[%s17579_s0 + $0x90] sm:$0xff]  ;;  %v11178_v5 = vsel %vm136_vm0, %v85_v46, 0.0  ;;  %v11181_v6 = vsel %vm136_vm0, %v86_v47, 0.0 }
  0x1f   :  { %10189 = vmatprep.subr.bf16.mxu1 %v10717_v10  ;;  %v204_v34 = vadd.f32 %v203_v31, %v11062_v27  ;;  %v91_v54 = vld [vmem:[%s17579_s0 + $0x98] sm:$0xff]  ;;  %v92_v55 = vld [vmem:[%s17579_s0 + $0xa0] sm:$0xff]  ;;  %v93_v58 = vld [vmem:[%s17579_s0 + $0xa8] sm:$0xff]  ;;  %v11200_v13 = vsel %vm136_vm0, %v89_v51, 0.0  ;;  %v11203_v14 = vsel %vm136_vm0, %v90_v53, 0.0 }
  0x20   :  { %v94_v59 = vld [vmem:[%s17579_s0 + $0xb0] sm:$0xff]  ;;  %v95_v60 = vld [vmem:[%s17579_s0 + $0xb8] sm:$0xff]  ;;  %v96_v2 = vld [vmem:[%s17579_s0 + $0xc0] sm:$0xff]  ;;  %v11218_v22 = vsel %vm136_vm0, %v92_v55, 0.0  ;;  %v11221_v23 = vsel %vm136_vm0, %v93_v58, 0.0  ;;  %v271_v58 = vmul.f32 %v11034_v17, %v11034_v17 }
  0x21   :  { %1499 = vmatpush1.bf16.msra.mxu0 %v10704_v4  ;;  %v205_v39 = vadd.f32 %v204_v34, %v11076_v32  ;;  %v10714_v1 = vld [vmem:[%s17582_s3 + $0x58] sm:$0xff]   ;;  %v97_v3 = vld [vmem:[%s17579_s0 + $0xc8] sm:$0xff]  ;;  %v98_v4 = vld [vmem:[%s17579_s0 + $0xd0] sm:$0xff]  ;;  %v11236_v30 = vsel %vm136_vm0, %v95_v60, 0.0  ;;  %v11239_v31 = vsel %vm136_vm0, %v96_v2, 0.0 }
  0x22   :  { %1500 = vmatprep.subr.bf16.mxu0 %v17593_v0  ;;  %10190 = vmatpush3.bf16.msra.mxu1 %v10717_v10  ;;  %v100_v10 = vld [vmem:[%s17579_s0 + $0xe0] sm:$0xff]  ;;  %v102_v15 = vld [vmem:[%s17579_s0 + $0xf0] sm:$0xff]  ;;  %v103_v16 = vld [vmem:[%s17579_s0 + $0xf8] sm:$0xff]  ;;  %18012 = vst [vmem:[#allocation6_spill] sm:$0xff] %v11239_v31  ;;  %v11242_v33 = vsel %vm136_vm0, %v97_v3, 0.0  ;;  %v274_v3 = vmul.f32 %v11055_v24, %v11055_v24 }
  0x23   :  { %10191 = vmatprep.subr.bf16.mxu1 %v10719_v12  ;;  %v206_v48 = vadd.f32 %v205_v39, %v11083_v35  ;;  %v105_v26 = vld [vmem:[%s17579_s0 + $0x108] sm:$0xff]  ;;  %18013 = vst [vmem:[#allocation7_spill] sm:$0xff] %v11242_v33  ;;  %v10716_v34 = vld [vmem:[%s17582_s3 + $0x60] sm:$0xff]   ;;  %v11254_v38 = vsel %vm136_vm0, %v100_v10, 0.0  ;;  %v11261_v41 = vsel %vm136_vm0, %v102_v15, 0.0  ;;  %v11264_v42 = vsel %vm136_vm0, %v103_v16, 0.0  ;;  %vm11689_vm3 = vmneg %vm683_vm1 }
  0x24   :  { %18014 = vst [vmem:[#allocation8_spill] sm:$0xff] %v11254_v38  ;;  %18016 = vst [vmem:[#allocation10_spill] sm:$0xff] %v11261_v41  ;;  %v11270_v45 = vsel %vm136_vm0, %v105_v26, 0.0  ;;  %v10720_v51 = vld [vmem:[%s17582_s3 + $0x70] sm:$0xff]   ;;  %v10722_v55 = vld [vmem:[%s17582_s3 + $0x78] sm:$0xff]   ;;  %v276_v15 = vmul.f32 %v11076_v32, %v11076_v32 }
  0x25   :  { %1501 = vmatpush1.bf16.msra.mxu0 %v10705_v7  ;;  %v207_v57 = vadd.f32 %v206_v48, %v11106_v43  ;;  %v11184_v7 = vsel %vm136_vm0, %v87_v49, 0.0  ;;  %18017 = vst [vmem:[#allocation11_spill] sm:$0xff] %v11264_v42  ;;  %v10718_v48 = vld [vmem:[%s17582_s3 + $0x68] sm:$0xff]   ;;  %vm11713_vm5 = vmpackc.low %vm10881_vm4, %vm11689_vm3 }
  0x26   :  { %1502 = vmatprep.subr.bf16.mxu0 %v17593_v0  ;;  %10192 = vmatpush3.bf16.msra.mxu1 %v10719_v12  ;;  %v11197_v12 = vsel %vm136_vm0, %v88_v50, 0.0  ;;  %vm11722_vm6 = vmpackc.low %vm940_vm2, %vm10881_vm4 }
  0x27   :  { %10193 = vmatprep.subr.bf16.mxu1 %v10721_v21  ;;  %v208_v8 = vadd.f32 %v207_v57, %v11131_v52 }
  0x29   :  { %1503 = vmatpush1.bf16.msra.mxu0 %v10706_v9  ;;  %v99_v9 = vld [vmem:[%s17579_s0 + $0xd8] sm:$0xff]  ;;  %v209_v25 = vadd.f32 %v208_v8, %v11143_v56 }
  0x2a   :  { %1504 = vmatprep.subr.bf16.mxu0 %v17593_v0  ;;  %10194 = vmatpush3.bf16.msra.mxu1 %v10721_v21  ;;  %v11215_v21 = vsel %vm136_vm0, %v91_v54, 0.0 }
  0x2b   :  { %10195 = vmatprep.subr.bf16.mxu1 %v10723_v29  ;;  %v210_v39 = vadd.f32 %v209_v25, %v11157_v61  ;;  %v108_v25 = vld [vmem:[%s17579_s0 + $0x120] sm:$0xff] }
  0x2d   :  { %1505 = vmatpush1.bf16.msra.mxu0 %v10707_v11  ;;  %v101_v11 = vld [vmem:[%s17579_s0 + $0xe8] sm:$0xff]  ;;  %v211_v47 = vadd.f32 %v210_v39, %v11160_v62 }
  0x2e   :  { %1506 = vmatprep.subr.bf16.mxu0 %v17593_v0  ;;  %10196 = vmatpush3.bf16.msra.mxu1 %v10723_v29  ;;  %v11233_v29 = vsel %vm136_vm0, %v94_v59, 0.0  ;;  %v11258_v40 = vsel %vm136_vm0, %v101_v11, 0.0  ;;  %v272_v59 = vmul.f32 %v11037_v18, %v11037_v18 }
  0x2f   :  { %10197 = vmatprep.subr.bf16.mxu1 %v10724_v37  ;;  %18015 = vst [vmem:[#allocation9_spill] sm:$0xff] %v11258_v40  ;;  %v212_v49 = vadd.f32 %v211_v47, %v11163_v63  ;;  %v278_v47 = vmul.f32 %v11106_v43, %v11106_v43 }
  0x31   :  { %1507 = vmatpush1.bf16.msra.mxu0 %v10708_v20  ;;  %v104_v20 = vld [vmem:[%s17579_s0 + $0x100] sm:$0xff]  ;;  %v213_v50 = vadd.f32 %v212_v49, %v11178_v5 }
  0x32   :  { %1508 = vmatprep.subr.bf16.mxu0 %v17593_v0  ;;  %10198 = vmatpush3.bf16.msra.mxu1 %v10724_v37  ;;  %v11251_v37 = vsel %vm136_vm0, %v99_v9, 0.0  ;;  %v275_v9 = vmul.f32 %v11062_v27, %v11062_v27 }
  0x33   :  { %2423 = vmatprep.subr.bf16.mxu1 %v17593_v0  ;;  %v214_v53 = vadd.f32 %v213_v50, %v11181_v6 }
  0x35   :  { %1509 = vmatpush1.bf16.msra.mxu0 %v10709_v28  ;;  %v106_v28 = vld [vmem:[%s17579_s0 + $0x110] sm:$0xff]  ;;  %v215_v54 = vadd.f32 %v214_v53, %v11184_v7  ;;  %v279_v53 = vmul.f32 %v11131_v52, %v11131_v52 }
  0x36   :  { %1510 = vmatprep.subr.bf16.mxu0 %v17593_v0  ;;  %v11273_v46 = vsel %vm136_vm0, %v106_v28, 0.0  ;;  %v277_v28 = vmul.f32 %v11083_v35, %v11083_v35 }
  0x37   :  { %v216_v57 = vadd.f32 %v215_v54, %v11197_v12 }
  0x39   :  { %1511 = vmatpush1.bf16.msra.mxu0 %v10710_v36  ;;  %v11248_v36 = vsel %vm136_vm0, %v98_v4, 0.0  ;;  %v217_v60 = vadd.f32 %v216_v57, %v11200_v13  ;;  %v335_v4 = vadd.f32 %v272_v59, %v271_v58  ;;  %v280_v57 = vmul.f32 %v11143_v56, %v11143_v56 }
  0x3a   :  { %1512 = vmatprep.subr.bf16.mxu0 %v17593_v0 }
  0x3b   :  { %v218_v2 = vadd.f32 %v217_v60, %v11203_v14  ;;  %v281_v60 = vmul.f32 %v11157_v61, %v11157_v61 }
  0x3d   :  { %1513 = vmatpush1.bf16.msra.mxu0 %v10712_v44  ;;  %v11267_v44 = vsel %vm136_vm0, %v104_v20, 0.0  ;;  %v219_v8 = vadd.f32 %v218_v2, %v11215_v21  ;;  %v107_v20 = vld [vmem:[%s17579_s0 + $0x118] sm:$0xff] }
  0x3e   :  { %1514 = vmatprep.subr.bf16.mxu0 %v17593_v0  ;;  %v11325_v50 = vsel %vm136_vm0, %v107_v20, 0.0 }
  0x3f   :  { %v220_v11 = vadd.f32 %v219_v8, %v11218_v22 }
  0x41   :  { %1515 = vmatpush1.bf16.msra.mxu0 %v10714_v1  ;;  %v273_v1 = vmul.f32 %v11040_v19, %v11040_v19  ;;  %v221_v26 = vadd.f32 %v220_v11, %v11221_v23 }
  0x42   :  { %1516 = vmatprep.subr.bf16.mxu0 %v17593_v0 }
  0x43   :  { %v336_v10 = vadd.f32 %v335_v4, %v273_v1  ;;  %v222_v39 = vadd.f32 %v221_v26, %v11233_v29  ;;  %v110_v26 = vld [vmem:[%s17579_s0 + $0x130] sm:$0xff] }
  0x45   :  { %1517 = vmatpush1.bf16.msra.mxu0 %v10716_v34  ;;  %v337_v16 = vadd.f32 %v336_v10, %v274_v3  ;;  %v223_v49 = vadd.f32 %v222_v39, %v11236_v30  ;;  %v282_v3 = vmul.f32 %v11160_v62, %v11160_v62 }
  0x46   :  { %1518 = vmatprep.subr.bf16.mxu0 %v17593_v0 }
  0x47   :  { %v338_v34 = vadd.f32 %v337_v16, %v275_v9  ;;  %v283_v9 = vmul.f32 %v11163_v63, %v11163_v63 }
  0x49   :  { %1519 = vmatpush1.bf16.msra.mxu0 %v10718_v48  ;;  %v339_v48 = vadd.f32 %v338_v34, %v276_v15  ;;  %v284_v15 = vmul.f32 %v11178_v5, %v11178_v5  ;;  %v285_v34 = vmul.f32 %v11181_v6, %v11181_v6 }
  0x4a   :  { %1520 = vmatprep.subr.bf16.mxu0 %v17593_v0 }
  0x4b   :  { %v340_v54 = vadd.f32 %v339_v48, %v277_v28  ;;  %v111_v28 = vld [vmem:[%s17579_s0 + $0x138] sm:$0xff]  ;;  %v112_v48 = vld [vmem:[%s17579_s0 + $0x140] sm:$0xff] }
  0x4d   :  { %1521 = vmatpush1.bf16.msra.mxu0 %v10720_v51  ;;  %v11328_v51 = vsel %vm136_vm0, %v108_v25, 0.0  ;;  %v341_v58 = vadd.f32 %v340_v54, %v278_v47  ;;  %v109_v25 = vld [vmem:[%s17579_s0 + $0x128] sm:$0xff] }
  0x4e   :  { %1522 = vmatprep.subr.bf16.mxu0 %v17593_v0 }
  0x4f   :  { %v342_v1 = vadd.f32 %v341_v58, %v279_v53  ;;  %v286_v53 = vmul.f32 %v11184_v7, %v11184_v7 }
  0x51   :  { %1523 = vmatpush1.bf16.msra.mxu0 %v10722_v55  ;;  %v224_v55 = vadd.f32 %v223_v49, %v11239_v31  ;;  %v343_v4 = vadd.f32 %v342_v1, %v280_v57  ;;  %v113_v49 = vld [vmem:[%s17579_s0 + $0x148] sm:$0xff]  ;;  %v287_v57 = vmul.f32 %v11197_v12, %v11197_v12  ;;  %v11378_v1 = vsel %vm136_vm0, %v111_v28, 0.0  ;;  %v115_v28 = vld [vmem:[%s17579_s0 + $0x158] sm:$0xff] }
  0x53   :  { %v225_v59 = vadd.f32 %v224_v55, %v11242_v33  ;;  %v344_v10 = vadd.f32 %v343_v4, %v281_v60  ;;  %v11375_v60 = vsel %vm136_vm0, %v110_v26, 0.0  ;;  %v114_v26 = vld [vmem:[%s17579_s0 + $0x150] sm:$0xff] }
  0x54   :  { %1525 = vmatmul.mubr.bf16.vlgmr.msra.gmra.mrb[0].mxu0 %v17593_v0  ;;  %18018 = vst [vmem:[#allocation12_spill] sm:$0xff] %v11375_v60 }
  0x55   :  { %v226_v2 = vadd.f32 %v225_v59, %v11248_v36  ;;  %v345_v16 = vadd.f32 %v344_v10, %v282_v3  ;;  %v11372_v59 = vsel %vm136_vm0, %v109_v25, 0.0  ;;  %v288_v3 = vmul.f32 %v11200_v13, %v11200_v13 }
  0x57   :  { %v227_v8 = vadd.f32 %v226_v2, %v11251_v37  ;;  %v346_v39 = vadd.f32 %v345_v16, %v283_v9  ;;  %v11387_v9 = vsel %vm136_vm0, %v113_v49, 0.0  ;;  %v117_v49 = vld [vmem:[%s17579_s0 + $0x168] sm:$0xff] }
  0x59   :  { %v228_v11 = vadd.f32 %v227_v8, %v11254_v38  ;;  %v347_v54 = vadd.f32 %v346_v39, %v284_v15  ;;  %v11384_v8 = vsel %vm136_vm0, %v112_v48, 0.0  ;;  %v116_v39 = vld [vmem:[%s17579_s0 + $0x160] sm:$0xff] }
  0x5a   :  { %18019 = vst [vmem:[#allocation13_spill] sm:$0xff] %v11384_v8 }
  0x5b   :  { %v229_v20 = vadd.f32 %v228_v11, %v11258_v40  ;;  %v348_v58 = vadd.f32 %v347_v54, %v285_v34  ;;  %v289_v11 = vmul.f32 %v11203_v14, %v11203_v14  ;;  %v292_v54 = vmul.f32 %v11221_v23, %v11221_v23 }
  0x5d   :  { %v230_v47 = vadd.f32 %v229_v20, %v11261_v41  ;;  %v349_v4 = vadd.f32 %v348_v58, %v286_v53  ;;  %v290_v20 = vmul.f32 %v11215_v21, %v11215_v21  ;;  %v119_v58 = vld [vmem:[%s17579_s0 + $0x178] sm:$0xff] }
  0x5f   :  { %v231_v55 = vadd.f32 %v230_v47, %v11264_v42  ;;  %v350_v15 = vadd.f32 %v349_v4, %v287_v57  ;;  %v291_v47 = vmul.f32 %v11218_v22, %v11218_v22  ;;  %v118_v57 = vld [vmem:[%s17579_s0 + $0x170] sm:$0xff]  ;;  %v11424_v4 = vsel %vm136_vm0, %v115_v28, 0.0 }
  0x60   :  { %v294_v28 = vmul.f32 %v11236_v30, %v11236_v30 }
  0x61   :  { %v232_v2 = vadd.f32 %v231_v55, %v11267_v44  ;;  %v351_v25 = vadd.f32 %v350_v15, %v288_v3  ;;  %v11421_v3 = vsel %vm136_vm0, %v114_v26, 0.0  ;;  %v120_v15 = vld [vmem:[%s17579_s0 + $0x180] sm:$0xff]  ;;  %v11439_v26 = vsel %vm136_vm0, %v117_v49, 0.0 }
  0x62   :  { %18020 = vst [vmem:[#allocation14_spill] sm:$0xff] %v11421_v3 }
  0x63   :  { %v233_v10 = vadd.f32 %v232_v2, %v11270_v45  ;;  %v352_v48 = vadd.f32 %v351_v25, %v289_v11  ;;  %v121_v25 = vld [vmem:[%s17579_s0 + $0x188] sm:$0xff] }
  0x64   :  { %v11456_v49 = vsel %vm136_vm0, %v121_v25, 0.0 }
  0x65   :  { %v234_v16 = vadd.f32 %v233_v10, %v11273_v46  ;;  %v353_v55 = vadd.f32 %v352_v48, %v290_v20  ;;  %v293_v10 = vmul.f32 %v11233_v29, %v11233_v29  ;;  %v11445_v48 = vsel %vm136_vm0, %v118_v57, 0.0 }
  0x66   :  { %18022 = vst [vmem:[#allocation16_spill] sm:$0xff] %v11445_v48 }
  0x67   :  { %v235_v34 = vadd.f32 %v234_v16, %v11325_v50  ;;  %v354_v11 = vadd.f32 %v353_v55, %v291_v47  ;;  %v11432_v16 = vsel %vm136_vm0, %v116_v39, 0.0  ;;  %v11448_v39 = vsel %vm136_vm0, %v119_v58, 0.0  ;;  %v122_v58 = vld [vmem:[%s17579_s0 + $0x190] sm:$0xff] }
  0x68   :  { %18021 = vst [vmem:[#allocation15_spill] sm:$0xff] %v11432_v16 }
  0x69   :  { %v236_v53 = vadd.f32 %v235_v34, %v11328_v51  ;;  %v355_v34 = vadd.f32 %v354_v11, %v292_v54  ;;  %v296_v11 = vmul.f32 %v11242_v33, %v11242_v33  ;;  %v11477_v33 = vsel %vm136_vm0, %v122_v58, 0.0  ;;  %v125_v58 = vld [vmem:[%s17579_s0 + $0x1a8] sm:$0xff] }
  0x6a   :  { %18024 = vst [vmem:[#allocation18_spill] sm:$0xff] %v11477_v33 }
  0x6b   :  { %v237_v2 = vadd.f32 %v236_v53, %v11372_v59  ;;  %v295_v53 = vmul.f32 %v11239_v31, %v11239_v31  ;;  %v356_v55 = vadd.f32 %v355_v34, %v293_v10  ;;  %v123_v10 = vld [vmem:[%s17579_s0 + $0x198] sm:$0xff] }
  0x6c   :  { %v11480_v31 = vsel %vm136_vm0, %v123_v10, 0.0  ;;  %v301_v10 = vmul.f32 %v11261_v41, %v11261_v41 }
  0x6d   :  { %v238_v20 = vadd.f32 %v237_v2, %v11375_v60  ;;  %v11453_v2 = vsel %vm136_vm0, %v120_v15, 0.0  ;;  %v357_v57 = vadd.f32 %v356_v55, %v294_v28  ;;  %v297_v15 = vmul.f32 %v11248_v36, %v11248_v36  ;;  %18025 = vst [vmem:[#allocation19_spill] sm:$0xff] %v11480_v31 }
  0x6e   :  { %18023 = vst [vmem:[#allocation17_spill] sm:$0xff] %v11453_v2 }
  0x6f   :  { %v239_v47 = vadd.f32 %v238_v20, %v11378_v1  ;;  %v358_v25 = vadd.f32 %v357_v57, %v295_v53  ;;  %v300_v57 = vmul.f32 %v11258_v40, %v11258_v40 }
  0x71   :  { %v240_v54 = vadd.f32 %v239_v47, %v11384_v8  ;;  %v298_v47 = vmul.f32 %v11251_v37, %v11251_v37  ;;  %v359_v28 = vadd.f32 %v358_v25, %v296_v11  ;;  %v124_v25 = vld [vmem:[%s17579_s0 + $0x1a0] sm:$0xff] }
  0x72   :  { %v11501_v40 = vsel %vm136_vm0, %v124_v25, 0.0 }
  0x73   :  { %v241_v20 = vadd.f32 %v240_v54, %v11387_v9  ;;  %v299_v54 = vmul.f32 %v11254_v38, %v11254_v38  ;;  %v360_v0 = vadd.f32 %v359_v28, %v297_v15  ;;  %v302_v28 = vmul.f32 %v11264_v42, %v11264_v42  ;;  %18026 = vst [vmem:[#allocation20_spill] sm:$0xff] %v11501_v40 }
  0x74   :  { %v11504_v38 = vsel %vm136_vm0, %v125_v58, 0.0  ;;  %v306_v58 = vmul.f32 %v11325_v50, %v11325_v50 }
  0x75   :  { %v242_v34 = vadd.f32 %v241_v20, %v11421_v3  ;;  %v361_v20 = vadd.f32 %v360_v0, %v298_v47 }
  0x77   :  { %v243_v55 = vadd.f32 %v242_v34, %v11424_v4  ;;  %v362_v15 = vadd.f32 %v361_v20, %v299_v54  ;;  %v304_v20 = vmul.f32 %v11270_v45, %v11270_v45 }
  0x79   :  { %v244_v53 = vadd.f32 %v243_v55, %v11432_v16  ;;  %v363_v0 = vadd.f32 %v362_v15, %v300_v57  ;;  %v303_v55 = vmul.f32 %v11267_v44, %v11267_v44  ;;  %v126_v15 = vld [vmem:[%s17579_s0 + $0x1b0] sm:$0xff] }
  0x7a   :  { %v11525_v42 = vsel %vm136_vm0, %v126_v15, 0.0 }
  0x7b   :  { %v245_v11 = vadd.f32 %v244_v53, %v11439_v26  ;;  %v364_v53 = vadd.f32 %v363_v0, %v301_v10  ;;  %v305_v10 = vmul.f32 %v11273_v46, %v11273_v46  ;;  %18027 = vst [vmem:[#allocation21_spill] sm:$0xff] %v11525_v42 }
  0x7d   :  { %v246_v34 = vadd.f32 %v245_v11, %v11445_v48  ;;  %v365_v11 = vadd.f32 %v364_v53, %v302_v28  ;;  %v307_v28 = vmul.f32 %v11328_v51, %v11328_v51 }
  0x7f   :  { %v247_v47 = vadd.f32 %v246_v34, %v11448_v39  ;;  %v366_v25 = vadd.f32 %v365_v11, %v303_v55  ;;  %v308_v11 = vmul.f32 %v11372_v59, %v11372_v59 }
  0x81   :  { %v248_v54 = vadd.f32 %v247_v47, %v11453_v2  ;;  %v367_v0 = vadd.f32 %v366_v25, %v304_v20  ;;  %v128_v25 = vld [vmem:[%s17579_s0 + $0x1c0] sm:$0xff] }
  0x83   :  { %v249_v57 = vadd.f32 %v248_v54, %v11456_v49  ;;  %v368_v53 = vadd.f32 %v367_v0, %v305_v10  ;;  %v127_v54 = vld [vmem:[%s17579_s0 + $0x1b8] sm:$0xff] }
  0x84   :  { %v11535_v10 = vsel %vm136_vm0, %v127_v54, 0.0  ;;  %v129_v54 = vld [vmem:[%s17579_s0 + $0x1c8] sm:$0xff] }
  0x85   :  { %v250_v34 = vadd.f32 %v249_v57, %v11477_v33  ;;  %v369_v57 = vadd.f32 %v368_v53, %v306_v58  ;;  %18028 = vst [vmem:[#allocation22_spill] sm:$0xff] %v11535_v10  ;;  %v11543_v58 = vsel %vm136_vm0, %v128_v25, 0.0  ;;  %v130_v25 = vld [vmem:[%s17579_s0 + $0x1d0] sm:$0xff] }
  0x86   :  { %18029 = vst [vmem:[#allocation23_spill] sm:$0xff] %v11543_v58 }
  0x87   :  { %v251_v47 = vadd.f32 %v250_v34, %v11480_v31  ;;  %v309_v34 = vmul.f32 %v11375_v60, %v11375_v60  ;;  %v370_v15 = vadd.f32 %v369_v57, %v307_v28  ;;  %v312_v57 = vmul.f32 %v11387_v9, %v11387_v9 }
  0x89   :  { %v252_v55 = vadd.f32 %v251_v47, %v11501_v40  ;;  %v310_v47 = vmul.f32 %v11378_v1, %v11378_v1  ;;  %v371_v41 = vadd.f32 %v370_v15, %v308_v11  ;;  %v11555_v11 = vsel %vm136_vm0, %v129_v54, 0.0 }
  0x8a   :  { %18030 = vst [vmem:[#allocation24_spill] sm:$0xff] %v11555_v11  ;;  %v313_v15 = vmul.f32 %v11421_v3, %v11421_v3 }
  0x8b   :  { %v253_v20 = vadd.f32 %v252_v55, %v11504_v38  ;;  %v311_v55 = vmul.f32 %v11384_v8, %v11384_v8  ;;  %v372_v60 = vadd.f32 %v371_v41, %v309_v34  ;;  %v314_v41 = vmul.f32 %v11424_v4, %v11424_v4 }
  0x8d   :  { %v254_v0 = vadd.f32 %v253_v20, %v11525_v42  ;;  %v373_v20 = vadd.f32 %v372_v60, %v310_v47  ;;  %v131_v60 = vld [vmem:[%s17579_s0 + $0x1d8] sm:$0xff]  ;;  %v315_v47 = vmul.f32 %v11432_v16, %v11432_v16 }
  0x8f   :  { %v255_v53 = vadd.f32 %v254_v0, %v11535_v10  ;;  %v374_v0 = vadd.f32 %v373_v20, %v311_v55  ;;  %v316_v55 = vmul.f32 %v11439_v26, %v11439_v26  ;;  %v11577_v20 = vsel %vm136_vm0, %v131_v60, 0.0 }
  0x90   :  { %18032 = vst [vmem:[#allocation26_spill] sm:$0xff] %v11577_v20  ;;  %v319_v60 = vmul.f32 %v11453_v2, %v11453_v2 }
  0x91   :  { %v256_v28 = vadd.f32 %v255_v53, %v11543_v58  ;;  %v375_v34 = vadd.f32 %v374_v0, %v312_v57  ;;  %v11566_v53 = vsel %vm136_vm0, %v130_v25, 0.0  ;;  %v132_v57 = vld [vmem:[%s17579_s0 + $0x1e0] sm:$0xff]  ;;  %v317_v25 = vmul.f32 %v11445_v48, %v11445_v48 }
  0x92   :  { %18031 = vst [vmem:[#allocation25_spill] sm:$0xff] %v11566_v53 }
  0x93   :  { %v257_v8 = vadd.f32 %v256_v28, %v11555_v11  ;;  %v376_v54 = vadd.f32 %v375_v34, %v313_v15  ;;  %v11588_v34 = vsel %vm136_vm0, %v132_v57, 0.0  ;;  %v321_v57 = vmul.f32 %v11477_v33, %v11477_v33 }
  0x94   :  { %18033 = vst [vmem:[#allocation27_spill] sm:$0xff] %v11588_v34 }
  0x95   :  { %v258_v3 = vadd.f32 %v257_v8, %v11566_v53  ;;  %v377_v28 = vadd.f32 %v376_v54, %v314_v41  ;;  %v318_v8 = vmul.f32 %v11448_v39, %v11448_v39  ;;  %v133_v41 = vld [vmem:[%s17579_s0 + $0x1e8] sm:$0xff] }
  0x97   :  { %v378_v0 = vadd.f32 %v377_v28, %v315_v47  ;;  %v259_v16 = vadd.f32 %v258_v3, %v11577_v20  ;;  %v320_v3 = vmul.f32 %v11456_v49, %v11456_v49  ;;  %v11599_v28 = vsel %vm136_vm0, %v133_v41, 0.0 }
  0x98   :  { %18034 = vst [vmem:[#allocation28_spill] sm:$0xff] %v11599_v28  ;;  %v323_v41 = vmul.f32 %v11501_v40, %v11501_v40 }
  0x99   :  { %v379_v15 = vadd.f32 %v378_v0, %v316_v55  ;;  %v260_v48 = vadd.f32 %v259_v16, %v11588_v34  ;;  %v134_v55 = vld [vmem:[%s17579_s0 + $0x1f0] sm:$0xff]  ;;  %v322_v16 = vmul.f32 %v11480_v31, %v11480_v31  ;;  %v326_v31 = vmul.f32 %v11535_v10, %v11535_v10 }
  0x9b   :  { %v380_v54 = vadd.f32 %v379_v15, %v317_v25  ;;  %v261_v2 = vadd.f32 %v260_v48, %v11599_v28  ;;  %v11610_v15 = vsel %vm136_vm0, %v134_v55, 0.0  ;;  %v324_v48 = vmul.f32 %v11504_v38, %v11504_v38 }
  0x9c   :  { %18035 = vst [vmem:[#allocation29_spill] sm:$0xff] %v11610_v15 }
  0x9d   :  { %v381_v47 = vadd.f32 %v380_v54, %v318_v8  ;;  %v135_v8 = vld [vmem:[%s17579_s0 + $0x1f8] sm:$0xff]  ;;  %v262_v33 = vadd.f32 %v261_v2, %v11610_v15  ;;  %v327_v2 = vmul.f32 %v11543_v58, %v11543_v58 }
  0x9f   :  { %v382_v0 = vadd.f32 %v381_v47, %v319_v60  ;;  %v11621_v47 = vsel %vm136_vm0, %v135_v8, 0.0 }
  0xa0   :  { %18036 = vst [vmem:[#allocation30_spill] sm:$0xff] %v11621_v47 }
  0xa1   :  { %v383_v25 = vadd.f32 %v382_v0, %v320_v3  ;;  %v325_v3 = vmul.f32 %v11525_v42, %v11525_v42  ;;  %v263_v0 = vadd.f32 %v262_v33, %v11621_v47  ;;  %v330_v33 = vmul.f32 %v11577_v20, %v11577_v20 }
  0xa3   :  { %v384_v54 = vadd.f32 %v383_v25, %v321_v57  ;;  %v264_v25 = vrot.slane %v263_v0, 4 }
  0xa5   :  { %v385_v60 = vadd.f32 %v384_v54, %v322_v16  ;;  %v328_v16 = vmul.f32 %v11555_v11, %v11555_v11  ;;  %v329_v54 = vmul.f32 %v11566_v53, %v11566_v53 }
  0xa7   :  { %v386_v55 = vadd.f32 %v385_v60, %v323_v41  ;;  %v265_v41 = vadd.f32 %v264_v25, %v263_v0  ;;  %v334_v0 = vmul.f32 %v11621_v47, %v11621_v47 }
  0xa9   :  { %v387_v40 = vadd.f32 %v386_v55, %v324_v48  ;;  %v331_v48 = vmul.f32 %v11588_v34, %v11588_v34  ;;  %v266_v58 = vrot.slane %v265_v41, 2 }
  0xab   :  { %v388_v57 = vadd.f32 %v387_v40, %v325_v3  ;;  %v332_v40 = vmul.f32 %v11599_v28, %v11599_v28  ;;  %v267_v53 = vadd.f32 %v266_v58, %v265_v41  ;;  %v415_v58 = vlaneseq }
  0xad   :  { %v389_v8 = vadd.f32 %v388_v57, %v326_v31  ;;  %v333_v31 = vmul.f32 %v11610_v15, %v11610_v15  ;;  %v11644_v41 = vshrl.u32 %v415_v58, 7 }
  0xaf   :  { %v390_v42 = vadd.f32 %v389_v8, %v327_v2  ;;  %18037 = vst [vmem:[#allocation31_spill] sm:$0xff] %v11644_v41 }
  0xb1   :  { %v391_v60 = vadd.f32 %v390_v42, %v328_v16  ;;  %v268_v42 = vrot.slane %v267_v53, 1 }
  0xb3   :  { %v392_v55 = vadd.f32 %v391_v60, %v329_v54  ;;  %v269_v34 = vadd.f32 %v268_v42, %v267_v53  ;;  %v11650_v53 = vsub.s32 0, %v11644_v41 }
  0xb5   :  { %v393_v3 = vadd.f32 %v392_v55, %v330_v33  ;;  %v270_v20 = vmul.f32 0.001953125, %v269_v34  ;;  %18038 = vst [vmem:[#allocation32_spill] sm:$0xff] %v11650_v53 }
  0xb7   :  { %v394_v57 = vadd.f32 %v393_v3, %v331_v48  ;;  %v406_v55 = vmul.f32 %v270_v20, %v270_v20 }
  0xb9   :  { %v395_v2 = vadd.f32 %v394_v57, %v332_v40  ;;  %v405_v40 = vld [vmem:[%s17580_s1] sm:$0x1] }
  0xbb   :  { %v396_v25 = vadd.f32 %v395_v2, %v333_v31 }
  0xbd   :  { %v397_v16 = vadd.f32 %v396_v25, %v334_v0 }
  0xbf   :  { %v398_v8 = vrot.slane %v397_v16, 4 }
  0xc1   :  { %v399_v54 = vadd.f32 %v398_v8, %v397_v16  ;;  %v4061_v8 = vld [vmem:[%s17584_s5] sm:$0x3] }
  0xc2   :  { %4065 = vperm.xlu0 %10700, %v4061_v8  }
  0xc3   :  { %v400_v60 = vrot.slane %v399_v54, 2 }
  0xc5   :  { %v401_v11 = vadd.f32 %v400_v60, %v399_v54 }
  0xc7   :  { %v402_v28 = vrot.slane %v401_v11, 1 }
  0xc9   :  { %v403_v33 = vadd.f32 %v402_v28, %v401_v11  ;;  %v411_v11 = vld [vmem:[%s17581_s2] sm:$0x1] }
  0xcb   :  { %v404_v10 = vmul.f32 0.001953125, %v403_v33 }
  0xcd   :  { %v407_v15 = vsub.f32 %v404_v10, %v406_v55 }
  0xcf   :  { %v408_v48 = vadd.f32 1e-05, %v407_v15 }
  0xd1   :  { %10845 = vrsqrt.f32 %v408_v48 }
  0xdb   :  { %v10846_v3 = vpop.eup %10845 }
  0xdc   :  { %v410_v34 = vmul.f32 %v10846_v3, %v405_v40 }
  0xde   :  { %v412_v28 = vmul.f32 %v410_v34, %v270_v20  ;;  %v11656_v10 = vrot.slane %v410_v34, %v11650_v53 }
  0xe0   :  { %v413_v15 = vsub.f32 %v411_v11, %v412_v28  ;;  %v420_v31 = vmul.f32 %v11656_v10, %v11034_v17  ;;  %v421_v57 = vmul.f32 %v11656_v10, %v11037_v18  ;;  %v422_v0 = vmul.f32 %v11656_v10, %v11040_v19 }
  0xe1   :  { %v423_v2 = vmul.f32 %v11656_v10, %v11055_v24  ;;  %v424_v25 = vmul.f32 %v11656_v10, %v11062_v27  ;;  %v425_v20 = vmul.f32 %v11656_v10, %v11076_v32  ;;  %v426_v42 = vmul.f32 %v11656_v10, %v11083_v35 }
  0xe2   :  { %v11673_v17 = vrot.slane %v413_v15, %v11650_v53  ;;  %v427_v18 = vmul.f32 %v11656_v10, %v11106_v43  ;;  %v428_v19 = vmul.f32 %v11656_v10, %v11131_v52  ;;  %v429_v24 = vmul.f32 %v11656_v10, %v11143_v56 }
  0xe3   :  { %v18042_v15 = vmov 0 }
  0xe4   :  { %v490_v27 = vadd.f32 %v11673_v17, %v420_v31  ;;  %v491_v32 = vadd.f32 %v11673_v17, %v421_v57  ;;  %v492_v35 = vadd.f32 %v11673_v17, %v422_v0  ;;  %v493_v16 = vadd.f32 %v11673_v17, %v423_v2 }
  0xe5   :  { %v11694_v52 = vadd.f32 %v11673_v17, %v424_v25  ;;  %v11697_v56 = vadd.f32 %v11673_v17, %v425_v20  ;;  %v11700_v54 = vadd.f32 %v11673_v17, %v426_v42  ;;  %v11703_v60 = vadd.f32 %v11673_v17, %v427_v18  ;;  %v10725_v42 = vld [vmem:[%s17582_s3 + $0xc0] sm:$0xff]  }
  0xe6   :  { %v11705_v33 = vpack.c.bf16 %v491_v32, %v490_v27  ;;  %v684_v55 = vrot.slane %v490_v27, 7  ;;  %v685_v48 = vrot.slane %v491_v32, 7  ;;  %v941_v58 = vrot.slane %v490_v27, 1 }
  0xe7   :  { %v942_v40 = vrot.slane %v491_v32, 1  ;;  %v11707_v3 = vpack.c.bf16 %v493_v16, %v492_v35  ;;  %v944_v34 = vrot.slane %v492_v35, 1  ;;  %v945_v11 = vrot.slane %v493_v16, 1 }
  0xe8   :  { %1532 = vmatprep.mubr.bf16.mxu0 %v11705_v33  ;;  %v686_v28 = vsel %vm683_vm1, %v684_v55, %v685_v48  ;;  %v18043_v15 = vsel %vm11713_vm5, 4294967295, %v18042_v15  ;;  %v687_v31 = vrot.slane %v492_v35, 7  ;;  %v688_v57 = vrot.slane %v493_v16, 7 }
  0xe9   :  { %18041 = vst [vmem:[#allocation33_spill] sm:$0xff] %v11707_v3  ;;  %18044 = vst [vmem:[#allocation34_spill] sm:$0xff] %v18043_v15  ;;  %v947_v0 = vrot.slane %v11694_v52, 1  ;;  %v11718_v2 = vpack.c.bf16 %v686_v28, %v684_v55  ;;  %v943_v25 = vsel %vm940_vm2, %v941_v58, %v942_v40  ;;  %v18045_v20 = vmov 0  ;;  %v10726_v58 = vld [vmem:[%s17582_s3 + $0xc8] sm:$0xff]  }
  0xea   :  { %v18046_v20 = vsel %vm11722_vm6, 4294967295, %v18045_v20  ;;  %v946_v18 = vsel %vm940_vm2, %v944_v34, %v945_v11  ;;  %v948_v27 = vrot.slane %v11697_v56, 1  ;;  %v11731_v32 = vpack.c.bf16 %v942_v40, %v943_v25 }
  0xeb   :  { %18047 = vst [vmem:[#allocation35_spill] sm:$0xff] %v18046_v20  ;;  %v11733_v35 = vpack.c.bf16 %v945_v11, %v946_v18  ;;  %v430_v16 = vmul.f32 %v11656_v10, %v11157_v61  ;;  %8653 = vmatmul.mubr.msk.bf16.gmra.mrb[4].mxu0 %vm11713_vm5, %v11718_v2  ;;  %v950_v8 = vrot.slane %v11700_v54, 1  ;;  %v951_v43 = vrot.slane %v11703_v60, 1 }
  0xec   :  { %18048 = vst [vmem:[#allocation36_spill] sm:$0xff] %v11731_v32  ;;  %v431_v55 = vmul.f32 %v11656_v10, %v11160_v62  ;;  %10200 = vmatmul.mubr.msk.bf16.vlgmr.msra.gmra.mrb[0].mxu1 %vm11722_vm6, %v11731_v32  ;;  %1540 = vmatprep.mubr.bf16.mxu0 %v11707_v3  ;;  %v689_v48 = vsel %vm683_vm1, %v687_v31, %v688_v57  ;;  %v18050_v34 = vmov 0   ;;  %v691_v18 = vrot.slane %v11697_v56, 7 }
  0xed   :  { %18049 = vst [vmem:[#allocation37_spill] sm:$0xff] %v11733_v35  ;;  %2424 = vmatpush1.bf16.msra.mxu1 %v10725_v42  ;;  %10203 = vmatprep.mubr.msk.bf16.mxu1 %vm11722_vm6, %v11733_v35  ;;  %v949_v61 = vsel %vm940_vm2, %v947_v0, %v948_v27  ;;  %v11757_v62 = vadd.f32 %v11673_v17, %v428_v19  ;;  %v690_v42 = vrot.slane %v11694_v52, 7 }
  0xee   :  { %v11760_v40 = vadd.f32 %v11673_v17, %v429_v24  ;;  %2425 = vmatprep.subr.bf16.mxu1 %v18050_v34  ;;  %v952_v11 = vsel %vm940_vm2, %v950_v8, %v951_v43  ;;  %v11765_v28 = vadd.f32 %v11673_v17, %v430_v16  ;;  %v11767_v57 = vpack.c.bf16 %v689_v48, %v687_v31 }
  0xef   :  { %v11770_v0 = vadd.f32 %v11673_v17, %v431_v55  ;;  %v432_v25 = vmul.f32 %v11656_v10, %v11163_v63  ;;  %v11774_v19 = vpack.c.bf16 %v948_v27, %v949_v61  ;;  %v11778_v24 = vpack.c.bf16 %v11697_v56, %v11694_v52  ;;  %v10727_v63 = vld [vmem:[%s17582_s3 + $0xd0] sm:$0xff]   ;;  %v10728_v61 = vld [vmem:[%s17582_s3 + $0xd8] sm:$0xff]  }
  0xf0   :  { %18051 = vst [vmem:[#allocation38_spill] sm:$0xff] %v11767_v57  ;;  %v11782_v16 = vpack.c.bf16 %v951_v43, %v952_v11  ;;  %v953_v31 = vrot.slane %v11757_v62, 1  ;;  %v954_v8 = vrot.slane %v11760_v40, 1  ;;  %v433_v27 = vmul.f32 %v11656_v10, %v11178_v5 }
  0xf1   :  { %18052 = vst [vmem:[#allocation39_spill] sm:$0xff] %v11774_v19  ;;  %18053 = vst [vmem:[#allocation40_spill] sm:$0xff] %v11778_v24  ;;  %2426 = vmatpush1.bf16.msra.mxu1 %v10726_v58  ;;  %v956_v52 = vrot.slane %v11765_v28, 1  ;;  %v957_v56 = vrot.slane %v11770_v0, 1  ;;  %v434_v43 = vmul.f32 %v11656_v10, %v11181_v6  ;;  %v435_v55 = vmul.f32 %v11656_v10, %v11184_v7 }
  0xf2   :  { %18054 = vst [vmem:[#allocation41_spill] sm:$0xff] %v11782_v16  ;;  %2427 = vmatprep.subr.bf16.mxu1 %v18050_v34  ;;  %v692_v5 = vsel %vm683_vm1, %v690_v42, %v691_v18  ;;  %v11807_v48 = vadd.f32 %v11673_v17, %v432_v25  ;;  %v955_v6 = vsel %vm940_vm2, %v953_v31, %v954_v8 }
  0xf3   :  { %8657 = vmatmul.mubr.msk.bf16.gmra.mrb[8].mxu0 %vm11713_vm5, %v11767_v57  ;;  %v11814_v7 = vadd.f32 %v11673_v17, %v433_v27  ;;  %v958_v58 = vsel %vm940_vm2, %v956_v52, %v957_v56  ;;  %v11822_v11 = vadd.f32 %v11673_v17, %v434_v43  ;;  %v11825_v25 = vadd.f32 %v11673_v17, %v435_v55 }
  0xf4   :  { %10204 = vmatmul.mubr.msk.bf16.gmra.mrb[4].mxu1 %vm11722_vm6, %v11774_v19  ;;  %1548 = vmatprep.mubr.bf16.mxu0 %v11778_v24  ;;  %v11827_v18 = vpack.c.bf16 %v692_v5, %v690_v42  ;;  %v11831_v31 = vpack.c.bf16 %v11703_v60, %v11700_v54  ;;  %v693_v27 = vrot.slane %v11700_v54, 7  ;;  %v694_v52 = vrot.slane %v11703_v60, 7 }
  0xf5   :  { %10207 = vmatprep.mubr.msk.bf16.mxu1 %vm11722_vm6, %v11782_v16  ;;  %2428 = vmatpush1.bf16.msra.mxu1 %v10727_v63  ;;  %v11833_v63 = vpack.c.bf16 %v954_v8, %v955_v6  ;;  %v959_v53 = vrot.slane %v11807_v48, 1  ;;  %v11838_v41 = vpack.c.bf16 %v957_v56, %v958_v58  ;;  %v960_v43 = vrot.slane %v11814_v7, 1  ;;  %v10729_v8 = vld [vmem:[%s17582_s3 + $0xe0] sm:$0xff]   ;;  %v10730_v6 = vld [vmem:[%s17582_s3 + $0xe8] sm:$0xff]  }
  0xf6   :  { %2429 = vmatprep.subr.bf16.mxu1 %v18050_v34  ;;  %18055 = vst [vmem:[#allocation42_spill] sm:$0xff] %v11827_v18  ;;  %18056 = vst [vmem:[#allocation43_spill] sm:$0xff] %v11831_v31  ;;  %v436_v42 = vmul.f32 %v11656_v10, %v11197_v12  ;;  %v437_v55 = vmul.f32 %v11656_v10, %v11200_v13  ;;  %v962_v54 = vrot.slane %v11822_v11, 1  ;;  %v963_v60 = vrot.slane %v11825_v25, 1 }
  0xf7   :  { %18057 = vst [vmem:[#allocation44_spill] sm:$0xff] %v11833_v63  ;;  %18058 = vst [vmem:[#allocation45_spill] sm:$0xff] %v11838_v41  ;;  %v438_v56 = vmul.f32 %v11656_v10, %v11203_v14  ;;  %v439_v5 = vmul.f32 %v11656_v10, %v11215_v21  ;;  %v695_v12 = vsel %vm683_vm1, %v693_v27, %v694_v52 }
  0xf8   :  { %v961_v13 = vsel %vm940_vm2, %v959_v53, %v960_v43  ;;  %v11868_v14 = vadd.f32 %v11673_v17, %v436_v42  ;;  %v11871_v21 = vadd.f32 %v11673_v17, %v437_v55  ;;  %v11884_v53 = vpack.c.bf16 %v695_v12, %v693_v27 }
  0xf9   :  { %2430 = vmatpush1.bf16.msra.mxu1 %v10728_v61  ;;  %v964_v61 = vsel %vm940_vm2, %v962_v54, %v963_v60  ;;  %v11878_v58 = vadd.f32 %v11673_v17, %v438_v56  ;;  %v11881_v52 = vadd.f32 %v11673_v17, %v439_v5  ;;  %v11888_v42 = vpack.c.bf16 %v11760_v40, %v11757_v62 }
  0xfa   :  { %2431 = vmatprep.subr.bf16.mxu1 %v18050_v34  ;;  %18059 = vst [vmem:[#allocation46_spill] sm:$0xff] %v11884_v53  ;;  %v696_v55 = vrot.slane %v11757_v62, 7  ;;  %v697_v54 = vrot.slane %v11760_v40, 7  ;;  %v440_v56 = vmul.f32 %v11656_v10, %v11218_v22  ;;  %v441_v5 = vmul.f32 %v11656_v10, %v11221_v23  ;;  %v10731_v62 = vld [vmem:[%s17582_s3 + $0xf0] sm:$0xff]  }
  0xfb   :  { %8661 = vmatmul.mubr.msk.bf16.gmra.mrb[12].mxu0 %vm11713_vm5, %v11827_v18  ;;  %18060 = vst [vmem:[#allocation47_spill] sm:$0xff] %v11888_v42  ;;  %v11898_v47 = vpack.c.bf16 %v963_v60, %v964_v61  ;;  %v965_v27 = vrot.slane %v11868_v14, 1  ;;  %v966_v12 = vrot.slane %v11871_v21, 1  ;;  %v969_v40 = vrot.slane %v11881_v52, 1 }
  0xfc   :  { %10208 = vmatmul.mubr.msk.bf16.gmra.mrb[8].mxu1 %vm11722_vm6, %v11833_v63  ;;  %1556 = vmatprep.mubr.bf16.mxu0 %v11831_v31  ;;  %v442_v22 = vmul.f32 %v11656_v10, %v11233_v29  ;;  %v443_v23 = vmul.f32 %v11656_v10, %v11236_v30  ;;  %v698_v60 = vsel %vm683_vm1, %v696_v55, %v697_v54  ;;  %v10740_v31 = vld [vmem:[%s17582_s3 + $0x138] sm:$0xff]  }
  0xfd   :  { %10211 = vmatprep.mubr.msk.bf16.mxu1 %vm11722_vm6, %v11838_v41  ;;  %2432 = vmatpush1.bf16.msra.mxu1 %v10729_v8  ;;  %v11891_v8 = vpack.c.bf16 %v960_v43, %v961_v13  ;;  %18062 = vst [vmem:[#allocation49_spill] sm:$0xff] %v11898_v47  ;;  %v968_v43 = vrot.slane %v11878_v58, 1  ;;  %v11921_v13 = vadd.f32 %v11673_v17, %v440_v56  ;;  %v18067_v41 = vld [vmem:[#allocation6_spill] sm:$0xff] }
  0xfe   :  { %2433 = vmatprep.subr.bf16.mxu1 %v18050_v34  ;;  %v11924_v29 = vadd.f32 %v11673_v17, %v441_v5  ;;  %v967_v30 = vsel %vm940_vm2, %v965_v27, %v966_v12  ;;  %v11935_v54 = vadd.f32 %v11673_v17, %v442_v22  ;;  %v11938_v56 = vadd.f32 %v11673_v17, %v443_v23 }
  0xff   :  { %18061 = vst [vmem:[#allocation48_spill] sm:$0xff] %v11891_v8  ;;  %v970_v61 = vsel %vm940_vm2, %v968_v43, %v969_v40  ;;  %v11941_v5 = vpack.c.bf16 %v698_v60, %v696_v55  ;;  %v11945_v27 = vpack.c.bf16 %v11770_v0, %v11765_v28  ;;  %v700_v43 = vrot.slane %v11770_v0, 7  ;;  %v18068_v60 = vld [vmem:[#allocation7_spill] sm:$0xff] }
 0x100   :  { %v971_v22 = vrot.slane %v11921_v13, 1  ;;  %v11953_v23 = vpack.c.bf16 %v969_v40, %v970_v61  ;;  %v444_v55 = vmul.f32 %v11656_v10, %v18067_v41  ;;  %v445_v63 = vmul.f32 %v11656_v10, %v18068_v60  ;;  %v10734_v61 = vld [vmem:[%s17582_s3 + $0x108] sm:$0xff]   ;;  %v18069_v60 = vld [vmem:[#allocation8_spill] sm:$0xff] }
 0x101   :  { %2434 = vmatpush1.bf16.msra.mxu1 %v10730_v6  ;;  %v10732_v6 = vld [vmem:[%s17582_s3 + $0xf8] sm:$0xff]   ;;  %18063 = vst [vmem:[#allocation50_spill] sm:$0xff] %v11941_v5  ;;  %18064 = vst [vmem:[#allocation51_spill] sm:$0xff] %v11945_v27  ;;  %v446_v16 = vmul.f32 %v11656_v10, %v11248_v36  ;;  %v974_v0 = vrot.slane %v11935_v54, 1  ;;  %v447_v40 = vmul.f32 %v11656_v10, %v11251_v37 }
 0x102   :  { %2435 = vmatprep.subr.bf16.mxu1 %v18050_v34  ;;  %18066 = vst [vmem:[#allocation53_spill] sm:$0xff] %v11953_v23  ;;  %v11982_v37 = vadd.f32 %v11673_v17, %v444_v55  ;;  %v448_v55 = vmul.f32 %v11656_v10, %v18069_v60  ;;  %v706_v60 = vrot.slane %v11825_v25, 7 }
 0x103   :  { %8665 = vmatmul.mubr.msk.bf16.gmra.mrb[16].mxu0 %vm11713_vm5, %v11884_v53 }
 0x104   :  { %10212 = vmatmul.mubr.msk.bf16.gmra.mrb[12].mxu1 %vm11722_vm6, %v11891_v8  ;;  %1564 = vmatprep.mubr.bf16.mxu0 %v11888_v42  ;;  %v972_v8 = vrot.slane %v11924_v29, 1 }
 0x105   :  { %10215 = vmatprep.mubr.msk.bf16.mxu1 %vm11722_vm6, %v11898_v47  ;;  %2436 = vmatpush1.bf16.msra.mxu1 %v10731_v62  ;;  %v699_v62 = vrot.slane %v11765_v28, 7  ;;  %v11948_v47 = vpack.c.bf16 %v966_v12, %v967_v30  ;;  %v10733_v28 = vld [vmem:[%s17582_s3 + $0x100] sm:$0xff]   ;;  %v975_v12 = vrot.slane %v11938_v56, 1  ;;  %v11985_v30 = vadd.f32 %v11673_v17, %v445_v63 }
 0x106   :  { %2437 = vmatprep.subr.bf16.mxu1 %v18050_v34  ;;  %v973_v41 = vsel %vm940_vm2, %v971_v22, %v972_v8  ;;  %v11995_v22 = vadd.f32 %v11673_v17, %v447_v40  ;;  %v705_v40 = vrot.slane %v11822_v11, 7 }
 0x107   :  { %18065 = vst [vmem:[#allocation52_spill] sm:$0xff] %v11948_v47  ;;  %v701_v36 = vsel %vm683_vm1, %v699_v62, %v700_v43  ;;  %v976_v43 = vsel %vm940_vm2, %v974_v0, %v975_v12  ;;  %v12006_v19 = vpack.c.bf16 %v972_v8, %v973_v41  ;;  %v12010_v0 = vpack.c.bf16 %v11814_v7, %v11807_v48  ;;  %v10735_v8 = vld [vmem:[%s17582_s3 + $0x110] sm:$0xff]  }
 0x108   :  { %v12014_v35 = vpack.c.bf16 %v975_v12, %v976_v43  ;;  %v452_v43 = vmul.f32 %v11656_v10, %v11267_v44  ;;  %v10736_v44 = vld [vmem:[%s17582_s3 + $0x118] sm:$0xff]  }
 0x109   :  { %2438 = vmatpush1.bf16.msra.mxu1 %v10732_v6  ;;  %v11988_v6 = vadd.f32 %v11673_v17, %v446_v16  ;;  %v12002_v16 = vpack.c.bf16 %v701_v36, %v699_v62  ;;  %18072 = vst [vmem:[#allocation7_spill] sm:$0xff] %v12006_v19  ;;  %18073 = vst [vmem:[#allocation8_spill] sm:$0xff] %v12010_v0  ;;  %v978_v62 = vrot.slane %v11985_v30, 1 }
 0x10a   :  { %2439 = vmatprep.subr.bf16.mxu1 %v18050_v34 }
 0x10b   :  { %8669 = vmatmul.mubr.msk.bf16.gmra.mrb[20].mxu0 %vm11713_vm5, %v11941_v5  ;;  %18071 = vst [vmem:[#allocation6_spill] sm:$0xff] %v12002_v16  ;;  %v980_v36 = vrot.slane %v11988_v6, 1 }
 0x10c   :  { %10216 = vmatmul.mubr.msk.bf16.gmra.mrb[16].mxu1 %vm11722_vm6, %v11948_v47  ;;  %1572 = vmatprep.mubr.bf16.mxu0 %v11945_v27  ;;  %v703_v47 = vrot.slane %v11814_v7, 7  ;;  %v12024_v7 = vadd.f32 %v11673_v17, %v448_v55  ;;  %v453_v55 = vmul.f32 %v11656_v10, %v11270_v45 }
 0x10d   :  { %10219 = vmatprep.mubr.msk.bf16.mxu1 %vm11722_vm6, %v11953_v23  ;;  %2440 = vmatpush1.bf16.msra.mxu1 %v10733_v28  ;;  %v18070_v23 = vld [vmem:[#allocation9_spill] sm:$0xff]  ;;  %v702_v28 = vrot.slane %v11807_v48, 7  ;;  %v981_v48 = vrot.slane %v11995_v22, 1 }
 0x10e   :  { %v449_v63 = vmul.f32 %v11656_v10, %v18070_v23  ;;  %2441 = vmatprep.subr.bf16.mxu1 %v18050_v34  ;;  %18074 = vst [vmem:[#allocation9_spill] sm:$0xff] %v12014_v35  ;;  %v977_v23 = vrot.slane %v11982_v37, 1  ;;  %v983_v32 = vrot.slane %v12024_v7, 1 }
 0x10f   :  { %v704_v12 = vsel %vm683_vm1, %v702_v28, %v703_v47  ;;  %v982_v45 = vsel %vm940_vm2, %v980_v36, %v981_v48  ;;  %v12072_v36 = vadd.f32 %v11673_v17, %v453_v55  ;;  %v18081_v55 = vld [vmem:[#allocation13_spill] sm:$0xff] }
 0x110   :  { %v12027_v41 = vadd.f32 %v11673_v17, %v449_v63  ;;  %v979_v47 = vsel %vm940_vm2, %v977_v23, %v978_v62  ;;  %v708_v63 = vrot.slane %v11868_v14, 7  ;;  %v709_v23 = vrot.slane %v11871_v21, 7 }
 0x111   :  { %2442 = vmatpush1.bf16.msra.mxu1 %v10734_v61  ;;  %v707_v61 = vsel %vm683_vm1, %v705_v40, %v706_v60  ;;  %v455_v60 = vmul.f32 %v11656_v10, %v11325_v50  ;;  %v12066_v50 = vpack.c.bf16 %v11825_v25, %v11822_v11  ;;  %v10737_v11 = vld [vmem:[%s17582_s3 + $0x120] sm:$0xff]  }
 0x112   :  { %2443 = vmatprep.subr.bf16.mxu1 %v18050_v34  ;;  %v12076_v27 = vpack.c.bf16 %v707_v61, %v705_v40  ;;  %v457_v40 = vmul.f32 %v11656_v10, %v11372_v59  ;;  %v18080_v61 = vld [vmem:[#allocation12_spill] sm:$0xff]  ;;  %v990_v59 = vrot.slane %v12072_v36, 1 }
 0x113   :  { %8673 = vmatmul.mubr.msk.bf16.gmra.mrb[24].mxu0 %vm11713_vm5, %v12002_v16  ;;  %18077 = vst [vmem:[#allocation56_spill] sm:$0xff] %v12066_v50  ;;  %v12074_v16 = vpack.c.bf16 %v981_v48, %v982_v45  ;;  %v456_v48 = vmul.f32 %v11656_v10, %v11328_v51  ;;  %v18082_v45 = vld [vmem:[#allocation14_spill] sm:$0xff] }
 0x114   :  { %10220 = vmatmul.mubr.msk.bf16.gmra.mrb[20].mxu1 %vm11722_vm6, %v12006_v19  ;;  %1580 = vmatprep.mubr.bf16.mxu0 %v12010_v0  ;;  %v454_v19 = vmul.f32 %v11656_v10, %v11273_v46  ;;  %v12060_v0 = vpack.c.bf16 %v704_v12, %v702_v28  ;;  %v12062_v46 = vpack.c.bf16 %v978_v62, %v979_v47  ;;  %v712_v12 = vrot.slane %v11881_v52, 7 }
 0x115   :  { %10223 = vmatprep.mubr.msk.bf16.mxu1 %vm11722_vm6, %v12014_v35  ;;  %2444 = vmatpush1.bf16.msra.mxu1 %v10735_v8  ;;  %v984_v35 = vrot.slane %v12027_v41, 1  ;;  %v12069_v8 = vadd.f32 %v11673_v17, %v452_v43  ;;  %18078 = vst [vmem:[#allocation57_spill] sm:$0xff] %v12074_v16  ;;  %18079 = vst [vmem:[#allocation58_spill] sm:$0xff] %v12076_v27  ;;  %v12082_v28 = vadd.f32 %v11673_v17, %v455_v60 }
 0x116   :  { %2445 = vmatprep.subr.bf16.mxu1 %v18050_v34  ;;  %18075 = vst [vmem:[#allocation54_spill] sm:$0xff] %v12060_v0  ;;  %18076 = vst [vmem:[#allocation55_spill] sm:$0xff] %v12062_v46  ;;  %v12079_v5 = vadd.f32 %v11673_v17, %v454_v19  ;;  %v710_v62 = vsel %vm683_vm1, %v708_v63, %v709_v23  ;;  %v711_v19 = vrot.slane %v11878_v58, 7 }
 0x117   :  { %v985_v25 = vsel %vm940_vm2, %v983_v32, %v984_v35  ;;  %v458_v32 = vmul.f32 %v11656_v10, %v18080_v61  ;;  %v459_v43 = vmul.f32 %v11656_v10, %v11378_v1  ;;  %v989_v51 = vrot.slane %v12069_v8, 1 }
 0x118   :  { %v460_v47 = vmul.f32 %v11656_v10, %v18081_v55  ;;  %v461_v60 = vmul.f32 %v11656_v10, %v11387_v9  ;;  %v992_v1 = vrot.slane %v12079_v5, 1  ;;  %v462_v23 = vmul.f32 %v11656_v10, %v18082_v45  ;;  %v10738_v55 = vld [vmem:[%s17582_s3 + $0x128] sm:$0xff]  }
 0x119   :  { %2446 = vmatpush1.bf16.msra.mxu1 %v10736_v44  ;;  %v993_v44 = vrot.slane %v12082_v28, 1  ;;  %v463_v61 = vmul.f32 %v11656_v10, %v11424_v4  ;;  %v12126_v9 = vadd.f32 %v11673_v17, %v456_v48  ;;  %v12136_v4 = vpack.c.bf16 %v11871_v21, %v11868_v14 }
 0x11a   :  { %2447 = vmatprep.subr.bf16.mxu1 %v18050_v34  ;;  %v12143_v48 = vadd.f32 %v11673_v17, %v458_v32  ;;  %v12148_v45 = vpack.c.bf16 %v984_v35, %v985_v25  ;;  %v12153_v42 = vadd.f32 %v11673_v17, %v460_v47  ;;  %v12156_v14 = vadd.f32 %v11673_v17, %v461_v60  ;;  %v10739_v35 = vld [vmem:[%s17582_s3 + $0x130] sm:$0xff]   ;;  %v18087_v60 = vld [vmem:[#allocation15_spill] sm:$0xff] }
 0x11b   :  { %8677 = vmatmul.mubr.msk.bf16.gmra.mrb[28].mxu0 %vm11713_vm5, %v12060_v0  ;;  %18083 = vst [vmem:[#allocation12_spill] sm:$0xff] %v12136_v4  ;;  %v12150_v0 = vpack.c.bf16 %v710_v62, %v708_v63  ;;  %v991_v21 = vsel %vm940_vm2, %v989_v51, %v990_v59  ;;  %v12164_v32 = vadd.f32 %v11673_v17, %v463_v61  ;;  %v995_v25 = vrot.slane %v12126_v9, 1 }
 0x11c   :  { %10224 = vmatmul.mubr.msk.bf16.gmra.mrb[24].mxu1 %vm11722_vm6, %v12062_v46  ;;  %1588 = vmatprep.mubr.bf16.mxu0 %v12066_v50  ;;  %v714_v46 = vrot.slane %v11921_v13, 7  ;;  %v715_v50 = vrot.slane %v11924_v29, 7  ;;  %18085 = vst [vmem:[#allocation14_spill] sm:$0xff] %v12148_v45  ;;  %v994_v63 = vsel %vm940_vm2, %v992_v1, %v993_v44  ;;  %v717_v47 = vrot.slane %v11935_v54, 7 }
 0x11d   :  { %10227 = vmatprep.mubr.msk.bf16.mxu1 %vm11722_vm6, %v12074_v16  ;;  %2448 = vmatpush1.bf16.msra.mxu1 %v10737_v11  ;;  %v12129_v16 = vadd.f32 %v11673_v17, %v457_v40  ;;  %v12140_v11 = vpack.c.bf16 %v11881_v52, %v11878_v58  ;;  %v12146_v40 = vadd.f32 %v11673_v17, %v459_v43  ;;  %v718_v61 = vrot.slane %v11938_v56, 7 }
 0x11e   :  { %2449 = vmatprep.subr.bf16.mxu1 %v18050_v34  ;;  %18086 = vst [vmem:[#allocation59_spill] sm:$0xff] %v12150_v0  ;;  %v713_v58 = vsel %vm683_vm1, %v711_v19, %v712_v12  ;;  %v12161_v52 = vadd.f32 %v11673_v17, %v462_v23  ;;  %v716_v43 = vsel %vm683_vm1, %v714_v46, %v715_v50  ;;  %v998_v12 = vrot.slane %v12143_v48, 1 }
 0x11f   :  { %18084 = vst [vmem:[#allocation13_spill] sm:$0xff] %v12140_v11  ;;  %v996_v62 = vrot.slane %v12129_v16, 1  ;;  %v999_v51 = vrot.slane %v12146_v40, 1  ;;  %v464_v1 = vmul.f32 %v11656_v10, %v18087_v60  ;;  %v1001_v50 = vrot.slane %v12153_v42, 1 }
 0x120   :  { %v1002_v23 = vrot.slane %v12156_v14, 1  ;;  %v1004_v60 = vrot.slane %v12161_v52, 1  ;;  %v1005_v53 = vrot.slane %v12164_v32, 1  ;;  %v12201_v18 = vpack.c.bf16 %v990_v59, %v991_v21 }
 0x121   :  { %2450 = vmatpush1.bf16.msra.mxu1 %v10738_v55  ;;  %v465_v55 = vmul.f32 %v11656_v10, %v11439_v26  ;;  %v997_v26 = vsel %vm940_vm2, %v995_v25, %v996_v62  ;;  %v12211_v24 = vpack.c.bf16 %v993_v44, %v994_v63  ;;  %v12217_v59 = vadd.f32 %v11673_v17, %v464_v1  ;;  %v18096_v25 = vld [vmem:[#allocation17_spill] sm:$0xff]  ;;  %v18098_v1 = vld [vmem:[#allocation18_spill] sm:$0xff] }
 0x122   :  { %2451 = vmatprep.subr.bf16.mxu1 %v18050_v34  ;;  %v1003_v21 = vsel %vm940_vm2, %v1001_v50, %v1002_v23  ;;  %v12228_v44 = vpack.c.bf16 %v996_v62, %v997_v26  ;;  %v1006_v63 = vsel %vm940_vm2, %v1004_v60, %v1005_v53  ;;  %v470_v62 = vmul.f32 %v11656_v10, %v18098_v1  ;;  %v18101_v50 = vld [vmem:[#allocation19_spill] sm:$0xff]  ;;  %v18103_v60 = vld [vmem:[#allocation20_spill] sm:$0xff] }
 0x123   :  { %8681 = vmatmul.mubr.msk.bf16.gmra.mrb[32].mxu0 %vm11713_vm5, %v12076_v27  ;;  %v12192_v27 = vpack.c.bf16 %v713_v58, %v711_v19  ;;  %v12206_v19 = vpack.c.bf16 %v11924_v29, %v11921_v13  ;;  %v467_v58 = vmul.f32 %v11656_v10, %v11448_v39  ;;  %18092 = vst [vmem:[#allocation61_spill] sm:$0xff] %v12211_v24  ;;  %v738_v26 = vrot.slane %v12126_v9, 7 }
 0x124   :  { %10228 = vmatmul.mubr.msk.bf16.gmra.mrb[28].mxu1 %vm11722_vm6, %v12148_v45  ;;  %1596 = vmatprep.mubr.bf16.mxu0 %v12136_v4  ;;  %v18089_v45 = vld [vmem:[#allocation16_spill] sm:$0xff]  ;;  %v12222_v13 = vpack.c.bf16 %v11938_v56, %v11935_v54  ;;  %v719_v29 = vsel %vm683_vm1, %v717_v47, %v718_v61  ;;  %v12226_v39 = vadd.f32 %v11673_v17, %v465_v55 }
 0x125   :  { %10231 = vmatprep.mubr.bf16.mxu1 %v18050_v34  ;;  %18088 = vst [vmem:[#allocation15_spill] sm:$0xff] %v12192_v27  ;;  %v466_v4 = vmul.f32 %v11656_v10, %v18089_v45  ;;  %2452 = vmatpush1.bf16.msra.mxu1 %v10739_v35  ;;  %18090 = vst [vmem:[#allocation16_spill] sm:$0xff] %v12201_v18  ;;  %v1000_v45 = vsel %vm940_vm2, %v998_v12, %v999_v51 }
 0x126   :  { %18091 = vst [vmem:[#allocation60_spill] sm:$0xff] %v12206_v19  ;;  %2453 = vmatprep.subr.bf16.mxu1 %v18050_v34  ;;  %v12214_v35 = vpack.c.bf16 %v716_v43, %v714_v46  ;;  %18094 = vst [vmem:[#allocation63_spill] sm:$0xff] %v12222_v13  ;;  %v468_v43 = vmul.f32 %v11656_v10, %v18096_v25  ;;  %v12236_v12 = vpack.c.bf16 %v999_v51, %v1000_v45 }
 0x127   :  { %18095 = vst [vmem:[#allocation64_spill] sm:$0xff] %v12228_v44  ;;  %v12232_v46 = vadd.f32 %v11673_v17, %v466_v4  ;;  %v12239_v54 = vadd.f32 %v11673_v17, %v467_v58  ;;  %v469_v56 = vmul.f32 %v11656_v10, %v11456_v49  ;;  %v12249_v4 = vpack.c.bf16 %v1002_v23, %v1003_v21  ;;  %v18107_v21 = vld [vmem:[#allocation21_spill] sm:$0xff] }
 0x128   :  { %18093 = vst [vmem:[#allocation62_spill] sm:$0xff] %v12214_v35  ;;  %18097 = vst [vmem:[#allocation17_spill] sm:$0xff] %v12236_v12  ;;  %v471_v61 = vmul.f32 %v11656_v10, %v18101_v50  ;;  %v12260_v49 = vpack.c.bf16 %v1005_v53, %v1006_v63  ;;  %v472_v23 = vmul.f32 %v11656_v10, %v18103_v60  ;;  %v733_v45 = vrot.slane %v12072_v36, 7 }
 0x129   :  { %2454 = vmatpush1.bf16.msra.mxu1 %v10740_v31  ;;  %18099 = vst [vmem:[#allocation18_spill] sm:$0xff] %v12249_v4  ;;  %v12251_v31 = vpack.c.bf16 %v719_v29, %v717_v47  ;;  %v732_v47 = vrot.slane %v12069_v8, 7  ;;  %v12271_v58 = vadd.f32 %v11673_v17, %v468_v43  ;;  %v473_v53 = vmul.f32 %v11656_v10, %v11504_v38 }
 0x12a   :  { %3355 = vmatprep.subr.bf16.mxu1 %v18050_v34  ;;  %18102 = vst [vmem:[#allocation19_spill] sm:$0xff] %v12260_v49  ;;  %v12278_v29 = vadd.f32 %v11673_v17, %v469_v56  ;;  %v12281_v63 = vadd.f32 %v11673_v17, %v470_v62  ;;  %v12285_v25 = vpack.c.bf16 %v12082_v28, %v12079_v5  ;;  %v735_v38 = vrot.slane %v12079_v5, 7 }
 0x12b   :  { %8685 = vmatmul.mubr.msk.bf16.gmra.mrb[36].mxu0 %vm11713_vm5, %v12150_v0  ;;  %18100 = vst [vmem:[#allocation65_spill] sm:$0xff] %v12251_v31  ;;  %v12288_v43 = vadd.f32 %v11673_v17, %v471_v61  ;;  %v734_v1 = vsel %vm683_vm1, %v732_v47, %v733_v45  ;;  %v736_v50 = vrot.slane %v12082_v28, 7  ;;  %v12294_v60 = vadd.f32 %v11673_v17, %v472_v23  ;;  %v18108_v23 = vld [vmem:[#allocation22_spill] sm:$0xff] }
 0x12c   :  { %10232 = vmatmul.mubr.msk.bf16.gmra.mrb[32].mxu1 %vm11722_vm6, %v12201_v18  ;;  %1604 = vmatprep.mubr.bf16.mxu0 %v12140_v11  ;;  %18104 = vst [vmem:[#allocation20_spill] sm:$0xff] %v12285_v25  ;;  %v12296_v56 = vpack.c.bf16 %v734_v1, %v732_v47  ;;  %v12300_v62 = vpack.c.bf16 %v12129_v16, %v12126_v9  ;;  %v739_v28 = vrot.slane %v12129_v16, 7  ;;  %v741_v9 = vrot.slane %v12143_v48, 7 }
 0x12d   :  { %10235 = vmatprep.mubr.msk.bf16.mxu1 %vm11722_vm6, %v12211_v24  ;;  %v12304_v61 = vadd.f32 %v11673_v17, %v473_v53  ;;  %v474_v45 = vmul.f32 %v11656_v10, %v18107_v21  ;;  %v737_v5 = vsel %vm683_vm1, %v735_v38, %v736_v50  ;;  %v475_v47 = vmul.f32 %v11656_v10, %v18108_v23 }
 0x12e   :  { %18105 = vst [vmem:[#allocation66_spill] sm:$0xff] %v12296_v56  ;;  %18106 = vst [vmem:[#allocation67_spill] sm:$0xff] %v12300_v62  ;;  %v12312_v1 = vpack.c.bf16 %v737_v5, %v735_v38  ;;  %v12316_v51 = vpack.c.bf16 %v12146_v40, %v12143_v48  ;;  %v740_v53 = vsel %vm683_vm1, %v738_v26, %v739_v28  ;;  %v742_v21 = vrot.slane %v12146_v40, 7  ;;  %v12341_v28 = vpop.f32.mrb[0].mxu0 }
 0x12f   :  { %v12326_v16 = vpack.c.bf16 %v12156_v14, %v12153_v42  ;;  %v744_v38 = vrot.slane %v12153_v42, 7  ;;  %v12333_v48 = vpack.c.bf16 %v740_v53, %v738_v26  ;;  %v745_v50 = vrot.slane %v12156_v14, 7  ;;  %18114 = vst [vmem:[#allocation71_spill] sm:$0xff] %v12341_v28  ;;  %v1528_v53 = vpop.f32.mrb[1].mxu0 }
 0x130   :  { %18109 = vst [vmem:[#allocation21_spill] sm:$0xff] %v12312_v1  ;;  %18110 = vst [vmem:[#allocation22_spill] sm:$0xff] %v12316_v51  ;;  %v12338_v5 = vpack.c.bf16 %v12164_v32, %v12161_v52  ;;  %v747_v40 = vrot.slane %v12161_v52, 7  ;;  %v743_v42 = vsel %vm683_vm1, %v741_v9, %v742_v21  ;;  %v748_v23 = vrot.slane %v12164_v32, 7 }
 0x131   :  { %18111 = vst [vmem:[#allocation68_spill] sm:$0xff] %v12326_v16  ;;  %18112 = vst [vmem:[#allocation69_spill] sm:$0xff] %v12333_v48  ;;  %v12350_v26 = vpack.c.bf16 %v12226_v39, %v12217_v59  ;;  %v750_v14 = vrot.slane %v12217_v59, 7  ;;  %v12353_v55 = vpack.c.bf16 %v743_v42, %v741_v9  ;;  %v746_v52 = vsel %vm683_vm1, %v744_v38, %v745_v50 }
 0x132   :  { %18113 = vst [vmem:[#allocation70_spill] sm:$0xff] %v12338_v5  ;;  %v12361_v21 = vpack.c.bf16 %v746_v52, %v744_v38  ;;  %v749_v32 = vsel %vm683_vm1, %v747_v40, %v748_v23  ;;  %v753_v24 = vrot.slane %v12232_v46, 7  ;;  %v754_v18 = vrot.slane %v12239_v54, 7 }
 0x133   :  { %8689 = vmatmul.mubr.msk.bf16.gmra.mrb[40].mxu0 %vm11713_vm5, %v12192_v27  ;;  %18115 = vst [vmem:[#allocation72_spill] sm:$0xff] %v12350_v26  ;;  %18116 = vst [vmem:[#allocation73_spill] sm:$0xff] %v12353_v55  ;;  %v12366_v28 = vpack.c.bf16 %v749_v32, %v747_v40  ;;  %v12371_v50 = vpack.c.bf16 %v12278_v29, %v12271_v58  ;;  %v756_v42 = vrot.slane %v12271_v58, 7  ;;  %v757_v23 = vrot.slane %v12278_v29, 7 }
 0x134   :  { %10236 = vmatmul.mubr.msk.bf16.gmra.mrb[36].mxu1 %vm11722_vm6, %v12228_v44  ;;  %1612 = vmatprep.mubr.bf16.mxu0 %v12206_v19  ;;  %v751_v44 = vrot.slane %v12226_v39, 7  ;;  %18118 = vst [vmem:[#allocation75_spill] sm:$0xff] %v12361_v21  ;;  %v755_v38 = vsel %vm683_vm1, %v753_v24, %v754_v18  ;;  %v12380_v52 = vpack.c.bf16 %v12288_v43, %v12281_v63  ;;  %v760_v32 = vrot.slane %v12288_v43, 7 }
 0x135   :  { %10239 = vmatprep.mubr.msk.bf16.mxu1 %vm11722_vm6, %v12236_v12  ;;  %v12359_v12 = vpack.c.bf16 %v12239_v54, %v12232_v46  ;;  %18119 = vst [vmem:[#allocation76_spill] sm:$0xff] %v12366_v28  ;;  %18120 = vst [vmem:[#allocation77_spill] sm:$0xff] %v12371_v50  ;;  %v12382_v40 = vpack.c.bf16 %v755_v38, %v753_v24  ;;  %v12388_v19 = vpack.c.bf16 %v12304_v61, %v12294_v60 }
 0x136   :  { %v752_v9 = vsel %vm683_vm1, %v750_v14, %v751_v44  ;;  %18122 = vst [vmem:[#allocation79_spill] sm:$0xff] %v12380_v52  ;;  %v759_v44 = vrot.slane %v12281_v63, 7  ;;  %v18125_v18 = vrot.slane %v12226_v39, 1  ;;  %v758_v24 = vsel %vm683_vm1, %v756_v42, %v757_v23 }
 0x137   :  { %18117 = vst [vmem:[#allocation74_spill] sm:$0xff] %v12359_v12  ;;  %v12374_v53 = vpack.c.bf16 %v752_v9, %v750_v14  ;;  %18123 = vst [vmem:[#allocation80_spill] sm:$0xff] %v12382_v40  ;;  %v18126_v14 = vrot.slane %v12217_v59, 1  ;;  %v762_v38 = vrot.slane %v12294_v60, 7  ;;  %v763_v27 = vrot.slane %v12304_v61, 7 }
 0x138   :  { %18124 = vst [vmem:[#allocation81_spill] sm:$0xff] %v12388_v19  ;;  %v18128_v19 = vrot.slane %v12232_v46, 1  ;;  %v12410_v11 = vpack.c.bf16 %v758_v24, %v756_v42  ;;  %v761_v23 = vsel %vm683_vm1, %v759_v44, %v760_v32  ;;  %v12429_v46 = vpack.c.bf16 %v11985_v30, %v11982_v37 }
 0x139   :  { %18121 = vst [vmem:[#allocation78_spill] sm:$0xff] %v12374_v53  ;;  %v1009_v9 = vsel %vm940_vm2, %v18126_v14, %v18125_v18  ;;  %v12413_v18 = vpop.f32.mrb[2].mxu0  ;;  %v12419_v14 = vadd.f32 %v11673_v17, %v474_v45  ;;  %v720_v42 = vrot.slane %v11982_v37, 7  ;;  %v721_v32 = vrot.slane %v11985_v30, 7 }
 0x13a   :  { %18129 = vst [vmem:[#allocation82_spill] sm:$0xff] %v12410_v11  ;;  %18131 = vst [vmem:[#allocation84_spill] sm:$0xff] %v12429_v46  ;;  %v18133_v45 = vrot.slane %v12226_v39, 1  ;;  %v1014_v37 = vrot.slane %v12278_v29, 1  ;;  %v1016_v30 = vrot.slane %v12281_v63, 1  ;;  %v10747_v29 = vld [vmem:[%s17582_s3 + $0x140] sm:$0xff]  }
 0x13b   :  { %8693 = vmatmul.mubr.msk.bf16.gmra.mrb[44].mxu0 %vm11713_vm5, %v12214_v35  ;;  %v18127_v35 = vrot.slane %v12239_v54, 1  ;;  %v722_v63 = vsel %vm683_vm1, %v720_v42, %v721_v32  ;;  %10263 = vmatprep.subr.bf16.mxu0 %v10747_v29 }
 0x13c   :  { %10240 = vmatmul.mubr.msk.bf16.gmra.mrb[40].mxu1 %vm11722_vm6, %v12249_v4  ;;  %1620 = vmatprep.mubr.bf16.mxu0 %v12222_v13  ;;  %v12422_v4 = vadd.f32 %v11673_v17, %v475_v47  ;;  %v12424_v13 = vpack.c.bf16 %v761_v23, %v759_v44  ;;  %v1013_v47 = vrot.slane %v12271_v58, 1  ;;  %v765_v44 = vrot.slane %v12419_v14, 7 }
 0x13d   :  { %v1012_v59 = vsel %vm940_vm2, %v18128_v19, %v18127_v35  ;;  %10243 = vmatprep.mubr.msk.bf16.mxu1 %vm11722_vm6, %v12260_v49  ;;  %v764_v19 = vsel %vm683_vm1, %v762_v38, %v763_v27  ;;  %v1531_v35 = vpop.f32.mrb[3].mxu0  ;;  %v12437_v49 = vpack.c.bf16 %v18133_v45, %v1009_v9  ;;  %v18135_v23 = vrot.slane %v12239_v54, 1  ;;  %v18138_v9 = vld [vmem:[#allocation24_spill] sm:$0xff]  ;;  %10264 = vmatpush3.bf16.msra.mxu0 %v10747_v29 }
 0x13e   :  { %18130 = vst [vmem:[#allocation83_spill] sm:$0xff] %v12424_v13  ;;  %v12433_v24 = vpack.c.bf16 %v764_v19, %v762_v38  ;;  %v766_v27 = vrot.slane %v12422_v4, 7  ;;  %v1017_v38 = vrot.slane %v12288_v43, 1  ;;  %v18137_v19 = vld [vmem:[#allocation23_spill] sm:$0xff]  ;;  %v477_v58 = vmul.f32 %v11656_v10, %v18138_v9 }
 0x13f   :  { %18134 = vst [vmem:[#allocation86_spill] sm:$0xff] %v12437_v49  ;;  %v12444_v35 = vpack.c.bf16 %v18135_v23, %v1012_v59  ;;  %v476_v39 = vmul.f32 %v11656_v10, %v18137_v19  ;;  %v12455_v45 = vpack.c.bf16 %v12422_v4, %v12419_v14  ;;  %v1015_v43 = vsel %vm940_vm2, %v1013_v47, %v1014_v37  ;;  %v10748_v47 = vld [vmem:[%s17582_s3 + $0x148] sm:$0xff]  }
 0x140   :  { %18132 = vst [vmem:[#allocation85_spill] sm:$0xff] %v12433_v24  ;;  %v767_v54 = vsel %vm683_vm1, %v765_v44, %v766_v27  ;;  %v12480_v23 = vadd.f32 %v11673_v17, %v477_v58  ;;  %v12482_v32 = vpack.c.bf16 %v722_v63, %v720_v42  ;;  %v723_v19 = vrot.slane %v11988_v6, 7  ;;  %10265 = vmatprep.subr.bf16.mxu0 %v10748_v47 }
 0x141   :  { %18136 = vst [vmem:[#allocation87_spill] sm:$0xff] %v12444_v35  ;;  %18139 = vst [vmem:[#allocation23_spill] sm:$0xff] %v12455_v45  ;;  %v12458_v59 = vpack.c.bf16 %v767_v54, %v765_v44  ;;  %v1018_v44 = vsel %vm940_vm2, %v1016_v30, %v1017_v38  ;;  %v12477_v27 = vadd.f32 %v11673_v17, %v476_v39  ;;  %v724_v30 = vrot.slane %v11995_v22, 7 }
 0x142   :  { %18141 = vst [vmem:[#allocation88_spill] sm:$0xff] %v12482_v32  ;;  %v12490_v9 = vpack.c.bf16 %v11995_v22, %v11988_v6  ;;  %v769_v58 = vrot.slane %v12480_v23, 7  ;;  %v12495_v54 = vpack.c.bf16 %v1014_v37, %v1015_v43  ;;  %v12497_v42 = vpack.c.bf16 %v1017_v38, %v1018_v44  ;;  %v18146_v6 = vld [vmem:[#allocation26_spill] sm:$0xff]  ;;  %10266 = vmatpush3.bf16.msra.mxu0 %v10748_v47 }
 0x143   :  { %18140 = vst [vmem:[#allocation24_spill] sm:$0xff] %v12458_v59  ;;  %8697 = vmatmul.mubr.msk.bf16.gmra.mrb[48].mxu0 %vm11713_vm5, %v12251_v31  ;;  %v768_v39 = vrot.slane %v12477_v27, 7  ;;  %v1019_v29 = vrot.slane %v12294_v60, 1  ;;  %v1020_v63 = vrot.slane %v12304_v61, 1  ;;  %v12507_v22 = vpack.c.bf16 %v12480_v23, %v12477_v27  ;;  %v10749_v61 = vld [vmem:[%s17582_s3 + $0x150] sm:$0xff]  }
 0x144   :  { %10244 = vmatmul.mubr.msk.bf16.gmra.mrb[44].mxu1 %vm11722_vm6, %v12437_v49  ;;  %1628 = vmatprep.mubr.bf16.mxu0 %v12429_v46  ;;  %18142 = vst [vmem:[#allocation89_spill] sm:$0xff] %v12490_v9  ;;  %18143 = vst [vmem:[#allocation90_spill] sm:$0xff] %v12495_v54  ;;  %v479_v46 = vmul.f32 %v11656_v10, %v18146_v6  ;;  %v1022_v38 = vrot.slane %v12419_v14, 1  ;;  %v1023_v43 = vrot.slane %v12422_v4, 1 }
 0x145   :  { %10247 = vmatprep.mubr.msk.bf16.mxu1 %vm11722_vm6, %v12444_v35  ;;  %18144 = vst [vmem:[#allocation91_spill] sm:$0xff] %v12497_v42  ;;  %v18145_v35 = vld [vmem:[#allocation25_spill] sm:$0xff]  ;;  %v770_v37 = vsel %vm683_vm1, %v768_v39, %v769_v58  ;;  %v1021_v4 = vsel %vm940_vm2, %v1019_v29, %v1020_v63  ;;  %10267 = vmatprep.subr.bf16.mxu0 %v10749_v61  ;;  %v726_v29 = vrot.slane %v12024_v7, 7 }
 0x146   :  { %v478_v49 = vmul.f32 %v11656_v10, %v18145_v35  ;;  %18147 = vst [vmem:[#allocation25_spill] sm:$0xff] %v12507_v22  ;;  %v12512_v60 = vpack.c.bf16 %v770_v37, %v768_v39  ;;  %v725_v35 = vsel %vm683_vm1, %v723_v19, %v724_v30  ;;  %v549_v44 = vadd.f32 %v11673_v17, %v479_v46  ;;  %v10751_v58 = vld [vmem:[%s17582_s3 + $0x158] sm:$0xff]  }
 0x147   :  { %v12531_v47 = vpack.c.bf16 %v725_v35, %v723_v19  ;;  %v12535_v30 = vpack.c.bf16 %v12027_v41, %v12024_v7  ;;  %v1024_v39 = vsel %vm940_vm2, %v1022_v38, %v1023_v43  ;;  %10268 = vmatpush3.bf16.msra.mxu0 %v10749_v61  ;;  %v12543_v37 = vpack.c.bf16 %v1020_v63, %v1021_v4  ;;  %v18152_v35 = vld [vmem:[#allocation27_spill] sm:$0xff] }
 0x148   :  { %18148 = vst [vmem:[#allocation26_spill] sm:$0xff] %v12512_v60  ;;  %v548_v14 = vadd.f32 %v11673_v17, %v478_v49  ;;  %v727_v49 = vrot.slane %v12027_v41, 7  ;;  %v772_v46 = vrot.slane %v549_v44, 7  ;;  %v1025_v19 = vrot.slane %v12477_v27, 1  ;;  %10269 = vmatprep.subr.bf16.mxu0 %v10751_v58  ;;  %v10752_v27 = vld [vmem:[%s17582_s3 + $0x160] sm:$0xff]  }
 0x149   :  { %18149 = vst [vmem:[#allocation92_spill] sm:$0xff] %v12531_v47  ;;  %18150 = vst [vmem:[#allocation93_spill] sm:$0xff] %v12535_v30  ;;  %v12550_v61 = vpack.c.bf16 %v1023_v43, %v1024_v39  ;;  %v1029_v63 = vrot.slane %v549_v44, 1  ;;  %v10753_v39 = vld [vmem:[%s17582_s3 + $0x168] sm:$0xff]  }
 0x14a   :  { %v771_v6 = vrot.slane %v548_v14, 7  ;;  %18151 = vst [vmem:[#allocation94_spill] sm:$0xff] %v12543_v37  ;;  %v12553_v7 = vpack.c.bf16 %v549_v44, %v548_v14 }
 0x14b   :  { %8701 = vmatmul.mubr.msk.bf16.gmra.mrb[52].mxu0 %vm11713_vm5, %v12482_v32  ;;  %18154 = vst [vmem:[#allocation27_spill] sm:$0xff] %v12550_v61  ;;  %v1028_v32 = vrot.slane %v548_v14, 1 }
 0x14c   :  { %10248 = vmatmul.mubr.msk.bf16.gmra.mrb[48].mxu1 %vm11722_vm6, %v12495_v54  ;;  %1636 = vmatprep.mubr.bf16.mxu0 %v12490_v9  ;;  %v18153_v54 = vld [vmem:[#allocation28_spill] sm:$0xff]  ;;  %v1026_v9 = vrot.slane %v12480_v23, 1  ;;  %v773_v41 = vsel %vm683_vm1, %v771_v6, %v772_v46  ;;  %v728_v23 = vsel %vm683_vm1, %v726_v29, %v727_v49 }
 0x14d   :  { %10251 = vmatprep.mubr.msk.bf16.mxu1 %vm11722_vm6, %v12497_v42  ;;  %v480_v42 = vmul.f32 %v11656_v10, %v18152_v35  ;;  %v481_v38 = vmul.f32 %v11656_v10, %v18153_v54  ;;  %18155 = vst [vmem:[#allocation28_spill] sm:$0xff] %v12553_v7  ;;  %10270 = vmatpush3.bf16.msra.mxu0 %v10751_v58 }
 0x14e   :  { %v12556_v4 = vpack.c.bf16 %v773_v41, %v771_v6  ;;  %v1027_v43 = vsel %vm940_vm2, %v1025_v19, %v1026_v9  ;;  %10271 = vmatprep.subr.bf16.mxu0 %v10752_v27  ;;  %v1030_v44 = vsel %vm940_vm2, %v1028_v32, %v1029_v63  ;;  %v12579_v58 = vpack.c.bf16 %v728_v23, %v726_v29  ;;  %v10754_v29 = vld [vmem:[%s17582_s3 + $0x170] sm:$0xff]  }
 0x14f   :  { %v550_v54 = vadd.f32 %v11673_v17, %v480_v42  ;;  %v551_v14 = vadd.f32 %v11673_v17, %v481_v38  ;;  %v12581_v6 = vpack.c.bf16 %v1026_v9, %v1027_v43  ;;  %v12583_v35 = vpack.c.bf16 %v1029_v63, %v1030_v44  ;;  %v10756_v63 = vld [vmem:[%s17582_s3 + $0x178] sm:$0xff]   ;;  %v4066_v43 = vpop.permute.xlu0 %4065 }
 0x150   :  { %18156 = vst [vmem:[#allocation95_spill] sm:$0xff] %v12556_v4  ;;  %18157 = vst [vmem:[#allocation96_spill] sm:$0xff] %v12579_v58  ;;  %v12611_v23 = vpack.c.bf16 %v12072_v36, %v12069_v8  ;;  %v10741_v36 = vld [vmem:[%s17582_s3 + $0x180] sm:$0xff]  }
 0x151   :  { %10272 = vmatpush3.bf16.msra.mxu0 %v10752_v27  ;;  %v774_v49 = vrot.slane %v550_v54, 7  ;;  %v775_v42 = vrot.slane %v551_v14, 7  ;;  %18158 = vst [vmem:[#allocation97_spill] sm:$0xff] %v12581_v6  ;;  %v1031_v46 = vrot.slane %v550_v54, 1  ;;  %18159 = vst [vmem:[#allocation98_spill] sm:$0xff] %v12583_v35  ;;  %v1032_v19 = vrot.slane %v551_v14, 1 }
 0x152   :  { %10273 = vmatprep.subr.bf16.mxu0 %v10753_v39  ;;  %v12585_v38 = vpack.c.bf16 %v551_v14, %v550_v54  ;;  %v8566_v54 = vld [vmem:[%s17585_s6] ss:$0 sm:$0xff] }
 0x153   :  { %8705 = vmatmul.mubr.msk.bf16.gmra.mrb[56].mxu0 %vm11713_vm5, %v12531_v47  ;;  %v776_v32 = vsel %vm683_vm1, %v774_v49, %v775_v42  ;;  %v1033_v9 = vsel %vm940_vm2, %v1031_v46, %v1032_v19  ;;  %v12622_v14 = vmul.f32 %v8566_v54, %v4066_v43  ;;  %v10883_v43 = vmov 2475754826  }
 0x154   :  { %10252 = vmatmul.mubr.msk.bf16.gmra.mrb[52].mxu1 %vm11722_vm6, %v12543_v37  ;;  %1644 = vmatprep.mubr.bf16.mxu0 %v12535_v30  ;;  %18160 = vst [vmem:[#allocation99_spill] sm:$0xff] %v12585_v38  ;;  %v12588_v41 = vpack.c.bf16 %v776_v32, %v774_v49  ;;  %v12607_v27 = vpack.c.bf16 %v1032_v19, %v1033_v9 }
 0x155   :  { %10255 = vmatprep.mubr.msk.bf16.mxu1 %vm11722_vm6, %v12550_v61  ;;  %10274 = vmatpush3.bf16.msra.mxu0 %v10753_v39  ;;  %v4078_v8 = vand.u32 2139095040, %v12622_v14  ;;  %v17714_v49 = vand.u32 2147483647, %v12622_v14  ;;  %vm4077_vm14 = vcmp.lt.s32.totalorder %v12622_v14, 0 }
 0x156   :  { %18161 = vst [vmem:[#allocation100_spill] sm:$0xff] %v12588_v41  ;;  %10275 = vmatprep.subr.bf16.mxu0 %v10754_v29  ;;  %18162 = vst [vmem:[#allocation101_spill] sm:$0xff] %v12607_v27 }
 0x157   :  { %v4079_v44 = vshrl.u32 %v4078_v8, 23  ;;  %v4082_v19 = vand.u32 8388607, %v17714_v49  ;;  %v18163_v49 = vld [vmem:[#allocation40_spill] sm:$0xff] }
 0x159   :  { %10276 = vmatpush3.bf16.msra.mxu0 %v10754_v29  ;;  %v8567_v39 = vadd.s32 4294967169, %v4079_v44 }
 0x15a   :  { %10277 = vmatprep.subr.bf16.mxu0 %v10756_v63 }
 0x15b   :  { %8709 = vmatmul.mubr.msk.bf16.gmra.mrb[60].mxu0 %vm11713_vm5, %v12579_v58  ;;  %v4085_v42 = vadd.s32 1, %v8567_v39  ;;  %v10885_v39 = vmov 2102212464  }
 0x15c   :  { %10256 = vmatmul.mubr.msk.bf16.gmra.mrb[56].mxu1 %vm11722_vm6, %v12581_v6  ;;  %1652 = vmatprep.mubr.bf16.mxu0 %v18050_v34 }
 0x15d   :  { %10259 = vmatprep.mubr.msk.bf16.mxu1 %vm11722_vm6, %v12583_v35  ;;  %10278 = vmatpush3.bf16.msra.mxu0 %v10756_v63  ;;  %vm4086_vm7 = vcmp.gt.s32.totalorder %v4085_v42, 0  ;;  %v10882_v63 = vmov 683565275  }
 0x15e   :  { %v4087_v46 = vsel %vm4086_vm7, %v4085_v42, 0  ;;  %v10886_v42 = vmov 920167782   ;;  %vm4167_vm7 = vweird.f32 %v12622_v14 }
 0x15f   :  { %v4089_v32 = vand.u32 31, %v4087_v46  ;;  %v4088_v29 = vshrl.u32 %v4087_v46, 5 }
 0x161   :  { %v4090_v9 = vsub.s32 32, %v4089_v32  ;;  %v4092_v54 = vshll.u32 %v10882_v63, %v4089_v32  ;;  %v4095_v8 = vshll.u32 %v10883_v43, %v4089_v32  ;;  %v4104_v46 = vshll.u32 %v10886_v42, %v4089_v32 }
 0x162   :  { %vm4107_vm8 = vcmp.lt.s32.totalorder %v4088_v29, 1  ;;  %vm4110_vm9 = vcmp.lt.s32.totalorder %v4088_v29, 4  ;;  %vm4109_vm10 = vcmp.lt.s32.totalorder %v4088_v29, 3  ;;  %vm4108_vm11 = vcmp.lt.s32.totalorder %v4088_v29, 2  ;;  %v10750_v29 = vld [vmem:[%s17582_s3 + $0x1b0] sm:$0xff]  }
 0x163   :  { %1653 = vmatmul.mubr.bf16.gmra.mrb[64].mxu0 %v18050_v34  ;;  %v4091_v35 = vshrl.u32 %v10882_v63, %v4090_v9  ;;  %v4093_v6 = vshrl.u32 %v10883_v43, %v4090_v9  ;;  %v4102_v37 = vshrl.u32 %v10886_v42, %v4090_v9 }
 0x164   :  { %10260 = vmatmul.mubr.msk.bf16.gmra.mrb[60].mxu1 %vm11722_vm6, %v12607_v27  ;;  %1660 = vmatprep.mubr.bf16.mxu0 %v12611_v23  ;;  %v4083_v27 = vor.u32 8388608, %v4082_v19  ;;  %v10745_v19 = vld [vmem:[%s17582_s3 + $0x1a0] sm:$0xff]  }
 0x165   :  { %2455 = vmatprep.mubr.bf16.mxu1 %v11705_v33  ;;  %v10742_v33 = vld [vmem:[%s17582_s3 + $0x188] sm:$0xff]  }
 0x16b   :  { %8713 = vmatmul.mubr.msk.bf16.gmra.mrb[68].mxu0 %vm11713_vm5, %v12296_v56 }
 0x16c   :  { %8863 = vmatmul.mubr.msk.bf16.vlgmr.msra.gmra.mrb[64].mxu1 %vm11713_vm5, %v11718_v2  ;;  %1668 = vmatprep.mubr.bf16.mxu0 %v12285_v25  ;;  %v10743_v2 = vld [vmem:[%s17582_s3 + $0x190] sm:$0xff]   ;;  %v4094_v25 = vor.u32 %v4093_v6, %v4092_v54 }
 0x16d   :  { %3356 = vmatpush1.bf16.msra.mxu1 %v10741_v36  ;;  %2463 = vmatprep.mubr.bf16.mxu1 %v11707_v3  ;;  %v10884_v36 = vmov 2131351028   ;;  %v10744_v3 = vld [vmem:[%s17582_s3 + $0x198] sm:$0xff]  }
 0x16e   :  { %3357 = vmatprep.subr.bf16.mxu1 %v18050_v34  ;;  %v4098_v44 = vshll.u32 %v10884_v36, %v4089_v32  ;;  %v4096_v61 = vshrl.u32 %v10884_v36, %v4090_v9  ;;  %v4111_v63 = vsel %vm4107_vm8, %v4091_v35, %v4094_v25  ;;  %v4123_v36 = vshll.u32 %v4083_v27, 8 }
 0x171   :  { %3358 = vmatpush1.bf16.msra.mxu1 %v10742_v33  ;;  %v4101_v33 = vshll.u32 %v10885_v39, %v4089_v32  ;;  %v4097_v32 = vor.u32 %v4096_v61, %v4095_v8 }
 0x172   :  { %3359 = vmatprep.subr.bf16.mxu1 %v18050_v34 }
 0x173   :  { %8717 = vmatmul.mubr.msk.bf16.gmra.mrb[72].mxu0 %vm11713_vm5, %v12312_v1  ;;  %v4115_v43 = vsel %vm4107_vm8, %v4094_v25, %v4097_v32 }
 0x174   :  { %8867 = vmatmul.mubr.msk.bf16.gmra.mrb[68].mxu1 %vm11713_vm5, %v11767_v57  ;;  %1676 = vmatprep.mubr.bf16.mxu0 %v12300_v62  ;;  %v4099_v57 = vshrl.u32 %v10885_v39, %v4090_v9  ;;  %v10887_v62 = vmov 1326507024  }
 0x175   :  { %2471 = vmatprep.mubr.bf16.mxu1 %v18163_v49  ;;  %3360 = vmatpush1.bf16.msra.mxu1 %v10743_v2  ;;  %v4105_v1 = vshrl.u32 %v10887_v62, %v4090_v9  ;;  %v4103_v2 = vor.u32 %v4102_v37, %v4101_v33  ;;  %v18164_v9 = vld [vmem:[#allocation42_spill] sm:$0xff] }
 0x176   :  { %3361 = vmatprep.subr.bf16.mxu1 %v18050_v34  ;;  %v4100_v49 = vor.u32 %v4099_v57, %v4098_v44 }
 0x177   :  { %v4106_v56 = vor.u32 %v4105_v1, %v4104_v46  ;;  %v4116_v61 = vsel %vm4110_vm9, %v4103_v2, 920167782 }
 0x178   :  { %v4112_v62 = vsel %vm4110_vm9, %v4100_v49, 2102212464  ;;  %v4119_v57 = vsel %vm4107_vm8, %v4097_v32, %v4100_v49  ;;  %v4117_v1 = vsel %vm4109_vm10, %v4100_v49, %v4116_v61  ;;  %v10746_v49 = vld [vmem:[%s17582_s3 + $0x1a8] sm:$0xff]  }
 0x179   :  { %3362 = vmatpush1.bf16.msra.mxu1 %v10744_v3  ;;  %v4120_v37 = vsel %vm4110_vm9, %v4106_v56, 1326507024  ;;  %v4113_v3 = vsel %vm4109_vm10, %v4097_v32, %v4112_v62  ;;  %v4118_v35 = vsel %vm4108_vm11, %v4115_v43, %v4117_v1  ;;  %v18165_v56 = vld [vmem:[#allocation43_spill] sm:$0xff]  ;;  %v18166_v32 = vld [vmem:[#allocation46_spill] sm:$0xff] }
 0x17a   :  { %3363 = vmatprep.subr.bf16.mxu1 %v18050_v34  ;;  %v4121_v6 = vsel %vm4109_vm10, %v4103_v2, %v4120_v37  ;;  %v4114_v25 = vsel %vm4108_vm11, %v4111_v63, %v4113_v3  ;;  %v12683_v44 = vmul.u32.u64.low %v4123_v36, %v4118_v35  ;;  %v12684_v39 = vmul.u32.u64.high %v4123_v36, %v4118_v35, %v12683_v44  ;;  %v10755_v63 = vld [vmem:[%s17582_s3 + $0x1b8] sm:$0xff]   ;;  %v10757_v62 = vld [vmem:[%s17582_s3 + $0x1c0] sm:$0xff]   ;;  %v18169_v3 = vld [vmem:[#allocation51_spill] sm:$0xff] }
 0x17b   :  { %8721 = vmatmul.mubr.msk.bf16.gmra.mrb[76].mxu0 %vm11713_vm5, %v12333_v48  ;;  %v4122_v27 = vsel %vm4108_vm11, %v4119_v57, %v4121_v6  ;;  %v4130_v33 = vmul.u32 %v4123_v36, %v4114_v25  ;;  %v18168_v57 = vld [vmem:[#allocation50_spill] sm:$0xff]  ;;  %v10758_v1 = vld [vmem:[%s17582_s3 + $0x1c8] sm:$0xff]   ;;  %v10759_v35 = vld [vmem:[%s17582_s3 + $0x1d0] sm:$0xff]   ;;  %vm10890_vm11 = vmmov 0  }
 0x17c   :  { %8871 = vmatmul.mubr.msk.bf16.gmra.mrb[72].mxu1 %vm11713_vm5, %v18164_v9  ;;  %1684 = vmatprep.mubr.bf16.mxu0 %v12316_v51  ;;  %v12680_v54 = vmul.u32.u64.low %v4123_v36, %v4122_v27  ;;  %v12681_v8 = vmul.u32.u64.high %v4123_v36, %v4122_v27, %v12680_v54  ;;  %v4133_v42 = vadd.s32 1, %v12684_v39 }
 0x17d   :  { %2479 = vmatprep.mubr.bf16.mxu1 %v18165_v56  ;;  %3364 = vmatpush1.bf16.msra.mxu1 %v10745_v19  ;;  %v18167_v19 = vld [vmem:[#allocation47_spill] sm:$0xff] }
 0x17e   :  { %3365 = vmatprep.subr.bf16.mxu1 %v18050_v34  ;;  %vm4132_vm12 = vc.u32 %v12681_v8, %v12683_v44 }
 0x17f   :  { %v4134_v46 = vsel %vm4132_vm12, %v4133_v42, %v12684_v39  ;;  %v18171_v39 = vld [vmem:[#allocation8_spill] sm:$0xff]  ;;  %vm4286_vm12 = vcmask 130048  }
 0x180   :  { %v4135_v2 = vadd.s32 %v4134_v46, %v4130_v33  ;;  %v4131_v33 = vadd.s32 %v12683_v44, %v12681_v8 }
 0x181   :  { %3366 = vmatpush1.bf16.msra.mxu1 %v10746_v49  ;;  %v18170_v49 = vld [vmem:[#allocation6_spill] sm:$0xff] }
 0x182   :  { %3367 = vmatprep.subr.bf16.mxu1 %v18050_v34  ;;  %v4136_v43 = vadd.s32 536870912, %v4135_v2 }
 0x183   :  { %8725 = vmatmul.mubr.msk.bf16.gmra.mrb[80].mxu0 %vm11713_vm5, %v12353_v55 }
 0x184   :  { %8875 = vmatmul.mubr.msk.bf16.gmra.mrb[76].mxu1 %vm11713_vm5, %v18166_v32  ;;  %1692 = vmatprep.mubr.bf16.mxu0 %v12326_v16  ;;  %v12706_v36 = vshrl.u32 %v4136_v43, 30 }
 0x185   :  { %2487 = vmatprep.mubr.bf16.mxu1 %v18167_v19  ;;  %3368 = vmatpush1.bf16.msra.mxu1 %v10750_v29 }
 0x186   :  { %3369 = vmatprep.subr.bf16.mxu1 %v18050_v34  ;;  %v4138_v61 = vshll.u32 %v12706_v36, 30 }
 0x188   :  { %v4139_v37 = vsub.s32 %v4135_v2, %v4138_v61  ;;  %v10760_v61 = vld [vmem:[%s17582_s3 + $0x1d8] sm:$0xff]  }
 0x189   :  { %3370 = vmatpush1.bf16.msra.mxu1 %v10755_v63 }
 0x18a   :  { %3371 = vmatprep.subr.bf16.mxu1 %v18050_v34  ;;  %v4141_v6 = vsub.s32 0, %v4139_v37 }
 0x18b   :  { %8729 = vmatmul.mubr.msk.bf16.gmra.mrb[84].mxu0 %vm11713_vm5, %v12361_v21 }
 0x18c   :  { %8879 = vmatmul.mubr.msk.bf16.gmra.mrb[80].mxu1 %vm11713_vm5, %v18168_v57  ;;  %1700 = vmatprep.mubr.bf16.mxu0 %v12338_v5  ;;  %v8568_v25 = vmin.u32 %v4141_v6, %v4139_v37 }
 0x18d   :  { %2495 = vmatprep.mubr.bf16.mxu1 %v18169_v3  ;;  %3372 = vmatpush1.bf16.msra.mxu1 %v10757_v62  ;;  %v18172_v62 = vld [vmem:[#allocation54_spill] sm:$0xff] }
 0x18e   :  { %3373 = vmatprep.subr.bf16.mxu1 %v18050_v34  ;;  %v4143_v27 = vclz %v8568_v25 }
 0x190   :  { %v8569_v54 = vadd.s32 4294967294, %v4143_v27  ;;  %v18174_v27 = vld [vmem:[#allocation58_spill] sm:$0xff] }
 0x191   :  { %3374 = vmatpush1.bf16.msra.mxu1 %v10758_v1 }
 0x192   :  { %3375 = vmatprep.subr.bf16.mxu1 %v18050_v34  ;;  %vm8570_vm13 = vcmp.lt.s32.totalorder %v8569_v54, 0 }
 0x193   :  { %8733 = vmatmul.mubr.msk.bf16.gmra.mrb[88].mxu0 %vm11713_vm5, %v12366_v28  ;;  %v4146_v29 = vsel %vm8570_vm13, 0, %v8569_v54  ;;  %vm4299_vm13 = vcmask 261120  }
 0x194   :  { %8883 = vmatmul.mubr.msk.bf16.gmra.mrb[84].mxu1 %vm11713_vm5, %v18170_v49  ;;  %1708 = vmatprep.mubr.bf16.mxu0 %v12350_v26  ;;  %v4147_v42 = vsub.s32 32, %v4146_v29  ;;  %v4148_v46 = vshll.u32 %v4139_v37, %v4146_v29  ;;  %v4151_v2 = vsub.s32 4294967266, %v4146_v29  ;;  %v18173_v37 = vld [vmem:[#allocation56_spill] sm:$0xff]  ;;  %v18176_v29 = vand.u32 2147483647, %v12622_v14 }
 0x195   :  { %2503 = vmatprep.mubr.bf16.mxu1 %v18171_v39  ;;  %3376 = vmatpush1.bf16.msra.mxu1 %v10759_v35 }
 0x196   :  { %3377 = vmatprep.subr.bf16.mxu1 %v18050_v34  ;;  %v4149_v63 = vshrl.u32 %v4131_v33, %v4147_v42  ;;  %v4152_v43 = vadd.s32 127, %v4151_v2  ;;  %v18175_v33 = vld [vmem:[#allocation12_spill] sm:$0xff]  ;;  %vm4076_vm15 = vcmp.le.f32.partialorder %v18176_v29, 0.7853982  ;;  %v10761_v2 = vld [vmem:[%s17582_s3 + $0x1e0] sm:$0xff]  }
 0x198   :  { %v4150_v8 = vor.u32 %v4149_v63, %v4148_v46  ;;  %v4153_v44 = vshll.u32 %v4152_v43, 23  ;;  %v18177_v63 = vld [vmem:[#allocation13_spill] sm:$0xff]  ;;  %v4161_v43 = vsub.s32 4, %v12706_v36 }
 0x199   :  { %3378 = vmatpush1.bf16.msra.mxu1 %v10760_v61 }
 0x19a   :  { %v4154_v1 = vor.u32 4788187, %v4153_v44  ;;  %v4157_v6 = vcvt.s32.f32 %v4150_v8  ;;  %3379 = vmatprep.subr.bf16.mxu1 %v18050_v34  ;;  %v4162_v8 = vsel %vm4077_vm14, %v4161_v43, %v12706_v36 }
 0x19b   :  { %8737 = vmatmul.mubr.msk.bf16.gmra.mrb[92].mxu0 %vm11713_vm5, %v12374_v53  ;;  %v4164_v44 = vsel %vm4076_vm15, 0, %v4162_v8 }
 0x19c   :  { %8887 = vmatmul.mubr.msk.bf16.gmra.mrb[88].mxu1 %vm11713_vm5, %v18172_v62  ;;  %1716 = vmatprep.mubr.bf16.mxu0 %v12359_v12  ;;  %v4155_v25 = vand.u32 2147483647, %v4154_v1  ;;  %v4272_v61 = vand.u32 3, %v4164_v44  ;;  %v4168_v36 = vadd.s32 3, %v4164_v44 }
 0x19d   :  { %2511 = vmatprep.mubr.bf16.mxu1 %v18173_v37  ;;  %3380 = vmatpush1.bf16.msra.mxu1 %v10761_v2 }
 0x19e   :  { %v4158_v35 = vmul.f32 %v4157_v6, %v4155_v25  ;;  %3381 = vmatprep.subr.bf16.mxu1 %v18050_v34  ;;  %vm4274_vm0 = vcmp.eq.s32.totalorder %v4272_v61, 0  ;;  %vm4277_vm3 = vcmp.eq.s32.totalorder %v4272_v61, 2  ;;  %vm4273_vm4 = vcmp.lt.s32.totalorder %v4272_v61, 2  ;;  %v10762_v61 = vld [vmem:[%s17582_s3 + $0x1e8] sm:$0xff]  }
 0x19f   :  { %v4169_v2 = vand.u32 3, %v4168_v36  ;;  %v18185_v36 = vld [vmem:[#allocation71_spill] sm:$0xff] }
 0x1a0   :  { %v4159_v54 = vxor.u32 2147483648, %v4158_v35 }
 0x1a1   :  { %vm4170_vm8 = vcmp.lt.s32.totalorder %v4169_v2, 2  ;;  %vm4171_vm9 = vcmp.eq.s32.totalorder %v4169_v2, 0  ;;  %vm4174_vm10 = vcmp.eq.s32.totalorder %v4169_v2, 2  ;;  %3382 = vmatpush1.bf16.msra.mxu1 %v10762_v61  ;;  %v18189_v61 = vld [vmem:[#allocation84_spill] sm:$0xff] }
 0x1a2   :  { %v4160_v42 = vsel %vm4077_vm14, %v4159_v54, %v4158_v35  ;;  %v18178_v35 = vld [vmem:[#allocation15_spill] sm:$0xff]  ;;  %v18179_v54 = vld [vmem:[#allocation81_spill] sm:$0xff]  ;;  %3383 = vmatprep.subr.bf16.mxu1 %v18050_v34 }
 0x1a3   :  { %8741 = vmatmul.mubr.msk.bf16.gmra.mrb[96].mxu0 %vm11713_vm5, %v12382_v40  ;;  %v4163_v46 = vsel %vm4076_vm15, %v12622_v14, %v4160_v42  ;;  %v18180_v42 = vld [vmem:[#allocation60_spill] sm:$0xff]  ;;  %v18182_v14 = vld [vmem:[#allocation62_spill] sm:$0xff] }
 0x1a4   :  { %8891 = vmatmul.mubr.msk.bf16.gmra.mrb[92].mxu1 %vm11713_vm5, %v18174_v27  ;;  %1724 = vmatprep.mubr.bf16.mxu0 %v12371_v50  ;;  %10847 = vcosq.f32 %v4163_v46 }
 0x1a5   :  { %2519 = vmatprep.mubr.bf16.mxu1 %v18175_v33  ;;  %10849 = vsinq.f32 %v4163_v46 }
 0x1ab   :  { %8745 = vmatmul.mubr.msk.bf16.gmra.mrb[100].mxu0 %vm11713_vm5, %v12410_v11 }
 0x1ac   :  { %8895 = vmatmul.mubr.msk.bf16.gmra.mrb[96].mxu1 %vm11713_vm5, %v12150_v0  ;;  %1732 = vmatprep.mubr.bf16.mxu0 %v12380_v52 }
 0x1ad   :  { %2527 = vmatprep.mubr.bf16.mxu1 %v18177_v63 }
 0x1ae   :  { %v10848_v1 = vpop.eup %10847 }
 0x1af   :  { %v10850_v6 = vpop.eup %10849  ;;  %v4175_v25 = vxor.u32 2147483648, %v10848_v1 }
 0x1b0   :  { %v4172_v29 = vxor.u32 2147483648, %v10850_v6 }
 0x1b1   :  { %v4279_v46 = vsel %vm4277_vm3, %v4175_v25, %v10850_v6  ;;  %v4176_v0 = vsel %vm4174_vm10, %v4175_v25, %v10850_v6 }
 0x1b2   :  { %v4276_v43 = vsel %vm4274_vm0, %v10848_v1, %v4172_v29 }
 0x1b3   :  { %8749 = vmatmul.mubr.msk.bf16.gmra.mrb[104].mxu0 %vm11713_vm5, %v12424_v13  ;;  %v4280_v8 = vsel %vm4273_vm4, %v4276_v43, %v4279_v46 }
 0x1b4   :  { %8899 = vmatmul.mubr.msk.bf16.gmra.mrb[100].mxu1 %vm11713_vm5, %v18178_v35  ;;  %1740 = vmatprep.mubr.bf16.mxu0 %v18179_v54  ;;  %v4281_v63 = vsel %vm4167_vm7, nan, %v4280_v8  ;;  %v4173_v35 = vsel %vm4171_vm9, %v10848_v1, %v4172_v29 }
 0x1b5   :  { %2535 = vmatprep.mubr.bf16.mxu1 %v18180_v42  ;;  %4283 = vrot.lane.b32.xlu0 %v4281_v63, %s10888_s27  ;;  %v4177_v33 = vsel %vm4170_vm8, %v4173_v35, %v4176_v0  ;;  %v18183_v63 = vld [vmem:[#allocation63_spill] sm:$0xff] }
 0x1b6   :  { %v12793_v44 = vsel %vm4167_vm7, nan, %v4177_v33 }
 0x1b7   :  { %18181 = vst [vmem:[#allocation42_spill] sm:$0xff] %v12793_v44 }
 0x1bb   :  { %8753 = vmatmul.mubr.msk.bf16.gmra.mrb[108].mxu0 %vm11713_vm5, %v12433_v24 }
 0x1bc   :  { %8903 = vmatmul.mubr.msk.bf16.gmra.mrb[104].mxu1 %vm11713_vm5, %v18182_v14  ;;  %1748 = vmatprep.mubr.bf16.mxu0 %v12455_v45 }
 0x1bd   :  { %2543 = vmatprep.mubr.bf16.mxu1 %v18183_v63  ;;  %v18197_v63 = vld [vmem:[#allocation11_spill] sm:$0xff] }
 0x1be   :  { %v1534_v1 = vpop.f32.mrb[4].mxu0 }
 0x1bf   :  { %v10201_v0 = vpop.f32.mrb[0].mxu1  ;;  %v1536_v6 = vpop.f32.mrb[5].mxu0 }
 0x1c0   :  { %v12804_v33 = vadd.f32 %v10201_v0, %v1534_v1  ;;  %v1815_v25 = vpop.f32.mrb[1].mxu1  ;;  %v1537_v35 = vpop.f32.mrb[6].mxu0 }
 0x1c1   :  { %v12807_v29 = vadd.f32 %v1815_v25, %v18185_v36  ;;  %v10202_v46 = vpop.f32.mrb[2].mxu1  ;;  %v1539_v2 = vpop.f32.mrb[7].mxu0 }
 0x1c2   :  { %18184 = vst [vmem:[#allocation102_spill] sm:$0xff] %v12804_v33  ;;  %v12809_v43 = vadd.f32 %v10202_v46, %v1537_v35  ;;  %v1818_v8 = vpop.f32.mrb[3].mxu1  ;;  %v12827_v2 = vld [vmem:[%s17582_s3 + $0x200] sm:$0xff]  }
 0x1c3   :  { %18186 = vst [vmem:[#allocation71_spill] sm:$0xff] %v12807_v29  ;;  %v12812_v44 = vadd.f32 %v1818_v8, %v12413_v18  ;;  %8757 = vmatmul.mubr.msk.bf16.gmra.mrb[112].mxu0 %vm11713_vm5, %v12458_v59  ;;  %10343 = vmatprep.subr.bf16.mxu0 %v12827_v2  ;;  %v18196_v29 = vld [vmem:[#allocation10_spill] sm:$0xff] }
 0x1c4   :  { %18187 = vst [vmem:[#allocation103_spill] sm:$0xff] %v12809_v43  ;;  %8907 = vmatmul.mubr.msk.bf16.gmra.mrb[108].mxu1 %vm11713_vm5, %v12251_v31  ;;  %1756 = vmatprep.mubr.bf16.mxu0 %v12507_v22  ;;  %v450_v33 = vmul.f32 %v11656_v10, %v18196_v29 }
 0x1c5   :  { %18188 = vst [vmem:[#allocation104_spill] sm:$0xff] %v12812_v44  ;;  %2551 = vmatprep.mubr.bf16.mxu1 %v18189_v61 }
 0x1c6   :  { %v1542_v1 = vpop.f32.mrb[8].mxu0 }
 0x1c7   :  { %v10205_v0 = vpop.f32.mrb[4].mxu1  ;;  %v1544_v6 = vpop.f32.mrb[9].mxu0 }
 0x1c8   :  { %v1831_v25 = vpop.f32.mrb[5].mxu1  ;;  %v1545_v35 = vpop.f32.mrb[10].mxu0  ;;  %v18192_v6 = vld [vmem:[#allocation88_spill] sm:$0xff] }
 0x1c9   :  { %v12822_v36 = vadd.f32 %v1831_v25, %v1542_v1  ;;  %v10206_v18 = vpop.f32.mrb[6].mxu1  ;;  %v1547_v46 = vpop.f32.mrb[11].mxu0  ;;  %v10764_v1 = vld [vmem:[%s17582_s3 + $0x1f0] sm:$0xff]   ;;  %v18193_v25 = vld [vmem:[#allocation89_spill] sm:$0xff] }
 0x1ca   :  { %v1834_v8 = vpop.f32.mrb[7].mxu1  ;;  %3384 = vmatpush1.bf16.msra.mxu1 %v10764_v1 }
 0x1cb   :  { %18190 = vst [vmem:[#allocation105_spill] sm:$0xff] %v12822_v36  ;;  %v12829_v31 = vadd.f32 %v1834_v8, %v1545_v35  ;;  %8761 = vmatmul.mubr.msk.bf16.gmra.mrb[116].mxu0 %vm11713_vm5, %v12512_v60  ;;  %3385 = vmatprep.subr.bf16.mxu1 %v18050_v34 }
 0x1cc   :  { %8911 = vmatmul.mubr.msk.bf16.gmra.mrb[112].mxu1 %vm11713_vm5, %v18192_v6  ;;  %1764 = vmatprep.mubr.bf16.mxu0 %v12553_v7 }
 0x1cd   :  { %18191 = vst [vmem:[#allocation106_spill] sm:$0xff] %v12829_v31  ;;  %2559 = vmatprep.mubr.bf16.mxu1 %v18193_v25  ;;  %v451_v25 = vmul.f32 %v11656_v10, %v18197_v63 }
 0x1ce   :  { %v1550_v35 = vpop.f32.mrb[12].mxu0 }
 0x1cf   :  { %v12843_v46 = vadd.f32 %v10205_v0, %v1550_v35  ;;  %v10209_v8 = vpop.f32.mrb[8].mxu1  ;;  %v1552_v31 = vpop.f32.mrb[13].mxu0  ;;  %v12864_v29 = vadd.f32 %v11673_v17, %v451_v25 }
 0x1d0   :  { %v1847_v36 = vpop.f32.mrb[9].mxu1  ;;  %v1553_v61 = vpop.f32.mrb[14].mxu0  ;;  %v12861_v31 = vadd.f32 %v11673_v17, %v450_v33 }
 0x1d1   :  { %18194 = vst [vmem:[#allocation107_spill] sm:$0xff] %v12843_v46  ;;  %v12846_v44 = vadd.f32 %v10206_v18, %v1553_v61  ;;  %v10210_v6 = vpop.f32.mrb[10].mxu1  ;;  %v1555_v43 = vpop.f32.mrb[15].mxu0  ;;  %v730_v25 = vrot.slane %v12864_v29, 7 }
 0x1d2   :  { %v1850_v14 = vpop.f32.mrb[11].mxu1  ;;  %v729_v33 = vrot.slane %v12861_v31, 7 }
 0x1d3   :  { %18195 = vst [vmem:[#allocation108_spill] sm:$0xff] %v12846_v44  ;;  %8765 = vmatmul.mubr.msk.bf16.gmra.mrb[120].mxu0 %vm11713_vm5, %v12556_v4 }
 0x1d4   :  { %8915 = vmatmul.mubr.msk.bf16.gmra.mrb[116].mxu1 %vm11713_vm5, %v12531_v47  ;;  %1772 = vmatprep.mubr.bf16.mxu0 %v12585_v38 }
 0x1d5   :  { %2567 = vmatprep.mubr.bf16.mxu1 %v12535_v30  ;;  %v12872_v30 = vpack.c.bf16 %v12864_v29, %v12861_v31 }
 0x1d6   :  { %v1558_v63 = vpop.f32.mrb[16].mxu0 }
 0x1d7   :  { %v12866_v43 = vadd.f32 %v1847_v36, %v1558_v63  ;;  %v10213_v61 = vpop.f32.mrb[12].mxu1  ;;  %v1560_v0 = vpop.f32.mrb[17].mxu0  ;;  %18200 = vst [vmem:[#allocation109_spill] sm:$0xff] %v12872_v30  ;;  %v731_v36 = vsel %vm683_vm1, %v729_v33, %v730_v25  ;;  %v10765_v25 = vld [vmem:[%s17582_s3 + $0x208] sm:$0xff]  }
 0x1d8   :  { %v1863_v18 = vpop.f32.mrb[13].mxu1  ;;  %v1561_v1 = vpop.f32.mrb[18].mxu0  ;;  %v12894_v42 = vpack.c.bf16 %v731_v36, %v729_v33 }
 0x1d9   :  { %18198 = vst [vmem:[#allocation10_spill] sm:$0xff] %v12866_v43  ;;  %v12868_v35 = vadd.f32 %v1850_v14, %v1561_v1  ;;  %v10214_v47 = vpop.f32.mrb[14].mxu1  ;;  %v1563_v44 = vpop.f32.mrb[19].mxu0  ;;  %v18201_v14 = vld [vmem:[#allocation36_spill] sm:$0xff] }
 0x1da   :  { %v1866_v46 = vpop.f32.mrb[15].mxu1  ;;  %v10769_v44 = vld [vmem:[%s17582_s3 + $0x1f8] sm:$0xff]   ;;  %18203 = vst [vmem:[#allocation110_spill] sm:$0xff] %v12894_v42 }
 0x1db   :  { %18199 = vst [vmem:[#allocation11_spill] sm:$0xff] %v12868_v35  ;;  %8769 = vmatmul.mubr.msk.bf16.gmra.mrb[124].mxu0 %vm11713_vm5, %v12588_v41  ;;  %3386 = vmatpush1.bf16.msra.mxu1 %v10769_v44  ;;  %v18205_v44 = vld [vmem:[#allocation37_spill] sm:$0xff] }
 0x1dc   :  { %8919 = vmatmul.mubr.msk.bf16.gmra.mrb[120].mxu1 %vm11713_vm5, %v12579_v58  ;;  %10279 = vmatprep.mubr.msk.bf16.mxu0 %vm11722_vm6, %v18201_v14 }
 0x1dd   :  { %2575 = vmatprep.mubr.bf16.mxu1 %v12872_v30 }
 0x1de   :  { %v1566_v63 = vpop.f32.mrb[20].mxu0 }
 0x1df   :  { %v12890_v0 = vadd.f32 %v10209_v8, %v1566_v63  ;;  %v12892_v1 = vpop.f32.mrb[16].mxu1  ;;  %v1568_v35 = vpop.f32.mrb[21].mxu0  ;;  %v18206_v8 = vld [vmem:[#allocation39_spill] sm:$0xff] }
 0x1e0   :  { %v1879_v58 = vpop.f32.mrb[17].mxu1  ;;  %v1569_v43 = vpop.f32.mrb[22].mxu0 }
 0x1e1   :  { %18202 = vst [vmem:[#allocation36_spill] sm:$0xff] %v12890_v0  ;;  %v12896_v14 = vadd.f32 %v10210_v6, %v1569_v43  ;;  %v12898_v27 = vpop.f32.mrb[18].mxu1  ;;  %v1571_v37 = vpop.f32.mrb[23].mxu0  ;;  %v10766_v6 = vld [vmem:[%s17582_s3 + $0x210] sm:$0xff]  }
 0x1e2   :  { %v1882_v62 = vpop.f32.mrb[19].mxu1 }
 0x1e3   :  { %18204 = vst [vmem:[#allocation111_spill] sm:$0xff] %v12896_v14  ;;  %10280 = vmatmul.mubr.msk.bf16.vlgmr.msra.gmra.mrb[128].mxu0 %vm11722_vm6, %v18205_v44 }
 0x1e4   :  { %8923 = vmatmul.mubr.msk.bf16.gmra.mrb[124].mxu1 %vm11713_vm5, %v12894_v42  ;;  %10283 = vmatprep.mubr.msk.bf16.mxu0 %vm11722_vm6, %v18206_v8 }
 0x1e5   :  { %2583 = vmatprep.mubr.bf16.mxu1 %v12611_v23  ;;  %10344 = vmatpush3.bf16.msra.mxu0 %v12827_v2 }
 0x1e6   :  { %v1574_v37 = vpop.f32.mrb[24].mxu0  ;;  %10345 = vmatprep.subr.bf16.mxu0 %v10765_v25 }
 0x1e7   :  { %v12917_v43 = vadd.f32 %v1863_v18, %v1574_v37  ;;  %v12919_v35 = vpop.f32.mrb[20].mxu1  ;;  %v1576_v33 = vpop.f32.mrb[25].mxu0  ;;  %v10767_v18 = vld [vmem:[%s17582_s3 + $0x218] sm:$0xff]  }
 0x1e8   :  { %v12921_v36 = vpop.f32.mrb[21].mxu1  ;;  %v1577_v63 = vpop.f32.mrb[26].mxu0  ;;  %v18209_v37 = vld [vmem:[#allocation41_spill] sm:$0xff]  ;;  %v18210_v33 = vld [vmem:[#allocation66_spill] sm:$0xff] }
 0x1e9   :  { %18207 = vst [vmem:[#allocation37_spill] sm:$0xff] %v12917_v43  ;;  %v12923_v42 = vadd.f32 %v1866_v46, %v1577_v63  ;;  %v12925_v30 = vpop.f32.mrb[22].mxu1  ;;  %v1579_v23 = vpop.f32.mrb[27].mxu0  ;;  %10346 = vmatpush3.bf16.msra.mxu0 %v10765_v25  ;;  %v18211_v46 = vld [vmem:[#allocation44_spill] sm:$0xff] }
 0x1ea   :  { %v12927_v2 = vpop.f32.mrb[23].mxu1  ;;  %10347 = vmatprep.subr.bf16.mxu0 %v10766_v6  ;;  %v18212_v25 = vld [vmem:[#allocation20_spill] sm:$0xff]  ;;  %v10768_v23 = vld [vmem:[%s17582_s3 + $0x220] sm:$0xff]  }
 0x1eb   :  { %18208 = vst [vmem:[#allocation39_spill] sm:$0xff] %v12923_v42  ;;  %10284 = vmatmul.mubr.msk.bf16.gmra.mrb[132].mxu0 %vm11722_vm6, %v18209_v37  ;;  %v17741_v42 = vmov 0.0|0.0  }
 0x1ec   :  { %8927 = vmatmul.mubr.msk.bf16.gmra.mrb[128].mxu1 %vm11713_vm5, %v18210_v33  ;;  %10287 = vmatprep.mubr.msk.bf16.mxu0 %vm11722_vm6, %v18211_v46 }
 0x1ed   :  { %2591 = vmatprep.mubr.bf16.mxu1 %v18212_v25  ;;  %10348 = vmatpush3.bf16.msra.mxu0 %v10766_v6 }
 0x1ee   :  { %v1582_v63 = vpop.f32.mrb[28].mxu0  ;;  %10349 = vmatprep.subr.bf16.mxu0 %v10767_v18  ;;  %10674 = vmatprep.subr.bf16.mxu1 %v17741_v42 }
 0x1ef   :  { %v12946_v43 = vadd.f32 %v10213_v61, %v1582_v63  ;;  %v12948_v14 = vpop.f32.mrb[24].mxu1  ;;  %v1584_v33 = vpop.f32.mrb[29].mxu0  ;;  %v10770_v61 = vld [vmem:[%s17582_s3 + $0x228] sm:$0xff]   ;;  %v18215_v63 = vld [vmem:[#allocation45_spill] sm:$0xff] }
 0x1f0   :  { %v12950_v0 = vpop.f32.mrb[25].mxu1  ;;  %v1585_v39 = vpop.f32.mrb[30].mxu0  ;;  %v18216_v33 = vld [vmem:[#allocation21_spill] sm:$0xff] }
 0x1f1   :  { %18213 = vst [vmem:[#allocation41_spill] sm:$0xff] %v12946_v43  ;;  %v12952_v49 = vadd.f32 %v10214_v47, %v1585_v39  ;;  %v12954_v6 = vpop.f32.mrb[26].mxu1  ;;  %v1587_v25 = vpop.f32.mrb[31].mxu0  ;;  %10350 = vmatpush3.bf16.msra.mxu0 %v10767_v18  ;;  %v18217_v47 = vld [vmem:[#allocation48_spill] sm:$0xff]  ;;  %v18218_v39 = vld [vmem:[#allocation67_spill] sm:$0xff] }
 0x1f2   :  { %v12956_v3 = vpop.f32.mrb[27].mxu1  ;;  %10351 = vmatprep.subr.bf16.mxu0 %v10768_v23  ;;  %v10771_v25 = vld [vmem:[%s17582_s3 + $0x230] sm:$0xff]  }
 0x1f3   :  { %18214 = vst [vmem:[#allocation66_spill] sm:$0xff] %v12952_v49  ;;  %10288 = vmatmul.mubr.msk.bf16.gmra.mrb[136].mxu0 %vm11722_vm6, %v18215_v63 }
 0x1f4   :  { %8931 = vmatmul.mubr.msk.bf16.gmra.mrb[132].mxu1 %vm11713_vm5, %v18216_v33  ;;  %10291 = vmatprep.mubr.msk.bf16.mxu0 %vm11722_vm6, %v18217_v47 }
 0x1f5   :  { %2599 = vmatprep.mubr.bf16.mxu1 %v18218_v39  ;;  %10352 = vmatpush3.bf16.msra.mxu0 %v10768_v23 }
 0x1f6   :  { %v1590_v18 = vpop.f32.mrb[32].mxu0  ;;  %10353 = vmatprep.subr.bf16.mxu0 %v10770_v61 }
 0x1f7   :  { %v12974_v42 = vadd.f32 %v1879_v58, %v1590_v18  ;;  %v12976_v49 = vpop.f32.mrb[28].mxu1  ;;  %v1592_v43 = vpop.f32.mrb[33].mxu0  ;;  %v10772_v58 = vld [vmem:[%s17582_s3 + $0x238] sm:$0xff]  }
 0x1f8   :  { %v12978_v57 = vpop.f32.mrb[29].mxu1  ;;  %v1593_v33 = vpop.f32.mrb[34].mxu0  ;;  %v18221_v18 = vld [vmem:[#allocation49_spill] sm:$0xff] }
 0x1f9   :  { %18219 = vst [vmem:[#allocation44_spill] sm:$0xff] %v12974_v42  ;;  %v12980_v19 = vadd.f32 %v1882_v62, %v1593_v33  ;;  %v12982_v32 = vpop.f32.mrb[30].mxu1  ;;  %v1595_v39 = vpop.f32.mrb[35].mxu0  ;;  %10354 = vmatpush3.bf16.msra.mxu0 %v10770_v61  ;;  %v18222_v62 = vld [vmem:[#allocation52_spill] sm:$0xff] }
 0x1fa   :  { %v12984_v23 = vpop.f32.mrb[31].mxu1  ;;  %10355 = vmatprep.subr.bf16.mxu0 %v10771_v25 }
 0x1fb   :  { %18220 = vst [vmem:[#allocation45_spill] sm:$0xff] %v12980_v19  ;;  %10292 = vmatmul.mubr.msk.bf16.gmra.mrb[140].mxu0 %vm11722_vm6, %v18221_v18 }
 0x1fc   :  { %8935 = vmatmul.mubr.msk.bf16.gmra.mrb[136].mxu1 %vm11713_vm5, %v12333_v48  ;;  %10295 = vmatprep.mubr.msk.bf16.mxu0 %vm11722_vm6, %v18222_v62 }
 0x1fd   :  { %2607 = vmatprep.mubr.bf16.mxu1 %v12316_v51  ;;  %10356 = vmatpush3.bf16.msra.mxu0 %v10771_v25  ;;  %v18225_v25 = vld [vmem:[#allocation53_spill] sm:$0xff] }
 0x1fe   :  { %v1598_v43 = vpop.f32.mrb[36].mxu0  ;;  %10357 = vmatprep.subr.bf16.mxu0 %v10772_v58 }
 0x1ff   :  { %v13000_v61 = vadd.f32 %v12892_v1, %v1598_v43  ;;  %v13002_v33 = vpop.f32.mrb[32].mxu1  ;;  %v1600_v39 = vpop.f32.mrb[37].mxu0  ;;  %v18226_v1 = vld [vmem:[#allocation7_spill] sm:$0xff] }
 0x200   :  { %v13004_v19 = vpop.f32.mrb[33].mxu1  ;;  %v1601_v42 = vpop.f32.mrb[38].mxu0 }
 0x201   :  { %18223 = vst [vmem:[#allocation48_spill] sm:$0xff] %v13000_v61  ;;  %v13007_v48 = vadd.f32 %v12898_v27, %v1601_v42  ;;  %v13009_v56 = vpop.f32.mrb[34].mxu1  ;;  %v1603_v62 = vpop.f32.mrb[39].mxu0  ;;  %10358 = vmatpush3.bf16.msra.mxu0 %v10772_v58 }
 0x202   :  { %v13011_v51 = vpop.f32.mrb[35].mxu1  ;;  %5759 = vmatprep.subr.bf16.mxu0 %v18050_v34  ;;  %v18356_v20 = vld [vmem:[#allocation45_spill] sm:$0xff] }
 0x203   :  { %18224 = vst [vmem:[#allocation49_spill] sm:$0xff] %v13007_v48  ;;  %10296 = vmatmul.mubr.msk.bf16.gmra.mrb[144].mxu0 %vm11722_vm6, %v18225_v25 }
 0x204   :  { %8939 = vmatmul.mubr.msk.bf16.gmra.mrb[140].mxu1 %vm11713_vm5, %v12353_v55  ;;  %10299 = vmatprep.mubr.msk.bf16.mxu0 %vm11722_vm6, %v18226_v1  ;;  %v18229_v1 = vld [vmem:[#allocation9_spill] sm:$0xff] }
 0x205   :  { %2615 = vmatprep.mubr.bf16.mxu1 %v12326_v16 }
 0x206   :  { %v1606_v27 = vpop.f32.mrb[40].mxu0 }
 0x207   :  { %v13025_v42 = vadd.f32 %v12921_v36, %v1606_v27  ;;  %v13027_v58 = vpop.f32.mrb[36].mxu1  ;;  %v1608_v62 = vpop.f32.mrb[41].mxu0  ;;  %v18230_v36 = vld [vmem:[#allocation55_spill] sm:$0xff] }
 0x208   :  { %v13029_v43 = vpop.f32.mrb[37].mxu1  ;;  %v1609_v39 = vpop.f32.mrb[42].mxu0 }
 0x209   :  { %18227 = vst [vmem:[#allocation53_spill] sm:$0xff] %v13025_v42  ;;  %v13032_v48 = vadd.f32 %v12927_v2, %v1609_v39  ;;  %v13034_v55 = vpop.f32.mrb[38].mxu1  ;;  %v1611_v61 = vpop.f32.mrb[43].mxu0 }
 0x20a   :  { %v13036_v34 = vpop.f32.mrb[39].mxu1 }
 0x20b   :  { %18228 = vst [vmem:[#allocation112_spill] sm:$0xff] %v13032_v48  ;;  %10300 = vmatmul.mubr.msk.bf16.gmra.mrb[148].mxu0 %vm11722_vm6, %v18229_v1  ;;  %v986_v48 = vrot.slane %v12861_v31, 1 }
 0x20c   :  { %8943 = vmatmul.mubr.msk.bf16.gmra.mrb[144].mxu1 %vm11713_vm5, %v12361_v21  ;;  %10303 = vmatprep.mubr.msk.bf16.mxu0 %vm11722_vm6, %v18230_v36  ;;  %v987_v21 = vrot.slane %v12864_v29, 1 }
 0x20d   :  { %2623 = vmatprep.mubr.bf16.mxu1 %v12338_v5 }
 0x20e   :  { %v1614_v2 = vpop.f32.mrb[44].mxu0 }
 0x20f   :  { %v13049_v27 = vadd.f32 %v12919_v35, %v1614_v2  ;;  %v13051_v61 = vpop.f32.mrb[40].mxu1  ;;  %v1616_v62 = vpop.f32.mrb[45].mxu0  ;;  %v18233_v35 = vld [vmem:[#allocation57_spill] sm:$0xff]  ;;  %v18234_v2 = vld [vmem:[#allocation14_spill] sm:$0xff] }
 0x210   :  { %v13053_v39 = vpop.f32.mrb[41].mxu1  ;;  %v1617_v16 = vpop.f32.mrb[46].mxu0 }
 0x211   :  { %18231 = vst [vmem:[#allocation113_spill] sm:$0xff] %v13049_v27  ;;  %v13058_v42 = vadd.f32 %v12925_v30, %v1617_v16  ;;  %v13060_v36 = vpop.f32.mrb[42].mxu1  ;;  %v1619_v5 = vpop.f32.mrb[47].mxu0  ;;  %v988_v16 = vsel %vm940_vm2, %v986_v48, %v987_v21 }
 0x212   :  { %v13062_v1 = vpop.f32.mrb[43].mxu1  ;;  %v13080_v62 = vpack.c.bf16 %v987_v21, %v988_v16  ;;  %v18237_v21 = vld [vmem:[#allocation16_spill] sm:$0xff] }
 0x213   :  { %18232 = vst [vmem:[#allocation114_spill] sm:$0xff] %v13058_v42  ;;  %10304 = vmatmul.mubr.msk.bf16.gmra.mrb[152].mxu0 %vm11722_vm6, %v18233_v35 }
 0x214   :  { %8947 = vmatmul.mubr.msk.bf16.gmra.mrb[148].mxu1 %vm11713_vm5, %v12366_v28  ;;  %10307 = vmatprep.mubr.msk.bf16.mxu0 %vm11722_vm6, %v18234_v2 }
 0x215   :  { %2631 = vmatprep.mubr.bf16.mxu1 %v12350_v26 }
 0x216   :  { %v1622_v30 = vpop.f32.mrb[48].mxu0 }
 0x217   :  { %v13076_v5 = vadd.f32 %v12950_v0, %v1622_v30  ;;  %v13078_v31 = vpop.f32.mrb[44].mxu1  ;;  %v1624_v29 = vpop.f32.mrb[49].mxu0 }
 0x218   :  { %v13082_v42 = vpop.f32.mrb[45].mxu1  ;;  %v1625_v28 = vpop.f32.mrb[50].mxu0 }
 0x219   :  { %18235 = vst [vmem:[#allocation115_spill] sm:$0xff] %v13076_v5  ;;  %v13085_v27 = vadd.f32 %v12956_v3, %v1625_v28  ;;  %v13087_v2 = vpop.f32.mrb[46].mxu1  ;;  %v1627_v48 = vpop.f32.mrb[51].mxu0 }
 0x21a   :  { %v13089_v35 = vpop.f32.mrb[47].mxu1 }
 0x21b   :  { %18236 = vst [vmem:[#allocation116_spill] sm:$0xff] %v13085_v27  ;;  %10308 = vmatmul.mubr.msk.bf16.gmra.mrb[156].mxu0 %vm11722_vm6, %v13080_v62 }
 0x21c   :  { %8951 = vmatmul.mubr.msk.bf16.gmra.mrb[152].mxu1 %vm11713_vm5, %v12374_v53  ;;  %10311 = vmatprep.mubr.msk.bf16.mxu0 %vm11722_vm6, %v18237_v21  ;;  %v18240_v21 = vld [vmem:[#allocation61_spill] sm:$0xff] }
 0x21d   :  { %2639 = vmatprep.mubr.bf16.mxu1 %v12359_v12 }
 0x21e   :  { %v1630_v28 = vpop.f32.mrb[52].mxu0 }
 0x21f   :  { %v13102_v3 = vadd.f32 %v12948_v14, %v1630_v28  ;;  %v13104_v0 = vpop.f32.mrb[48].mxu1  ;;  %v1632_v16 = vpop.f32.mrb[53].mxu0  ;;  %v18241_v14 = vld [vmem:[#allocation64_spill] sm:$0xff] }
 0x220   :  { %v13106_v30 = vpop.f32.mrb[49].mxu1  ;;  %v1633_v29 = vpop.f32.mrb[54].mxu0 }
 0x221   :  { %18238 = vst [vmem:[#allocation16_spill] sm:$0xff] %v13102_v3  ;;  %v13109_v48 = vadd.f32 %v12954_v6, %v1633_v29  ;;  %v13111_v53 = vpop.f32.mrb[50].mxu1  ;;  %v1635_v26 = vpop.f32.mrb[55].mxu0 }
 0x222   :  { %v13113_v27 = vpop.f32.mrb[51].mxu1 }
 0x223   :  { %18239 = vst [vmem:[#allocation117_spill] sm:$0xff] %v13109_v48  ;;  %10312 = vmatmul.mubr.msk.bf16.gmra.mrb[160].mxu0 %vm11722_vm6, %v18240_v21 }
 0x224   :  { %8955 = vmatmul.mubr.msk.bf16.gmra.mrb[156].mxu1 %vm11713_vm5, %v12382_v40  ;;  %10315 = vmatprep.mubr.msk.bf16.mxu0 %vm11722_vm6, %v18241_v14  ;;  %v18244_v14 = vld [vmem:[#allocation17_spill] sm:$0xff] }
 0x225   :  { %2647 = vmatprep.mubr.bf16.mxu1 %v12371_v50 }
 0x226   :  { %v1638_v6 = vpop.f32.mrb[56].mxu0 }
 0x227   :  { %v13126_v28 = vadd.f32 %v12978_v57, %v1638_v6  ;;  %v13128_v26 = vpop.f32.mrb[52].mxu1  ;;  %v1640_v16 = vpop.f32.mrb[57].mxu0  ;;  %v18245_v57 = vld [vmem:[#allocation18_spill] sm:$0xff] }
 0x228   :  { %v13130_v29 = vpop.f32.mrb[53].mxu1  ;;  %v1641_v12 = vpop.f32.mrb[58].mxu0 }
 0x229   :  { %18242 = vst [vmem:[#allocation61_spill] sm:$0xff] %v13126_v28  ;;  %v13133_v48 = vadd.f32 %v12984_v23, %v1641_v12  ;;  %v13135_v40 = vpop.f32.mrb[54].mxu1  ;;  %v1643_v5 = vpop.f32.mrb[59].mxu0 }
 0x22a   :  { %v13137_v3 = vpop.f32.mrb[55].mxu1 }
 0x22b   :  { %18243 = vst [vmem:[#allocation118_spill] sm:$0xff] %v13133_v48  ;;  %10316 = vmatmul.mubr.msk.bf16.gmra.mrb[164].mxu0 %vm11722_vm6, %v18244_v14 }
 0x22c   :  { %8959 = vmatmul.mubr.msk.bf16.gmra.mrb[160].mxu1 %vm11713_vm5, %v12410_v11  ;;  %10319 = vmatprep.mubr.msk.bf16.mxu0 %vm11722_vm6, %v18245_v57  ;;  %v18248_v57 = vld [vmem:[#allocation19_spill] sm:$0xff] }
 0x22d   :  { %2655 = vmatprep.mubr.bf16.mxu1 %v12380_v52 }
 0x22e   :  { %v1646_v12 = vpop.f32.mrb[60].mxu0 }
 0x22f   :  { %v13150_v23 = vadd.f32 %v12976_v49, %v1646_v12  ;;  %v13152_v5 = vpop.f32.mrb[56].mxu1  ;;  %v1648_v6 = vpop.f32.mrb[61].mxu0  ;;  %v18249_v49 = vld [vmem:[#allocation86_spill] sm:$0xff] }
 0x230   :  { %v13154_v16 = vpop.f32.mrb[57].mxu1  ;;  %v1649_v50 = vpop.f32.mrb[62].mxu0 }
 0x231   :  { %18246 = vst [vmem:[#allocation119_spill] sm:$0xff] %v13150_v23  ;;  %v13157_v48 = vadd.f32 %v12982_v32, %v1649_v50  ;;  %v13159_v11 = vpop.f32.mrb[58].mxu1  ;;  %v1651_v28 = vpop.f32.mrb[63].mxu0 }
 0x232   :  { %v13161_v14 = vpop.f32.mrb[59].mxu1 }
 0x233   :  { %18247 = vst [vmem:[#allocation120_spill] sm:$0xff] %v13157_v48  ;;  %10320 = vmatmul.mubr.msk.bf16.gmra.mrb[168].mxu0 %vm11722_vm6, %v18248_v57 }
 0x234   :  { %8963 = vmatmul.mubr.msk.bf16.gmra.mrb[164].mxu1 %vm11713_vm5, %v12424_v13  ;;  %10323 = vmatprep.mubr.msk.bf16.mxu0 %vm11722_vm6, %v18249_v49  ;;  %v18253_v49 = vld [vmem:[#allocation87_spill] sm:$0xff] }
 0x235   :  { %2663 = vmatprep.mubr.bf16.mxu1 %v18179_v54 }
 0x236   :  { %v1654_v50 = vpop.f32.mrb[64].mxu0 }
 0x237   :  { %v13174_v32 = vadd.f32 %v13004_v19, %v1654_v50  ;;  %v13176_v28 = vpop.f32.mrb[60].mxu1  ;;  %v1656_v12 = vpop.f32.mrb[65].mxu0  ;;  %v18254_v19 = vld [vmem:[#allocation90_spill] sm:$0xff] }
 0x238   :  { %v13178_v6 = vpop.f32.mrb[61].mxu1  ;;  %v1657_v52 = vpop.f32.mrb[66].mxu0 }
 0x239   :  { %18250 = vst [vmem:[#allocation121_spill] sm:$0xff] %v13174_v32  ;;  %v13181_v48 = vadd.f32 %v13011_v51, %v1657_v52  ;;  %v13183_v13 = vpop.f32.mrb[62].mxu1  ;;  %v1659_v23 = vpop.f32.mrb[67].mxu0 }
 0x23a   :  { %18252 = vst [vmem:[#allocation123_spill] sm:$0xff] %v13183_v13  ;;  %v13185_v57 = vpop.f32.mrb[63].mxu1  ;;  %v18257_v13 = vld [vmem:[#allocation91_spill] sm:$0xff] }
 0x23b   :  { %18251 = vst [vmem:[#allocation122_spill] sm:$0xff] %v13181_v48  ;;  %10324 = vmatmul.mubr.msk.bf16.gmra.mrb[172].mxu0 %vm11722_vm6, %v18253_v49 }
 0x23c   :  { %8967 = vmatmul.mubr.msk.bf16.gmra.mrb[168].mxu1 %vm11713_vm5, %v12433_v24  ;;  %10327 = vmatprep.mubr.msk.bf16.mxu0 %vm11722_vm6, %v18254_v19 }
 0x23d   :  { %2671 = vmatprep.mubr.bf16.mxu1 %v12455_v45 }
 0x23e   :  { %v1662_v51 = vpop.f32.mrb[68].mxu0 }
 0x23f   :  { %v13198_v52 = vadd.f32 %v13002_v33, %v1662_v51  ;;  %v13200_v23 = vpop.f32.mrb[64].mxu1  ;;  %v1664_v50 = vpop.f32.mrb[69].mxu0  ;;  %v18258_v33 = vld [vmem:[#allocation94_spill] sm:$0xff] }
 0x240   :  { %v2459_v12 = vpop.f32.mrb[65].mxu1  ;;  %v1665_v54 = vpop.f32.mrb[70].mxu0 }
 0x241   :  { %18255 = vst [vmem:[#allocation90_spill] sm:$0xff] %v13198_v52  ;;  %v13203_v48 = vadd.f32 %v13009_v56, %v1665_v54  ;;  %v13205_v32 = vpop.f32.mrb[66].mxu1  ;;  %v1667_v24 = vpop.f32.mrb[71].mxu0  ;;  %v18260_v12 = vld [vmem:[#allocation29_spill] sm:$0xff] }
 0x242   :  { %v2462_v49 = vpop.f32.mrb[67].mxu1  ;;  %v482_v45 = vmul.f32 %v11656_v10, %v18260_v12 }
 0x243   :  { %18256 = vst [vmem:[#allocation124_spill] sm:$0xff] %v13203_v48  ;;  %10328 = vmatmul.mubr.msk.bf16.gmra.mrb[176].mxu0 %vm11722_vm6, %v18257_v13  ;;  %v18261_v48 = vld [vmem:[#allocation30_spill] sm:$0xff] }
 0x244   :  { %8971 = vmatmul.mubr.msk.bf16.gmra.mrb[172].mxu1 %vm11713_vm5, %v12458_v59  ;;  %10331 = vmatprep.mubr.msk.bf16.mxu0 %vm11722_vm6, %v18258_v33  ;;  %v483_v59 = vmul.f32 %v11656_v10, %v18261_v48  ;;  %v552_v10 = vadd.f32 %v11673_v17, %v482_v45 }
 0x245   :  { %2679 = vmatprep.mubr.bf16.mxu1 %v12507_v22 }
 0x246   :  { %v1670_v56 = vpop.f32.mrb[72].mxu0  ;;  %v1034_v12 = vrot.slane %v552_v10, 1 }
 0x247   :  { %v13218_v54 = vadd.f32 %v13029_v43, %v1670_v56  ;;  %v13220_v24 = vpop.f32.mrb[68].mxu1  ;;  %v1672_v49 = vpop.f32.mrb[73].mxu0  ;;  %v18263_v43 = vld [vmem:[#allocation27_spill] sm:$0xff]  ;;  %v18264_v56 = vld [vmem:[#allocation97_spill] sm:$0xff] }
 0x248   :  { %v2467_v51 = vpop.f32.mrb[69].mxu1  ;;  %v1673_v50 = vpop.f32.mrb[74].mxu0 }
 0x249   :  { %18259 = vst [vmem:[#allocation125_spill] sm:$0xff] %v13218_v54  ;;  %v13227_v52 = vadd.f32 %v13036_v34, %v1673_v50  ;;  %v13229_v33 = vpop.f32.mrb[70].mxu1  ;;  %v1675_v22 = vpop.f32.mrb[75].mxu0  ;;  %v553_v34 = vadd.f32 %v11673_v17, %v483_v59  ;;  %v18267_v59 = vld [vmem:[#allocation98_spill] sm:$0xff] }
 0x24a   :  { %v2470_v13 = vpop.f32.mrb[71].mxu1 }
 0x24b   :  { %18262 = vst [vmem:[#allocation29_spill] sm:$0xff] %v13227_v52  ;;  %10332 = vmatmul.mubr.msk.bf16.gmra.mrb[180].mxu0 %vm11722_vm6, %v18263_v43 }
 0x24c   :  { %8975 = vmatmul.mubr.msk.bf16.gmra.mrb[176].mxu1 %vm11713_vm5, %v12512_v60  ;;  %10335 = vmatprep.mubr.msk.bf16.mxu0 %vm11722_vm6, %v18264_v56  ;;  %v1035_v60 = vrot.slane %v553_v34, 1 }
 0x24d   :  { %2687 = vmatprep.mubr.bf16.mxu1 %v12553_v7 }
 0x24e   :  { %v1678_v22 = vpop.f32.mrb[76].mxu0 }
 0x24f   :  { %v13244_v13 = vadd.f32 %v13027_v58, %v1678_v22  ;;  %v13246_v48 = vpop.f32.mrb[72].mxu1  ;;  %v1680_v49 = vpop.f32.mrb[77].mxu0  ;;  %v18268_v58 = vld [vmem:[#allocation101_spill] sm:$0xff]  ;;  %v1036_v22 = vsel %vm940_vm2, %v1034_v12, %v1035_v60  ;;  %v13276_v12 = vpack.c.bf16 %v553_v34, %v552_v10 }
 0x250   :  { %v2475_v51 = vpop.f32.mrb[73].mxu1  ;;  %v1681_v50 = vpop.f32.mrb[78].mxu0 }
 0x251   :  { %18265 = vst [vmem:[#allocation30_spill] sm:$0xff] %v13244_v13  ;;  %v13249_v52 = vadd.f32 %v13034_v55, %v1681_v50  ;;  %v13251_v54 = vpop.f32.mrb[74].mxu1  ;;  %v1683_v45 = vpop.f32.mrb[79].mxu0  ;;  %18269 = vst [vmem:[#allocation97_spill] sm:$0xff] %v13276_v12 }
 0x252   :  { %v2478_v17 = vpop.f32.mrb[75].mxu1  ;;  %v13269_v45 = vpack.c.bf16 %v1035_v60, %v1036_v22 }
 0x253   :  { %18266 = vst [vmem:[#allocation27_spill] sm:$0xff] %v13249_v52  ;;  %10336 = vmatmul.mubr.msk.bf16.gmra.mrb[184].mxu0 %vm11722_vm6, %v18267_v59 }
 0x254   :  { %8979 = vmatmul.mubr.msk.bf16.gmra.mrb[180].mxu1 %vm11713_vm5, %v12556_v4  ;;  %10339 = vmatprep.mubr.msk.bf16.mxu0 %vm11722_vm6, %v18268_v58  ;;  %v778_v58 = vrot.slane %v553_v34, 7 }
 0x255   :  { %2695 = vmatprep.mubr.bf16.mxu1 %v12585_v38  ;;  %v777_v38 = vrot.slane %v552_v10, 7 }
 0x256   :  { %v1686_v55 = vpop.f32.mrb[80].mxu0 }
 0x257   :  { %v13265_v49 = vadd.f32 %v13053_v39, %v1686_v55  ;;  %v13267_v51 = vpop.f32.mrb[76].mxu1  ;;  %v1688_v50 = vpop.f32.mrb[81].mxu0  ;;  %v779_v60 = vsel %vm683_vm1, %v777_v38, %v778_v58  ;;  %v4289_v58 = vld [vmem:[%s17586_s7 + $0x8] sm:$0xff] }
 0x258   :  { %v2483_v17 = vpop.f32.mrb[77].mxu1  ;;  %v1689_v7 = vpop.f32.mrb[82].mxu0 }
 0x259   :  { %v13272_v4 = vadd.f32 %v13062_v1, %v1689_v7  ;;  %v13274_v52 = vpop.f32.mrb[78].mxu1  ;;  %v1691_v13 = vpop.f32.mrb[83].mxu0 }
 0x25a   :  { %v2486_v59 = vpop.f32.mrb[79].mxu1 }
 0x25b   :  { %10340 = vmatmul.mubr.msk.bf16.gmra.mrb[188].mxu0 %vm11722_vm6, %v13269_v45  ;;  %v13294_v59 = vpack.c.bf16 %v779_v60, %v777_v38  ;;  %v18271_v38 = vld [vmem:[#allocation33_spill] sm:$0xff] }
 0x25c   :  { %8983 = vmatmul.mubr.msk.bf16.gmra.mrb[184].mxu1 %vm11713_vm5, %v12588_v41  ;;  %10359 = vmatprep.mubr.msk.bf16.mxu0 %vm11722_vm6, %v18205_v44  ;;  %v18294_v41 = vld [vmem:[#allocation14_spill] sm:$0xff] }
 0x25d   :  { %2703 = vmatprep.mubr.bf16.mxu1 %v13276_v12  ;;  %18270 = vst [vmem:[#allocation126_spill] sm:$0xff] %v13294_v59 }
 0x25e   :  { %v1694_v7 = vpop.f32.mrb[84].mxu0 }
 0x25f   :  { %v13290_v1 = vadd.f32 %v13051_v61, %v1694_v7  ;;  %v13292_v39 = vpop.f32.mrb[80].mxu1  ;;  %v1696_v10 = vpop.f32.mrb[85].mxu0  ;;  %v4288_v61 = vld [vmem:[%s17586_s7] sm:$0xff] }
 0x260   :  { %v2491_v34 = vpop.f32.mrb[81].mxu1  ;;  %v1697_v13 = vpop.f32.mrb[86].mxu0 }
 0x261   :  { %v13297_v22 = vadd.f32 %v13060_v36, %v1697_v13  ;;  %v13299_v55 = vpop.f32.mrb[82].mxu1  ;;  %v1699_v44 = vpop.f32.mrb[87].mxu0  ;;  %v10675_v13 = vpack.c.bf16 %v4289_v58, %v4288_v61  ;;  %v18274_v58 = vmov 0.0|0.0  }
 0x262   :  { %v2494_v50 = vpop.f32.mrb[83].mxu1 }
 0x263   :  { %10360 = vmatmul.mubr.msk.bf16.vlgmr.msra.gmra.mrb[192].mxu0 %vm11722_vm6, %v18206_v8 }
 0x264   :  { %8987 = vmatmul.mubr.msk.bf16.gmra.mrb[188].mxu1 %vm11713_vm5, %v13294_v59  ;;  %10363 = vmatprep.mubr.msk.bf16.mxu0 %vm11722_vm6, %v18209_v37  ;;  %v18288_v59 = vld [vmem:[#allocation55_spill] sm:$0xff] }
 0x265   :  { %3387 = vmatprep.mubr.bf16.mxu1 %v18271_v38  ;;  %v18272_v38 = vld [vmem:[#allocation38_spill] sm:$0xff] }
 0x266   :  { %v1702_v36 = vpop.f32.mrb[88].mxu0 }
 0x267   :  { %v13318_v8 = vadd.f32 %v13082_v42, %v1702_v36  ;;  %v13320_v17 = vpop.f32.mrb[84].mxu1  ;;  %v1704_v60 = vpop.f32.mrb[89].mxu0  ;;  %v4290_v42 = vld [vmem:[%s17586_s7 + $0x10] sm:$0xff] }
 0x268   :  { %v2499_v7 = vpop.f32.mrb[85].mxu1  ;;  %v1705_v10 = vpop.f32.mrb[90].mxu0  ;;  %v18273_v36 = vld [vmem:[#allocation40_spill] sm:$0xff] }
 0x269   :  { %v13323_v37 = vadd.f32 %v13089_v35, %v1705_v10  ;;  %v13325_v34 = vpop.f32.mrb[86].mxu1  ;;  %v1707_v44 = vpop.f32.mrb[91].mxu0  ;;  %v4291_v35 = vld [vmem:[%s17586_s7 + $0x18] sm:$0xff] }
 0x26a   :  { %v2502_v50 = vpop.f32.mrb[87].mxu1 }
 0x26b   :  { %10364 = vmatmul.mubr.msk.bf16.gmra.mrb[196].mxu0 %vm11722_vm6, %v18211_v46  ;;  %v10678_v46 = vpack.c.bf16 %v4291_v35, %v4290_v42 }
 0x26c   :  { %9087 = vmatmul.mubr.msk.bf16.vlgmr.msra.gmra.mrb[192].mxu1 %vm11713_vm5, %v18272_v38  ;;  %10367 = vmatprep.mubr.msk.bf16.mxu0 %vm11722_vm6, %v18215_v63 }
 0x26d   :  { %10676 = vmatpush3.bf16.msra.mxu1 %v10675_v13  ;;  %3395 = vmatprep.mubr.bf16.mxu1 %v18273_v36 }
 0x26e   :  { %v1710_v61 = vpop.f32.mrb[92].mxu0  ;;  %10677 = vmatprep.subr.bf16.mxu1 %v18274_v58 }
 0x26f   :  { %v13345_v60 = vadd.f32 %v13078_v31, %v1710_v61  ;;  %v13347_v7 = vpop.f32.mrb[88].mxu1  ;;  %v1712_v63 = vpop.f32.mrb[93].mxu0  ;;  %v18275_v31 = vld [vmem:[#allocation43_spill] sm:$0xff] }
 0x270   :  { %v2507_v10 = vpop.f32.mrb[89].mxu1  ;;  %v1713_v44 = vpop.f32.mrb[94].mxu0 }
 0x271   :  { %v13350_v50 = vadd.f32 %v13087_v2, %v1713_v44  ;;  %v13352_v38 = vpop.f32.mrb[90].mxu1  ;;  %v1715_v13 = vpop.f32.mrb[95].mxu0  ;;  %10679 = vmatpush3.bf16.msra.mxu1 %v10678_v46  ;;  %v18278_v44 = vld [vmem:[#allocation52_spill] sm:$0xff] }
 0x272   :  { %v2510_v36 = vpop.f32.mrb[91].mxu1 }
 0x273   :  { %10368 = vmatmul.mubr.msk.bf16.gmra.mrb[200].mxu0 %vm11722_vm6, %v18217_v47 }
 0x274   :  { %9091 = vmatmul.mubr.msk.bf16.gmra.mrb[196].mxu1 %vm11713_vm5, %v18164_v9  ;;  %10371 = vmatprep.mubr.msk.bf16.mxu0 %vm11722_vm6, %v18221_v18  ;;  %v18279_v18 = vld [vmem:[#allocation46_spill] sm:$0xff] }
 0x275   :  { %3403 = vmatprep.mubr.bf16.mxu1 %v18275_v31 }
 0x276   :  { %v1718_v2 = vpop.f32.mrb[96].mxu0 }
 0x277   :  { %v13365_v42 = vadd.f32 %v13106_v30, %v1718_v2  ;;  %v13367_v35 = vpop.f32.mrb[92].mxu1  ;;  %v1720_v46 = vpop.f32.mrb[97].mxu0  ;;  %v18280_v30 = vld [vmem:[#allocation47_spill] sm:$0xff] }
 0x278   :  { %v2515_v61 = vpop.f32.mrb[93].mxu1  ;;  %v1721_v58 = vpop.f32.mrb[98].mxu0 }
 0x279   :  { %18276 = vst [vmem:[#allocation33_spill] sm:$0xff] %v13365_v42  ;;  %v13370_v47 = vadd.f32 %v13113_v27, %v1721_v58  ;;  %v13372_v63 = vpop.f32.mrb[94].mxu1  ;;  %v1723_v9 = vpop.f32.mrb[99].mxu0  ;;  %v18324_v42 = vld [vmem:[#allocation104_spill] sm:$0xff] }
 0x27a   :  { %v2518_v10 = vpop.f32.mrb[95].mxu1 }
 0x27b   :  { %18277 = vst [vmem:[#allocation38_spill] sm:$0xff] %v13370_v47  ;;  %10372 = vmatmul.mubr.msk.bf16.gmra.mrb[204].mxu0 %vm11722_vm6, %v18278_v44  ;;  %v18282_v44 = vld [vmem:[#allocation7_spill] sm:$0xff] }
 0x27c   :  { %9095 = vmatmul.mubr.msk.bf16.gmra.mrb[200].mxu1 %vm11713_vm5, %v18279_v18  ;;  %10375 = vmatprep.mubr.msk.bf16.mxu0 %vm11722_vm6, %v18225_v25  ;;  %v18283_v25 = vld [vmem:[#allocation50_spill] sm:$0xff]  ;;  %v18285_v18 = vld [vmem:[#allocation51_spill] sm:$0xff] }
 0x27d   :  { %3411 = vmatprep.mubr.bf16.mxu1 %v18280_v30 }
 0x27e   :  { %v1726_v27 = vpop.f32.mrb[100].mxu0 }
 0x27f   :  { %v13385_v13 = vadd.f32 %v13104_v0, %v1726_v27  ;;  %v13387_v36 = vpop.f32.mrb[96].mxu1  ;;  %v1728_v31 = vpop.f32.mrb[101].mxu0  ;;  %v18284_v0 = vld [vmem:[#allocation9_spill] sm:$0xff] }
 0x280   :  { %v2523_v2 = vpop.f32.mrb[97].mxu1  ;;  %v1729_v46 = vpop.f32.mrb[102].mxu0 }
 0x281   :  { %v13390_v61 = vadd.f32 %v13111_v53, %v1729_v46  ;;  %v13392_v58 = vpop.f32.mrb[98].mxu1  ;;  %v1731_v9 = vpop.f32.mrb[103].mxu0 }
 0x282   :  { %v2526_v10 = vpop.f32.mrb[99].mxu1 }
 0x283   :  { %18281 = vst [vmem:[#allocation40_spill] sm:$0xff] %v13390_v61  ;;  %10376 = vmatmul.mubr.msk.bf16.gmra.mrb[208].mxu0 %vm11722_vm6, %v18282_v44 }
 0x284   :  { %9099 = vmatmul.mubr.msk.bf16.gmra.mrb[204].mxu1 %vm11713_vm5, %v18283_v25  ;;  %10379 = vmatprep.mubr.msk.bf16.mxu0 %vm11722_vm6, %v18284_v0  ;;  %v18289_v0 = vld [vmem:[#allocation6_spill] sm:$0xff] }
 0x285   :  { %3419 = vmatprep.mubr.bf16.mxu1 %v18285_v18  ;;  %v18291_v18 = vld [vmem:[#allocation8_spill] sm:$0xff] }
 0x286   :  { %v1734_v53 = vpop.f32.mrb[104].mxu0 }
 0x287   :  { %v13405_v30 = vadd.f32 %v13130_v29, %v1734_v53  ;;  %v13407_v27 = vpop.f32.mrb[100].mxu1  ;;  %v1736_v31 = vpop.f32.mrb[105].mxu0  ;;  %v18290_v29 = vld [vmem:[#allocation57_spill] sm:$0xff] }
 0x288   :  { %v2531_v2 = vpop.f32.mrb[101].mxu1  ;;  %v1737_v46 = vpop.f32.mrb[106].mxu0 }
 0x289   :  { %18286 = vst [vmem:[#allocation43_spill] sm:$0xff] %v13405_v30  ;;  %v13410_v9 = vadd.f32 %v13137_v3, %v1737_v46  ;;  %v13412_v10 = vpop.f32.mrb[102].mxu1  ;;  %v1739_v44 = vpop.f32.mrb[107].mxu0 }
 0x28a   :  { %v2534_v25 = vpop.f32.mrb[103].mxu1 }
 0x28b   :  { %18287 = vst [vmem:[#allocation52_spill] sm:$0xff] %v13410_v9  ;;  %10380 = vmatmul.mubr.msk.bf16.gmra.mrb[212].mxu0 %vm11722_vm6, %v18288_v59  ;;  %v18299_v9 = vmov 0  }
 0x28c   :  { %9103 = vmatmul.mubr.msk.bf16.gmra.mrb[208].mxu1 %vm11713_vm5, %v18289_v0  ;;  %10383 = vmatprep.mubr.msk.bf16.mxu0 %vm11722_vm6, %v18290_v29  ;;  %v18295_v29 = vld [vmem:[#allocation54_spill] sm:$0xff] }
 0x28d   :  { %3427 = vmatprep.mubr.bf16.mxu1 %v18291_v18 }
 0x28e   :  { %v1742_v3 = vpop.f32.mrb[108].mxu0 }
 0x28f   :  { %v13425_v53 = vadd.f32 %v13128_v26, %v1742_v3  ;;  %v13427_v31 = vpop.f32.mrb[104].mxu1  ;;  %v1744_v2 = vpop.f32.mrb[109].mxu0  ;;  %v18296_v26 = vld [vmem:[#allocation56_spill] sm:$0xff] }
 0x290   :  { %v2539_v46 = vpop.f32.mrb[105].mxu1  ;;  %v1745_v44 = vpop.f32.mrb[110].mxu0 }
 0x291   :  { %18292 = vst [vmem:[#allocation46_spill] sm:$0xff] %v13425_v53  ;;  %v13430_v59 = vadd.f32 %v13135_v40, %v1745_v44  ;;  %v13432_v25 = vpop.f32.mrb[106].mxu1  ;;  %v1747_v0 = vpop.f32.mrb[111].mxu0  ;;  %v18323_v53 = vld [vmem:[#allocation103_spill] sm:$0xff] }
 0x292   :  { %v2542_v12 = vpop.f32.mrb[107].mxu1 }
 0x293   :  { %18293 = vst [vmem:[#allocation47_spill] sm:$0xff] %v13430_v59  ;;  %10384 = vmatmul.mubr.msk.bf16.gmra.mrb[216].mxu0 %vm11722_vm6, %v18294_v41  ;;  %v18317_v59 = vld [vmem:[#allocation86_spill] sm:$0xff] }
 0x294   :  { %9107 = vmatmul.mubr.msk.bf16.gmra.mrb[212].mxu1 %vm11713_vm5, %v18295_v29  ;;  %10387 = vmatprep.mubr.msk.bf16.mxu0 %vm11722_vm6, %v13080_v62  ;;  %v18300_v62 = vld [vmem:[#allocation58_spill] sm:$0xff] }
 0x295   :  { %3435 = vmatprep.mubr.bf16.mxu1 %v18296_v26 }
 0x296   :  { %v1750_v40 = vpop.f32.mrb[112].mxu0 }
 0x297   :  { %v13445_v18 = vadd.f32 %v13154_v16, %v1750_v40  ;;  %v13447_v3 = vpop.f32.mrb[108].mxu1  ;;  %v1752_v12 = vpop.f32.mrb[113].mxu0  ;;  %v18301_v16 = vld [vmem:[#allocation12_spill] sm:$0xff] }
 0x298   :  { %v2547_v2 = vpop.f32.mrb[109].mxu1  ;;  %v1753_v46 = vpop.f32.mrb[114].mxu0 }
 0x299   :  { %18297 = vst [vmem:[#allocation7_spill] sm:$0xff] %v13445_v18  ;;  %v13450_v41 = vadd.f32 %v13161_v14, %v1753_v46  ;;  %v13452_v44 = vpop.f32.mrb[110].mxu1  ;;  %v1755_v0 = vpop.f32.mrb[115].mxu0  ;;  %v18304_v18 = vld [vmem:[#allocation64_spill] sm:$0xff] }
 0x29a   :  { %v2550_v29 = vpop.f32.mrb[111].mxu1 }
 0x29b   :  { %18298 = vst [vmem:[#allocation50_spill] sm:$0xff] %v13450_v41  ;;  %10388 = vmatmul.mubr.bf16.gmra.mrb[220].mxu0 %v18299_v9 }
 0x29c   :  { %9111 = vmatmul.mubr.msk.bf16.gmra.mrb[216].mxu1 %vm11713_vm5, %v18300_v62  ;;  %10391 = vmatprep.mubr.msk.bf16.mxu0 %vm11722_vm6, %v18240_v21  ;;  %v18305_v21 = vld [vmem:[#allocation59_spill] sm:$0xff] }
 0x29d   :  { %3443 = vmatprep.mubr.bf16.mxu1 %v18301_v16  ;;  %v18307_v16 = vld [vmem:[#allocation13_spill] sm:$0xff] }
 0x29e   :  { %v1758_v26 = vpop.f32.mrb[116].mxu0 }
 0x29f   :  { %v13463_v14 = vadd.f32 %v13152_v5, %v1758_v26  ;;  %v13465_v40 = vpop.f32.mrb[112].mxu1  ;;  %v1760_v12 = vpop.f32.mrb[117].mxu0  ;;  %v18306_v5 = vld [vmem:[#allocation17_spill] sm:$0xff] }
 0x2a0   :  { %v2555_v2 = vpop.f32.mrb[113].mxu1  ;;  %v1761_v46 = vpop.f32.mrb[118].mxu0 }
 0x2a1   :  { %18302 = vst [vmem:[#allocation9_spill] sm:$0xff] %v13463_v14  ;;  %v13468_v0 = vadd.f32 %v13159_v11, %v1761_v46  ;;  %v13470_v29 = vpop.f32.mrb[114].mxu1  ;;  %v1763_v62 = vpop.f32.mrb[119].mxu0  ;;  %v18310_v14 = vld [vmem:[#allocation18_spill] sm:$0xff] }
 0x2a2   :  { %v2558_v41 = vpop.f32.mrb[115].mxu1 }
 0x2a3   :  { %18303 = vst [vmem:[#allocation51_spill] sm:$0xff] %v13468_v0  ;;  %10392 = vmatmul.mubr.msk.bf16.gmra.mrb[224].mxu0 %vm11722_vm6, %v18304_v18 }
 0x2a4   :  { %9115 = vmatmul.mubr.msk.bf16.gmra.mrb[220].mxu1 %vm11713_vm5, %v18305_v21  ;;  %10395 = vmatprep.mubr.msk.bf16.mxu0 %vm11722_vm6, %v18306_v5  ;;  %v18311_v5 = vld [vmem:[#allocation15_spill] sm:$0xff] }
 0x2a5   :  { %3451 = vmatprep.mubr.bf16.mxu1 %v18307_v16  ;;  %v18313_v16 = vld [vmem:[#allocation60_spill] sm:$0xff] }
 0x2a6   :  { %v1766_v11 = vpop.f32.mrb[120].mxu0 }
 0x2a7   :  { %v13483_v26 = vadd.f32 %v13178_v6, %v1766_v11  ;;  %v13485_v12 = vpop.f32.mrb[116].mxu1  ;;  %v1768_v41 = vpop.f32.mrb[121].mxu0  ;;  %v18312_v6 = vld [vmem:[#allocation19_spill] sm:$0xff] }
 0x2a8   :  { %v2563_v2 = vpop.f32.mrb[117].mxu1  ;;  %v1769_v46 = vpop.f32.mrb[122].mxu0 }
 0x2a9   :  { %18308 = vst [vmem:[#allocation55_spill] sm:$0xff] %v13483_v26  ;;  %v13488_v18 = vadd.f32 %v13185_v57, %v1769_v46  ;;  %v13490_v62 = vpop.f32.mrb[118].mxu1  ;;  %v1771_v21 = vpop.f32.mrb[123].mxu0 }
 0x2aa   :  { %v2566_v0 = vpop.f32.mrb[119].mxu1 }
 0x2ab   :  { %18309 = vst [vmem:[#allocation6_spill] sm:$0xff] %v13488_v18  ;;  %10396 = vmatmul.mubr.msk.bf16.gmra.mrb[228].mxu0 %vm11722_vm6, %v18310_v14  ;;  %v18315_v14 = vld [vmem:[#allocation123_spill] sm:$0xff] }
 0x2ac   :  { %9119 = vmatmul.mubr.msk.bf16.gmra.mrb[224].mxu1 %vm11713_vm5, %v18311_v5  ;;  %10399 = vmatprep.mubr.msk.bf16.mxu0 %vm11722_vm6, %v18312_v6  ;;  %v18318_v6 = vld [vmem:[#allocation62_spill] sm:$0xff] }
 0x2ad   :  { %3459 = vmatprep.mubr.bf16.mxu1 %v18313_v16  ;;  %v18319_v16 = vld [vmem:[#allocation87_spill] sm:$0xff] }
 0x2ae   :  { %v1774_v57 = vpop.f32.mrb[124].mxu0 }
 0x2af   :  { %v13503_v11 = vadd.f32 %v13176_v28, %v1774_v57  ;;  %v13505_v41 = vpop.f32.mrb[120].mxu1  ;;  %v1776_v0 = vpop.f32.mrb[125].mxu0  ;;  %v13518_v28 = vld [vmem:[%s17583_s4] ss:$0 sm:$0xff]  ;;  %v18320_v57 = vld [vmem:[#allocation63_spill] sm:$0xff] }
 0x2b0   :  { %v2571_v2 = vpop.f32.mrb[121].mxu1  ;;  %v1777_v46 = vpop.f32.mrb[126].mxu0  ;;  %v18321_v0 = vld [vmem:[#allocation102_spill] sm:$0xff] }
 0x2b1   :  { %18314 = vst [vmem:[#allocation57_spill] sm:$0xff] %v13503_v11  ;;  %v13508_v21 = vadd.f32 %v18315_v14, %v1777_v46  ;;  %v13510_v18 = vpop.f32.mrb[122].mxu1  ;;  %v1779_v5 = vpop.f32.mrb[127].mxu0  ;;  %v2072_v2 = vadd.f32 %v13518_v28, %v18321_v0 }
 0x2b2   :  { %v2574_v26 = vpop.f32.mrb[123].mxu1  ;;  %v18322_v5 = vld [vmem:[#allocation71_spill] sm:$0xff] }
 0x2b3   :  { %18316 = vst [vmem:[#allocation8_spill] sm:$0xff] %v13508_v21  ;;  %10400 = vmatmul.mubr.msk.bf16.gmra.mrb[232].mxu0 %vm11722_vm6, %v18317_v59  ;;  %v2070_v21 = vadd.f32 %v13518_v28, %v18322_v5 }
 0x2b4   :  { %9123 = vmatmul.mubr.msk.bf16.gmra.mrb[228].mxu1 %vm11713_vm5, %v18318_v6  ;;  %10403 = vmatprep.mubr.msk.bf16.mxu0 %vm11722_vm6, %v18319_v16  ;;  %v2073_v16 = vadd.f32 %v13518_v28, %v18323_v53 }
 0x2b5   :  { %3467 = vmatprep.mubr.bf16.mxu1 %v18320_v57 }
 0x2b6   :  { %v10281_v26 = vpop.f32.mrb[128].mxu0 }
 0x2b7   :  { %v13529_v59 = vpop.f32.mrb[124].mxu1  ;;  %v2755_v46 = vadd.f32 %v10281_v26, %v13220_v24  ;;  %v2746_v14 = vpop.f32.mrb[129].mxu0  ;;  %v2071_v24 = vadd.f32 %v13518_v28, %v18324_v42  ;;  %v18328_v42 = vld [vmem:[#allocation84_spill] sm:$0xff] }
 0x2b8   :  { %v2579_v11 = vpop.f32.mrb[125].mxu1  ;;  %v2747_v6 = vadd.f32 %v2746_v14, %v13200_v23  ;;  %v10282_v30 = vpop.f32.mrb[130].mxu0  ;;  %v18330_v14 = vld [vmem:[#allocation105_spill] sm:$0xff] }
 0x2b9   :  { %v13537_v57 = vadd.f32 %v2755_v46, %v2072_v2  ;;  %v13539_v47 = vpop.f32.mrb[126].mxu1  ;;  %v2758_v0 = vadd.f32 %v10282_v30, %v13229_v33  ;;  %v2749_v61 = vpop.f32.mrb[131].mxu0  ;;  %v18326_v2 = vld [vmem:[#allocation65_spill] sm:$0xff]  ;;  %v18327_v33 = vld [vmem:[#allocation91_spill] sm:$0xff] }
 0x2ba   :  { %v13544_v26 = vadd.f32 %v2747_v6, %v2070_v21  ;;  %v2582_v5 = vpop.f32.mrb[127].mxu1  ;;  %v2750_v11 = vadd.f32 %v2749_v61, %v13205_v32  ;;  %v18329_v32 = vld [vmem:[#allocation107_spill] sm:$0xff]  ;;  %v2074_v6 = vadd.f32 %v13518_v28, %v18330_v14 }
 0x2bb   :  { %v13547_v23 = vadd.f32 %v2758_v0, %v2073_v16  ;;  %10404 = vmatmul.mubr.msk.bf16.gmra.mrb[236].mxu0 %vm11722_vm6, %v18254_v19  ;;  %v2076_v61 = vadd.f32 %v13518_v28, %v18329_v32  ;;  %v18331_v5 = vld [vmem:[#allocation108_spill] sm:$0xff] }
 0x2bc   :  { %v13552_v53 = vadd.f32 %v2750_v11, %v2071_v24  ;;  %9127 = vmatmul.mubr.msk.bf16.gmra.mrb[232].mxu1 %vm11713_vm5, %v18326_v2  ;;  %10407 = vmatprep.mubr.msk.bf16.mxu0 %vm11722_vm6, %v18327_v33  ;;  %v2077_v11 = vadd.f32 %v13518_v28, %v18331_v5 }
 0x2bd   :  { %18325 = vst [vmem:[#allocation14_spill] sm:$0xff] %v13547_v23  ;;  %3475 = vmatprep.mubr.bf16.mxu1 %v18328_v42  ;;  %v18332_v23 = vld [vmem:[#allocation106_spill] sm:$0xff] }
 0x2be   :  { %v10285_v30 = vpop.f32.mrb[132].mxu0 }
 0x2bf   :  { %v13563_v21 = vpop.f32.mrb[128].mxu1  ;;  %v2771_v19 = vadd.f32 %v10285_v30, %v13267_v51  ;;  %v2762_v46 = vpop.f32.mrb[133].mxu0  ;;  %v2075_v51 = vadd.f32 %v13518_v28, %v18332_v23 }
 0x2c0   :  { %v2587_v16 = vpop.f32.mrb[129].mxu1  ;;  %v2763_v0 = vadd.f32 %v2762_v46, %v13246_v48  ;;  %v10286_v24 = vpop.f32.mrb[134].mxu0  ;;  %v18334_v46 = vld [vmem:[#allocation94_spill] sm:$0xff] }
 0x2c1   :  { %v13571_v2 = vadd.f32 %v2771_v19, %v2076_v61  ;;  %v13573_v33 = vpop.f32.mrb[130].mxu1  ;;  %v2774_v42 = vadd.f32 %v10286_v24, %v13274_v52  ;;  %v2765_v32 = vpop.f32.mrb[135].mxu0  ;;  %v18335_v19 = vld [vmem:[#allocation88_spill] sm:$0xff]  ;;  %v18336_v52 = vld [vmem:[#allocation89_spill] sm:$0xff] }
 0x2c2   :  { %v13578_v30 = vadd.f32 %v2763_v0, %v2074_v6  ;;  %v2590_v14 = vpop.f32.mrb[131].mxu1  ;;  %v2766_v16 = vadd.f32 %v2765_v32, %v13251_v54  ;;  %v18337_v54 = vld [vmem:[#allocation36_spill] sm:$0xff] }
 0x2c3   :  { %v13581_v48 = vadd.f32 %v2774_v42, %v2077_v11  ;;  %10408 = vmatmul.mubr.msk.bf16.gmra.mrb[240].mxu0 %vm11722_vm6, %v18334_v46  ;;  %v2080_v6 = vadd.f32 %v13518_v28, %v18337_v54  ;;  %v18338_v11 = vld [vmem:[#allocation10_spill] sm:$0xff] }
 0x2c4   :  { %v13586_v61 = vadd.f32 %v2766_v16, %v2075_v51  ;;  %9131 = vmatmul.mubr.msk.bf16.gmra.mrb[236].mxu1 %vm11713_vm5, %v18335_v19  ;;  %10411 = vmatprep.mubr.msk.bf16.mxu0 %vm11722_vm6, %v18263_v43  ;;  %v2078_v42 = vadd.f32 %v13518_v28, %v18338_v11  ;;  %v18339_v16 = vld [vmem:[#allocation111_spill] sm:$0xff] }
 0x2c5   :  { %18333 = vst [vmem:[#allocation54_spill] sm:$0xff] %v13581_v48  ;;  %3483 = vmatprep.mubr.bf16.mxu1 %v18336_v52  ;;  %v2081_v43 = vadd.f32 %v13518_v28, %v18339_v16  ;;  %v18340_v48 = vld [vmem:[#allocation11_spill] sm:$0xff]  ;;  %v18346_v16 = vld [vmem:[#allocation37_spill] sm:$0xff] }
 0x2c6   :  { %v10289_v23 = vpop.f32.mrb[136].mxu0 }
 0x2c7   :  { %v13597_v0 = vpop.f32.mrb[132].mxu1  ;;  %v2787_v24 = vadd.f32 %v10289_v23, %v13320_v17  ;;  %v2778_v5 = vpop.f32.mrb[137].mxu0  ;;  %v2079_v17 = vadd.f32 %v13518_v28, %v18340_v48  ;;  %v18344_v48 = vld [vmem:[#allocation93_spill] sm:$0xff] }
 0x2c8   :  { %v2595_v32 = vpop.f32.mrb[133].mxu1  ;;  %v2779_v51 = vadd.f32 %v2778_v5, %v13292_v39  ;;  %v10290_v14 = vpop.f32.mrb[138].mxu0 }
 0x2c9   :  { %v13605_v46 = vadd.f32 %v2787_v24, %v2080_v6  ;;  %v13607_v19 = vpop.f32.mrb[134].mxu1  ;;  %v2790_v52 = vadd.f32 %v10290_v14, %v13325_v34  ;;  %v2781_v54 = vpop.f32.mrb[139].mxu0  ;;  %v18342_v24 = vld [vmem:[#allocation92_spill] sm:$0xff]  ;;  %v18343_v34 = vld [vmem:[#allocation98_spill] sm:$0xff] }
 0x2ca   :  { %v13612_v23 = vadd.f32 %v2779_v51, %v2078_v42  ;;  %v2598_v11 = vpop.f32.mrb[135].mxu1  ;;  %v2782_v32 = vadd.f32 %v2781_v54, %v13299_v55  ;;  %v18345_v55 = vld [vmem:[#allocation41_spill] sm:$0xff] }
 0x2cb   :  { %v13615_v39 = vadd.f32 %v2790_v52, %v2081_v43  ;;  %10412 = vmatmul.mubr.msk.bf16.gmra.mrb[244].mxu0 %vm11722_vm6, %v18264_v56  ;;  %v2084_v42 = vadd.f32 %v13518_v28, %v18345_v55  ;;  %v2082_v43 = vadd.f32 %v13518_v28, %v18346_v16  ;;  %v18347_v11 = vld [vmem:[#allocation66_spill] sm:$0xff] }
 0x2cc   :  { %v13620_v6 = vadd.f32 %v2782_v32, %v2079_v17  ;;  %9135 = vmatmul.mubr.msk.bf16.gmra.mrb[240].mxu1 %vm11713_vm5, %v18342_v24  ;;  %10415 = vmatprep.mubr.msk.bf16.mxu0 %vm11722_vm6, %v18343_v34  ;;  %v2085_v32 = vadd.f32 %v13518_v28, %v18347_v11 }
 0x2cd   :  { %18341 = vst [vmem:[#allocation56_spill] sm:$0xff] %v13615_v39  ;;  %3491 = vmatprep.mubr.bf16.mxu1 %v18344_v48  ;;  %v18348_v39 = vld [vmem:[#allocation39_spill] sm:$0xff] }
 0x2ce   :  { %v10293_v5 = vpop.f32.mrb[140].mxu0 }
 0x2cf   :  { %v13631_v51 = vpop.f32.mrb[136].mxu1  ;;  %v2803_v56 = vadd.f32 %v10293_v5, %v13367_v35  ;;  %v2794_v14 = vpop.f32.mrb[141].mxu0  ;;  %v2083_v35 = vadd.f32 %v13518_v28, %v18348_v39 }
 0x2d0   :  { %v2603_v52 = vpop.f32.mrb[137].mxu1  ;;  %v2795_v54 = vadd.f32 %v2794_v14, %v13347_v7  ;;  %v10294_v17 = vpop.f32.mrb[142].mxu0  ;;  %v18349_v14 = vld [vmem:[#allocation101_spill] sm:$0xff] }
 0x2d1   :  { %v13639_v24 = vadd.f32 %v2803_v56, %v2084_v42  ;;  %v13641_v34 = vpop.f32.mrb[138].mxu1  ;;  %v2806_v48 = vadd.f32 %v10294_v17, %v13372_v63  ;;  %v2797_v55 = vpop.f32.mrb[143].mxu0  ;;  %v18350_v56 = vld [vmem:[#allocation96_spill] sm:$0xff]  ;;  %v18351_v63 = vld [vmem:[#allocation109_spill] sm:$0xff] }
 0x2d2   :  { %v13646_v5 = vadd.f32 %v2795_v54, %v2082_v43  ;;  %v2606_v16 = vpop.f32.mrb[139].mxu1  ;;  %v2798_v52 = vadd.f32 %v2797_v55, %v13352_v38  ;;  %v18352_v38 = vld [vmem:[#allocation48_spill] sm:$0xff] }
 0x2d3   :  { %v13649_v7 = vadd.f32 %v2806_v48, %v2085_v32  ;;  %10416 = vmatmul.mubr.msk.bf16.gmra.mrb[248].mxu0 %vm11722_vm6, %v18349_v14  ;;  %v2088_v43 = vadd.f32 %v13518_v28, %v18352_v38  ;;  %v18353_v32 = vld [vmem:[#allocation44_spill] sm:$0xff] }
 0x2d4   :  { %v13654_v42 = vadd.f32 %v2798_v52, %v2083_v35  ;;  %9139 = vmatmul.mubr.msk.bf16.gmra.mrb[244].mxu1 %vm11713_vm5, %v18350_v56  ;;  %10419 = vmatprep.mubr.msk.bf16.mxu0 %vm11722_vm6, %v13269_v45  ;;  %v2086_v48 = vadd.f32 %v13518_v28, %v18353_v32  ;;  %v18354_v52 = vld [vmem:[#allocation49_spill] sm:$0xff] }
 0x2d5   :  { %3499 = vmatprep.mubr.bf16.mxu1 %v18351_v63  ;;  %v2089_v45 = vadd.f32 %v13518_v28, %v18354_v52 }
 0x2d6   :  { %v10297_v39 = vpop.f32.mrb[144].mxu0 }
 0x2d7   :  { %v13665_v54 = vpop.f32.mrb[140].mxu1  ;;  %v2819_v17 = vadd.f32 %v10297_v39, %v13407_v27  ;;  %v2810_v11 = vpop.f32.mrb[145].mxu0  ;;  %v2087_v27 = vadd.f32 %v13518_v28, %v18356_v20 }
 0x2d8   :  { %v2611_v55 = vpop.f32.mrb[141].mxu1  ;;  %v2811_v35 = vadd.f32 %v2810_v11, %v13387_v36  ;;  %v10298_v16 = vpop.f32.mrb[146].mxu0 }
 0x2d9   :  { %v13673_v14 = vadd.f32 %v2819_v17, %v2088_v43  ;;  %v13675_v56 = vpop.f32.mrb[142].mxu1  ;;  %v2822_v63 = vadd.f32 %v10298_v16, %v13412_v10  ;;  %v2813_v38 = vpop.f32.mrb[147].mxu0  ;;  %v18358_v43 = vld [vmem:[#allocation110_spill] sm:$0xff]  ;;  %v18359_v10 = vld [vmem:[#allocation113_spill] sm:$0xff] }
 0x2da   :  { %v13680_v39 = vadd.f32 %v2811_v35, %v2086_v48  ;;  %v2614_v32 = vpop.f32.mrb[143].mxu1  ;;  %v2814_v55 = vadd.f32 %v2813_v38, %v13392_v58  ;;  %v2092_v17 = vadd.f32 %v13518_v28, %v18359_v10  ;;  %v18360_v16 = vld [vmem:[#allocation53_spill] sm:$0xff] }
 0x2db   :  { %18355 = vst [vmem:[#allocation58_spill] sm:$0xff] %v13673_v14  ;;  %v13683_v36 = vadd.f32 %v2822_v63, %v2089_v45  ;;  %10420 = vmatmul.mubr.bf16.gmra.mrb[252].mxu0 %v18299_v9  ;;  %v2090_v52 = vadd.f32 %v13518_v28, %v18360_v16  ;;  %v18363_v14 = vld [vmem:[#allocation112_spill] sm:$0xff] }
 0x2dc   :  { %v13686_v11 = vadd.f32 %v2814_v55, %v2087_v27  ;;  %9143 = vmatmul.mubr.msk.bf16.gmra.mrb[248].mxu1 %vm11713_vm5, %v18358_v43  ;;  %5791 = vmatprep.mubr.bf16.mxu0 %v18299_v9  ;;  %v18361_v27 = vld [vmem:[#allocation114_spill] sm:$0xff] }
 0x2dd   :  { %18357 = vst [vmem:[#allocation12_spill] sm:$0xff] %v13683_v36  ;;  %3507 = vmatprep.mubr.bf16.mxu1 %v18299_v9  ;;  %v2093_v32 = vadd.f32 %v13518_v28, %v18361_v27  ;;  %v18366_v27 = vld [vmem:[#allocation16_spill] sm:$0xff] }
 0x2de   :  { %v10301_v20 = vpop.f32.mrb[148].mxu0 }
 0x2df   :  { %v13695_v48 = vpop.f32.mrb[144].mxu1  ;;  %v2835_v58 = vadd.f32 %v10301_v20, %v13447_v3  ;;  %v2826_v35 = vpop.f32.mrb[149].mxu0  ;;  %v2091_v3 = vadd.f32 %v13518_v28, %v18363_v14 }
 0x2e0   :  { %v2619_v45 = vpop.f32.mrb[145].mxu1  ;;  %v2827_v63 = vadd.f32 %v2826_v35, %v13427_v31  ;;  %v10302_v38 = vpop.f32.mrb[150].mxu0 }
 0x2e1   :  { %v13703_v55 = vadd.f32 %v2835_v58, %v2092_v17  ;;  %v13705_v43 = vpop.f32.mrb[146].mxu1  ;;  %v2838_v10 = vadd.f32 %v10302_v38, %v13452_v44  ;;  %v2829_v36 = vpop.f32.mrb[151].mxu0  ;;  %v18365_v17 = vld [vmem:[#allocation20_spill] sm:$0xff]  ;;  %v2096_v44 = vadd.f32 %v13518_v28, %v18366_v27 }
 0x2e2   :  { %v13710_v20 = vadd.f32 %v2827_v63, %v2090_v52  ;;  %v2622_v16 = vpop.f32.mrb[147].mxu1  ;;  %v2830_v45 = vadd.f32 %v2829_v36, %v13432_v25  ;;  %v18367_v63 = vld [vmem:[#allocation115_spill] sm:$0xff] }
 0x2e3   :  { %18362 = vst [vmem:[#allocation64_spill] sm:$0xff] %v13703_v55  ;;  %v13713_v31 = vadd.f32 %v2838_v10, %v2093_v32  ;;  %v2094_v25 = vadd.f32 %v13518_v28, %v18367_v63  ;;  %v18370_v55 = vld [vmem:[#allocation116_spill] sm:$0xff] }
 0x2e4   :  { %v13715_v35 = vadd.f32 %v2830_v45, %v2091_v3  ;;  %3508 = vmatmul.mubr.bf16.gmra.mrb[252].mxu1 %v18299_v9  ;;  %v18368_v3 = vld [vmem:[#allocation117_spill] sm:$0xff] }
 0x2e5   :  { %18364 = vst [vmem:[#allocation59_spill] sm:$0xff] %v13713_v31  ;;  %3515 = vmatprep.mubr.bf16.mxu1 %v18365_v17  ;;  %v2097_v16 = vadd.f32 %v13518_v28, %v18368_v3  ;;  %v18372_v3 = vld [vmem:[#allocation21_spill] sm:$0xff] }
 0x2e6   :  { %v10305_v58 = vpop.f32.mrb[152].mxu0 }
 0x2e7   :  { %v13721_v38 = vpop.f32.mrb[148].mxu1  ;;  %v2851_v14 = vadd.f32 %v10305_v58, %v13485_v12  ;;  %v2842_v52 = vpop.f32.mrb[153].mxu0  ;;  %v2095_v12 = vadd.f32 %v13518_v28, %v18370_v55 }
 0x2e8   :  { %v2627_v36 = vpop.f32.mrb[149].mxu1  ;;  %v2843_v32 = vadd.f32 %v2842_v52, %v13465_v40  ;;  %v10306_v10 = vpop.f32.mrb[154].mxu0 }
 0x2e9   :  { %v13729_v45 = vadd.f32 %v2851_v14, %v2096_v44  ;;  %v13731_v17 = vpop.f32.mrb[150].mxu1  ;;  %v2854_v27 = vadd.f32 %v10306_v10, %v13490_v62  ;;  %v2845_v31 = vpop.f32.mrb[155].mxu0  ;;  %v18373_v44 = vld [vmem:[#allocation67_spill] sm:$0xff] }
 0x2ea   :  { %v13736_v58 = vadd.f32 %v2843_v32, %v2094_v25  ;;  %v2630_v63 = vpop.f32.mrb[151].mxu1  ;;  %v2846_v36 = vadd.f32 %v2845_v31, %v13470_v29  ;;  %v18374_v14 = vld [vmem:[#allocation119_spill] sm:$0xff]  ;;  %v18375_v29 = vld [vmem:[#allocation61_spill] sm:$0xff] }
 0x2eb   :  { %18369 = vst [vmem:[#allocation17_spill] sm:$0xff] %v13729_v45  ;;  %v13739_v40 = vadd.f32 %v2854_v27, %v2097_v16  ;;  %v2100_v10 = vadd.f32 %v13518_v28, %v18374_v14  ;;  %v2098_v31 = vadd.f32 %v13518_v28, %v18375_v29  ;;  %v18376_v63 = vld [vmem:[#allocation120_spill] sm:$0xff]  ;;  %v18378_v45 = vld [vmem:[#allocation118_spill] sm:$0xff] }
 0x2ec   :  { %v13741_v52 = vadd.f32 %v2846_v36, %v2095_v12  ;;  %9147 = vmatmul.mubr.msk.bf16.gmra.mrb[0].mxu1 %vm11713_vm5, %v18372_v3  ;;  %v2101_v36 = vadd.f32 %v13518_v28, %v18376_v63  ;;  %v18380_v63 = vld [vmem:[#allocation69_spill] sm:$0xff] }
 0x2ed   :  { %18371 = vst [vmem:[#allocation13_spill] sm:$0xff] %v13739_v40  ;;  %3523 = vmatprep.mubr.bf16.mxu1 %v18373_v44 }
 0x2ee   :  { %v10309_v62 = vpop.f32.mrb[156].mxu0 }
 0x2ef   :  { %v13749_v55 = vpop.f32.mrb[152].mxu1  ;;  %v2867_v25 = vadd.f32 %v10309_v62, %v13529_v59  ;;  %v2858_v32 = vpop.f32.mrb[157].mxu0  ;;  %v2099_v59 = vadd.f32 %v13518_v28, %v18378_v45 }
 0x2f0   :  { %v2635_v16 = vpop.f32.mrb[153].mxu1  ;;  %v2859_v27 = vadd.f32 %v2858_v32, %v13505_v41  ;;  %v10310_v12 = vpop.f32.mrb[158].mxu0 }
 0x2f1   :  { %v13757_v3 = vadd.f32 %v2867_v25, %v2100_v10  ;;  %v13759_v44 = vpop.f32.mrb[154].mxu1  ;;  %v2870_v14 = vadd.f32 %v10310_v12, %v13539_v47  ;;  %v2861_v40 = vpop.f32.mrb[159].mxu0  ;;  %v18381_v10 = vld [vmem:[#allocation22_spill] sm:$0xff] }
 0x2f2   :  { %v13764_v62 = vadd.f32 %v2859_v27, %v2098_v31  ;;  %v2638_v29 = vpop.f32.mrb[155].mxu1  ;;  %v2862_v16 = vadd.f32 %v2861_v40, %v13510_v18  ;;  %v18382_v25 = vld [vmem:[#allocation90_spill] sm:$0xff]  ;;  %v18383_v18 = vld [vmem:[#allocation121_spill] sm:$0xff] }
 0x2f3   :  { %18377 = vst [vmem:[#allocation18_spill] sm:$0xff] %v13757_v3  ;;  %v13767_v41 = vadd.f32 %v2870_v14, %v2101_v36  ;;  %v2104_v12 = vadd.f32 %v13518_v28, %v18382_v25  ;;  %v2102_v40 = vadd.f32 %v13518_v28, %v18383_v18  ;;  %v18384_v29 = vld [vmem:[#allocation124_spill] sm:$0xff]  ;;  %v18386_v3 = vld [vmem:[#allocation122_spill] sm:$0xff] }
 0x2f4   :  { %v13769_v32 = vadd.f32 %v2862_v16, %v2099_v59  ;;  %9151 = vmatmul.mubr.msk.bf16.gmra.mrb[4].mxu1 %vm11713_vm5, %v18380_v63  ;;  %v2105_v16 = vadd.f32 %v13518_v28, %v18384_v29  ;;  %v18388_v29 = vld [vmem:[#allocation73_spill] sm:$0xff] }
 0x2f5   :  { %18379 = vst [vmem:[#allocation15_spill] sm:$0xff] %v13767_v41  ;;  %3531 = vmatprep.mubr.bf16.mxu1 %v18381_v10 }
 0x2f6   :  { %v10313_v47 = vpop.f32.mrb[160].mxu0 }
 0x2f7   :  { %v13777_v45 = vpop.f32.mrb[156].mxu1  ;;  %v2883_v31 = vadd.f32 %v10313_v47, %v13597_v0  ;;  %v2874_v27 = vpop.f32.mrb[161].mxu0  ;;  %v2103_v0 = vadd.f32 %v13518_v28, %v18386_v3 }
 0x2f8   :  { %v2643_v36 = vpop.f32.mrb[157].mxu1  ;;  %v2875_v14 = vadd.f32 %v2874_v27, %v13563_v21  ;;  %v10314_v59 = vpop.f32.mrb[162].mxu0 }
 0x2f9   :  { %v13785_v63 = vadd.f32 %v2883_v31, %v2104_v12  ;;  %v13787_v10 = vpop.f32.mrb[158].mxu1  ;;  %v2886_v25 = vadd.f32 %v10314_v59, %v13607_v19  ;;  %v2877_v41 = vpop.f32.mrb[163].mxu0  ;;  %v18389_v12 = vld [vmem:[#allocation68_spill] sm:$0xff]  ;;  %v18390_v31 = vld [vmem:[#allocation30_spill] sm:$0xff] }
 0x2fa   :  { %v13792_v47 = vadd.f32 %v2875_v14, %v2102_v40  ;;  %v2646_v18 = vpop.f32.mrb[159].mxu1  ;;  %v2878_v36 = vadd.f32 %v2877_v41, %v13573_v33  ;;  %v2108_v59 = vadd.f32 %v13518_v28, %v18390_v31  ;;  %v18391_v33 = vld [vmem:[#allocation125_spill] sm:$0xff] }
 0x2fb   :  { %18385 = vst [vmem:[#allocation19_spill] sm:$0xff] %v13785_v63  ;;  %v13795_v21 = vadd.f32 %v2886_v25, %v2105_v16  ;;  %v2106_v41 = vadd.f32 %v13518_v28, %v18391_v33  ;;  %v18392_v18 = vld [vmem:[#allocation27_spill] sm:$0xff]  ;;  %v18393_v63 = vld [vmem:[#allocation29_spill] sm:$0xff] }
 0x2fc   :  { %v13797_v27 = vadd.f32 %v2878_v36, %v2103_v0  ;;  %9155 = vmatmul.mubr.msk.bf16.gmra.mrb[8].mxu1 %vm11713_vm5, %v18388_v29  ;;  %v2109_v36 = vadd.f32 %v13518_v28, %v18392_v18  ;;  %v18394_v18 = vld [vmem:[#allocation75_spill] sm:$0xff] }
 0x2fd   :  { %18387 = vst [vmem:[#allocation60_spill] sm:$0xff] %v13795_v21  ;;  %3539 = vmatprep.mubr.bf16.mxu1 %v18389_v12 }
 0x2fe   :  { %v10317_v19 = vpop.f32.mrb[164].mxu0 }
 0x2ff   :  { %v13805_v3 = vpop.f32.mrb[160].mxu1  ;;  %v2899_v40 = vadd.f32 %v10317_v19, %v13665_v54  ;;  %v2890_v14 = vpop.f32.mrb[165].mxu0  ;;  %v2107_v54 = vadd.f32 %v13518_v28, %v18393_v63 }
 0x300   :  { %v2651_v16 = vpop.f32.mrb[161].mxu1  ;;  %v2891_v25 = vadd.f32 %v2890_v14, %v13631_v51  ;;  %v10318_v0 = vpop.f32.mrb[166].mxu0 }
 0x301   :  { %v13813_v29 = vadd.f32 %v2899_v40, %v2108_v59  ;;  %v13815_v12 = vpop.f32.mrb[162].mxu1  ;;  %v2902_v31 = vadd.f32 %v10318_v0, %v13675_v56  ;;  %v2893_v21 = vpop.f32.mrb[167].mxu0  ;;  %v18395_v59 = vld [vmem:[#allocation70_spill] sm:$0xff]  ;;  %v2112_v40 = vadd.f32 %v13518_v28, %v13290_v1 }
 0x302   :  { %v13820_v19 = vadd.f32 %v2891_v25, %v2106_v41  ;;  %v2654_v33 = vpop.f32.mrb[163].mxu1  ;;  %v2894_v16 = vadd.f32 %v2893_v21, %v13641_v34  ;;  %v2110_v34 = vadd.f32 %v13518_v28, %v13265_v49 }
 0x303   :  { %v13823_v51 = vadd.f32 %v2902_v31, %v2109_v36  ;;  %v2113_v31 = vadd.f32 %v13518_v28, %v13297_v22  ;;  %v18397_v22 = vld [vmem:[#allocation72_spill] sm:$0xff] }
 0x304   :  { %v13825_v14 = vadd.f32 %v2894_v16, %v2107_v54  ;;  %9159 = vmatmul.mubr.msk.bf16.gmra.mrb[12].mxu1 %vm11713_vm5, %v18394_v18 }
 0x305   :  { %3547 = vmatprep.mubr.bf16.mxu1 %v18395_v59 }
 0x306   :  { %v10321_v56 = vpop.f32.mrb[168].mxu0 }
 0x307   :  { %v2657_v63 = vpop.f32.mrb[164].mxu1  ;;  %v2915_v41 = vadd.f32 %v10321_v56, %v13721_v38  ;;  %v2906_v25 = vpop.f32.mrb[169].mxu0  ;;  %v2111_v38 = vadd.f32 %v13518_v28, %v13272_v4 }
 0x308   :  { %v2659_v21 = vpop.f32.mrb[165].mxu1  ;;  %v2907_v0 = vadd.f32 %v2906_v25, %v13695_v48  ;;  %v10322_v36 = vpop.f32.mrb[170].mxu0  ;;  %v18396_v25 = vld [vmem:[#allocation76_spill] sm:$0xff] }
 0x309   :  { %v13839_v54 = vadd.f32 %v2915_v41, %v2112_v40  ;;  %v2660_v33 = vpop.f32.mrb[166].mxu1  ;;  %v2918_v16 = vadd.f32 %v10322_v36, %v13731_v17  ;;  %v2909_v1 = vpop.f32.mrb[171].mxu0  ;;  %v2116_v40 = vadd.f32 %v13518_v28, %v13345_v60 }
 0x30a   :  { %v13844_v18 = vadd.f32 %v2907_v0, %v2110_v34  ;;  %v2662_v59 = vpop.f32.mrb[167].mxu1  ;;  %v2910_v49 = vadd.f32 %v2909_v1, %v13705_v43  ;;  %v2114_v43 = vadd.f32 %v13518_v28, %v13318_v8 }
 0x30b   :  { %v13847_v56 = vadd.f32 %v2918_v16, %v2113_v31  ;;  %v2117_v31 = vadd.f32 %v13518_v28, %v13350_v50  ;;  %v18399_v50 = vld [vmem:[#allocation74_spill] sm:$0xff] }
 0x30c   :  { %v13849_v48 = vadd.f32 %v2910_v49, %v2111_v38  ;;  %9163 = vmatmul.mubr.msk.bf16.gmra.mrb[16].mxu1 %vm11713_vm5, %v18396_v25 }
 0x30d   :  { %3555 = vmatprep.mubr.bf16.mxu1 %v18397_v22  ;;  %v18398_v22 = vld [vmem:[#allocation78_spill] sm:$0xff] }
 0x30e   :  { %v10325_v17 = vpop.f32.mrb[172].mxu0 }
 0x30f   :  { %v2665_v4 = vpop.f32.mrb[168].mxu1  ;;  %v2931_v41 = vadd.f32 %v10325_v17, %v13777_v45  ;;  %v2922_v34 = vpop.f32.mrb[173].mxu0  ;;  %v2115_v45 = vadd.f32 %v13518_v28, %v13323_v37  ;;  %v2120_v17 = vadd.f32 %v13518_v28, %v13385_v13 }
 0x310   :  { %v2667_v21 = vpop.f32.mrb[169].mxu1  ;;  %v2923_v0 = vadd.f32 %v2922_v34, %v13749_v55  ;;  %v10326_v36 = vpop.f32.mrb[174].mxu0  ;;  %v18400_v34 = vld [vmem:[#allocation33_spill] sm:$0xff] }
 0x311   :  { %v13863_v16 = vadd.f32 %v2931_v41, %v2116_v40  ;;  %v2668_v1 = vpop.f32.mrb[170].mxu1  ;;  %v2934_v38 = vadd.f32 %v10326_v36, %v13787_v10  ;;  %v2925_v60 = vpop.f32.mrb[175].mxu0  ;;  %v18401_v36 = vld [vmem:[#allocation40_spill] sm:$0xff] }
 0x312   :  { %v13868_v59 = vadd.f32 %v2923_v0, %v2114_v43  ;;  %v2670_v49 = vpop.f32.mrb[171].mxu1  ;;  %v2926_v8 = vadd.f32 %v2925_v60, %v13759_v44  ;;  %v2118_v44 = vadd.f32 %v13518_v28, %v18400_v34 }
 0x313   :  { %v13871_v25 = vadd.f32 %v2934_v38, %v2117_v31  ;;  %v2121_v31 = vadd.f32 %v13518_v28, %v18401_v36 }
 0x314   :  { %v13873_v55 = vadd.f32 %v2926_v8, %v2115_v45  ;;  %9167 = vmatmul.mubr.msk.bf16.gmra.mrb[20].mxu1 %vm11713_vm5, %v18398_v22  ;;  %v18403_v8 = vld [vmem:[#allocation38_spill] sm:$0xff] }
 0x315   :  { %3563 = vmatprep.mubr.bf16.mxu1 %v18399_v50  ;;  %v2119_v13 = vadd.f32 %v13518_v28, %v18403_v8 }
 0x316   :  { %v10329_v10 = vpop.f32.mrb[176].mxu0 }
 0x317   :  { %v2673_v37 = vpop.f32.mrb[172].mxu1  ;;  %v2947_v40 = vadd.f32 %v10329_v10, %v2657_v63  ;;  %v2938_v41 = vpop.f32.mrb[177].mxu0 }
 0x318   :  { %v2675_v43 = vpop.f32.mrb[173].mxu1  ;;  %v2939_v21 = vadd.f32 %v2938_v41, %v13805_v3  ;;  %v10330_v0 = vpop.f32.mrb[178].mxu0  ;;  %v18405_v41 = vld [vmem:[#allocation80_spill] sm:$0xff] }
 0x319   :  { %v13886_v38 = vadd.f32 %v2947_v40, %v2120_v17  ;;  %v2676_v60 = vpop.f32.mrb[174].mxu1  ;;  %v2950_v45 = vadd.f32 %v10330_v0, %v2660_v33  ;;  %v2941_v49 = vpop.f32.mrb[179].mxu0  ;;  %v18406_v17 = vld [vmem:[#allocation77_spill] sm:$0xff]  ;;  %v18407_v40 = vld [vmem:[#allocation46_spill] sm:$0xff]  ;;  %v18408_v0 = vld [vmem:[#allocation43_spill] sm:$0xff] }
 0x31a   :  { %v13890_v63 = vadd.f32 %v2939_v21, %v2118_v44  ;;  %v2678_v22 = vpop.f32.mrb[175].mxu1  ;;  %v2942_v50 = vadd.f32 %v2941_v49, %v13815_v12  ;;  %v2124_v34 = vadd.f32 %v13518_v28, %v18407_v40  ;;  %v2122_v12 = vadd.f32 %v13518_v28, %v18408_v0  ;;  %v18409_v49 = vld [vmem:[#allocation47_spill] sm:$0xff] }
 0x31b   :  { %18402 = vst [vmem:[#allocation123_spill] sm:$0xff] %v13886_v38  ;;  %v13893_v10 = vadd.f32 %v2950_v45, %v2121_v31  ;;  %v2125_v8 = vadd.f32 %v13518_v28, %v18409_v49 }
 0x31c   :  { %v13895_v3 = vadd.f32 %v2942_v50, %v2119_v13  ;;  %9171 = vmatmul.mubr.msk.bf16.gmra.mrb[24].mxu1 %vm11713_vm5, %v18405_v41 }
 0x31d   :  { %18404 = vst [vmem:[#allocation86_spill] sm:$0xff] %v13893_v10  ;;  %3571 = vmatprep.mubr.bf16.mxu1 %v18406_v17  ;;  %v18411_v17 = vld [vmem:[#allocation52_spill] sm:$0xff] }
 0x31e   :  { %v10333_v33 = vpop.f32.mrb[180].mxu0  ;;  %v2123_v40 = vadd.f32 %v13518_v28, %v18411_v17 }
 0x31f   :  { %v2681_v43 = vpop.f32.mrb[176].mxu1  ;;  %v2963_v44 = vadd.f32 %v10333_v33, %v2673_v37  ;;  %v2954_v21 = vpop.f32.mrb[181].mxu0 }
 0x320   :  { %v2683_v36 = vpop.f32.mrb[177].mxu1  ;;  %v2955_v31 = vadd.f32 %v2954_v21, %v2665_v4  ;;  %v10334_v45 = vpop.f32.mrb[182].mxu0  ;;  %v18415_v4 = vld [vmem:[#allocation82_spill] sm:$0xff] }
 0x321   :  { %v13907_v13 = vadd.f32 %v2963_v44, %v2124_v34  ;;  %v2684_v22 = vpop.f32.mrb[178].mxu1  ;;  %v2966_v50 = vadd.f32 %v10334_v45, %v2676_v60  ;;  %v2957_v41 = vpop.f32.mrb[183].mxu0  ;;  %v18416_v34 = vld [vmem:[#allocation79_spill] sm:$0xff] }
 0x322   :  { %v13911_v10 = vadd.f32 %v2955_v31, %v2122_v12  ;;  %v2686_v37 = vpop.f32.mrb[179].mxu1  ;;  %v2958_v33 = vadd.f32 %v2957_v41, %v2668_v1  ;;  %v18417_v36 = vld [vmem:[#allocation7_spill] sm:$0xff]  ;;  %v18418_v12 = vld [vmem:[#allocation9_spill] sm:$0xff]  ;;  %v18419_v41 = vld [vmem:[#allocation50_spill] sm:$0xff] }
 0x323   :  { %18410 = vst [vmem:[#allocation62_spill] sm:$0xff] %v13907_v13  ;;  %v13913_v38 = vadd.f32 %v2966_v50, %v2125_v8  ;;  %v2126_v45 = vadd.f32 %v13518_v28, %v18417_v36  ;;  %v2128_v31 = vadd.f32 %v13518_v28, %v18418_v12  ;;  %v2127_v17 = vadd.f32 %v13518_v28, %v18419_v41 }
 0x324   :  { %18412 = vst [vmem:[#allocation87_spill] sm:$0xff] %v13911_v10  ;;  %v13915_v0 = vadd.f32 %v2958_v33, %v2123_v40  ;;  %9175 = vmatmul.mubr.msk.bf16.gmra.mrb[28].mxu1 %vm11713_vm5, %v18415_v4  ;;  %v18420_v40 = vld [vmem:[#allocation51_spill] sm:$0xff] }
 0x325   :  { %18413 = vst [vmem:[#allocation63_spill] sm:$0xff] %v13913_v38  ;;  %3579 = vmatprep.mubr.bf16.mxu1 %v18416_v34  ;;  %v2129_v37 = vadd.f32 %v13518_v28, %v18420_v40  ;;  %v18428_v40 = vld [vmem:[#allocation6_spill] sm:$0xff] }
 0x326   :  { %18414 = vst [vmem:[#allocation102_spill] sm:$0xff] %v13915_v0  ;;  %v10337_v44 = vpop.f32.mrb[184].mxu0 }
 0x327   :  { %v2689_v60 = vpop.f32.mrb[180].mxu1  ;;  %v2970_v21 = vpop.f32.mrb[185].mxu0 }
 0x328   :  { %v2979_v1 = vadd.f32 %v10337_v44, %v2689_v60  ;;  %v2691_v49 = vpop.f32.mrb[181].mxu1  ;;  %v2971_v8 = vadd.f32 %v2970_v21, %v2681_v43  ;;  %v10338_v50 = vpop.f32.mrb[186].mxu0  ;;  %v18425_v43 = vld [vmem:[#allocation83_spill] sm:$0xff]  ;;  %v18426_v60 = vld [vmem:[#allocation81_spill] sm:$0xff] }
 0x329   :  { %v2692_v33 = vpop.f32.mrb[182].mxu1  ;;  %v2973_v4 = vpop.f32.mrb[187].mxu0 }
 0x32a   :  { %v13929_v34 = vadd.f32 %v2979_v1, %v2128_v31  ;;  %v13931_v38 = vadd.f32 %v2971_v8, %v2126_v45  ;;  %v2982_v36 = vadd.f32 %v10338_v50, %v2692_v33  ;;  %v2694_v13 = vpop.f32.mrb[183].mxu1  ;;  %v2974_v0 = vadd.f32 %v2973_v4, %v2684_v22  ;;  %v18427_v31 = vld [vmem:[#allocation55_spill] sm:$0xff] }
 0x32b   :  { %v2130_v45 = vadd.f32 %v13518_v28, %v18427_v31  ;;  %v18433_v31 = vld [vmem:[#allocation57_spill] sm:$0xff] }
 0x32c   :  { %18421 = vst [vmem:[#allocation71_spill] sm:$0xff] %v13929_v34  ;;  %18422 = vst [vmem:[#allocation103_spill] sm:$0xff] %v13931_v38  ;;  %v13933_v12 = vadd.f32 %v2982_v36, %v2129_v37  ;;  %v13935_v44 = vadd.f32 %v2974_v0, %v2127_v17  ;;  %9179 = vmatmul.mubr.msk.bf16.gmra.mrb[32].mxu1 %vm11713_vm5, %v18425_v43  ;;  %v2131_v0 = vadd.f32 %v13518_v28, %v18428_v40  ;;  %v18431_v36 = vld [vmem:[#allocation85_spill] sm:$0xff]  ;;  %v18432_v43 = vld [vmem:[#allocation23_spill] sm:$0xff] }
 0x32d   :  { %3587 = vmatprep.mubr.bf16.mxu1 %v18426_v60 }
 0x32e   :  { %18423 = vst [vmem:[#allocation104_spill] sm:$0xff] %v13933_v12  ;;  %18424 = vst [vmem:[#allocation65_spill] sm:$0xff] %v13935_v44  ;;  %v10341_v21 = vpop.f32.mrb[188].mxu0 }
 0x32f   :  { %v2697_v49 = vpop.f32.mrb[184].mxu1  ;;  %v2986_v41 = vpop.f32.mrb[189].mxu0 }
 0x330   :  { %v2699_v1 = vpop.f32.mrb[185].mxu1  ;;  %v2987_v8 = vadd.f32 %v2986_v41, %v2697_v49  ;;  %v10342_v13 = vpop.f32.mrb[190].mxu0 }
 0x331   :  { %v2700_v22 = vpop.f32.mrb[186].mxu1  ;;  %v2989_v50 = vpop.f32.mrb[191].mxu0  ;;  %v2132_v1 = vadd.f32 %v13518_v28, %v18433_v31 }
 0x332   :  { %v13945_v17 = vadd.f32 %v2987_v8, %v2130_v45  ;;  %v2702_v37 = vpop.f32.mrb[187].mxu1  ;;  %v2990_v33 = vadd.f32 %v2989_v50, %v2700_v22  ;;  %v18434_v22 = vld [vmem:[#allocation8_spill] sm:$0xff] }
 0x333   :  { %v2133_v50 = vadd.f32 %v13518_v28, %v18434_v22  ;;  %v18441_v22 = vld [vmem:[#allocation26_spill] sm:$0xff] }
 0x334   :  { %18429 = vst [vmem:[#allocation91_spill] sm:$0xff] %v13945_v17  ;;  %v13947_v4 = vadd.f32 %v2990_v33, %v2131_v0  ;;  %9183 = vmatmul.mubr.msk.bf16.gmra.mrb[36].mxu1 %vm11713_vm5, %v18431_v36  ;;  %v18438_v17 = vld [vmem:[#allocation25_spill] sm:$0xff] }
 0x335   :  { %3595 = vmatprep.mubr.bf16.mxu1 %v18432_v43  ;;  %v18437_v43 = vld [vmem:[#allocation24_spill] sm:$0xff] }
 0x336   :  { %18430 = vst [vmem:[#allocation84_spill] sm:$0xff] %v13947_v4  ;;  %v10361_v60 = vpop.f32.mrb[192].mxu0 }
 0x337   :  { %v2705_v49 = vpop.f32.mrb[188].mxu1  ;;  %v3678_v41 = vpop.f32.mrb[193].mxu0 }
 0x338   :  { %v2995_v12 = vadd.f32 %v10341_v21, %v2705_v49  ;;  %v2707_v40 = vpop.f32.mrb[189].mxu1  ;;  %v10362_v45 = vpop.f32.mrb[194].mxu0 }
 0x339   :  { %v2708_v8 = vpop.f32.mrb[190].mxu1  ;;  %v3681_v37 = vpop.f32.mrb[195].mxu0 }
 0x33a   :  { %v13957_v0 = vadd.f32 %v2995_v12, %v2132_v1  ;;  %v2998_v33 = vadd.f32 %v10342_v13, %v2708_v8  ;;  %v2710_v36 = vpop.f32.mrb[191].mxu1 }
 0x33c   :  { %18435 = vst [vmem:[#allocation107_spill] sm:$0xff] %v13957_v0  ;;  %v13959_v4 = vadd.f32 %v2998_v33, %v2133_v50  ;;  %9187 = vmatmul.mubr.msk.bf16.gmra.mrb[40].mxu1 %vm11713_vm5, %v18437_v43 }
 0x33d   :  { %3603 = vmatprep.mubr.bf16.mxu1 %v18438_v17  ;;  %v18442_v17 = vld [vmem:[#allocation28_spill] sm:$0xff] }
 0x33e   :  { %18436 = vst [vmem:[#allocation105_spill] sm:$0xff] %v13959_v4  ;;  %v10365_v21 = vpop.f32.mrb[196].mxu0 }
 0x33f   :  { %v3389_v49 = vpop.f32.mrb[192].mxu1  ;;  %v3694_v31 = vpop.f32.mrb[197].mxu0 }
 0x340   :  { %v3679_v40 = vadd.f32 %v3678_v41, %v3389_v49  ;;  %v3391_v34 = vpop.f32.mrb[193].mxu1  ;;  %v10366_v44 = vpop.f32.mrb[198].mxu0 }
 0x341   :  { %v3392_v38 = vpop.f32.mrb[194].mxu1  ;;  %v3697_v28 = vpop.f32.mrb[199].mxu0 }
 0x342   :  { %v13966_v12 = vadd.f32 %v3679_v40, %v13544_v26  ;;  %v3682_v13 = vadd.f32 %v3681_v37, %v3392_v38  ;;  %v3394_v1 = vpop.f32.mrb[195].mxu1  ;;  %v18444_v40 = vld [vmem:[#allocation14_spill] sm:$0xff] }
 0x343   :  { %v18446_v1 = vld [vmem:[#allocation95_spill] sm:$0xff] }
 0x344   :  { %18439 = vst [vmem:[#allocation108_spill] sm:$0xff] %v13966_v12  ;;  %v13969_v8 = vadd.f32 %v3682_v13, %v13552_v53  ;;  %9191 = vmatmul.mubr.msk.bf16.gmra.mrb[44].mxu1 %vm11713_vm5, %v18441_v22  ;;  %v18447_v22 = vld [vmem:[#allocation99_spill] sm:$0xff] }
 0x345   :  { %3611 = vmatprep.mubr.bf16.mxu1 %v18442_v17 }
 0x346   :  { %18440 = vst [vmem:[#allocation106_spill] sm:$0xff] %v13969_v8  ;;  %v13975_v50 = vpop.f32.mrb[200].mxu0 }
 0x347   :  { %v3397_v34 = vpop.f32.mrb[196].mxu1  ;;  %v3710_v41 = vpop.f32.mrb[201].mxu0 }
 0x348   :  { %v3687_v33 = vadd.f32 %v10361_v60, %v3397_v34  ;;  %v3399_v36 = vpop.f32.mrb[197].mxu1  ;;  %v13977_v43 = vpop.f32.mrb[202].mxu0 }
 0x349   :  { %v3400_v26 = vpop.f32.mrb[198].mxu1  ;;  %v3713_v38 = vpop.f32.mrb[203].mxu0 }
 0x34a   :  { %v13980_v37 = vadd.f32 %v3687_v33, %v13537_v57  ;;  %v3690_v53 = vadd.f32 %v10362_v45, %v3400_v26  ;;  %v3402_v49 = vpop.f32.mrb[199].mxu1 }
 0x34c   :  { %18443 = vst [vmem:[#allocation94_spill] sm:$0xff] %v13980_v37  ;;  %v13983_v13 = vadd.f32 %v3690_v53, %v18444_v40  ;;  %9195 = vmatmul.mubr.msk.bf16.gmra.mrb[48].mxu1 %vm11713_vm5, %v18446_v1  ;;  %v18450_v1 = vld [vmem:[#allocation100_spill] sm:$0xff] }
 0x34d   :  { %3619 = vmatprep.mubr.bf16.mxu1 %v18447_v22  ;;  %v18451_v22 = vld [vmem:[#allocation97_spill] sm:$0xff] }
 0x34e   :  { %18445 = vst [vmem:[#allocation88_spill] sm:$0xff] %v13983_v13  ;;  %v13989_v60 = vpop.f32.mrb[204].mxu0 }
 0x34f   :  { %v3405_v17 = vpop.f32.mrb[200].mxu1  ;;  %v13991_v34 = vpop.f32.mrb[205].mxu0 }
 0x350   :  { %v3695_v36 = vadd.f32 %v3694_v31, %v3405_v17  ;;  %v3407_v4 = vpop.f32.mrb[201].mxu1  ;;  %v13993_v57 = vpop.f32.mrb[206].mxu0 }
 0x351   :  { %v3408_v45 = vpop.f32.mrb[202].mxu1  ;;  %v13995_v33 = vpop.f32.mrb[207].mxu0 }
 0x352   :  { %v13998_v26 = vadd.f32 %v3695_v36, %v13578_v30  ;;  %v3698_v53 = vadd.f32 %v3697_v28, %v3408_v45  ;;  %v3410_v49 = vpop.f32.mrb[203].mxu1 }
 0x353   :  { %v18453_v49 = vld [vmem:[#allocation54_spill] sm:$0xff] }
 0x354   :  { %18448 = vst [vmem:[#allocation89_spill] sm:$0xff] %v13998_v26  ;;  %v14001_v40 = vadd.f32 %v3698_v53, %v13586_v61  ;;  %9199 = vmatmul.mubr.msk.bf16.gmra.mrb[52].mxu1 %vm11713_vm5, %v18450_v1 }
 0x355   :  { %3627 = vmatprep.mubr.bf16.mxu1 %v18451_v22  ;;  %v18455_v22 = vld [vmem:[#allocation126_spill] sm:$0xff] }
 0x356   :  { %18449 = vst [vmem:[#allocation36_spill] sm:$0xff] %v14001_v40  ;;  %v14007_v4 = vpop.f32.mrb[208].mxu0 }
 0x357   :  { %v3413_v31 = vpop.f32.mrb[204].mxu1  ;;  %v14009_v17 = vpop.f32.mrb[209].mxu0 }
 0x358   :  { %v3703_v0 = vadd.f32 %v10365_v21, %v3413_v31  ;;  %v3415_v13 = vpop.f32.mrb[205].mxu1  ;;  %v14011_v30 = vpop.f32.mrb[210].mxu0 }
 0x359   :  { %v3416_v28 = vpop.f32.mrb[206].mxu1  ;;  %v14013_v36 = vpop.f32.mrb[211].mxu0 }
 0x35a   :  { %v14016_v61 = vadd.f32 %v3703_v0, %v13571_v2  ;;  %v3706_v45 = vadd.f32 %v10366_v44, %v3416_v28  ;;  %v3418_v53 = vpop.f32.mrb[207].mxu1 }
 0x35c   :  { %18452 = vst [vmem:[#allocation10_spill] sm:$0xff] %v14016_v61  ;;  %v14019_v1 = vadd.f32 %v3706_v45, %v18453_v49  ;;  %9203 = vmatmul.mubr.msk.bf16.gmra.mrb[56].mxu1 %vm11713_vm5, %v18455_v22  ;;  %v10891_v22 = vmov 0.0  }
 0x35d   :  { %3635 = vmatprep.mubr.bf16.mxu1 %v18299_v9 }
 0x35e   :  { %18454 = vst [vmem:[#allocation111_spill] sm:$0xff] %v14019_v1  ;;  %v14025_v21 = vpop.f32.mrb[212].mxu0  ;;  %v18460_v1 = vld [vmem:[#allocation56_spill] sm:$0xff] }
 0x35f   :  { %v3421_v13 = vpop.f32.mrb[208].mxu1  ;;  %v14027_v31 = vpop.f32.mrb[213].mxu0 }
 0x360   :  { %v3711_v40 = vadd.f32 %v3710_v41, %v3421_v13  ;;  %v3423_v26 = vpop.f32.mrb[209].mxu1  ;;  %v14029_v2 = vpop.f32.mrb[214].mxu0 }
 0x361   :  { %v3424_v44 = vpop.f32.mrb[210].mxu1  ;;  %v14031_v0 = vpop.f32.mrb[215].mxu0 }
 0x362   :  { %v14034_v28 = vadd.f32 %v3711_v40, %v13612_v23  ;;  %v3714_v45 = vadd.f32 %v3713_v38, %v3424_v44  ;;  %v3426_v53 = vpop.f32.mrb[211].mxu1  ;;  %v4284_v41 = vpop.permute.xlu0 %4283 }
 0x364   :  { %18456 = vst [vmem:[#allocation11_spill] sm:$0xff] %v14034_v28  ;;  %v14037_v49 = vadd.f32 %v3714_v45, %v13620_v6  ;;  %3636 = vmatmul.mubr.bf16.gmra.mrb[60].mxu1 %v18299_v9 }
 0x365   :  { %10431 = vmatprep.mubr.msk.f32.mxu1 %vm10890_vm11, %v10891_v22 }
 0x366   :  { %18457 = vst [vmem:[#allocation92_spill] sm:$0xff] %v14037_v49  ;;  %v14040_v26 = vpop.f32.mrb[216].mxu0  ;;  %v18459_v49 = vld [vmem:[#allocation42_spill] sm:$0xff] }
 0x367   :  { %v3429_v13 = vpop.f32.mrb[212].mxu1  ;;  %v14042_v15 = vpop.f32.mrb[217].mxu0  ;;  %v4287_v28 = vsel %vm4286_vm12, %v18459_v49, %v4284_v41 }
 0x368   :  { %v3719_v23 = vadd.f32 %v13975_v50, %v3429_v13  ;;  %v3431_v40 = vpop.f32.mrb[213].mxu1  ;;  %v14045_v38 = vpop.f32.mrb[218].mxu0 }
 0x369   :  { %v3432_v44 = vpop.f32.mrb[214].mxu1  ;;  %v14047_v6 = vpop.f32.mrb[219].mxu0 }
 0x36a   :  { %v14050_v45 = vadd.f32 %v3719_v23, %v13605_v46  ;;  %v3722_v53 = vadd.f32 %v13977_v43, %v3432_v44  ;;  %v3434_v22 = vpop.f32.mrb[215].mxu1 }
 0x36c   :  { %18458 = vst [vmem:[#allocation98_spill] sm:$0xff] %v14050_v45  ;;  %v14055_v61 = vadd.f32 %v3722_v53, %v18460_v1  ;;  %10432 = vmatmul.mubr.msk.f32.vlgmr.msra.gmra.mrb[64].mxu1 %vm4299_vm13, %v4287_v28 }
 0x36d   :  { %10450 = vmatprep.mubr.bf16.mxu1 %v18299_v9 }
 0x36e   :  { %18461 = vst [vmem:[#allocation93_spill] sm:$0xff] %v14055_v61  ;;  %v14058_v50 = vpop.f32.mrb[220].mxu0 }
 0x36f   :  { %v3437_v13 = vpop.f32.mrb[216].mxu1  ;;  %v14060_v40 = vpop.f32.mrb[221].mxu0 }
 0x370   :  { %v3727_v37 = vadd.f32 %v13991_v34, %v3437_v13  ;;  %v3439_v46 = vpop.f32.mrb[217].mxu1  ;;  %v14063_v23 = vpop.f32.mrb[222].mxu0 }
 0x371   :  { %v3440_v43 = vpop.f32.mrb[218].mxu1  ;;  %v14065_v44 = vpop.f32.mrb[223].mxu0 }
 0x372   :  { %v14068_v49 = vadd.f32 %v3727_v37, %v13646_v5  ;;  %v3730_v1 = vadd.f32 %v13995_v33, %v3440_v43  ;;  %v3442_v28 = vpop.f32.mrb[219].mxu1 }
 0x374   :  { %18462 = vst [vmem:[#allocation41_spill] sm:$0xff] %v14068_v49  ;;  %v14072_v41 = vadd.f32 %v3730_v1, %v13654_v42 }
 0x376   :  { %18463 = vst [vmem:[#allocation37_spill] sm:$0xff] %v14072_v41  ;;  %v14074_v53 = vpop.f32.mrb[224].mxu0 }
 0x377   :  { %v3445_v22 = vpop.f32.mrb[220].mxu1  ;;  %v14076_v9 = vpop.f32.mrb[225].mxu0 }
 0x378   :  { %v3735_v34 = vadd.f32 %v13989_v60, %v3445_v22  ;;  %v3447_v13 = vpop.f32.mrb[221].mxu1  ;;  %v14079_v46 = vpop.f32.mrb[226].mxu0 }
 0x379   :  { %v3448_v61 = vpop.f32.mrb[222].mxu1  ;;  %v14081_v45 = vpop.f32.mrb[227].mxu0 }
 0x37a   :  { %v14084_v5 = vadd.f32 %v3735_v34, %v13639_v24  ;;  %v3738_v37 = vadd.f32 %v13993_v57, %v3448_v61  ;;  %v3450_v42 = vpop.f32.mrb[223].mxu1 }
 0x37c   :  { %18464 = vst [vmem:[#allocation66_spill] sm:$0xff] %v14084_v5  ;;  %v14088_v33 = vadd.f32 %v3738_v37, %v13649_v7 }
 0x37e   :  { %18465 = vst [vmem:[#allocation39_spill] sm:$0xff] %v14088_v33  ;;  %v14090_v43 = vpop.f32.mrb[228].mxu0 }
 0x37f   :  { %v3453_v1 = vpop.f32.mrb[224].mxu1  ;;  %v14092_v28 = vpop.f32.mrb[229].mxu0 }
 0x380   :  { %v3743_v60 = vadd.f32 %v14009_v17, %v3453_v1  ;;  %v3455_v22 = vpop.f32.mrb[225].mxu1  ;;  %v14095_v13 = vpop.f32.mrb[230].mxu0 }
 0x381   :  { %v3456_v41 = vpop.f32.mrb[226].mxu1  ;;  %v14097_v49 = vpop.f32.mrb[231].mxu0 }
 0x382   :  { %v14100_v24 = vadd.f32 %v3743_v60, %v13680_v39  ;;  %v3746_v57 = vadd.f32 %v14013_v36, %v3456_v41  ;;  %v3458_v7 = vpop.f32.mrb[227].mxu1  ;;  %v18468_v39 = vld [vmem:[#allocation58_spill] sm:$0xff]  ;;  %v18470_v41 = vld [vmem:[#allocation12_spill] sm:$0xff] }
 0x384   :  { %18466 = vst [vmem:[#allocation101_spill] sm:$0xff] %v14100_v24  ;;  %v14104_v61 = vadd.f32 %v3746_v57, %v13686_v11 }
 0x386   :  { %18467 = vst [vmem:[#allocation96_spill] sm:$0xff] %v14104_v61  ;;  %v14106_v34 = vpop.f32.mrb[232].mxu0 }
 0x387   :  { %v3461_v37 = vpop.f32.mrb[228].mxu1  ;;  %v14108_v42 = vpop.f32.mrb[233].mxu0 }
 0x388   :  { %v3751_v17 = vadd.f32 %v14007_v4, %v3461_v37  ;;  %v3463_v1 = vpop.f32.mrb[229].mxu1  ;;  %v14111_v22 = vpop.f32.mrb[234].mxu0 }
 0x389   :  { %v3464_v33 = vpop.f32.mrb[230].mxu1  ;;  %v14113_v5 = vpop.f32.mrb[235].mxu0 }
 0x38a   :  { %v14116_v60 = vadd.f32 %v3751_v17, %v18468_v39  ;;  %v3754_v36 = vadd.f32 %v14011_v30, %v3464_v33  ;;  %v3466_v11 = vpop.f32.mrb[231].mxu1 }
 0x38c   :  { %18469 = vst [vmem:[#allocation109_spill] sm:$0xff] %v14116_v60  ;;  %v14120_v57 = vadd.f32 %v3754_v36, %v18470_v41 }
 0x38e   :  { %18471 = vst [vmem:[#allocation48_spill] sm:$0xff] %v14120_v57  ;;  %v14122_v7 = vpop.f32.mrb[236].mxu0 }
 0x38f   :  { %v3469_v61 = vpop.f32.mrb[232].mxu1  ;;  %v14124_v24 = vpop.f32.mrb[237].mxu0 }
 0x390   :  { %v3759_v4 = vadd.f32 %v14027_v31, %v3469_v61  ;;  %v3471_v37 = vpop.f32.mrb[233].mxu1  ;;  %v14127_v1 = vpop.f32.mrb[238].mxu0 }
 0x391   :  { %v3472_v8 = vpop.f32.mrb[234].mxu1  ;;  %v14129_v12 = vpop.f32.mrb[239].mxu0 }
 0x392   :  { %v14132_v17 = vadd.f32 %v3759_v4, %v13710_v20  ;;  %v3762_v30 = vadd.f32 %v14031_v0, %v3472_v8  ;;  %v3474_v33 = vpop.f32.mrb[235].mxu1  ;;  %v18475_v20 = vld [vmem:[#allocation64_spill] sm:$0xff]  ;;  %v18477_v0 = vld [vmem:[#allocation59_spill] sm:$0xff] }
 0x394   :  { %18472 = vst [vmem:[#allocation44_spill] sm:$0xff] %v14132_v17  ;;  %v14136_v39 = vadd.f32 %v3762_v30, %v13715_v35 }
 0x396   :  { %18473 = vst [vmem:[#allocation49_spill] sm:$0xff] %v14136_v39  ;;  %v14138_v36 = vpop.f32.mrb[240].mxu0 }
 0x397   :  { %v3477_v11 = vpop.f32.mrb[236].mxu1  ;;  %v14140_v41 = vpop.f32.mrb[241].mxu0 }
 0x398   :  { %v3767_v31 = vadd.f32 %v14025_v21, %v3477_v11  ;;  %v3479_v61 = vpop.f32.mrb[237].mxu1  ;;  %v14143_v37 = vpop.f32.mrb[242].mxu0 }
 0x399   :  { %18474 = vst [vmem:[#allocation45_spill] sm:$0xff] %v14143_v37  ;;  %v3480_v57 = vpop.f32.mrb[238].mxu1  ;;  %v14145_v60 = vpop.f32.mrb[243].mxu0 }
 0x39a   :  { %v14148_v4 = vadd.f32 %v3767_v31, %v18475_v20  ;;  %v3770_v8 = vadd.f32 %v14029_v2, %v3480_v57  ;;  %v3482_v35 = vpop.f32.mrb[239].mxu1 }
 0x39c   :  { %18476 = vst [vmem:[#allocation110_spill] sm:$0xff] %v14148_v4  ;;  %v14152_v30 = vadd.f32 %v3770_v8, %v18477_v0 }
 0x39e   :  { %18478 = vst [vmem:[#allocation113_spill] sm:$0xff] %v14152_v30  ;;  %v14154_v33 = vpop.f32.mrb[244].mxu0 }
 0x39f   :  { %v3485_v39 = vpop.f32.mrb[240].mxu1  ;;  %v14156_v17 = vpop.f32.mrb[245].mxu0 }
 0x3a0   :  { %v3775_v21 = vadd.f32 %v14042_v15, %v3485_v39  ;;  %v3487_v11 = vpop.f32.mrb[241].mxu1  ;;  %v14159_v61 = vpop.f32.mrb[246].mxu0 }
 0x3a1   :  { %v3488_v10 = vpop.f32.mrb[242].mxu1  ;;  %v14161_v37 = vpop.f32.mrb[247].mxu0 }
 0x3a2   :  { %v14164_v31 = vadd.f32 %v3775_v21, %v13736_v58  ;;  %v3778_v2 = vadd.f32 %v14047_v6, %v3488_v10  ;;  %v3490_v57 = vpop.f32.mrb[243].mxu1  ;;  %v18483_v58 = vld [vmem:[#allocation17_spill] sm:$0xff] }
 0x3a3   :  { %v18485_v6 = vld [vmem:[#allocation13_spill] sm:$0xff] }
 0x3a4   :  { %18479 = vst [vmem:[#allocation53_spill] sm:$0xff] %v14164_v31  ;;  %v14168_v20 = vadd.f32 %v3778_v2, %v13741_v52 }
 0x3a6   :  { %18480 = vst [vmem:[#allocation114_spill] sm:$0xff] %v14168_v20  ;;  %v14170_v8 = vpop.f32.mrb[248].mxu0 }
 0x3a7   :  { %18481 = vst [vmem:[#allocation112_spill] sm:$0xff] %v14170_v8  ;;  %v3493_v35 = vpop.f32.mrb[244].mxu1  ;;  %v14172_v0 = vpop.f32.mrb[249].mxu0 }
 0x3a8   :  { %v3783_v15 = vadd.f32 %v14040_v26, %v3493_v35  ;;  %v3495_v39 = vpop.f32.mrb[245].mxu1  ;;  %v14175_v11 = vpop.f32.mrb[250].mxu0 }
 0x3a9   :  { %18482 = vst [vmem:[#allocation20_spill] sm:$0xff] %v14175_v11  ;;  %v3496_v30 = vpop.f32.mrb[246].mxu1  ;;  %v14177_v4 = vpop.f32.mrb[251].mxu0 }
 0x3aa   :  { %v14180_v21 = vadd.f32 %v3783_v15, %v18483_v58  ;;  %v3786_v10 = vadd.f32 %v14045_v38, %v3496_v30  ;;  %v3498_v52 = vpop.f32.mrb[247].mxu1 }
 0x3ac   :  { %18484 = vst [vmem:[#allocation16_spill] sm:$0xff] %v14180_v21  ;;  %v14184_v2 = vadd.f32 %v3786_v10, %v18485_v6 }
 0x3ae   :  { %18486 = vst [vmem:[#allocation115_spill] sm:$0xff] %v14184_v2  ;;  %v14186_v57 = vpop.f32.mrb[252].mxu0 }
 0x3af   :  { %v3501_v20 = vpop.f32.mrb[248].mxu1  ;;  %v14188_v31 = vpop.f32.mrb[253].mxu0 }
 0x3b0   :  { %v3791_v26 = vadd.f32 %v14060_v40, %v3501_v20  ;;  %v3503_v35 = vpop.f32.mrb[249].mxu1  ;;  %v14191_v39 = vpop.f32.mrb[254].mxu0  ;;  %v18488_v20 = vld [vmem:[#allocation18_spill] sm:$0xff] }
 0x3b1   :  { %18487 = vst [vmem:[#allocation117_spill] sm:$0xff] %v14191_v39  ;;  %v3504_v11 = vpop.f32.mrb[250].mxu1  ;;  %v14193_v8 = vpop.f32.mrb[255].mxu0  ;;  %v18489_v39 = vld [vmem:[#allocation15_spill] sm:$0xff] }
 0x3b2   :  { %v14196_v15 = vadd.f32 %v3791_v26, %v13764_v62  ;;  %v3794_v38 = vadd.f32 %v14065_v44, %v3504_v11  ;;  %v3506_v30 = vpop.f32.mrb[251].mxu1 }
 0x3b4   :  { %v14200_v58 = vadd.f32 %v3794_v38, %v13769_v32 }
 0x3b7   :  { %v3509_v10 = vpop.f32.mrb[252].mxu1 }
 0x3b8   :  { %v3799_v52 = vadd.f32 %v14058_v50, %v3509_v10  ;;  %v3511_v6 = vpop.f32.mrb[253].mxu1 }
 0x3b9   :  { %v3512_v40 = vpop.f32.mrb[254].mxu1 }
 0x3ba   :  { %v14204_v35 = vadd.f32 %v3799_v52, %v18488_v20  ;;  %v3802_v2 = vadd.f32 %v14063_v23, %v3512_v40  ;;  %v3514_v21 = vpop.f32.mrb[255].mxu1  ;;  %v18492_v20 = vld [vmem:[#allocation60_spill] sm:$0xff] }
 0x3bc   :  { %v14208_v62 = vadd.f32 %v3802_v2, %v18489_v39  ;;  %v18491_v39 = vld [vmem:[#allocation19_spill] sm:$0xff] }
 0x3bf   :  { %v3517_v26 = vpop.f32.mrb[0].mxu1 }
 0x3c0   :  { %v3807_v44 = vadd.f32 %v14076_v9, %v3517_v26  ;;  %v3519_v11 = vpop.f32.mrb[1].mxu1 }
 0x3c1   :  { %v3520_v32 = vpop.f32.mrb[2].mxu1 }
 0x3c2   :  { %v14212_v38 = vadd.f32 %v3807_v44, %v13792_v47  ;;  %v3810_v50 = vadd.f32 %v14081_v45, %v3520_v32  ;;  %v3522_v30 = vpop.f32.mrb[3].mxu1 }
 0x3c4   :  { %18490 = vst [vmem:[#allocation116_spill] sm:$0xff] %v14212_v38  ;;  %v14216_v10 = vadd.f32 %v3810_v50, %v13797_v27 }
 0x3c7   :  { %v3525_v52 = vpop.f32.mrb[4].mxu1 }
 0x3c8   :  { %v3815_v23 = vadd.f32 %v14074_v53, %v3525_v52  ;;  %v3527_v21 = vpop.f32.mrb[5].mxu1 }
 0x3c9   :  { %v3528_v2 = vpop.f32.mrb[6].mxu1 }
 0x3ca   :  { %v14220_v6 = vadd.f32 %v3815_v23, %v18491_v39  ;;  %v3818_v9 = vadd.f32 %v14079_v46, %v3528_v2  ;;  %v3530_v40 = vpop.f32.mrb[7].mxu1 }
 0x3cc   :  { %v14224_v47 = vadd.f32 %v3818_v9, %v18492_v20 }
 0x3cf   :  { %v3533_v26 = vpop.f32.mrb[8].mxu1 }
 0x3d0   :  { %v3823_v45 = vadd.f32 %v14092_v28, %v3533_v26  ;;  %v3535_v44 = vpop.f32.mrb[9].mxu1 }
 0x3d1   :  { %v3536_v27 = vpop.f32.mrb[10].mxu1 }
 0x3d2   :  { %v14228_v11 = vadd.f32 %v3823_v45, %v13820_v19  ;;  %v3826_v53 = vadd.f32 %v14097_v49, %v3536_v27  ;;  %v3538_v32 = vpop.f32.mrb[11].mxu1 }
 0x3d4   :  { %v14232_v50 = vadd.f32 %v3826_v53, %v13825_v14 }
 0x3d7   :  { %v3541_v30 = vpop.f32.mrb[12].mxu1 }
 0x3d8   :  { %v3831_v46 = vadd.f32 %v14090_v43, %v3541_v30  ;;  %v3543_v52 = vpop.f32.mrb[13].mxu1 }
 0x3d9   :  { %v3544_v23 = vpop.f32.mrb[14].mxu1 }
 0x3da   :  { %v14236_v21 = vadd.f32 %v3831_v46, %v13813_v29  ;;  %v3834_v28 = vadd.f32 %v14095_v13, %v3544_v23  ;;  %v3546_v2 = vpop.f32.mrb[15].mxu1 }
 0x3dc   :  { %v14240_v19 = vadd.f32 %v3834_v28, %v13823_v51 }
 0x3df   :  { %v3549_v39 = vpop.f32.mrb[16].mxu1 }
 0x3e0   :  { %v3839_v49 = vadd.f32 %v14108_v42, %v3549_v39  ;;  %v3551_v9 = vpop.f32.mrb[17].mxu1 }
 0x3e1   :  { %v3552_v14 = vpop.f32.mrb[18].mxu1 }
 0x3e2   :  { %v14244_v40 = vadd.f32 %v3839_v49, %v13844_v18  ;;  %v3842_v43 = vadd.f32 %v14113_v5, %v3552_v14  ;;  %v3554_v20 = vpop.f32.mrb[19].mxu1 }
 0x3e4   :  { %v14248_v29 = vadd.f32 %v3842_v43, %v13849_v48 }
 0x3e7   :  { %v3557_v26 = vpop.f32.mrb[20].mxu1 }
 0x3e8   :  { %v3847_v13 = vadd.f32 %v14106_v34, %v3557_v26  ;;  %v3559_v45 = vpop.f32.mrb[21].mxu1  ;;  %v18493_v26 = vld [vmem:[#allocation123_spill] sm:$0xff] }
 0x3e9   :  { %v3560_v51 = vpop.f32.mrb[22].mxu1 }
 0x3ea   :  { %v14252_v44 = vadd.f32 %v3847_v13, %v13839_v54  ;;  %v3850_v42 = vadd.f32 %v14111_v22, %v3560_v51  ;;  %v3562_v27 = vpop.f32.mrb[23].mxu1 }
 0x3ec   :  { %v14256_v18 = vadd.f32 %v3850_v42, %v13847_v56  ;;  %v18495_v42 = vld [vmem:[#allocation86_spill] sm:$0xff] }
 0x3ef   :  { %v3565_v53 = vpop.f32.mrb[24].mxu1 }
 0x3f0   :  { %v3855_v5 = vadd.f32 %v14124_v24, %v3565_v53  ;;  %v3567_v32 = vpop.f32.mrb[25].mxu1 }
 0x3f1   :  { %v3568_v48 = vpop.f32.mrb[26].mxu1 }
 0x3f2   :  { %v14260_v30 = vadd.f32 %v3855_v5, %v13868_v59  ;;  %v3858_v34 = vadd.f32 %v14129_v12, %v3568_v48  ;;  %v3570_v46 = vpop.f32.mrb[27].mxu1  ;;  %v18496_v5 = vld [vmem:[#allocation87_spill] sm:$0xff] }
 0x3f4   :  { %v14264_v54 = vadd.f32 %v3858_v34, %v13873_v55  ;;  %v18497_v34 = vld [vmem:[#allocation102_spill] sm:$0xff] }
 0x3f7   :  { %v3573_v52 = vpop.f32.mrb[28].mxu1 }
 0x3f8   :  { %v3863_v22 = vadd.f32 %v14122_v7, %v3573_v52  ;;  %v3575_v23 = vpop.f32.mrb[29].mxu1 }
 0x3f9   :  { %v3576_v56 = vpop.f32.mrb[30].mxu1 }
 0x3fa   :  { %v14268_v28 = vadd.f32 %v3863_v22, %v13863_v16  ;;  %v3866_v24 = vadd.f32 %v14127_v1, %v3576_v56  ;;  %v3578_v2 = vpop.f32.mrb[31].mxu1 }
 0x3fc   :  { %v14272_v59 = vadd.f32 %v3866_v24, %v13871_v25  ;;  %v18498_v24 = vld [vmem:[#allocation62_spill] sm:$0xff] }
 0x3ff   :  { %v3581_v39 = vpop.f32.mrb[32].mxu1 }
 0x400   :  { %v3871_v12 = vadd.f32 %v14140_v41, %v3581_v39  ;;  %v3583_v49 = vpop.f32.mrb[33].mxu1  ;;  %v18494_v41 = vld [vmem:[#allocation45_spill] sm:$0xff] }
 0x401   :  { %v3584_v55 = vpop.f32.mrb[34].mxu1 }
 0x402   :  { %v14276_v9 = vadd.f32 %v3871_v12, %v13890_v63  ;;  %v3874_v7 = vadd.f32 %v14145_v60, %v3584_v55  ;;  %v3586_v14 = vpop.f32.mrb[35].mxu1  ;;  %v18499_v12 = vld [vmem:[#allocation63_spill] sm:$0xff] }
 0x404   :  { %v14280_v16 = vadd.f32 %v3874_v7, %v13895_v3 }
 0x407   :  { %v3589_v43 = vpop.f32.mrb[36].mxu1 }
 0x408   :  { %v3879_v1 = vadd.f32 %v14138_v36, %v3589_v43  ;;  %v3591_v20 = vpop.f32.mrb[37].mxu1  ;;  %v18500_v43 = vld [vmem:[#allocation103_spill] sm:$0xff] }
 0x409   :  { %v3592_v25 = vpop.f32.mrb[38].mxu1 }
 0x40a   :  { %v14284_v13 = vadd.f32 %v3879_v1, %v18493_v26  ;;  %v3882_v45 = vadd.f32 %v18494_v41, %v3592_v25  ;;  %v3594_v51 = vpop.f32.mrb[39].mxu1  ;;  %v18501_v25 = vld [vmem:[#allocation65_spill] sm:$0xff] }
 0x40c   :  { %v14288_v63 = vadd.f32 %v3882_v45, %v18495_v42 }
 0x40f   :  { %v3597_v27 = vpop.f32.mrb[40].mxu1 }
 0x410   :  { %v3887_v60 = vadd.f32 %v14156_v17, %v3597_v27  ;;  %v3599_v53 = vpop.f32.mrb[41].mxu1  ;;  %v18503_v27 = vld [vmem:[#allocation71_spill] sm:$0xff] }
 0x411   :  { %v3600_v3 = vpop.f32.mrb[42].mxu1 }
 0x412   :  { %v14292_v32 = vadd.f32 %v3887_v60, %v18496_v5  ;;  %v3890_v36 = vadd.f32 %v14161_v37, %v3600_v3  ;;  %v3602_v48 = vpop.f32.mrb[43].mxu1  ;;  %v18505_v5 = vld [vmem:[#allocation104_spill] sm:$0xff] }
 0x414   :  { %v14296_v46 = vadd.f32 %v3890_v36, %v18497_v34 }
 0x417   :  { %v3605_v52 = vpop.f32.mrb[44].mxu1 }
 0x418   :  { %v3895_v22 = vadd.f32 %v14154_v33, %v3605_v52  ;;  %v3607_v23 = vpop.f32.mrb[45].mxu1 }
 0x419   :  { %v3608_v56 = vpop.f32.mrb[46].mxu1 }
 0x41a   :  { %v14300_v2 = vadd.f32 %v3895_v22, %v18498_v24  ;;  %v3898_v17 = vadd.f32 %v14159_v61, %v3608_v56  ;;  %v3610_v39 = vpop.f32.mrb[47].mxu1  ;;  %v18502_v61 = vld [vmem:[#allocation112_spill] sm:$0xff]  ;;  %v18506_v22 = vld [vmem:[#allocation91_spill] sm:$0xff] }
 0x41c   :  { %v14304_v49 = vadd.f32 %v3898_v17, %v18499_v12  ;;  %v18507_v17 = vld [vmem:[#allocation84_spill] sm:$0xff] }
 0x41d   :  { %v18508_v12 = vld [vmem:[#allocation108_spill] sm:$0xff] }
 0x41f   :  { %v3613_v55 = vpop.f32.mrb[48].mxu1 }
 0x420   :  { %v3903_v37 = vadd.f32 %v14172_v0, %v3613_v55  ;;  %v3615_v7 = vpop.f32.mrb[49].mxu1  ;;  %v18504_v0 = vld [vmem:[#allocation20_spill] sm:$0xff] }
 0x421   :  { %v3616_v14 = vpop.f32.mrb[50].mxu1  ;;  %v18522_v7 = vld [vmem:[#allocation107_spill] sm:$0xff] }
 0x422   :  { %v14308_v1 = vadd.f32 %v3903_v37, %v18500_v43  ;;  %v3906_v33 = vadd.f32 %v14177_v4, %v3616_v14  ;;  %v3618_v20 = vpop.f32.mrb[51].mxu1  ;;  %v18509_v37 = vld [vmem:[#allocation106_spill] sm:$0xff] }
 0x423   :  { %v18510_v14 = vld [vmem:[#allocation94_spill] sm:$0xff] }
 0x424   :  { %v14312_v26 = vadd.f32 %v3906_v33, %v18501_v25  ;;  %v18511_v33 = vld [vmem:[#allocation88_spill] sm:$0xff] }
 0x427   :  { %v3621_v41 = vpop.f32.mrb[52].mxu1 }
 0x428   :  { %v3911_v45 = vadd.f32 %v18502_v61, %v3621_v41  ;;  %v3623_v51 = vpop.f32.mrb[53].mxu1  ;;  %v18513_v41 = vld [vmem:[#allocation36_spill] sm:$0xff]  ;;  %v18530_v61 = vld [vmem:[#allocation105_spill] sm:$0xff] }
 0x429   :  { %v3624_v42 = vpop.f32.mrb[54].mxu1  ;;  %v18514_v51 = vld [vmem:[#allocation10_spill] sm:$0xff] }
 0x42a   :  { %v14316_v60 = vadd.f32 %v3911_v45, %v18503_v27  ;;  %v3914_v53 = vadd.f32 %v18504_v0, %v3624_v42  ;;  %v3626_v3 = vpop.f32.mrb[55].mxu1 }
 0x42b   :  { %v10892_v3 = vmov 1966171168  }
 0x42c   :  { %v14320_v36 = vadd.f32 %v3914_v53, %v18505_v5  ;;  %v4376_v5 = vunpack.c.l.s4 %v10892_v3 }
 0x42f   :  { %v3629_v48 = vpop.f32.mrb[56].mxu1 }
 0x430   :  { %v3919_v4 = vadd.f32 %v14188_v31, %v3629_v48  ;;  %v3631_v34 = vpop.f32.mrb[57].mxu1  ;;  %v18512_v31 = vld [vmem:[#allocation89_spill] sm:$0xff]  ;;  %v18541_v48 = vmax.f32 %v18508_v12, 0.0  ;;  %v18551_v12 = vmax.f32 %v18513_v41, 0.0 }
 0x431   :  { %v3632_v52 = vpop.f32.mrb[58].mxu1  ;;  %v18539_v34 = vld [vmem:[#allocation31_spill] sm:$0xff] }
 0x432   :  { %v14324_v23 = vadd.f32 %v3919_v4, %v18506_v22  ;;  %v3922_v56 = vadd.f32 %v14193_v8, %v3632_v52  ;;  %v3634_v24 = vpop.f32.mrb[59].mxu1  ;;  %v18525_v4 = vld [vmem:[#allocation39_spill] sm:$0xff]  ;;  %v18526_v52 = vld [vmem:[#allocation101_spill] sm:$0xff]  ;;  %v8575_v22 = vld [vmem:[%s17587_s8] ss:$0 sm:$0xff] }
 0x433   :  { %v18537_v8 = vld [vmem:[#allocation16_spill] sm:$0xff] }
 0x434   :  { %v14328_v39 = vadd.f32 %v3922_v56, %v18507_v17  ;;  %v18527_v56 = vld [vmem:[#allocation96_spill] sm:$0xff] }
 0x437   :  { %v3637_v45 = vpop.f32.mrb[60].mxu1 }
 0x438   :  { %v3927_v0 = vadd.f32 %v14186_v57, %v3637_v45  ;;  %v3639_v53 = vpop.f32.mrb[61].mxu1  ;;  %v18523_v57 = vld [vmem:[#allocation117_spill] sm:$0xff] }
 0x439   :  { %v3640_v25 = vpop.f32.mrb[62].mxu1 }
 0x43a   :  { %v14346_v27 = vadd.f32 %v3927_v0, %v18522_v7  ;;  %v3930_v45 = vadd.f32 %v18523_v57, %v3640_v25  ;;  %v3642_v53 = vpop.f32.mrb[63].mxu1  ;;  %v4377_v7 = vunpack.c.0.s8 %v4376_v5  ;;  %v18531_v0 = vld [vmem:[#allocation44_spill] sm:$0xff] }
 0x43b   :  { %v18558_v53 = vld [vmem:[#allocation11_spill] sm:$0xff]  ;;  %v18561_v25 = vld [vmem:[#allocation92_spill] sm:$0xff] }
 0x43c   :  { %v14356_v42 = vadd.f32 %v3930_v45, %v18530_v61  ;;  %v18538_v45 = vld [vmem:[#allocation115_spill] sm:$0xff]  ;;  %v4380_v20 = vsub.s32 %v4377_v7, %v18539_v34  ;;  %v18549_v7 = vmax.f32 %v18512_v31, 0.0  ;;  %v18562_v31 = vmax.f32 %v18561_v25, 0.0 }
 0x43d   :  { %v18555_v34 = vld [vmem:[#allocation111_spill] sm:$0xff] }
 0x43f   :  { %v4369_v3 = vpop.f32.mrb[64].mxu1 }
 0x440   :  { %v4370_v24 = vadd.f32 %v8575_v22, %v4369_v3  ;;  %v10433_v17 = vpop.f32.mrb[65].mxu1  ;;  %v18540_v22 = vld [vmem:[#allocation32_spill] sm:$0xff] }
 0x441   :  { %v18547_v17 = vmax.f32 %v18511_v33, 0.0  ;;  %v18559_v33 = vmax.f32 %v18558_v53, 0.0 }
 0x442   :  { %v4373_v38 = vmax.f32 %v4370_v24, 0.0  ;;  %v18543_v24 = vmax.f32 %v18509_v37, 0.0  ;;  %v18553_v37 = vmax.f32 %v18514_v51, 0.0 }
 0x444   :  { %v4381_v55 = vrot.slane %v4373_v38, %v4380_v20 }
 0x446   :  { %v4382_v3 = vcombine.high %v4381_v55, %v4381_v55  ;;  %v4389_v5 = vrot.slane %v4381_v55, %v4380_v20 }
 0x448   :  { %v4396_v57 = vrot.slane %v4382_v3, %v4380_v20  ;;  %v4400_v61 = vrot.slane %v4389_v5, %v18540_v22  ;;  %v18545_v5 = vmax.f32 %v18510_v14, 0.0  ;;  %v18556_v14 = vmax.f32 %v18555_v34, 0.0 }
 0x44a   :  { %v14408_v43 = vrot.slane %v4396_v57, %v18540_v22  ;;  %v14412_v38 = vadd.f32 %v4400_v61, %v18541_v48  ;;  %v14416_v20 = vadd.f32 %v4400_v61, %v18543_v24  ;;  %v14420_v3 = vadd.f32 %v4400_v61, %v18545_v5  ;;  %v18563_v22 = vld [vmem:[#allocation98_spill] sm:$0xff] }
 0x44b   :  { %v14424_v55 = vadd.f32 %v4400_v61, %v18547_v17  ;;  %v14428_v57 = vadd.f32 %v4400_v61, %v18549_v7  ;;  %v14432_v48 = vadd.f32 %v4400_v61, %v18551_v12  ;;  %v14436_v24 = vadd.f32 %v4400_v61, %v18553_v37 }
 0x44c   :  { %18542 = vst [vmem:[#allocation21_spill] sm:$0xff] %v14412_v38  ;;  %18544 = vst [vmem:[#allocation67_spill] sm:$0xff] %v14416_v20  ;;  %v14440_v5 = vadd.f32 %v4400_v61, %v18556_v14  ;;  %v14444_v17 = vadd.f32 %v4400_v61, %v18559_v33  ;;  %v14448_v7 = vadd.f32 %v4400_v61, %v18562_v31  ;;  %v18564_v41 = vmax.f32 %v18563_v22, 0.0 }
 0x44d   :  { %18546 = vst [vmem:[#allocation119_spill] sm:$0xff] %v14420_v3  ;;  %18548 = vst [vmem:[#allocation61_spill] sm:$0xff] %v14424_v55  ;;  %v18578_v22 = vmax.f32 %v18525_v4, 0.0  ;;  %v18590_v4 = vmax.f32 %v18531_v0, 0.0 }
 0x44e   :  { %18550 = vst [vmem:[#allocation120_spill] sm:$0xff] %v14428_v57  ;;  %18552 = vst [vmem:[#allocation118_spill] sm:$0xff] %v14432_v48  ;;  %v14452_v12 = vadd.f32 %v4400_v61, %v18564_v41  ;;  %v18566_v48 = vld [vmem:[#allocation93_spill] sm:$0xff] }
 0x44f   :  { %18554 = vst [vmem:[#allocation69_spill] sm:$0xff] %v14436_v24  ;;  %18557 = vst [vmem:[#allocation22_spill] sm:$0xff] %v14440_v5  ;;  %v18567_v51 = vmax.f32 %v18566_v48, 0.0  ;;  %v18569_v24 = vld [vmem:[#allocation41_spill] sm:$0xff]  ;;  %v14472_v41 = vadd.f32 %v4400_v61, %v18578_v22  ;;  %v18580_v48 = vmax.f32 %v18526_v52, 0.0  ;;  %v14492_v22 = vadd.f32 %v4400_v61, %v18590_v4 }
 0x450   :  { %18560 = vst [vmem:[#allocation90_spill] sm:$0xff] %v14444_v17  ;;  %18565 = vst [vmem:[#allocation121_spill] sm:$0xff] %v14452_v12  ;;  %v18570_v34 = vmax.f32 %v18569_v24, 0.0  ;;  %v18572_v5 = vld [vmem:[#allocation37_spill] sm:$0xff]  ;;  %v18575_v17 = vld [vmem:[#allocation66_spill] sm:$0xff]  ;;  %v18582_v24 = vmax.f32 %v18527_v56, 0.0 }
 0x451   :  { %v14456_v37 = vadd.f32 %v4400_v61, %v18567_v51  ;;  %v18573_v53 = vmax.f32 %v18572_v5, 0.0  ;;  %v18576_v25 = vmax.f32 %v18575_v17, 0.0  ;;  %18579 = vst [vmem:[#allocation30_spill] sm:$0xff] %v14472_v41  ;;  %v14476_v51 = vadd.f32 %v4400_v61, %v18580_v48  ;;  %v18591_v41 = vld [vmem:[#allocation49_spill] sm:$0xff] }
 0x452   :  { %v14460_v14 = vadd.f32 %v4400_v61, %v18570_v34  ;;  %v14480_v34 = vadd.f32 %v4400_v61, %v18582_v24  ;;  %v18592_v52 = vmax.f32 %v18591_v41, 0.0  ;;  %v18604_v41 = vmax.f32 %v18537_v8, 0.0 }
 0x453   :  { %18568 = vst [vmem:[#allocation124_spill] sm:$0xff] %v14456_v37  ;;  %v14464_v33 = vadd.f32 %v4400_v61, %v18573_v53  ;;  %v14468_v31 = vadd.f32 %v4400_v61, %v18576_v25  ;;  %18581 = vst [vmem:[#allocation125_spill] sm:$0xff] %v14476_v51  ;;  %v18593_v51 = vld [vmem:[#allocation110_spill] sm:$0xff]  ;;  %v18614_v8 = vmax.f32 %v14208_v62, 0.0 }
 0x454   :  { %18571 = vst [vmem:[#allocation122_spill] sm:$0xff] %v14460_v14  ;;  %18583 = vst [vmem:[#allocation27_spill] sm:$0xff] %v14480_v34  ;;  %v18584_v14 = vld [vmem:[#allocation109_spill] sm:$0xff]  ;;  %v14496_v48 = vadd.f32 %v4400_v61, %v18592_v52  ;;  %v18594_v56 = vmax.f32 %v18593_v51, 0.0  ;;  %v14516_v52 = vadd.f32 %v4400_v61, %v18604_v41  ;;  %v18606_v51 = vmax.f32 %v18538_v45, 0.0 }
 0x455   :  { %18574 = vst [vmem:[#allocation73_spill] sm:$0xff] %v14464_v33  ;;  %18577 = vst [vmem:[#allocation68_spill] sm:$0xff] %v14468_v31  ;;  %v18585_v5 = vmax.f32 %v18584_v14, 0.0  ;;  %v18587_v33 = vld [vmem:[#allocation48_spill] sm:$0xff]  ;;  %v18595_v34 = vld [vmem:[#allocation113_spill] sm:$0xff]  ;;  %v14536_v41 = vadd.f32 %v4400_v61, %v18614_v8 }
 0x456   :  { %v18588_v17 = vmax.f32 %v18587_v33, 0.0  ;;  %v14500_v24 = vadd.f32 %v4400_v61, %v18594_v56  ;;  %v18596_v14 = vmax.f32 %v18595_v34, 0.0  ;;  %18605 = vst [vmem:[#allocation78_spill] sm:$0xff] %v14516_v52  ;;  %v14520_v56 = vadd.f32 %v4400_v61, %v18606_v51  ;;  %v18616_v52 = vld [vmem:[#allocation116_spill] sm:$0xff] }
 0x457   :  { %v14484_v53 = vadd.f32 %v4400_v61, %v18585_v5  ;;  %v18608_v34 = vmax.f32 %v14196_v15, 0.0  ;;  %18615 = vst [vmem:[#allocation80_spill] sm:$0xff] %v14536_v41  ;;  %v18617_v45 = vmax.f32 %v18616_v52, 0.0  ;;  %v18618_v15 = vmax.f32 %v14216_v10, 0.0 }
 0x458   :  { %v14488_v25 = vadd.f32 %v4400_v61, %v18588_v17  ;;  %v14504_v5 = vadd.f32 %v4400_v61, %v18596_v14  ;;  %18607 = vst [vmem:[#allocation74_spill] sm:$0xff] %v14520_v56  ;;  %v18622_v10 = vmax.f32 %v14232_v50, 0.0  ;;  %v18626_v50 = vmax.f32 %v14248_v29, 0.0 }
 0x459   :  { %18586 = vst [vmem:[#allocation29_spill] sm:$0xff] %v14484_v53  ;;  %v18598_v53 = vld [vmem:[#allocation53_spill] sm:$0xff]  ;;  %v14524_v14 = vadd.f32 %v4400_v61, %v18608_v34  ;;  %v14541_v51 = vadd.f32 %v14408_v43, %v18617_v45  ;;  %v14546_v34 = vadd.f32 %v14408_v43, %v18618_v15  ;;  %v18630_v29 = vmax.f32 %v14264_v54, 0.0 }
 0x45a   :  { %18589 = vst [vmem:[#allocation75_spill] sm:$0xff] %v14488_v25  ;;  %18597 = vst [vmem:[#allocation70_spill] sm:$0xff] %v14504_v5  ;;  %v18599_v33 = vmax.f32 %v18598_v53, 0.0  ;;  %v18601_v25 = vld [vmem:[#allocation114_spill] sm:$0xff]  ;;  %v18610_v53 = vmax.f32 %v14200_v58, 0.0  ;;  %v18619_v58 = vmax.f32 %v14220_v6, 0.0 }
 0x45b   :  { %v18602_v0 = vmax.f32 %v18601_v25, 0.0  ;;  %18609 = vst [vmem:[#allocation33_spill] sm:$0xff] %v14524_v14  ;;  %v18612_v25 = vmax.f32 %v14204_v35, 0.0  ;;  %v18623_v6 = vmax.f32 %v14236_v21, 0.0  ;;  %v18627_v21 = vmax.f32 %v14252_v44, 0.0 }
 0x45c   :  { %v14508_v17 = vadd.f32 %v4400_v61, %v18599_v33  ;;  %v14528_v33 = vadd.f32 %v4400_v61, %v18610_v53  ;;  %v14551_v35 = vadd.f32 %v14408_v43, %v18619_v58  ;;  %v18620_v53 = vmax.f32 %v14224_v47, 0.0 }
 0x45d   :  { %v14512_v4 = vadd.f32 %v4400_v61, %v18602_v0  ;;  %v14532_v0 = vadd.f32 %v4400_v61, %v18612_v25  ;;  %v18621_v61 = vmax.f32 %v14228_v11, 0.0  ;;  %v14566_v25 = vadd.f32 %v14408_v43, %v18622_v10 }
 0x45e   :  { %18600 = vst [vmem:[#allocation76_spill] sm:$0xff] %v14508_v17  ;;  %18611 = vst [vmem:[#allocation40_spill] sm:$0xff] %v14528_v33  ;;  %v14556_v62 = vadd.f32 %v14408_v43, %v18620_v53  ;;  %v14571_v8 = vadd.f32 %v14408_v43, %v18623_v6  ;;  %v18624_v47 = vmax.f32 %v14240_v19, 0.0  ;;  %v18625_v11 = vmax.f32 %v14244_v40, 0.0 }
 0x45f   :  { %18603 = vst [vmem:[#allocation72_spill] sm:$0xff] %v14512_v4  ;;  %18613 = vst [vmem:[#allocation38_spill] sm:$0xff] %v14532_v0  ;;  %v14561_v52 = vadd.f32 %v14408_v43, %v18621_v61  ;;  %v14586_v58 = vadd.f32 %v14408_v43, %v18626_v50  ;;  %v14591_v53 = vadd.f32 %v14408_v43, %v18627_v21  ;;  %v18628_v19 = vmax.f32 %v14256_v18, 0.0 }
 0x460   :  { %v14576_v45 = vadd.f32 %v14408_v43, %v18624_v47  ;;  %v14581_v15 = vadd.f32 %v14408_v43, %v18625_v11  ;;  %v18629_v40 = vmax.f32 %v14260_v30, 0.0  ;;  %v14606_v6 = vadd.f32 %v14408_v43, %v18630_v29 }
 0x461   :  { %v14596_v61 = vadd.f32 %v14408_v43, %v18628_v19  ;;  %v18631_v44 = vmax.f32 %v14268_v28, 0.0  ;;  %v18632_v18 = vmax.f32 %v14272_v59, 0.0  ;;  %v18633_v30 = vmax.f32 %v14276_v9, 0.0 }
 0x462   :  { %v14601_v10 = vadd.f32 %v14408_v43, %v18629_v40  ;;  %v18634_v54 = vmax.f32 %v14280_v16, 0.0  ;;  %v18635_v28 = vmax.f32 %v14284_v13, 0.0  ;;  %v18636_v59 = vmax.f32 %v14288_v63, 0.0 }
 0x463   :  { %v14611_v47 = vadd.f32 %v14408_v43, %v18631_v44  ;;  %v14616_v11 = vadd.f32 %v14408_v43, %v18632_v18  ;;  %v14621_v50 = vadd.f32 %v14408_v43, %v18633_v30  ;;  %v18637_v9 = vmax.f32 %v14292_v32, 0.0 }
 0x464   :  { %v14626_v21 = vadd.f32 %v14408_v43, %v18634_v54  ;;  %v14631_v19 = vadd.f32 %v14408_v43, %v18635_v28  ;;  %v14636_v40 = vadd.f32 %v14408_v43, %v18636_v59  ;;  %v18638_v16 = vmax.f32 %v14296_v46, 0.0 }
 0x465   :  { %v14641_v29 = vadd.f32 %v14408_v43, %v18637_v9  ;;  %v18639_v13 = vmax.f32 %v14300_v2, 0.0  ;;  %v18640_v63 = vmax.f32 %v14304_v49, 0.0  ;;  %v18641_v32 = vmax.f32 %v14308_v1, 0.0 }
 0x466   :  { %v14646_v44 = vadd.f32 %v14408_v43, %v18638_v16  ;;  %v18642_v46 = vmax.f32 %v14312_v26, 0.0  ;;  %v18643_v2 = vmax.f32 %v14316_v60, 0.0  ;;  %v18645_v49 = vmax.f32 %v14320_v36, 0.0 }
 0x467   :  { %v14651_v18 = vadd.f32 %v14408_v43, %v18639_v13  ;;  %v14656_v30 = vadd.f32 %v14408_v43, %v18640_v63  ;;  %v14661_v54 = vadd.f32 %v14408_v43, %v18641_v32  ;;  %v18647_v1 = vmax.f32 %v14324_v23, 0.0 }
 0x468   :  { %v14666_v28 = vadd.f32 %v14408_v43, %v18642_v46  ;;  %v14671_v59 = vadd.f32 %v14408_v43, %v18643_v2  ;;  %v14676_v9 = vadd.f32 %v14408_v43, %v18645_v49  ;;  %v18648_v26 = vmax.f32 %v14328_v39, 0.0 }
 0x469   :  { %v14681_v16 = vadd.f32 %v14408_v43, %v18647_v1  ;;  %v18649_v60 = vmax.f32 %v14346_v27, 0.0  ;;  %v18651_v36 = vmax.f32 %v14356_v42, 0.0  ;;  %v4471_v23 = vadd.f32 %v14416_v20, %v14412_v38 }
 0x46a   :  { %18644 = vst [vmem:[#allocation77_spill] sm:$0xff] %v14671_v59  ;;  %18646 = vst [vmem:[#allocation46_spill] sm:$0xff] %v14676_v9  ;;  %v14686_v13 = vadd.f32 %v14408_v43, %v18648_v26  ;;  %v4541_v46 = vmul.f32 %v14412_v38, %v14412_v38  ;;  %v4542_v39 = vmul.f32 %v14416_v20, %v14416_v20  ;;  %v18653_v38 = vld [vmem:[#allocation118_spill] sm:$0xff] }
 0x46b   :  { %v14691_v63 = vadd.f32 %v14408_v43, %v18649_v60  ;;  %v14696_v32 = vadd.f32 %v14408_v43, %v18651_v36  ;;  %v4543_v27 = vmul.f32 %v14420_v3, %v14420_v3  ;;  %v4472_v2 = vadd.f32 %v4471_v23, %v14420_v3  ;;  %v18654_v23 = vld [vmem:[#allocation69_spill] sm:$0xff] }
 0x46c   :  { %v4605_v49 = vadd.f32 %v4542_v39, %v4541_v46  ;;  %v4544_v42 = vmul.f32 %v14424_v55, %v14424_v55  ;;  %v4545_v26 = vmul.f32 %v14428_v57, %v14428_v57  ;;  %v4546_v20 = vmul.f32 %v18653_v38, %v18653_v38 }
 0x46d   :  { %18650 = vst [vmem:[#allocation43_spill] sm:$0xff] %v14691_v63  ;;  %18652 = vst [vmem:[#allocation47_spill] sm:$0xff] %v14696_v32  ;;  %v4473_v43 = vadd.f32 %v4472_v2, %v14424_v55  ;;  %v4547_v46 = vmul.f32 %v18654_v23, %v18654_v23  ;;  %v18655_v2 = vld [vmem:[#allocation22_spill] sm:$0xff] }
 0x46e   :  { %v4606_v1 = vadd.f32 %v4605_v49, %v4543_v27  ;;  %v4548_v27 = vmul.f32 %v18655_v2, %v18655_v2 }
 0x46f   :  { %v4474_v60 = vadd.f32 %v4473_v43, %v14428_v57  ;;  %v18656_v43 = vld [vmem:[#allocation90_spill] sm:$0xff] }
 0x470   :  { %v4607_v36 = vadd.f32 %v4606_v1, %v4544_v42  ;;  %v4549_v42 = vmul.f32 %v18656_v43, %v18656_v43 }
 0x471   :  { %v4475_v32 = vadd.f32 %v4474_v60, %v18653_v38 }
 0x472   :  { %v4608_v63 = vadd.f32 %v4607_v36, %v4545_v26  ;;  %v4550_v26 = vmul.f32 %v14448_v7, %v14448_v7 }
 0x473   :  { %v4476_v39 = vadd.f32 %v4475_v32, %v18654_v23 }
 0x474   :  { %v4609_v3 = vadd.f32 %v4608_v63, %v4546_v20  ;;  %v4551_v20 = vmul.f32 %v14452_v12, %v14452_v12 }
 0x475   :  { %v4477_v49 = vadd.f32 %v4476_v39, %v18655_v2 }
 0x476   :  { %v4610_v55 = vadd.f32 %v4609_v3, %v4547_v46  ;;  %v4552_v3 = vmul.f32 %v14456_v37, %v14456_v37 }
 0x477   :  { %v4478_v1 = vadd.f32 %v4477_v49, %v18656_v43  ;;  %v10773_v49 = vld [vmem:[#allocation3] sm:$0xff]  }
 0x478   :  { %v4611_v57 = vadd.f32 %v4610_v55, %v4548_v27  ;;  %v18657_v55 = vld [vmem:[#allocation122_spill] sm:$0xff]  ;;  %5760 = vmatpush1.bf16.msra.mxu0 %v10773_v49  ;;  %v18661_v49 = vld [vmem:[#allocation125_spill] sm:$0xff] }
 0x479   :  { %v4479_v60 = vadd.f32 %v4478_v1, %v14448_v7  ;;  %v4553_v27 = vmul.f32 %v18657_v55, %v18657_v55 }
 0x47a   :  { %v4612_v36 = vadd.f32 %v4611_v57, %v4549_v42  ;;  %v18658_v57 = vld [vmem:[#allocation73_spill] sm:$0xff] }
 0x47b   :  { %v4480_v63 = vadd.f32 %v4479_v60, %v14452_v12  ;;  %v4554_v42 = vmul.f32 %v18658_v57, %v18658_v57  ;;  %v10774_v12 = vld [vmem:[#allocation3 + $0x8] sm:$0xff]  }
 0x47c   :  { %v4613_v32 = vadd.f32 %v4612_v36, %v4550_v26  ;;  %v18659_v36 = vmov 0  }
 0x47d   :  { %v4481_v46 = vadd.f32 %v4480_v63, %v14456_v37  ;;  %5761 = vmatprep.subr.bf16.mxu0 %v18659_v36  ;;  %v18660_v37 = vld [vmem:[#allocation30_spill] sm:$0xff] }
 0x47e   :  { %v4614_v39 = vadd.f32 %v4613_v32, %v4551_v20  ;;  %v4555_v20 = vmul.f32 %v14468_v31, %v14468_v31  ;;  %5762 = vmatpush1.bf16.msra.mxu0 %v10774_v12 }
 0x47f   :  { %v4482_v43 = vadd.f32 %v4481_v46, %v18657_v55  ;;  %5763 = vmatprep.subr.bf16.mxu0 %v18659_v36  ;;  %v18662_v55 = vld [vmem:[#allocation27_spill] sm:$0xff] }
 0x480   :  { %v4615_v1 = vadd.f32 %v4614_v39, %v4552_v3  ;;  %v4556_v3 = vmul.f32 %v18660_v37, %v18660_v37 }
 0x481   :  { %v4483_v60 = vadd.f32 %v4482_v43, %v18658_v57  ;;  %v10775_v43 = vld [vmem:[#allocation3 + $0x10] sm:$0xff]  }
 0x482   :  { %v4616_v26 = vadd.f32 %v4615_v1, %v4553_v27  ;;  %v4557_v27 = vmul.f32 %v18661_v49, %v18661_v49  ;;  %5764 = vmatpush1.bf16.msra.mxu0 %v10775_v43  ;;  %v10777_v43 = vld [vmem:[#allocation3 + $0x20] sm:$0xff]  }
 0x483   :  { %v4484_v63 = vadd.f32 %v4483_v60, %v14468_v31  ;;  %5765 = vmatprep.subr.bf16.mxu0 %v18659_v36  ;;  %v18664_v31 = vld [vmem:[#allocation75_spill] sm:$0xff] }
 0x484   :  { %v4617_v32 = vadd.f32 %v4616_v26, %v4554_v42  ;;  %v4558_v42 = vmul.f32 %v18662_v55, %v18662_v55  ;;  %v10776_v26 = vld [vmem:[#allocation3 + $0x18] sm:$0xff]  }
 0x485   :  { %v4485_v46 = vadd.f32 %v4484_v63, %v18660_v37 }
 0x486   :  { %v4618_v39 = vadd.f32 %v4617_v32, %v4555_v20  ;;  %v18663_v20 = vld [vmem:[#allocation29_spill] sm:$0xff]  ;;  %5766 = vmatpush1.bf16.msra.mxu0 %v10776_v26  ;;  %v10778_v26 = vld [vmem:[#allocation3 + $0x28] sm:$0xff]  }
 0x487   :  { %v4486_v1 = vadd.f32 %v4485_v46, %v18661_v49  ;;  %v4559_v63 = vmul.f32 %v18663_v20, %v18663_v20  ;;  %5767 = vmatprep.subr.bf16.mxu0 %v18659_v36 }
 0x488   :  { %v4619_v57 = vadd.f32 %v4618_v39, %v4556_v3  ;;  %v4560_v3 = vmul.f32 %v18664_v31, %v18664_v31 }
 0x489   :  { %v4487_v12 = vadd.f32 %v4486_v1, %v18662_v55 }
 0x48a   :  { %v4620_v60 = vadd.f32 %v4619_v57, %v4557_v27  ;;  %v4561_v57 = vmul.f32 %v14492_v22, %v14492_v22  ;;  %5768 = vmatpush1.bf16.msra.mxu0 %v10777_v43  ;;  %v10779_v43 = vld [vmem:[#allocation3 + $0x30] sm:$0xff]  }
 0x48b   :  { %v4488_v32 = vadd.f32 %v4487_v12, %v18663_v20  ;;  %5769 = vmatprep.subr.bf16.mxu0 %v18659_v36 }
 0x48c   :  { %v4621_v37 = vadd.f32 %v4620_v60, %v4558_v42  ;;  %v4562_v42 = vmul.f32 %v14496_v48, %v14496_v48 }
 0x48d   :  { %v4489_v46 = vadd.f32 %v4488_v32, %v18664_v31 }
 0x48e   :  { %v4622_v39 = vadd.f32 %v4621_v37, %v4559_v63  ;;  %v4563_v37 = vmul.f32 %v14500_v24, %v14500_v24  ;;  %5770 = vmatpush1.bf16.msra.mxu0 %v10778_v26  ;;  %v10780_v26 = vld [vmem:[#allocation3 + $0x38] sm:$0xff]  }
 0x48f   :  { %v4490_v27 = vadd.f32 %v4489_v46, %v14492_v22  ;;  %5771 = vmatprep.subr.bf16.mxu0 %v18659_v36 }
 0x490   :  { %v4623_v1 = vadd.f32 %v4622_v39, %v4560_v3  ;;  %v4564_v3 = vmul.f32 %v14504_v5, %v14504_v5 }
 0x491   :  { %v4491_v12 = vadd.f32 %v4490_v27, %v14496_v48 }
 0x492   :  { %v4624_v60 = vadd.f32 %v4623_v1, %v4561_v57  ;;  %v4565_v57 = vmul.f32 %v14508_v17, %v14508_v17  ;;  %5772 = vmatpush1.bf16.msra.mxu0 %v10779_v43  ;;  %v10781_v43 = vld [vmem:[#allocation3 + $0x40] sm:$0xff]  }
 0x493   :  { %v4492_v63 = vadd.f32 %v4491_v12, %v14500_v24  ;;  %5773 = vmatprep.subr.bf16.mxu0 %v18659_v36 }
 0x494   :  { %v4625_v32 = vadd.f32 %v4624_v60, %v4562_v42  ;;  %v4566_v42 = vmul.f32 %v14512_v4, %v14512_v4 }
 0x495   :  { %v4493_v46 = vadd.f32 %v4492_v63, %v14504_v5 }
 0x496   :  { %v4626_v39 = vadd.f32 %v4625_v32, %v4563_v37  ;;  %v18665_v37 = vld [vmem:[#allocation78_spill] sm:$0xff]  ;;  %5774 = vmatpush1.bf16.msra.mxu0 %v10780_v26  ;;  %v10782_v26 = vld [vmem:[#allocation3 + $0x48] sm:$0xff]  }
 0x497   :  { %v4494_v27 = vadd.f32 %v4493_v46, %v14508_v17  ;;  %v4567_v63 = vmul.f32 %v18665_v37, %v18665_v37  ;;  %5775 = vmatprep.subr.bf16.mxu0 %v18659_v36 }
 0x498   :  { %v4627_v1 = vadd.f32 %v4626_v39, %v4564_v3  ;;  %v4568_v3 = vmul.f32 %v14520_v56, %v14520_v56 }
 0x499   :  { %v4495_v12 = vadd.f32 %v4494_v27, %v14512_v4 }
 0x49a   :  { %v4628_v60 = vadd.f32 %v4627_v1, %v4565_v57  ;;  %v4569_v57 = vmul.f32 %v14524_v14, %v14524_v14  ;;  %5776 = vmatpush1.bf16.msra.mxu0 %v10781_v43  ;;  %v10783_v43 = vld [vmem:[#allocation3 + $0x50] sm:$0xff]  }
 0x49b   :  { %v4496_v32 = vadd.f32 %v4495_v12, %v18665_v37  ;;  %5777 = vmatprep.subr.bf16.mxu0 %v18659_v36 }
 0x49c   :  { %v4629_v5 = vadd.f32 %v4628_v60, %v4566_v42  ;;  %v4570_v42 = vmul.f32 %v14528_v33, %v14528_v33 }
 0x49d   :  { %v4497_v46 = vadd.f32 %v4496_v32, %v14520_v56 }
 0x49e   :  { %v4630_v39 = vadd.f32 %v4629_v5, %v4567_v63  ;;  %v4571_v5 = vmul.f32 %v14532_v0, %v14532_v0  ;;  %5778 = vmatpush1.bf16.msra.mxu0 %v10782_v26  ;;  %v10784_v26 = vld [vmem:[#allocation3 + $0x58] sm:$0xff]  }
 0x49f   :  { %v4498_v27 = vadd.f32 %v4497_v46, %v14524_v14  ;;  %5779 = vmatprep.subr.bf16.mxu0 %v18659_v36 }
 0x4a0   :  { %v4631_v1 = vadd.f32 %v4630_v39, %v4568_v3  ;;  %v4572_v3 = vmul.f32 %v14536_v41, %v14536_v41 }
 0x4a1   :  { %v4499_v12 = vadd.f32 %v4498_v27, %v14528_v33  ;;  %v10787_v33 = vld [vmem:[#allocation3 + $0x80] sm:$0xff]  }
 0x4a2   :  { %v4632_v60 = vadd.f32 %v4631_v1, %v4569_v57  ;;  %v4573_v57 = vmul.f32 %v14541_v51, %v14541_v51  ;;  %5780 = vmatpush1.bf16.msra.mxu0 %v10783_v43  ;;  %10434 = vmatprep.subr.bf16.mxu1 %v10787_v33 }
 0x4a3   :  { %v4500_v63 = vadd.f32 %v4499_v12, %v14532_v0  ;;  %5781 = vmatprep.subr.bf16.mxu0 %v18659_v36  ;;  %10435 = vmatpush3.bf16.msra.mxu1 %v10787_v33  ;;  %v10790_v33 = vld [vmem:[#allocation3 + $0x90] sm:$0xff]  }
 0x4a4   :  { %v4633_v32 = vadd.f32 %v4632_v60, %v4570_v42  ;;  %v4574_v42 = vmul.f32 %v14546_v34, %v14546_v34 }
 0x4a5   :  { %v4501_v46 = vadd.f32 %v4500_v63, %v14536_v41 }
 0x4a6   :  { %v4634_v39 = vadd.f32 %v4633_v32, %v4571_v5  ;;  %v4575_v5 = vmul.f32 %v14551_v35, %v14551_v35  ;;  %5782 = vmatpush1.bf16.msra.mxu0 %v10784_v26 }
 0x4a7   :  { %v4502_v27 = vadd.f32 %v4501_v46, %v14541_v51  ;;  %v4576_v46 = vmul.f32 %v14556_v62, %v14556_v62  ;;  %5783 = vmatprep.subr.bf16.mxu0 %v18659_v36 }
 0x4a8   :  { %v4635_v1 = vadd.f32 %v4634_v39, %v4572_v3  ;;  %v10788_v3 = vld [vmem:[#allocation3 + $0x88] sm:$0xff]  }
 0x4a9   :  { %v4503_v12 = vadd.f32 %v4502_v27, %v14546_v34  ;;  %10436 = vmatprep.subr.bf16.mxu1 %v10788_v3  ;;  %v4577_v27 = vmul.f32 %v14561_v52, %v14561_v52 }
 0x4aa   :  { %v4636_v60 = vadd.f32 %v4635_v1, %v4573_v57  ;;  %v10785_v57 = vld [vmem:[#allocation3 + $0x60] sm:$0xff]   ;;  %10437 = vmatpush3.bf16.msra.mxu1 %v10788_v3  ;;  %v10791_v3 = vld [vmem:[#allocation3 + $0x98] sm:$0xff]  }
 0x4ab   :  { %v4504_v63 = vadd.f32 %v4503_v12, %v14551_v35  ;;  %5784 = vmatpush1.bf16.msra.mxu0 %v10785_v57  ;;  %10438 = vmatprep.subr.bf16.mxu1 %v10790_v33 }
 0x4ac   :  { %v4637_v32 = vadd.f32 %v4636_v60, %v4574_v42  ;;  %v4578_v42 = vmul.f32 %v14566_v25, %v14566_v25  ;;  %5785 = vmatprep.subr.bf16.mxu0 %v18659_v36 }
 0x4ad   :  { %v4505_v39 = vadd.f32 %v4504_v63, %v14556_v62  ;;  %v4579_v63 = vmul.f32 %v14571_v8, %v14571_v8 }
 0x4ae   :  { %v4638_v43 = vadd.f32 %v4637_v32, %v4575_v5  ;;  %v10786_v5 = vld [vmem:[#allocation3 + $0x68] sm:$0xff]   ;;  %10439 = vmatpush3.bf16.msra.mxu1 %v10790_v33  ;;  %v10793_v33 = vld [vmem:[#allocation3 + $0xa0] sm:$0xff]  }
 0x4af   :  { %v4506_v1 = vadd.f32 %v4505_v39, %v14561_v52  ;;  %5786 = vmatpush1.bf16.msra.mxu0 %v10786_v5  ;;  %10440 = vmatprep.subr.bf16.mxu1 %v10791_v3 }
 0x4b0   :  { %v4639_v12 = vadd.f32 %v4638_v43, %v4576_v46  ;;  %v4580_v46 = vmul.f32 %v14576_v45, %v14576_v45  ;;  %5787 = vmatprep.subr.bf16.mxu0 %v18659_v36 }
 0x4b1   :  { %v4507_v60 = vadd.f32 %v4506_v1, %v14566_v25  ;;  %v4581_v1 = vmul.f32 %v14581_v15, %v14581_v15 }
 0x4b2   :  { %v4640_v26 = vadd.f32 %v4639_v12, %v4577_v27  ;;  %v10789_v27 = vld [vmem:[#allocation3 + $0x70] sm:$0xff]   ;;  %10441 = vmatpush3.bf16.msra.mxu1 %v10791_v3  ;;  %v10794_v3 = vld [vmem:[#allocation3 + $0xa8] sm:$0xff]  }
 0x4b3   :  { %v4508_v32 = vadd.f32 %v4507_v60, %v14571_v8  ;;  %5788 = vmatpush1.bf16.msra.mxu0 %v10789_v27  ;;  %10442 = vmatprep.subr.bf16.mxu1 %v10793_v33 }
 0x4b4   :  { %v4641_v39 = vadd.f32 %v4640_v26, %v4578_v42  ;;  %v4582_v42 = vmul.f32 %v14586_v58, %v14586_v58  ;;  %5789 = vmatprep.subr.bf16.mxu0 %v18659_v36 }
 0x4b5   :  { %v4509_v43 = vadd.f32 %v4508_v32, %v14576_v45  ;;  %v4583_v32 = vmul.f32 %v14591_v53, %v14591_v53 }
 0x4b6   :  { %v4642_v57 = vadd.f32 %v4641_v39, %v4579_v63  ;;  %v10792_v63 = vld [vmem:[#allocation3 + $0x78] sm:$0xff]   ;;  %10443 = vmatpush3.bf16.msra.mxu1 %v10793_v33  ;;  %v4586_v33 = vmul.f32 %v14606_v6, %v14606_v6 }
 0x4b7   :  { %v4510_v12 = vadd.f32 %v4509_v43, %v14581_v15  ;;  %5790 = vmatpush1.bf16.msra.mxu0 %v10792_v63  ;;  %10444 = vmatprep.subr.bf16.mxu1 %v10794_v3  ;;  %v4587_v63 = vmul.f32 %v14611_v47, %v14611_v47 }
 0x4b8   :  { %v4643_v60 = vadd.f32 %v4642_v57, %v4580_v46  ;;  %v4584_v46 = vmul.f32 %v14596_v61, %v14596_v61 }
 0x4b9   :  { %v4511_v26 = vadd.f32 %v4510_v12, %v14586_v58 }
 0x4ba   :  { %v4644_v5 = vadd.f32 %v4643_v60, %v4581_v1  ;;  %v4585_v1 = vmul.f32 %v14601_v10, %v14601_v10  ;;  %5792 = vmatmul.mubr.bf16.vlgmr.msra.gmra.mrb[0].mxu0 %v18659_v36  ;;  %10445 = vmatpush3.bf16.msra.mxu1 %v10794_v3 }
 0x4bb   :  { %v4512_v39 = vadd.f32 %v4511_v26, %v14591_v53 }
 0x4bc   :  { %v4645_v43 = vadd.f32 %v4644_v5, %v4582_v42  ;;  %v10796_v42 = vld [vmem:[#allocation3 + $0xb0] sm:$0xff]  }
 0x4bd   :  { %v4513_v57 = vadd.f32 %v4512_v39, %v14596_v61  ;;  %10446 = vmatprep.subr.bf16.mxu1 %v10796_v42 }
 0x4be   :  { %v4646_v27 = vadd.f32 %v4645_v43, %v4583_v32  ;;  %10447 = vmatpush3.bf16.msra.mxu1 %v10796_v42  ;;  %v10797_v43 = vld [vmem:[#allocation3 + $0xb8] sm:$0xff]   ;;  %v4590_v42 = vmul.f32 %v14626_v21, %v14626_v21 }
 0x4bf   :  { %v4514_v12 = vadd.f32 %v4513_v57, %v14601_v10  ;;  %10448 = vmatprep.subr.bf16.mxu1 %v10797_v43 }
 0x4c0   :  { %v4647_v60 = vadd.f32 %v4646_v27, %v4584_v46  ;;  %v4588_v46 = vmul.f32 %v14616_v11, %v14616_v11  ;;  %v4589_v27 = vmul.f32 %v14621_v50, %v14621_v50 }
 0x4c1   :  { %v4515_v26 = vadd.f32 %v4514_v12, %v14606_v6 }
 0x4c2   :  { %v4648_v5 = vadd.f32 %v4647_v60, %v4585_v1  ;;  %10449 = vmatpush3.bf16.msra.mxu1 %v10797_v43  ;;  %v10795_v60 = vld [vmem:[#allocation3 + $0x140] sm:$0xff]  }
 0x4c3   :  { %v4516_v32 = vadd.f32 %v4515_v26, %v14611_v47  ;;  %6690 = vmatprep.subr.bf16.mxu1 %v18659_v36  ;;  %10514 = vmatprep.subr.bf16.mxu0 %v10795_v60 }
 0x4c4   :  { %v4649_v39 = vadd.f32 %v4648_v5, %v4586_v33  ;;  %v4591_v5 = vmul.f32 %v14631_v19, %v14631_v19  ;;  %10515 = vmatpush3.bf16.msra.mxu0 %v10795_v60  ;;  %v4595_v60 = vmul.f32 %v14651_v18, %v14651_v18 }
 0x4c5   :  { %v4517_v3 = vadd.f32 %v4516_v32, %v14616_v11 }
 0x4c6   :  { %v4650_v57 = vadd.f32 %v4649_v39, %v4587_v63  ;;  %v4592_v39 = vmul.f32 %v14636_v40, %v14636_v40 }
 0x4c7   :  { %v4518_v1 = vadd.f32 %v4517_v3, %v14621_v50  ;;  %v4593_v3 = vmul.f32 %v14641_v29, %v14641_v29 }
 0x4c8   :  { %v4651_v12 = vadd.f32 %v4650_v57, %v4588_v46 }
 0x4c9   :  { %v4519_v33 = vadd.f32 %v4518_v1, %v14626_v21  ;;  %v4594_v1 = vmul.f32 %v14646_v44, %v14646_v44 }
 0x4ca   :  { %v4652_v26 = vadd.f32 %v4651_v12, %v4589_v27 }
 0x4cb   :  { %v4520_v63 = vadd.f32 %v4519_v33, %v14631_v19 }
 0x4cc   :  { %v4653_v32 = vadd.f32 %v4652_v26, %v4590_v42 }
 0x4cd   :  { %v4521_v43 = vadd.f32 %v4520_v63, %v14636_v40 }
 0x4ce   :  { %v4654_v46 = vadd.f32 %v4653_v32, %v4591_v5  ;;  %v4596_v5 = vmul.f32 %v14656_v30, %v14656_v30 }
 0x4cf   :  { %v4522_v57 = vadd.f32 %v4521_v43, %v14641_v29 }
 0x4d0   :  { %v4655_v27 = vadd.f32 %v4654_v46, %v4592_v39  ;;  %v4597_v39 = vmul.f32 %v14661_v54, %v14661_v54 }
 0x4d1   :  { %v4523_v12 = vadd.f32 %v4522_v57, %v14646_v44 }
 0x4d2   :  { %v4656_v33 = vadd.f32 %v4655_v27, %v4593_v3  ;;  %v4598_v3 = vmul.f32 %v14666_v28, %v14666_v28 }
 0x4d3   :  { %v4524_v42 = vadd.f32 %v4523_v12, %v14651_v18 }
 0x4d4   :  { %v4657_v26 = vadd.f32 %v4656_v33, %v4594_v1  ;;  %v4599_v1 = vmul.f32 %v14671_v59, %v14671_v59 }
 0x4d5   :  { %v4525_v63 = vadd.f32 %v4524_v42, %v14656_v30 }
 0x4d6   :  { %v4658_v32 = vadd.f32 %v4657_v26, %v4595_v60  ;;  %v4600_v60 = vmul.f32 %v14676_v9, %v14676_v9 }
 0x4d7   :  { %v4526_v43 = vadd.f32 %v4525_v63, %v14661_v54 }
 0x4d8   :  { %v4659_v46 = vadd.f32 %v4658_v32, %v4596_v5  ;;  %v4601_v5 = vmul.f32 %v14681_v16, %v14681_v16 }
 0x4d9   :  { %v4527_v57 = vadd.f32 %v4526_v43, %v14666_v28 }
 0x4da   :  { %v4660_v27 = vadd.f32 %v4659_v46, %v4597_v39  ;;  %v4602_v39 = vmul.f32 %v14686_v13, %v14686_v13 }
 0x4db   :  { %v4528_v12 = vadd.f32 %v4527_v57, %v14671_v59  ;;  %v10798_v57 = vld [vmem:[#allocation3 + $0x148] sm:$0xff]  }
 0x4dc   :  { %v4661_v33 = vadd.f32 %v4660_v27, %v4598_v3  ;;  %v18666_v3 = vld [vmem:[#allocation43_spill] sm:$0xff]  ;;  %10516 = vmatprep.subr.bf16.mxu0 %v10798_v57 }
 0x4dd   :  { %v4529_v42 = vadd.f32 %v4528_v12, %v14676_v9  ;;  %v4603_v27 = vmul.f32 %v18666_v3, %v18666_v3  ;;  %10517 = vmatpush3.bf16.msra.mxu0 %v10798_v57  ;;  %v10799_v9 = vld [vmem:[#allocation3 + $0x150] sm:$0xff]  }
 0x4de   :  { %v4662_v26 = vadd.f32 %v4661_v33, %v4599_v1  ;;  %v18667_v1 = vld [vmem:[#allocation47_spill] sm:$0xff]  ;;  %10518 = vmatprep.subr.bf16.mxu0 %v10799_v9 }
 0x4df   :  { %v4530_v63 = vadd.f32 %v4529_v42, %v14681_v16  ;;  %v4604_v33 = vmul.f32 %v18667_v1, %v18667_v1 }
 0x4e0   :  { %v4663_v32 = vadd.f32 %v4662_v26, %v4600_v60 }
 0x4e1   :  { %v4531_v43 = vadd.f32 %v4530_v63, %v14686_v13  ;;  %10519 = vmatpush3.bf16.msra.mxu0 %v10799_v9 }
 0x4e2   :  { %v4664_v46 = vadd.f32 %v4663_v32, %v4601_v5 }
 0x4e3   :  { %v4532_v41 = vadd.f32 %v4531_v43, %v18666_v3 }
 0x4e4   :  { %v4665_v12 = vadd.f32 %v4664_v46, %v4602_v39 }
 0x4e5   :  { %v4533_v60 = vadd.f32 %v4532_v41, %v18667_v1 }
 0x4e6   :  { %v4666_v42 = vadd.f32 %v4665_v12, %v4603_v27 }
 0x4e7   :  { %v4534_v26 = vrot.slane %v4533_v60, 4 }
 0x4e8   :  { %v4667_v0 = vadd.f32 %v4666_v42, %v4604_v33 }
 0x4e9   :  { %v4535_v14 = vadd.f32 %v4534_v26, %v4533_v60 }
 0x4ea   :  { %v4668_v63 = vrot.slane %v4667_v0, 4 }
 0x4eb   :  { %v4536_v5 = vrot.slane %v4535_v14, 2 }
 0x4ec   :  { %v4669_v32 = vadd.f32 %v4668_v63, %v4667_v0 }
 0x4ed   :  { %v4537_v56 = vadd.f32 %v4536_v5, %v4535_v14  ;;  %v4675_v14 = vld [vmem:[%s17588_s9] sm:$0x1] }
 0x4ee   :  { %v4670_v37 = vrot.slane %v4669_v32, 2 }
 0x4ef   :  { %v4538_v4 = vrot.slane %v4537_v56, 1 }
 0x4f0   :  { %v4671_v17 = vadd.f32 %v4670_v37, %v4669_v32 }
 0x4f1   :  { %v4539_v43 = vadd.f32 %v4538_v4, %v4537_v56  ;;  %v4681_v4 = vld [vmem:[%s17589_s10] sm:$0x1]  ;;  %v18668_v56 = vld [vmem:[#allocation32_spill] sm:$0xff] }
 0x4f2   :  { %v4672_v39 = vrot.slane %v4671_v17, 1 }
 0x4f3   :  { %v4540_v46 = vmul.f32 0.001953125, %v4539_v43 }
 0x4f4   :  { %v4673_v57 = vadd.f32 %v4672_v39, %v4671_v17 }
 0x4f5   :  { %v4676_v36 = vmul.f32 %v4540_v46, %v4540_v46 }
 0x4f6   :  { %v4674_v3 = vmul.f32 0.001953125, %v4673_v57 }
 0x4f8   :  { %v4677_v59 = vsub.f32 %v4674_v3, %v4676_v36  ;;  %v10806_v36 = vld [vmem:[#allocation3 + $0x158] sm:$0xff]  }
 0x4f9   :  { %10520 = vmatprep.subr.bf16.mxu0 %v10806_v36 }
 0x4fa   :  { %v4678_v41 = vadd.f32 1e-05, %v4677_v59  ;;  %10521 = vmatpush3.bf16.msra.mxu0 %v10806_v36 }
 0x4fc   :  { %10851 = vrsqrt.f32 %v4678_v41 }
 0x506   :  { %v10852_v27 = vpop.eup %10851 }
 0x507   :  { %v4680_v0 = vmul.f32 %v10852_v27, %v4675_v14 }
 0x509   :  { %v4682_v12 = vmul.f32 %v4680_v0, %v4540_v46  ;;  %v14914_v37 = vrot.slane %v4680_v0, %v18668_v56 }
 0x50b   :  { %v4683_v17 = vsub.f32 %v4681_v4, %v4682_v12  ;;  %18669 = vst [vmem:[#allocation52_spill] sm:$0xff] %v14914_v37  ;;  %v4722_v59 = vmul.f32 %v14914_v37, %v14541_v51  ;;  %v4723_v3 = vmul.f32 %v14914_v37, %v14546_v34  ;;  %v4726_v33 = vmul.f32 %v14914_v37, %v14561_v52 }
 0x50c   :  { %v4727_v60 = vmul.f32 %v14914_v37, %v14566_v25  ;;  %v4730_v42 = vmul.f32 %v14914_v37, %v14581_v15  ;;  %v4731_v26 = vmul.f32 %v14914_v37, %v14586_v58  ;;  %v4734_v63 = vmul.f32 %v14914_v37, %v14601_v10 }
 0x50d   :  { %v14917_v9 = vrot.slane %v4683_v17, %v18668_v56  ;;  %v4735_v51 = vmul.f32 %v14914_v37, %v14606_v6  ;;  %v4738_v34 = vmul.f32 %v14914_v37, %v14621_v50  ;;  %v4739_v52 = vmul.f32 %v14914_v37, %v14626_v21 }
 0x50e   :  { %v4742_v58 = vmul.f32 %v14914_v37, %v14641_v29  ;;  %v4743_v10 = vmul.f32 %v14914_v37, %v14646_v44  ;;  %v4746_v21 = vmul.f32 %v14914_v37, %v14661_v54  ;;  %v4747_v5 = vmul.f32 %v14914_v37, %v14666_v28 }
 0x50f   :  { %18670 = vst [vmem:[#allocation82_spill] sm:$0xff] %v14917_v9  ;;  %v14940_v25 = vadd.f32 %v14917_v9, %v4722_v59  ;;  %v14943_v15 = vadd.f32 %v14917_v9, %v4723_v3  ;;  %v14950_v6 = vadd.f32 %v14917_v9, %v4726_v33  ;;  %v14953_v50 = vadd.f32 %v14917_v9, %v4727_v60 }
 0x510   :  { %v4750_v32 = vmul.f32 %v14914_v37, %v14681_v16  ;;  %v14962_v29 = vadd.f32 %v14917_v9, %v4730_v42  ;;  %v4751_v44 = vmul.f32 %v14914_v37, %v14686_v13  ;;  %v14967_v43 = vadd.f32 %v14917_v9, %v4731_v26 }
 0x511   :  { %18671 = vst [vmem:[#allocation79_spill] sm:$0xff] %v14940_v25  ;;  %18672 = vst [vmem:[#allocation7_spill] sm:$0xff] %v14943_v15  ;;  %v14970_v39 = vadd.f32 %v14917_v9, %v4734_v63  ;;  %v14973_v54 = vadd.f32 %v14917_v9, %v4735_v51  ;;  %v14976_v28 = vadd.f32 %v14917_v9, %v4738_v34  ;;  %v5000_v46 = vrot.slane %v14940_v25, 7 }
 0x512   :  { %v14979_v16 = vadd.f32 %v14917_v9, %v4739_v52  ;;  %v5001_v57 = vrot.slane %v14943_v15, 7  ;;  %v14984_v13 = vadd.f32 %v14917_v9, %v4742_v58  ;;  %v14987_v41 = vadd.f32 %v14917_v9, %v4743_v10  ;;  %v18683_v15 = vld [vmem:[#allocation90_spill] sm:$0xff] }
 0x513   :  { %18673 = vst [vmem:[#allocation9_spill] sm:$0xff] %v14973_v54  ;;  %18674 = vst [vmem:[#allocation50_spill] sm:$0xff] %v14976_v28  ;;  %v5006_v27 = vrot.slane %v14950_v6, 7  ;;  %v5007_v14 = vrot.slane %v14953_v50, 7  ;;  %v14992_v0 = vadd.f32 %v14917_v9, %v4746_v21  ;;  %v14995_v12 = vadd.f32 %v14917_v9, %v4747_v5 }
 0x514   :  { %18675 = vst [vmem:[#allocation51_spill] sm:$0xff] %v14979_v16  ;;  %18676 = vst [vmem:[#allocation83_spill] sm:$0xff] %v14984_v13  ;;  %v5002_v4 = vsel %vm683_vm1, %v5000_v46, %v5001_v57  ;;  %v5012_v17 = vrot.slane %v14962_v29, 7  ;;  %v15000_v56 = vadd.f32 %v14917_v9, %v4750_v32  ;;  %v5013_v59 = vrot.slane %v14967_v43, 7 }
 0x515   :  { %18677 = vst [vmem:[#allocation81_spill] sm:$0xff] %v14987_v41  ;;  %18678 = vst [vmem:[#allocation55_spill] sm:$0xff] %v14992_v0  ;;  %v5008_v36 = vsel %vm683_vm1, %v5006_v27, %v5007_v14  ;;  %v5018_v3 = vrot.slane %v14970_v39, 7  ;;  %v15006_v33 = vadd.f32 %v14917_v9, %v4751_v44  ;;  %v5019_v60 = vrot.slane %v14973_v54, 7 }
 0x516   :  { %18679 = vst [vmem:[#allocation6_spill] sm:$0xff] %v14995_v12  ;;  %18680 = vst [vmem:[#allocation85_spill] sm:$0xff] %v15000_v56  ;;  %v5024_v42 = vrot.slane %v14976_v28, 7  ;;  %v5025_v26 = vrot.slane %v14979_v16, 7  ;;  %v5014_v63 = vsel %vm683_vm1, %v5012_v17, %v5013_v59  ;;  %v5030_v51 = vrot.slane %v14984_v13, 7  ;;  %v18682_v59 = vld [vmem:[#allocation120_spill] sm:$0xff] }
 0x517   :  { %18681 = vst [vmem:[#allocation23_spill] sm:$0xff] %v15006_v33  ;;  %v5031_v34 = vrot.slane %v14987_v41, 7  ;;  %v5020_v52 = vsel %vm683_vm1, %v5018_v3, %v5019_v60  ;;  %v5036_v10 = vrot.slane %v14992_v0, 7  ;;  %v5037_v5 = vrot.slane %v14995_v12, 7  ;;  %v18688_v12 = vld [vmem:[#allocation68_spill] sm:$0xff]  ;;  %v18689_v0 = vld [vmem:[#allocation30_spill] sm:$0xff] }
 0x518   :  { %v5026_v58 = vsel %vm683_vm1, %v5024_v42, %v5025_v26  ;;  %v5042_v32 = vrot.slane %v15000_v56, 7  ;;  %v5043_v44 = vrot.slane %v15006_v33, 7  ;;  %v4694_v1 = vmul.f32 %v14914_v37, %v18682_v59  ;;  %v18685_v33 = vld [vmem:[#allocation124_spill] sm:$0xff]  ;;  %v10815_v41 = vld [vmem:[#allocation3 + $0x160] sm:$0xff]  }
 0x519   :  { %v5032_v21 = vsel %vm683_vm1, %v5030_v51, %v5031_v34  ;;  %v5038_v57 = vsel %vm683_vm1, %v5036_v10, %v5037_v5  ;;  %v4695_v60 = vmul.f32 %v14914_v37, %v18653_v38  ;;  %v4696_v26 = vmul.f32 %v14914_v37, %v18654_v23  ;;  %v18686_v23 = vld [vmem:[#allocation122_spill] sm:$0xff]  ;;  %10522 = vmatprep.subr.bf16.mxu0 %v10815_v41 }
 0x51a   :  { %v5044_v14 = vsel %vm683_vm1, %v5042_v32, %v5043_v44  ;;  %v4697_v34 = vmul.f32 %v14914_v37, %v18655_v2  ;;  %v15033_v25 = vmul.f32 %v14914_v37, %v18683_v15  ;;  %v15037_v5 = vmul.f32 %v14914_v37, %v14448_v7  ;;  %v18684_v44 = vld [vmem:[#allocation121_spill] sm:$0xff]  ;;  %10523 = vmatpush3.bf16.msra.mxu0 %v10815_v41 }
 0x51b   :  { %v15041_v59 = vmul.f32 %v14914_v37, %v18684_v44  ;;  %v15045_v38 = vmul.f32 %v14914_v37, %v18685_v33  ;;  %v15049_v56 = vmul.f32 %v14914_v37, %v18686_v23  ;;  %v18687_v2 = vld [vmem:[#allocation73_spill] sm:$0xff]  ;;  %v15057_v7 = vmul.f32 %v14914_v37, %v18688_v12 }
 0x51c   :  { %v15053_v15 = vmul.f32 %v14914_v37, %v18687_v2  ;;  %v15061_v44 = vmul.f32 %v14914_v37, %v18689_v0  ;;  %v15065_v33 = vmul.f32 %v14914_v37, %v18661_v49  ;;  %v15069_v23 = vmul.f32 %v14914_v37, %v18662_v55  ;;  %v18699_v41 = vld [vmem:[#allocation21_spill] sm:$0xff] }
 0x51d   :  { %v15073_v2 = vmul.f32 %v14914_v37, %v18663_v20  ;;  %v15075_v13 = vpack.c.bf16 %v5002_v4, %v5000_v46  ;;  %v15077_v12 = vpack.c.bf16 %v5008_v36, %v5006_v27  ;;  %v15079_v16 = vpack.c.bf16 %v5014_v63, %v5012_v17  ;;  %v18698_v17 = vld [vmem:[#allocation70_spill] sm:$0xff] }
 0x51e   :  { %v15081_v0 = vpack.c.bf16 %v5020_v52, %v5018_v3  ;;  %v15083_v28 = vpack.c.bf16 %v5026_v58, %v5024_v42  ;;  %v15085_v49 = vpack.c.bf16 %v5032_v21, %v5030_v51  ;;  %v15087_v54 = vpack.c.bf16 %v5038_v57, %v5036_v10  ;;  %v18700_v42 = vld [vmem:[#allocation67_spill] sm:$0xff]  ;;  %v18702_v52 = vld [vmem:[#allocation61_spill] sm:$0xff] }
 0x51f   :  { %18690 = vst [vmem:[#allocation57_spill] sm:$0xff] %v15075_v13  ;;  %18691 = vst [vmem:[#allocation8_spill] sm:$0xff] %v15077_v12  ;;  %v15091_v55 = vmul.f32 %v14914_v37, %v18664_v31  ;;  %v15095_v20 = vmul.f32 %v14914_v37, %v14492_v22  ;;  %v15099_v46 = vmul.f32 %v14914_v37, %v14496_v48  ;;  %v10804_v13 = vld [vmem:[#allocation3 + $0xe0] sm:$0xff]  }
 0x520   :  { %18692 = vst [vmem:[#allocation24_spill] sm:$0xff] %v15079_v16  ;;  %18693 = vst [vmem:[#allocation25_spill] sm:$0xff] %v15081_v0  ;;  %v15101_v27 = vpack.c.bf16 %v5044_v14, %v5042_v32  ;;  %v15105_v4 = vmul.f32 %v14914_v37, %v14500_v24  ;;  %v15109_v36 = vmul.f32 %v14914_v37, %v18698_v17  ;;  %v10802_v16 = vld [vmem:[#allocation3 + $0xd0] sm:$0xff]  }
 0x521   :  { %18694 = vst [vmem:[#allocation26_spill] sm:$0xff] %v15083_v28  ;;  %18695 = vst [vmem:[#allocation28_spill] sm:$0xff] %v15085_v49  ;;  %v15113_v31 = vmul.f32 %v14914_v37, %v14551_v35  ;;  %v15117_v22 = vmul.f32 %v14914_v37, %v14556_v62  ;;  %v15121_v48 = vmul.f32 %v14914_v37, %v14571_v8  ;;  %v18701_v8 = vld [vmem:[#allocation119_spill] sm:$0xff]  ;;  %v18712_v28 = vmov 0  }
 0x522   :  { %18696 = vst [vmem:[#allocation14_spill] sm:$0xff] %v15087_v54  ;;  %18697 = vst [vmem:[#allocation95_spill] sm:$0xff] %v15101_v27  ;;  %v15125_v24 = vmul.f32 %v14914_v37, %v14576_v45  ;;  %v4690_v3 = vmul.f32 %v14914_v37, %v18699_v41  ;;  %v4691_v63 = vmul.f32 %v14914_v37, %v18700_v42 }
 0x523   :  { %v15133_v35 = vmul.f32 %v14914_v37, %v14591_v53  ;;  %v15137_v62 = vmul.f32 %v14914_v37, %v14596_v61  ;;  %v4692_v51 = vmul.f32 %v14914_v37, %v18701_v8  ;;  %v4693_v45 = vmul.f32 %v14914_v37, %v18702_v52 }
 0x524   :  { %v15145_v58 = vmul.f32 %v14914_v37, %v14611_v47  ;;  %v15149_v10 = vmul.f32 %v14914_v37, %v14616_v11  ;;  %v4760_v53 = vadd.f32 %v14917_v9, %v4690_v3  ;;  %v4761_v21 = vadd.f32 %v14917_v9, %v4691_v63 }
 0x525   :  { %v15155_v61 = vmul.f32 %v14914_v37, %v14631_v19  ;;  %v15159_v32 = vmul.f32 %v14914_v37, %v14636_v40  ;;  %v4762_v57 = vadd.f32 %v14917_v9, %v4692_v51  ;;  %v4763_v47 = vadd.f32 %v14917_v9, %v4693_v45 }
 0x526   :  { %v15163_v14 = vpack.c.bf16 %v4761_v21, %v4760_v53  ;;  %v4952_v11 = vrot.slane %v4760_v53, 7  ;;  %v4953_v17 = vrot.slane %v4761_v21, 7  ;;  %v5208_v41 = vrot.slane %v4760_v53, 1  ;;  %v10800_v53 = vld [vmem:[#allocation3 + $0xc0] sm:$0xff]  }
 0x527   :  { %v15166_v3 = vadd.f32 %v14917_v9, %v4694_v1  ;;  %v15169_v42 = vadd.f32 %v14917_v9, %v4695_v60  ;;  %v15172_v19 = vadd.f32 %v14917_v9, %v4696_v26  ;;  %v5209_v40 = vrot.slane %v4761_v21, 1 }
 0x528   :  { %18703 = vst [vmem:[#allocation99_spill] sm:$0xff] %v15163_v14  ;;  %v4954_v63 = vsel %vm683_vm1, %v4952_v11, %v4953_v17  ;;  %5799 = vmatprep.mubr.bf16.mxu0 %v15163_v14  ;;  %v5211_v8 = vrot.slane %v4762_v57, 1  ;;  %v5212_v51 = vrot.slane %v4763_v47, 1  ;;  %v15177_v52 = vadd.f32 %v14917_v9, %v4697_v34 }
 0x529   :  { %v15181_v1 = vmul.f32 %v14914_v37, %v14651_v18  ;;  %v5210_v60 = vsel %vm940_vm2, %v5208_v41, %v5209_v40  ;;  %v15184_v45 = vpack.c.bf16 %v4954_v63, %v4952_v11  ;;  %v15186_v26 = vpack.c.bf16 %v4763_v47, %v4762_v57 }
 0x52a   :  { %v15188_v21 = vpack.c.bf16 %v5209_v40, %v5210_v60  ;;  %v4955_v17 = vrot.slane %v4762_v57, 7  ;;  %v4956_v27 = vrot.slane %v4763_v47, 7  ;;  %v5213_v54 = vsel %vm940_vm2, %v5211_v8, %v5212_v51  ;;  %v18709_v40 = vld [vmem:[#allocation77_spill] sm:$0xff]  ;;  %v18710_v47 = vld [vmem:[#allocation46_spill] sm:$0xff] }
 0x52b   :  { %18704 = vst [vmem:[#allocation100_spill] sm:$0xff] %v15184_v45  ;;  %18705 = vst [vmem:[#allocation97_spill] sm:$0xff] %v15186_v26  ;;  %v15193_v34 = vmul.f32 %v14914_v37, %v14656_v30  ;;  %v5214_v18 = vrot.slane %v15166_v3, 1  ;;  %v5215_v49 = vrot.slane %v15169_v42, 1  ;;  %9297 = vmatmul.mubr.msk.bf16.gmra.mrb[4].mxu0 %vm11713_vm5, %v15184_v45  ;;  %v15200_v41 = vpack.c.bf16 %v5212_v51, %v5213_v54 }
 0x52c   :  { %18706 = vst [vmem:[#allocation54_spill] sm:$0xff] %v15188_v21  ;;  %v4748_v57 = vmul.f32 %v14914_v37, %v18709_v40  ;;  %v15206_v63 = vmul.f32 %v14914_v37, %v18710_v47  ;;  %10451 = vmatmul.mubr.msk.bf16.vlgmr.msra.gmra.mrb[68].mxu1 %vm11722_vm6, %v15188_v21  ;;  %5807 = vmatprep.mubr.bf16.mxu0 %v15186_v26  ;;  %v5217_v8 = vrot.slane %v15172_v19, 1  ;;  %v5218_v60 = vrot.slane %v15177_v52, 1  ;;  %v10801_v47 = vld [vmem:[#allocation3 + $0xc8] sm:$0xff]  }
 0x52d   :  { %18708 = vst [vmem:[#allocation126_spill] sm:$0xff] %v15200_v41  ;;  %v15216_v54 = vadd.f32 %v14917_v9, %v15033_v25  ;;  %v15220_v51 = vadd.f32 %v14917_v9, %v15037_v5  ;;  %v15224_v40 = vadd.f32 %v14917_v9, %v15041_v59  ;;  %10454 = vmatprep.mubr.msk.bf16.mxu1 %vm11722_vm6, %v15200_v41  ;;  %v4959_v0 = vrot.slane %v15169_v42, 7 }
 0x52e   :  { %6691 = vmatpush1.bf16.msra.mxu1 %v10800_v53  ;;  %v15231_v21 = vadd.f32 %v14917_v9, %v15049_v56  ;;  %v15235_v25 = vadd.f32 %v14917_v9, %v15053_v15  ;;  %v15239_v5 = vadd.f32 %v14917_v9, %v15057_v7  ;;  %v4957_v59 = vsel %vm683_vm1, %v4955_v17, %v4956_v27 }
 0x52f   :  { %6692 = vmatprep.subr.bf16.mxu1 %v18712_v28  ;;  %v15245_v53 = vadd.f32 %v14917_v9, %v15065_v33  ;;  %v15249_v56 = vadd.f32 %v14917_v9, %v15069_v23  ;;  %v15253_v15 = vadd.f32 %v14917_v9, %v15073_v2  ;;  %v5216_v41 = vsel %vm940_vm2, %v5214_v18, %v5215_v49 }
 0x530   :  { %v15258_v7 = vadd.f32 %v14917_v9, %v15095_v20  ;;  %v15262_v27 = vadd.f32 %v14917_v9, %v15099_v46  ;;  %v5219_v33 = vsel %vm940_vm2, %v5217_v8, %v5218_v60  ;;  %v15267_v23 = vadd.f32 %v14917_v9, %v15045_v38 }
 0x531   :  { %18713 = vst [vmem:[#allocation42_spill] sm:$0xff] %v15245_v53  ;;  %18714 = vst [vmem:[#allocation56_spill] sm:$0xff] %v15249_v56  ;;  %v15271_v2 = vadd.f32 %v14917_v9, %v15113_v31  ;;  %v4958_v18 = vrot.slane %v15166_v3, 7  ;;  %v15275_v20 = vpack.c.bf16 %v4957_v59, %v4955_v17  ;;  %v5220_v46 = vrot.slane %v15216_v54, 1 }
 0x532   :  { %6693 = vmatpush1.bf16.msra.mxu1 %v10801_v47  ;;  %v5221_v8 = vrot.slane %v15220_v51, 1  ;;  %v15279_v12 = vpack.c.bf16 %v5215_v49, %v5216_v41  ;;  %v15283_v38 = vpack.c.bf16 %v15169_v42, %v15166_v3  ;;  %v15288_v31 = vadd.f32 %v14917_v9, %v15121_v48 }
 0x533   :  { %18715 = vst [vmem:[#allocation58_spill] sm:$0xff] %v15275_v20  ;;  %6694 = vmatprep.subr.bf16.mxu1 %v18712_v28  ;;  %v4965_v47 = vrot.slane %v15220_v51, 7  ;;  %9301 = vmatmul.mubr.msk.bf16.gmra.mrb[8].mxu0 %vm11713_vm5, %v15275_v20  ;;  %v15295_v49 = vpack.c.bf16 %v5218_v60, %v5219_v33  ;;  %v15299_v3 = vadd.f32 %v14917_v9, %v15105_v4  ;;  %v5223_v48 = vrot.slane %v15224_v40, 1  ;;  %v10803_v33 = vld [vmem:[#allocation3 + $0xd8] sm:$0xff]  }
 0x534   :  { %18716 = vst [vmem:[#allocation12_spill] sm:$0xff] %v15279_v12  ;;  %18717 = vst [vmem:[#allocation64_spill] sm:$0xff] %v15283_v38  ;;  %v15303_v42 = vadd.f32 %v14917_v9, %v15133_v35  ;;  %10455 = vmatmul.mubr.msk.bf16.gmra.mrb[72].mxu1 %vm11722_vm6, %v15279_v12  ;;  %5815 = vmatprep.mubr.bf16.mxu0 %v15283_v38  ;;  %v5224_v41 = vrot.slane %v15267_v23, 1  ;;  %v15313_v60 = vadd.f32 %v14917_v9, %v15145_v58 }
 0x535   :  { %18718 = vst [vmem:[#allocation59_spill] sm:$0xff] %v15295_v49  ;;  %v15317_v4 = vadd.f32 %v14917_v9, %v15155_v61  ;;  %v5003_v35 = vrot.slane %v15271_v2, 7  ;;  %10458 = vmatprep.mubr.msk.bf16.mxu1 %vm11722_vm6, %v15295_v49  ;;  %v15325_v59 = vadd.f32 %v14917_v9, %v15117_v22  ;;  %v15329_v58 = vadd.f32 %v14917_v9, %v15181_v1 }
 0x536   :  { %6695 = vmatpush1.bf16.msra.mxu1 %v10802_v16  ;;  %v15332_v17 = vadd.f32 %v14917_v9, %v4748_v57  ;;  %v4960_v61 = vsel %vm683_vm1, %v4958_v18, %v4959_v0  ;;  %v5222_v12 = vsel %vm940_vm2, %v5220_v46, %v5221_v8  ;;  %v4961_v49 = vrot.slane %v15172_v19, 7 }
 0x537   :  { %6696 = vmatprep.subr.bf16.mxu1 %v18712_v28  ;;  %v18719_v22 = vrot.slane %v15216_v54, 7  ;;  %v5009_v38 = vrot.slane %v15288_v31, 7  ;;  %v5004_v1 = vrot.slane %v15325_v59, 7  ;;  %v5015_v57 = vrot.slane %v15303_v42, 7 }
 0x538   :  { %v5225_v20 = vsel %vm940_vm2, %v5223_v48, %v5224_v41  ;;  %v15349_v0 = vadd.f32 %v14917_v9, %v15061_v44  ;;  %v15353_v46 = vadd.f32 %v14917_v9, %v15125_v24  ;;  %v5021_v26 = vrot.slane %v15313_v60, 7 }
 0x539   :  { %v15341_v16 = vsel %vm683_vm1, %v18719_v22, %v4965_v47  ;;  %v15356_v47 = vpack.c.bf16 %v4960_v61, %v4958_v18  ;;  %v15358_v22 = vpack.c.bf16 %v5221_v8, %v5222_v12  ;;  %v5005_v45 = vsel %vm683_vm1, %v5003_v35, %v5004_v1  ;;  %v10805_v1 = vld [vmem:[#allocation3 + $0xe8] sm:$0xff]  }
 0x53a   :  { %18720 = vst [vmem:[#allocation17_spill] sm:$0xff] %v15349_v0  ;;  %6697 = vmatpush1.bf16.msra.mxu1 %v10803_v33  ;;  %v4962_v48 = vrot.slane %v15177_v52, 7  ;;  %v15364_v44 = vpack.c.bf16 %v15177_v52, %v15172_v19  ;;  %v15366_v14 = vpack.c.bf16 %v5005_v45, %v5003_v35  ;;  %v5010_v24 = vrot.slane %v15353_v46, 7 }
 0x53b   :  { %18721 = vst [vmem:[#allocation13_spill] sm:$0xff] %v15356_v47  ;;  %18722 = vst [vmem:[#allocation18_spill] sm:$0xff] %v15358_v22  ;;  %6698 = vmatprep.subr.bf16.mxu1 %v18712_v28  ;;  %v5226_v18 = vrot.slane %v15231_v21, 1  ;;  %v5227_v12 = vrot.slane %v15235_v25, 1  ;;  %9305 = vmatmul.mubr.msk.bf16.gmra.mrb[12].mxu0 %vm11713_vm5, %v15356_v47  ;;  %v15375_v8 = vpack.c.bf16 %v5224_v41, %v5225_v20  ;;  %v5229_v52 = vrot.slane %v15239_v5, 1 }
 0x53c   :  { %18723 = vst [vmem:[#allocation15_spill] sm:$0xff] %v15364_v44  ;;  %18724 = vst [vmem:[#allocation19_spill] sm:$0xff] %v15366_v14  ;;  %v15379_v19 = vadd.f32 %v14917_v9, %v15137_v62  ;;  %10459 = vmatmul.mubr.msk.bf16.gmra.mrb[76].mxu1 %vm11722_vm6, %v15358_v22  ;;  %5823 = vmatprep.mubr.bf16.mxu0 %v15364_v44  ;;  %v5230_v45 = vrot.slane %v15349_v0, 1  ;;  %v5011_v35 = vsel %vm683_vm1, %v5009_v38, %v5010_v24  ;;  %v10818_v22 = vld [vmem:[#allocation3 + $0x168] sm:$0xff]  }
 0x53d   :  { %18725 = vst [vmem:[#allocation60_spill] sm:$0xff] %v15375_v8  ;;  %v15390_v20 = vadd.f32 %v14917_v9, %v15149_v10  ;;  %v5232_v41 = vrot.slane %v15245_v53, 1  ;;  %v5233_v62 = vrot.slane %v15249_v56, 1  ;;  %10462 = vmatprep.mubr.msk.bf16.mxu1 %vm11722_vm6, %v15375_v8  ;;  %v15397_v33 = vpack.c.bf16 %v5011_v35, %v5009_v38  ;;  %10524 = vmatprep.subr.bf16.mxu0 %v10818_v22  ;;  %v10807_v53 = vld [vmem:[#allocation3 + $0xf0] sm:$0xff]  }
 0x53e   :  { %v5016_v61 = vrot.slane %v15379_v19, 7  ;;  %6699 = vmatpush1.bf16.msra.mxu1 %v10804_v13  ;;  %v5027_v24 = vrot.slane %v15317_v4, 7  ;;  %v5033_v10 = vrot.slane %v15329_v58, 7  ;;  %v4963_v44 = vsel %vm683_vm1, %v4961_v49, %v4962_v48  ;;  %10525 = vmatpush3.bf16.msra.mxu0 %v10818_v22 }
 0x53f   :  { %18726 = vst [vmem:[#allocation123_spill] sm:$0xff] %v15397_v33  ;;  %6700 = vmatprep.subr.bf16.mxu1 %v18712_v28  ;;  %v5022_v47 = vrot.slane %v15390_v20, 7  ;;  %v5228_v14 = vsel %vm940_vm2, %v5226_v18, %v5227_v12  ;;  %v15408_v38 = vadd.f32 %v14917_v9, %v15091_v55  ;;  %v15413_v35 = vadd.f32 %v14917_v9, %v15159_v32 }
 0x540   :  { %v5017_v13 = vsel %vm683_vm1, %v5015_v57, %v5016_v61  ;;  %v5039_v8 = vrot.slane %v15332_v17, 7  ;;  %v5231_v48 = vsel %vm940_vm2, %v5229_v52, %v5230_v45  ;;  %v5234_v18 = vsel %vm940_vm2, %v5232_v41, %v5233_v62 }
 0x541   :  { %v15417_v33 = vpack.c.bf16 %v5017_v13, %v5015_v57  ;;  %v5023_v56 = vsel %vm683_vm1, %v5021_v26, %v5022_v47  ;;  %v15421_v55 = vpack.c.bf16 %v4963_v44, %v4961_v49  ;;  %v5028_v32 = vrot.slane %v15413_v35, 7 }
 0x542   :  { %6701 = vmatpush1.bf16.msra.mxu1 %v10805_v1  ;;  %v15423_v61 = vpack.c.bf16 %v5023_v56, %v5021_v26  ;;  %v15426_v0 = vpack.c.bf16 %v5227_v12, %v5228_v14  ;;  %v15430_v52 = vpack.c.bf16 %v15220_v51, %v15216_v54  ;;  %v15435_v57 = vadd.f32 %v14917_v9, %v15193_v34 }
 0x543   :  { %18727 = vst [vmem:[#allocation45_spill] sm:$0xff] %v15417_v33  ;;  %18728 = vst [vmem:[#allocation86_spill] sm:$0xff] %v15421_v55  ;;  %6702 = vmatprep.subr.bf16.mxu1 %v18712_v28  ;;  %v15439_v49 = vadd.f32 %v14917_v9, %v15206_v63  ;;  %9309 = vmatmul.mubr.msk.bf16.gmra.mrb[16].mxu0 %vm11713_vm5, %v15421_v55  ;;  %v15444_v14 = vpack.c.bf16 %v5230_v45, %v5231_v48  ;;  %v5235_v26 = vrot.slane %v15253_v15, 1 }
 0x544   :  { %18729 = vst [vmem:[#allocation87_spill] sm:$0xff] %v15423_v61  ;;  %18730 = vst [vmem:[#allocation102_spill] sm:$0xff] %v15426_v0  ;;  %v5236_v51 = vrot.slane %v15408_v38, 1  ;;  %v5029_v56 = vsel %vm683_vm1, %v5027_v24, %v5028_v32  ;;  %v4967_v47 = vrot.slane %v15224_v40, 7  ;;  %v18733_v34 = vrot.slane %v15216_v54, 7  ;;  %10463 = vmatmul.mubr.msk.bf16.gmra.mrb[80].mxu1 %vm11722_vm6, %v15426_v0  ;;  %5831 = vmatprep.mubr.bf16.mxu0 %v15430_v52  ;;  %v10808_v54 = vld [vmem:[#allocation3 + $0xf8] sm:$0xff]  }
 0x545   :  { %18731 = vst [vmem:[#allocation62_spill] sm:$0xff] %v15430_v52  ;;  %18732 = vst [vmem:[#allocation63_spill] sm:$0xff] %v15444_v14  ;;  %v15459_v63 = vpack.c.bf16 %v5029_v56, %v5027_v24  ;;  %v5034_v44 = vrot.slane %v15435_v57, 7  ;;  %v15462_v12 = vpack.c.bf16 %v5233_v62, %v5234_v18  ;;  %10466 = vmatprep.mubr.msk.bf16.mxu1 %vm11722_vm6, %v15444_v14  ;;  %v4968_v1 = vrot.slane %v15267_v23, 7  ;;  %v18745_v14 = vld [vmem:[#allocation9_spill] sm:$0xff] }
 0x546   :  { %v15453_v22 = vpack.c.bf16 %v15341_v16, %v18733_v34  ;;  %6703 = vmatpush1.bf16.msra.mxu1 %v10807_v53  ;;  %v5040_v16 = vrot.slane %v15439_v49, 7  ;;  %v15470_v45 = vpack.c.bf16 %v15325_v59, %v15271_v2  ;;  %v15474_v41 = vpack.c.bf16 %v14953_v50, %v14950_v6  ;;  %v18760_v61 = vld [vmem:[#allocation85_spill] sm:$0xff] }
 0x547   :  { %18735 = vst [vmem:[#allocation65_spill] sm:$0xff] %v15459_v63  ;;  %18736 = vst [vmem:[#allocation112_spill] sm:$0xff] %v15462_v12  ;;  %6704 = vmatprep.subr.bf16.mxu1 %v18712_v28  ;;  %v5035_v62 = vsel %vm683_vm1, %v5033_v10, %v5034_v44  ;;  %v15481_v53 = vpack.c.bf16 %v15353_v46, %v15288_v31  ;;  %v15485_v24 = vpack.c.bf16 %v14967_v43, %v14962_v29 }
 0x548   :  { %18734 = vst [vmem:[#allocation103_spill] sm:$0xff] %v15453_v22  ;;  %18737 = vst [vmem:[#allocation71_spill] sm:$0xff] %v15470_v45  ;;  %v15489_v13 = vpack.c.bf16 %v15267_v23, %v15224_v40  ;;  %v5237_v48 = vsel %vm940_vm2, %v5235_v26, %v5236_v51  ;;  %v15492_v18 = vpack.c.bf16 %v5035_v62, %v5033_v10  ;;  %v10809_v23 = vld [vmem:[#allocation3 + $0x100] sm:$0xff]   ;;  %v18752_v62 = vld [vmem:[#allocation83_spill] sm:$0xff] }
 0x549   :  { %18738 = vst [vmem:[#allocation20_spill] sm:$0xff] %v15474_v41  ;;  %18739 = vst [vmem:[#allocation104_spill] sm:$0xff] %v15481_v53  ;;  %v5041_v32 = vsel %vm683_vm1, %v5039_v8, %v5040_v16  ;;  %v15497_v56 = vadd.f32 %v14917_v9, %v15109_v36  ;;  %v15503_v44 = vpack.c.bf16 %v15379_v19, %v15303_v42  ;;  %v18748_v26 = vld [vmem:[#allocation50_spill] sm:$0xff]  ;;  %v18749_v16 = vld [vmem:[#allocation51_spill] sm:$0xff]  ;;  %v4971_v53 = vrot.slane %v15235_v25, 7 }
 0x54a   :  { %18740 = vst [vmem:[#allocation91_spill] sm:$0xff] %v15485_v24  ;;  %18741 = vst [vmem:[#allocation84_spill] sm:$0xff] %v15489_v13  ;;  %v15499_v34 = vpack.c.bf16 %v5041_v32, %v5039_v8  ;;  %v15507_v40 = vpack.c.bf16 %v18745_v14, %v14970_v39  ;;  %6705 = vmatpush1.bf16.msra.mxu1 %v10808_v54  ;;  %v15511_v10 = vpack.c.bf16 %v15390_v20, %v15313_v60  ;;  %v18753_v32 = vld [vmem:[#allocation81_spill] sm:$0xff] }
 0x54b   :  { %18742 = vst [vmem:[#allocation108_spill] sm:$0xff] %v15492_v18  ;;  %18744 = vst [vmem:[#allocation94_spill] sm:$0xff] %v15503_v44  ;;  %v15515_v36 = vpack.c.bf16 %v18749_v16, %v18748_v26  ;;  %v15519_v8 = vpack.c.bf16 %v15413_v35, %v15317_v4  ;;  %v15523_v0 = vpack.c.bf16 %v18753_v32, %v18752_v62  ;;  %6706 = vmatprep.subr.bf16.mxu1 %v18712_v28  ;;  %v18757_v18 = vld [vmem:[#allocation6_spill] sm:$0xff]  ;;  %v18765_v44 = vld [vmem:[#allocation72_spill] sm:$0xff] }
 0x54c   :  { %18743 = vst [vmem:[#allocation106_spill] sm:$0xff] %v15499_v34  ;;  %18746 = vst [vmem:[#allocation88_spill] sm:$0xff] %v15507_v40  ;;  %v15528_v54 = vpack.c.bf16 %v15435_v57, %v15329_v58  ;;  %v18756_v34 = vld [vmem:[#allocation55_spill] sm:$0xff]  ;;  %v5239_v40 = vrot.slane %v15262_v27, 1  ;;  %9313 = vmatmul.mubr.msk.bf16.gmra.mrb[20].mxu0 %vm11713_vm5, %v15453_v22  ;;  %10467 = vmatmul.mubr.msk.bf16.gmra.mrb[84].mxu1 %vm11722_vm6, %v15462_v12  ;;  %v4715_v52 = vmul.f32 %v14914_v37, %v18765_v44 }
 0x54d   :  { %18747 = vst [vmem:[#allocation89_spill] sm:$0xff] %v15511_v10  ;;  %18750 = vst [vmem:[#allocation36_spill] sm:$0xff] %v15515_v36  ;;  %v15532_v63 = vpack.c.bf16 %v18757_v18, %v18756_v34  ;;  %v15536_v36 = vpack.c.bf16 %v15439_v49, %v15332_v17  ;;  %5839 = vmatprep.mubr.bf16.mxu0 %v15489_v13  ;;  %v18767_v13 = vld [vmem:[#allocation74_spill] sm:$0xff]  ;;  %v4969_v24 = vsel %vm683_vm1, %v4967_v47, %v4968_v1  ;;  %v10811_v1 = vld [vmem:[#allocation3 + $0x110] sm:$0xff]  }
 0x54e   :  { %18751 = vst [vmem:[#allocation10_spill] sm:$0xff] %v15519_v8  ;;  %18754 = vst [vmem:[#allocation107_spill] sm:$0xff] %v15523_v0  ;;  %v18761_v8 = vld [vmem:[#allocation23_spill] sm:$0xff]  ;;  %v5238_v0 = vrot.slane %v15258_v7, 1  ;;  %6707 = vmatpush1.bf16.msra.mxu1 %v10809_v23  ;;  %v4717_v22 = vmul.f32 %v14914_v37, %v18767_v13  ;;  %v15572_v44 = vadd.f32 %v14917_v9, %v4715_v52 }
 0x54f   :  { %18755 = vst [vmem:[#allocation117_spill] sm:$0xff] %v15528_v54  ;;  %18758 = vst [vmem:[#allocation39_spill] sm:$0xff] %v15532_v63  ;;  %v15540_v10 = vpack.c.bf16 %v18761_v8, %v18760_v61  ;;  %v15547_v54 = vpack.c.bf16 %v5236_v51, %v5237_v48  ;;  %v18764_v63 = vld [vmem:[#allocation76_spill] sm:$0xff]  ;;  %v10810_v51 = vld [vmem:[#allocation3 + $0x108] sm:$0xff]   ;;  %6708 = vmatprep.subr.bf16.mxu1 %v18712_v28  ;;  %v15582_v13 = vpack.c.bf16 %v4969_v24, %v4967_v47 }
 0x550   :  { %18759 = vst [vmem:[#allocation101_spill] sm:$0xff] %v15536_v36  ;;  %v5241_v36 = vrot.slane %v15299_v3, 1  ;;  %v4714_v33 = vmul.f32 %v14914_v37, %v18764_v63  ;;  %v18766_v48 = vld [vmem:[#allocation78_spill] sm:$0xff]  ;;  %v15580_v55 = vadd.f32 %v14917_v9, %v4717_v22  ;;  %v5245_v22 = vrot.slane %v15572_v44, 1  ;;  %v18772_v24 = vld [vmem:[#allocation33_spill] sm:$0xff] }
 0x551   :  { %18762 = vst [vmem:[#allocation96_spill] sm:$0xff] %v15540_v10  ;;  %18763 = vst [vmem:[#allocation105_spill] sm:$0xff] %v15547_v54  ;;  %v5242_v10 = vrot.slane %v15497_v56, 1  ;;  %10470 = vmatprep.mubr.msk.bf16.mxu1 %vm11722_vm6, %v15547_v54  ;;  %v4716_v12 = vmul.f32 %v14914_v37, %v18766_v48  ;;  %v5240_v54 = vsel %vm940_vm2, %v5238_v0, %v5239_v40 }
 0x552   :  { %v15569_v63 = vadd.f32 %v14917_v9, %v4714_v33  ;;  %18768 = vst [vmem:[#allocation44_spill] sm:$0xff] %v15582_v13  ;;  %6709 = vmatpush1.bf16.msra.mxu1 %v10810_v51  ;;  %v4970_v33 = vrot.slane %v15231_v21, 7  ;;  %v15586_v52 = vpack.c.bf16 %v5239_v40, %v5240_v54  ;;  %v15590_v0 = vpack.c.bf16 %v15235_v25, %v15231_v21 }
 0x553   :  { %v15576_v23 = vadd.f32 %v14917_v9, %v4716_v12  ;;  %v5243_v48 = vsel %vm940_vm2, %v5241_v36, %v5242_v10  ;;  %6710 = vmatprep.subr.bf16.mxu1 %v18712_v28  ;;  %v5248_v25 = vrot.slane %v15580_v55, 1  ;;  %v4718_v40 = vmul.f32 %v14914_v37, %v18772_v24  ;;  %v18773_v36 = vld [vmem:[#allocation40_spill] sm:$0xff] }
 0x554   :  { %18769 = vst [vmem:[#allocation16_spill] sm:$0xff] %v15586_v52  ;;  %18770 = vst [vmem:[#allocation115_spill] sm:$0xff] %v15590_v0  ;;  %v5244_v12 = vrot.slane %v15569_v63, 1  ;;  %9317 = vmatmul.mubr.msk.bf16.gmra.mrb[24].mxu0 %vm11713_vm5, %v15582_v13  ;;  %v15598_v47 = vpack.c.bf16 %v5242_v10, %v5243_v48  ;;  %10471 = vmatmul.mubr.msk.bf16.gmra.mrb[88].mxu1 %vm11722_vm6, %v15586_v52  ;;  %v4719_v54 = vmul.f32 %v14914_v37, %v18773_v36  ;;  %v10812_v10 = vld [vmem:[#allocation3 + $0x118] sm:$0xff]  }
 0x555   :  { %5847 = vmatprep.mubr.bf16.mxu0 %v15590_v0  ;;  %v5247_v21 = vrot.slane %v15576_v23, 1  ;;  %v4972_v51 = vsel %vm683_vm1, %v4970_v33, %v4971_v53  ;;  %v15616_v48 = vadd.f32 %v14917_v9, %v4718_v40  ;;  %v18776_v53 = vld [vmem:[#allocation17_spill] sm:$0xff] }
 0x556   :  { %18771 = vst [vmem:[#allocation31_spill] sm:$0xff] %v15598_v47  ;;  %10474 = vmatprep.mubr.msk.bf16.mxu1 %vm11722_vm6, %v15598_v47  ;;  %6711 = vmatpush1.bf16.msra.mxu1 %v10811_v1  ;;  %v15619_v52 = vadd.f32 %v14917_v9, %v4719_v54  ;;  %v5246_v24 = vsel %vm940_vm2, %v5244_v12, %v5245_v22  ;;  %v10813_v47 = vld [vmem:[#allocation3 + $0x120] sm:$0xff]   ;;  %v4973_v1 = vrot.slane %v15239_v5, 7  ;;  %v4974_v13 = vrot.slane %v18776_v53, 7  ;;  %v18785_v9 = vld [vmem:[#allocation7_spill] sm:$0xff] }
 0x557   :  { %6712 = vmatprep.subr.bf16.mxu1 %v18712_v28  ;;  %v5249_v36 = vsel %vm940_vm2, %v5247_v21, %v5248_v25  ;;  %v15623_v37 = vpack.c.bf16 %v4972_v51, %v4970_v33  ;;  %v15626_v0 = vpack.c.bf16 %v5245_v22, %v5246_v24  ;;  %v15631_v40 = vpack.c.bf16 %v18776_v53, %v15239_v5  ;;  %v10814_v5 = vld [vmem:[#allocation3 + $0x128] sm:$0xff]   ;;  %v10819_v22 = vld [vmem:[#allocation3 + $0x170] sm:$0xff]   ;;  %v18780_v24 = vld [vmem:[#allocation42_spill] sm:$0xff] }
 0x558   :  { %v5250_v12 = vrot.slane %v15616_v48, 1  ;;  %v5251_v21 = vrot.slane %v15619_v52, 1  ;;  %v15639_v33 = vpack.c.bf16 %v5248_v25, %v5249_v36  ;;  %v4975_v54 = vsel %vm683_vm1, %v4973_v1, %v4974_v13  ;;  %10526 = vmatprep.subr.bf16.mxu0 %v10819_v22  ;;  %v10816_v51 = vld [vmem:[#allocation3 + $0x130] sm:$0xff]   ;;  %v18784_v13 = vld [vmem:[#allocation79_spill] sm:$0xff] }
 0x559   :  { %18774 = vst [vmem:[#allocation111_spill] sm:$0xff] %v15623_v37  ;;  %18775 = vst [vmem:[#allocation11_spill] sm:$0xff] %v15626_v0  ;;  %10527 = vmatpush3.bf16.msra.mxu0 %v10819_v22  ;;  %v4976_v36 = vrot.slane %v18780_v24, 7  ;;  %v18781_v53 = vld [vmem:[#allocation56_spill] sm:$0xff]  ;;  %v5257_v22 = vrot.slane %v18785_v9, 1 }
 0x55a   :  { %6713 = vmatpush1.bf16.msra.mxu1 %v10812_v10  ;;  %18777 = vst [vmem:[#allocation92_spill] sm:$0xff] %v15631_v40  ;;  %18778 = vst [vmem:[#allocation98_spill] sm:$0xff] %v15639_v33  ;;  %v5252_v25 = vsel %vm940_vm2, %v5250_v12, %v5251_v21  ;;  %v15651_v10 = vpack.c.bf16 %v4975_v54, %v4973_v1  ;;  %v5256_v12 = vrot.slane %v18784_v13, 1  ;;  %v5259_v1 = vrot.slane %v15271_v2, 1 }
 0x55b   :  { %6714 = vmatprep.subr.bf16.mxu1 %v18712_v28 }
 0x55c   :  { %9321 = vmatmul.mubr.msk.bf16.gmra.mrb[28].mxu0 %vm11713_vm5, %v15623_v37  ;;  %10475 = vmatmul.mubr.msk.bf16.gmra.mrb[92].mxu1 %vm11722_vm6, %v15626_v0  ;;  %18779 = vst [vmem:[#allocation93_spill] sm:$0xff] %v15651_v10  ;;  %v4977_v0 = vrot.slane %v18781_v53, 7 }
 0x55d   :  { %5855 = vmatprep.mubr.bf16.mxu0 %v15631_v40  ;;  %10478 = vmatprep.mubr.msk.bf16.mxu1 %vm11722_vm6, %v15639_v33  ;;  %v15655_v33 = vpack.c.bf16 %v5251_v21, %v5252_v25  ;;  %v5260_v21 = vrot.slane %v15325_v59, 1  ;;  %v5258_v25 = vsel %vm940_vm2, %v5256_v12, %v5257_v22  ;;  %v4980_v59 = vrot.slane %v15408_v38, 7 }
 0x55e   :  { %6715 = vmatpush1.bf16.msra.mxu1 %v10813_v47  ;;  %v15659_v47 = vpack.c.bf16 %v18781_v53, %v18780_v24  ;;  %v4978_v54 = vsel %vm683_vm1, %v4976_v36, %v4977_v0  ;;  %v15681_v2 = vpack.c.bf16 %v5257_v22, %v5258_v25  ;;  %v5262_v0 = vrot.slane %v14950_v6, 1 }
 0x55f   :  { %6716 = vmatprep.subr.bf16.mxu1 %v18712_v28  ;;  %18782 = vst [vmem:[#allocation41_spill] sm:$0xff] %v15655_v33  ;;  %v5261_v24 = vsel %vm940_vm2, %v5259_v1, %v5260_v21  ;;  %v15678_v53 = vpack.c.bf16 %v4978_v54, %v4976_v36  ;;  %v5265_v12 = vrot.slane %v15288_v31, 1  ;;  %v4983_v31 = vrot.slane %v15262_v27, 7 }
 0x560   :  { %18783 = vst [vmem:[#allocation37_spill] sm:$0xff] %v15659_v47  ;;  %v15693_v36 = vpack.c.bf16 %v5260_v21, %v5261_v24  ;;  %v15717_v54 = vpack.c.bf16 %v15262_v27, %v15258_v7  ;;  %v5268_v25 = vrot.slane %v14962_v29, 1  ;;  %v5269_v24 = vrot.slane %v14967_v43, 1 }
 0x561   :  { %18786 = vst [vmem:[#allocation66_spill] sm:$0xff] %v15678_v53 }
 0x562   :  { %6717 = vmatpush1.bf16.msra.mxu1 %v10814_v5  ;;  %v10817_v5 = vld [vmem:[#allocation3 + $0x138] sm:$0xff]   ;;  %18789 = vst [vmem:[#allocation49_spill] sm:$0xff] %v15717_v54 }
 0x563   :  { %6718 = vmatprep.subr.bf16.mxu1 %v18712_v28 }
 0x564   :  { %9325 = vmatmul.mubr.msk.bf16.gmra.mrb[32].mxu0 %vm11713_vm5, %v15651_v10  ;;  %10479 = vmatmul.mubr.msk.bf16.gmra.mrb[96].mxu1 %vm11722_vm6, %v15655_v33  ;;  %v4979_v33 = vrot.slane %v15253_v15, 7 }
 0x565   :  { %5863 = vmatprep.mubr.bf16.mxu0 %v15659_v47  ;;  %10482 = vmatprep.mubr.bf16.mxu1 %v18712_v28  ;;  %v5263_v47 = vrot.slane %v14953_v50, 1 }
 0x566   :  { %6719 = vmatpush1.bf16.msra.mxu1 %v10816_v51  ;;  %v15686_v51 = vpack.c.bf16 %v15408_v38, %v15253_v15  ;;  %v5266_v15 = vrot.slane %v15353_v46, 1  ;;  %v4981_v6 = vsel %vm683_vm1, %v4979_v33, %v4980_v59  ;;  %v5270_v59 = vsel %vm940_vm2, %v5268_v25, %v5269_v24 }
 0x567   :  { %6720 = vmatprep.subr.bf16.mxu1 %v18712_v28  ;;  %v5264_v38 = vsel %vm940_vm2, %v5262_v0, %v5263_v47  ;;  %v15709_v21 = vpack.c.bf16 %v4981_v6, %v4979_v33  ;;  %v15748_v6 = vpack.c.bf16 %v15497_v56, %v15299_v3  ;;  %v4988_v25 = vrot.slane %v15569_v63, 7 }
 0x568   :  { %18787 = vst [vmem:[#allocation109_spill] sm:$0xff] %v15686_v51  ;;  %v5267_v1 = vsel %vm940_vm2, %v5265_v12, %v5266_v15  ;;  %v15713_v46 = vpack.c.bf16 %v5263_v47, %v5264_v38  ;;  %v5271_v47 = vrot.slane %v15303_v42, 1  ;;  %v15743_v42 = vpack.c.bf16 %v5269_v24, %v5270_v59 }
 0x569   :  { %18788 = vst [vmem:[#allocation48_spill] sm:$0xff] %v15709_v21  ;;  %v15724_v33 = vpack.c.bf16 %v5266_v15, %v5267_v1  ;;  %v4985_v15 = vrot.slane %v15299_v3, 7  ;;  %18791 = vst [vmem:[#allocation113_spill] sm:$0xff] %v15748_v6  ;;  %v5274_v38 = vrot.slane %v14970_v39, 1  ;;  %v5278_v3 = vrot.slane %v15390_v20, 1 }
 0x56a   :  { %6721 = vmatpush1.bf16.msra.mxu1 %v10817_v5  ;;  %v4982_v5 = vrot.slane %v15258_v7, 7  ;;  %v5272_v7 = vrot.slane %v15379_v19, 1  ;;  %v4986_v19 = vrot.slane %v15497_v56, 7  ;;  %v4989_v24 = vrot.slane %v15572_v44, 7 }
 0x56b   :  { %v5280_v20 = vrot.slane %v18748_v26, 1  ;;  %v10820_v26 = vld [vmem:[#allocation3 + $0x178] sm:$0xff]  }
 0x56c   :  { %9329 = vmatmul.mubr.msk.bf16.gmra.mrb[36].mxu0 %vm11713_vm5, %v15678_v53  ;;  %10483 = vmatmul.mubr.msk.bf16.gmra.mrb[100].mxu1 %vm11722_vm6, %v15681_v2  ;;  %v4984_v43 = vsel %vm683_vm1, %v4982_v5, %v4983_v31  ;;  %v5273_v0 = vsel %vm940_vm2, %v5271_v47, %v5272_v7  ;;  %v4987_v39 = vsel %vm683_vm1, %v4985_v15, %v4986_v19 }
 0x56d   :  { %5871 = vmatprep.mubr.bf16.mxu0 %v15686_v51  ;;  %10486 = vmatprep.mubr.msk.bf16.mxu1 %vm11722_vm6, %v15693_v36  ;;  %v15740_v12 = vpack.c.bf16 %v4984_v43, %v4982_v5  ;;  %v15755_v1 = vpack.c.bf16 %v5272_v7, %v5273_v0  ;;  %v5277_v5 = vrot.slane %v15313_v60, 1  ;;  %v15769_v31 = vpack.c.bf16 %v4987_v39, %v4985_v15 }
 0x56e   :  { %v15777_v60 = vpack.c.bf16 %v15572_v44, %v15569_v63  ;;  %v5281_v7 = vrot.slane %v18749_v16, 1  ;;  %v5284_v63 = vrot.slane %v15413_v35, 1  ;;  %v4990_v16 = vsel %vm683_vm1, %v4988_v25, %v4989_v24  ;;  %10528 = vmatprep.subr.bf16.mxu0 %v10820_v26 }
 0x56f   :  { %18790 = vst [vmem:[#allocation110_spill] sm:$0xff] %v15740_v12  ;;  %v5279_v56 = vsel %vm940_vm2, %v5277_v5, %v5278_v3  ;;  %18792 = vst [vmem:[#allocation53_spill] sm:$0xff] %v15769_v31  ;;  %10529 = vmatpush3.bf16.msra.mxu0 %v10820_v26  ;;  %v15798_v0 = vpack.c.bf16 %v4990_v16, %v4988_v25  ;;  %v4992_v15 = vrot.slane %v15580_v55, 7  ;;  %v5293_v24 = vrot.slane %v18757_v18, 1 }
 0x570   :  { %18793 = vst [vmem:[#allocation114_spill] sm:$0xff] %v15777_v60  ;;  %v15784_v43 = vpack.c.bf16 %v5278_v3, %v5279_v56  ;;  %v5282_v44 = vsel %vm940_vm2, %v5280_v20, %v5281_v7  ;;  %7621 = vmatprep.subr.bf16.mxu0 %v18712_v28  ;;  %v15807_v19 = vpack.c.bf16 %v15580_v55, %v15576_v23  ;;  %v5289_v3 = vrot.slane %v15329_v58, 1 }
 0x571   :  { %18794 = vst [vmem:[#allocation116_spill] sm:$0xff] %v15798_v0  ;;  %v15802_v35 = vpack.c.bf16 %v5281_v7, %v5282_v44  ;;  %v5290_v55 = vrot.slane %v15435_v57, 1  ;;  %v4995_v56 = vrot.slane %v15619_v52, 7  ;;  %v15836_v58 = vpack.c.bf16 %v15619_v52, %v15616_v48  ;;  %v10821_v44 = vld [vmem:[#allocation3 + $0x200] sm:$0xff]  }
 0x572   :  { %18795 = vst [vmem:[#allocation118_spill] sm:$0xff] %v15807_v19  ;;  %v5292_v57 = vrot.slane %v18756_v34, 1  ;;  %v5295_v7 = vrot.slane %v15332_v17, 1  ;;  %v5296_v52 = vrot.slane %v15439_v49, 1  ;;  %v5298_v26 = vrot.slane %v18760_v61, 1  ;;  %10594 = vmatprep.subr.bf16.mxu1 %v10821_v44 }
 0x573   :  { %18797 = vst [vmem:[#allocation22_spill] sm:$0xff] %v15836_v58  ;;  %v5299_v17 = vrot.slane %v18761_v8, 1  ;;  %v15880_v8 = vpack.c.bf16 %v18785_v9, %v18784_v13  ;;  %v18806_v9 = vld [vmem:[#allocation97_spill] sm:$0xff]  ;;  %v18807_v13 = vld [vmem:[#allocation19_spill] sm:$0xff] }
 0x574   :  { %9333 = vmatmul.mubr.msk.bf16.gmra.mrb[40].mxu0 %vm11713_vm5, %v15709_v21  ;;  %10487 = vmatmul.mubr.msk.bf16.gmra.mrb[104].mxu1 %vm11722_vm6, %v15713_v46  ;;  %v5294_v34 = vsel %vm940_vm2, %v5292_v57, %v5293_v24  ;;  %v18816_v57 = vld [vmem:[#allocation91_spill] sm:$0xff] }
 0x575   :  { %5879 = vmatprep.mubr.bf16.mxu0 %v15717_v54  ;;  %10490 = vmatprep.mubr.msk.bf16.mxu1 %vm11722_vm6, %v15724_v33  ;;  %v5300_v61 = vsel %vm940_vm2, %v5298_v26, %v5299_v17  ;;  %v18823_v26 = vld [vmem:[#allocation44_spill] sm:$0xff] }
 0x576   :  { %v15876_v16 = vpack.c.bf16 %v5299_v17, %v5300_v61  ;;  %v18824_v17 = vld [vmem:[#allocation88_spill] sm:$0xff]  ;;  %v18825_v61 = vld [vmem:[#allocation115_spill] sm:$0xff] }
 0x578   :  { %18802 = vst [vmem:[#allocation32_spill] sm:$0xff] %v15876_v16 }
 0x57c   :  { %9337 = vmatmul.mubr.msk.bf16.gmra.mrb[44].mxu0 %vm11713_vm5, %v15740_v12  ;;  %10491 = vmatmul.mubr.msk.bf16.gmra.mrb[108].mxu1 %vm11722_vm6, %v15743_v42 }
 0x57d   :  { %5887 = vmatprep.mubr.bf16.mxu0 %v15748_v6  ;;  %10494 = vmatprep.mubr.msk.bf16.mxu1 %vm11722_vm6, %v15755_v1 }
 0x584   :  { %9341 = vmatmul.mubr.msk.bf16.gmra.mrb[48].mxu0 %vm11713_vm5, %v15769_v31 }
 0x585   :  { %5895 = vmatprep.mubr.bf16.mxu0 %v15777_v60 }
 0x58c   :  { %9345 = vmatmul.mubr.msk.bf16.gmra.mrb[52].mxu0 %vm11713_vm5, %v15798_v0 }
 0x58d   :  { %v15705_v50 = vpop.f32.mrb[0].mxu0  ;;  %5903 = vmatprep.mubr.bf16.mxu0 %v15807_v19 }
 0x58e   :  { %v5795_v22 = vpop.f32.mrb[1].mxu0 }
 0x58f   :  { %v15735_v29 = vpop.f32.mrb[2].mxu0  ;;  %v5275_v22 = vrot.slane %v18745_v14, 1 }
 0x590   :  { %v5798_v27 = vpop.f32.mrb[3].mxu0 }
 0x591   :  { %v5276_v14 = vsel %vm940_vm2, %v5274_v38, %v5275_v22  ;;  %v5283_v27 = vrot.slane %v15317_v4, 1  ;;  %v4991_v4 = vrot.slane %v15576_v23, 7  ;;  %v5286_v38 = vrot.slane %v18752_v62, 1 }
 0x592   :  { %v15773_v47 = vpack.c.bf16 %v5275_v22, %v5276_v14  ;;  %v5287_v22 = vrot.slane %v18753_v32, 1  ;;  %v5291_v23 = vsel %vm940_vm2, %v5289_v3, %v5290_v55  ;;  %v4994_v14 = vrot.slane %v15616_v48, 7  ;;  %v18810_v3 = vld [vmem:[#allocation8_spill] sm:$0xff] }
 0x593   :  { %v5285_v59 = vsel %vm940_vm2, %v5283_v27, %v5284_v63  ;;  %v4993_v62 = vsel %vm683_vm1, %v4991_v4, %v4992_v15  ;;  %v15843_v20 = vpack.c.bf16 %v5290_v55, %v5291_v23  ;;  %v5297_v48 = vsel %vm940_vm2, %v5295_v7, %v5296_v52  ;;  %v18805_v15 = vld [vmem:[#allocation100_spill] sm:$0xff]  ;;  %v18811_v55 = vld [vmem:[#allocation13_spill] sm:$0xff]  ;;  %v10826_v23 = vld [vmem:[#allocation3 + $0x208] sm:$0xff]  }
 0x594   :  { %10495 = vmatmul.mubr.msk.bf16.gmra.mrb[112].mxu1 %vm11722_vm6, %v15773_v47  ;;  %v15814_v5 = vpack.c.bf16 %v5284_v63, %v5285_v59  ;;  %v5288_v32 = vsel %vm940_vm2, %v5286_v38, %v5287_v22  ;;  %v15828_v39 = vpack.c.bf16 %v4993_v62, %v4991_v4  ;;  %v4996_v18 = vsel %vm683_vm1, %v4994_v14, %v4995_v56  ;;  %v18803_v59 = vld [vmem:[#allocation99_spill] sm:$0xff]  ;;  %v18804_v4 = vld [vmem:[#allocation57_spill] sm:$0xff]  ;;  %v18808_v38 = vld [vmem:[#allocation58_spill] sm:$0xff] }
 0x595   :  { %10498 = vmatprep.mubr.msk.bf16.mxu1 %vm11722_vm6, %v15784_v43  ;;  %v15832_v25 = vpack.c.bf16 %v5287_v22, %v5288_v32  ;;  %18798 = vst [vmem:[#allocation125_spill] sm:$0xff] %v15843_v20  ;;  %v15857_v27 = vpack.c.bf16 %v4996_v18, %v4994_v14  ;;  %v15859_v63 = vpack.c.bf16 %v5293_v24, %v5294_v34  ;;  %v18809_v22 = vld [vmem:[#allocation64_spill] sm:$0xff]  ;;  %v18813_v32 = vld [vmem:[#allocation15_spill] sm:$0xff]  ;;  %v18815_v56 = vld [vmem:[#allocation86_spill] sm:$0xff] }
 0x596   :  { %18796 = vst [vmem:[#allocation69_spill] sm:$0xff] %v15828_v39  ;;  %9349 = vmatmul.mubr.msk.bf16.gmra.mrb[56].mxu0 %vm11713_vm5, %v15828_v39  ;;  %v15866_v49 = vpack.c.bf16 %v5296_v52, %v5297_v48  ;;  %v18812_v62 = vld [vmem:[#allocation104_spill] sm:$0xff]  ;;  %v18814_v14 = vld [vmem:[#allocation123_spill] sm:$0xff]  ;;  %v18817_v24 = vld [vmem:[#allocation62_spill] sm:$0xff] }
 0x597   :  { %5911 = vmatprep.mubr.bf16.mxu0 %v15836_v58  ;;  %18799 = vst [vmem:[#allocation27_spill] sm:$0xff] %v15857_v27  ;;  %18800 = vst [vmem:[#allocation29_spill] sm:$0xff] %v15859_v63  ;;  %v18818_v7 = vld [vmem:[#allocation24_spill] sm:$0xff]  ;;  %v18819_v52 = vld [vmem:[#allocation103_spill] sm:$0xff] }
 0x598   :  { %18801 = vst [vmem:[#allocation75_spill] sm:$0xff] %v15866_v49  ;;  %v18820_v18 = vld [vmem:[#allocation94_spill] sm:$0xff]  ;;  %v18821_v34 = vld [vmem:[#allocation84_spill] sm:$0xff]  ;;  %v18822_v48 = vld [vmem:[#allocation45_spill] sm:$0xff] }
 0x59c   :  { %10499 = vmatmul.mubr.msk.bf16.gmra.mrb[116].mxu1 %vm11722_vm6, %v15802_v35 }
 0x59d   :  { %10502 = vmatprep.mubr.msk.bf16.mxu1 %vm11722_vm6, %v15814_v5 }
 0x59e   :  { %9353 = vmatmul.mubr.msk.bf16.gmra.mrb[60].mxu0 %vm11713_vm5, %v15857_v27 }
 0x59f   :  { %5919 = vmatprep.mubr.bf16.mxu0 %v18712_v28 }
 0x5a4   :  { %10503 = vmatmul.mubr.msk.bf16.gmra.mrb[120].mxu1 %vm11722_vm6, %v15832_v25 }
 0x5a5   :  { %10506 = vmatprep.mubr.msk.bf16.mxu1 %vm11722_vm6, %v15843_v20 }
 0x5a6   :  { %5920 = vmatmul.mubr.bf16.gmra.mrb[64].mxu0 %v18712_v28 }
 0x5a7   :  { %5927 = vmatprep.mubr.bf16.mxu0 %v15880_v8 }
 0x5ac   :  { %10507 = vmatmul.mubr.msk.bf16.gmra.mrb[124].mxu1 %vm11722_vm6, %v15859_v63 }
 0x5ad   :  { %10510 = vmatprep.mubr.msk.bf16.mxu1 %vm11722_vm6, %v15866_v49 }
 0x5ae   :  { %9357 = vmatmul.mubr.msk.bf16.gmra.mrb[68].mxu0 %vm11713_vm5, %v18804_v4 }
 0x5af   :  { %5935 = vmatprep.mubr.bf16.mxu0 %v15470_v45 }
 0x5b4   :  { %10511 = vmatmul.mubr.msk.bf16.gmra.mrb[128].mxu1 %vm11722_vm6, %v15876_v16 }
 0x5b5   :  { %6722 = vmatprep.mubr.bf16.mxu1 %v18803_v59  ;;  %v18827_v59 = vld [vmem:[#allocation89_spill] sm:$0xff] }
 0x5b6   :  { %9361 = vmatmul.mubr.msk.bf16.gmra.mrb[72].mxu0 %vm11713_vm5, %v18807_v13 }
 0x5b7   :  { %5943 = vmatprep.mubr.bf16.mxu0 %v15474_v41 }
 0x5bc   :  { %9507 = vmatmul.mubr.msk.bf16.vlgmr.msra.gmra.mrb[132].mxu1 %vm11713_vm5, %v18805_v15  ;;  %v10831_v15 = vld [vmem:[#allocation3 + $0x210] sm:$0xff]  }
 0x5bd   :  { %6730 = vmatprep.mubr.bf16.mxu1 %v18806_v9  ;;  %10595 = vmatpush3.bf16.msra.mxu1 %v10821_v44  ;;  %v18826_v44 = vld [vmem:[#allocation25_spill] sm:$0xff]  ;;  %v18841_v9 = vld [vmem:[#allocation108_spill] sm:$0xff] }
 0x5be   :  { %9365 = vmatmul.mubr.msk.bf16.gmra.mrb[76].mxu0 %vm11713_vm5, %v18810_v3  ;;  %10596 = vmatprep.subr.bf16.mxu1 %v10826_v23 }
 0x5bf   :  { %5951 = vmatprep.mubr.bf16.mxu0 %v18812_v62 }
 0x5c1   :  { %10597 = vmatpush3.bf16.msra.mxu1 %v10826_v23  ;;  %v18828_v23 = vld [vmem:[#allocation87_spill] sm:$0xff] }
 0x5c2   :  { %10598 = vmatprep.subr.bf16.mxu1 %v10831_v15 }
 0x5c4   :  { %9511 = vmatmul.mubr.msk.bf16.gmra.mrb[136].mxu1 %vm11713_vm5, %v18808_v38 }
 0x5c5   :  { %6738 = vmatprep.mubr.bf16.mxu1 %v18809_v22  ;;  %10599 = vmatpush3.bf16.msra.mxu1 %v10831_v15  ;;  %v18834_v15 = vld [vmem:[#allocation107_spill] sm:$0xff] }
 0x5c6   :  { %9369 = vmatmul.mubr.msk.bf16.gmra.mrb[80].mxu0 %vm11713_vm5, %v18814_v14 }
 0x5c7   :  { %5959 = vmatprep.mubr.bf16.mxu0 %v18816_v57 }
 0x5cc   :  { %9515 = vmatmul.mubr.msk.bf16.gmra.mrb[140].mxu1 %vm11713_vm5, %v18811_v55 }
 0x5cd   :  { %6746 = vmatprep.mubr.bf16.mxu1 %v18813_v32 }
 0x5ce   :  { %9373 = vmatmul.mubr.msk.bf16.gmra.mrb[84].mxu0 %vm11713_vm5, %v18818_v7 }
 0x5cf   :  { %5967 = vmatprep.mubr.bf16.mxu0 %v18820_v18 }
 0x5d4   :  { %9519 = vmatmul.mubr.msk.bf16.gmra.mrb[144].mxu1 %vm11713_vm5, %v18815_v56 }
 0x5d5   :  { %6754 = vmatprep.mubr.bf16.mxu1 %v18817_v24 }
 0x5d6   :  { %9377 = vmatmul.mubr.msk.bf16.gmra.mrb[88].mxu0 %vm11713_vm5, %v18822_v48 }
 0x5d7   :  { %5975 = vmatprep.mubr.bf16.mxu0 %v18824_v17 }
 0x5dc   :  { %9523 = vmatmul.mubr.msk.bf16.gmra.mrb[148].mxu1 %vm11713_vm5, %v18819_v52 }
 0x5dd   :  { %6762 = vmatprep.mubr.bf16.mxu1 %v18821_v34  ;;  %v18833_v34 = vld [vmem:[#allocation65_spill] sm:$0xff] }
 0x5de   :  { %9381 = vmatmul.mubr.msk.bf16.gmra.mrb[92].mxu0 %vm11713_vm5, %v18826_v44 }
 0x5df   :  { %5983 = vmatprep.mubr.bf16.mxu0 %v18827_v59 }
 0x5e4   :  { %9527 = vmatmul.mubr.msk.bf16.gmra.mrb[152].mxu1 %vm11713_vm5, %v18823_v26  ;;  %v18830_v26 = vld [vmem:[#allocation37_spill] sm:$0xff] }
 0x5e5   :  { %6770 = vmatprep.mubr.bf16.mxu1 %v18825_v61  ;;  %v18829_v61 = vld [vmem:[#allocation36_spill] sm:$0xff] }
 0x5e6   :  { %9385 = vmatmul.mubr.msk.bf16.gmra.mrb[96].mxu0 %vm11713_vm5, %v18828_v23 }
 0x5e7   :  { %5991 = vmatprep.mubr.bf16.mxu0 %v18829_v61 }
 0x5ec   :  { %9531 = vmatmul.mubr.msk.bf16.gmra.mrb[156].mxu1 %vm11713_vm5, %v15623_v37  ;;  %v18831_v37 = vld [vmem:[#allocation26_spill] sm:$0xff] }
 0x5ed   :  { %6778 = vmatprep.mubr.bf16.mxu1 %v15631_v40  ;;  %v18832_v40 = vld [vmem:[#allocation10_spill] sm:$0xff] }
 0x5ee   :  { %9389 = vmatmul.mubr.msk.bf16.gmra.mrb[100].mxu0 %vm11713_vm5, %v18831_v37 }
 0x5ef   :  { %5999 = vmatprep.mubr.bf16.mxu0 %v18832_v40 }
 0x5f4   :  { %9535 = vmatmul.mubr.msk.bf16.gmra.mrb[160].mxu1 %vm11713_vm5, %v15651_v10 }
 0x5f5   :  { %6786 = vmatprep.mubr.bf16.mxu1 %v18830_v26  ;;  %v18835_v26 = vld [vmem:[#allocation28_spill] sm:$0xff] }
 0x5f6   :  { %9393 = vmatmul.mubr.msk.bf16.gmra.mrb[104].mxu0 %vm11713_vm5, %v18833_v34 }
 0x5f7   :  { %6007 = vmatprep.mubr.bf16.mxu0 %v18834_v15 }
 0x5fc   :  { %9539 = vmatmul.mubr.msk.bf16.gmra.mrb[164].mxu1 %vm11713_vm5, %v15678_v53 }
 0x5fd   :  { %6794 = vmatprep.mubr.bf16.mxu1 %v15686_v51  ;;  %v18836_v51 = vld [vmem:[#allocation117_spill] sm:$0xff] }
 0x5fe   :  { %9397 = vmatmul.mubr.msk.bf16.gmra.mrb[108].mxu0 %vm11713_vm5, %v18835_v26  ;;  %v5801_v53 = vpop.f32.mrb[4].mxu0 }
 0x5ff   :  { %6015 = vmatprep.mubr.bf16.mxu0 %v18836_v51  ;;  %v10452_v10 = vpop.f32.mrb[68].mxu1  ;;  %v5803_v52 = vpop.f32.mrb[5].mxu0 }
 0x600   :  { %v6082_v24 = vpop.f32.mrb[69].mxu1  ;;  %v5804_v56 = vpop.f32.mrb[6].mxu0  ;;  %v10836_v52 = vld [vmem:[#allocation3 + $0x218] sm:$0xff]  }
 0x601   :  { %v10453_v32 = vpop.f32.mrb[70].mxu1  ;;  %v5806_v55 = vpop.f32.mrb[7].mxu0  ;;  %10600 = vmatprep.subr.bf16.mxu1 %v10836_v52 }
 0x602   :  { %v15981_v22 = vadd.f32 %v10453_v32, %v5804_v56  ;;  %v6085_v38 = vpop.f32.mrb[71].mxu1  ;;  %10601 = vmatpush3.bf16.msra.mxu1 %v10836_v52  ;;  %v18846_v52 = vld [vmem:[#allocation101_spill] sm:$0xff] }
 0x604   :  { %9543 = vmatmul.mubr.msk.bf16.gmra.mrb[168].mxu1 %vm11713_vm5, %v15709_v21  ;;  %v15976_v21 = vadd.f32 %v10452_v10, %v5801_v53  ;;  %18839 = vst [vmem:[#allocation121_spill] sm:$0xff] %v15981_v22  ;;  %v18842_v10 = vld [vmem:[#allocation39_spill] sm:$0xff] }
 0x605   :  { %6802 = vmatprep.mubr.bf16.mxu1 %v15717_v54  ;;  %v15979_v54 = vadd.f32 %v6082_v24, %v15705_v50 }
 0x606   :  { %18837 = vst [vmem:[#allocation120_spill] sm:$0xff] %v15976_v21  ;;  %9401 = vmatmul.mubr.msk.bf16.gmra.mrb[112].mxu0 %vm11713_vm5, %v18841_v9  ;;  %v5809_v53 = vpop.f32.mrb[8].mxu0 }
 0x607   :  { %18838 = vst [vmem:[#allocation90_spill] sm:$0xff] %v15979_v54  ;;  %6023 = vmatprep.mubr.bf16.mxu0 %v18842_v10  ;;  %v10456_v50 = vpop.f32.mrb[72].mxu1  ;;  %v5811_v55 = vpop.f32.mrb[9].mxu0  ;;  %v18845_v54 = vld [vmem:[#allocation14_spill] sm:$0xff] }
 0x60c   :  { %9547 = vmatmul.mubr.msk.bf16.gmra.mrb[172].mxu1 %vm11713_vm5, %v15740_v12  ;;  %v15984_v12 = vadd.f32 %v6085_v38, %v15735_v29  ;;  %v6098_v29 = vpop.f32.mrb[73].mxu1  ;;  %v5812_v38 = vpop.f32.mrb[10].mxu0 }
 0x60d   :  { %6810 = vmatprep.mubr.bf16.mxu1 %v15748_v6  ;;  %v15994_v32 = vadd.f32 %v6098_v29, %v5809_v53  ;;  %v10457_v56 = vpop.f32.mrb[74].mxu1  ;;  %v5814_v24 = vpop.f32.mrb[11].mxu0  ;;  %v18855_v6 = vld [vmem:[#allocation82_spill] sm:$0xff] }
 0x60e   :  { %18840 = vst [vmem:[#allocation124_spill] sm:$0xff] %v15984_v12  ;;  %v6101_v12 = vpop.f32.mrb[75].mxu1  ;;  %9405 = vmatmul.mubr.msk.bf16.gmra.mrb[116].mxu0 %vm11713_vm5, %v18845_v54  ;;  %v5817_v55 = vpop.f32.mrb[12].mxu0 }
 0x60f   :  { %18843 = vst [vmem:[#allocation122_spill] sm:$0xff] %v15994_v32  ;;  %v15996_v22 = vadd.f32 %v6101_v12, %v5812_v38  ;;  %6031 = vmatprep.mubr.bf16.mxu0 %v18846_v52  ;;  %v16006_v53 = vadd.f32 %v10456_v50, %v5817_v55  ;;  %v10460_v29 = vpop.f32.mrb[76].mxu1  ;;  %v5819_v24 = vpop.f32.mrb[13].mxu0  ;;  %v18851_v50 = vld [vmem:[#allocation38_spill] sm:$0xff]  ;;  %v18852_v55 = vld [vmem:[#allocation52_spill] sm:$0xff]  ;;  %v18857_v52 = vld [vmem:[#allocation95_spill] sm:$0xff] }
 0x610   :  { %v6114_v32 = vpop.f32.mrb[77].mxu1  ;;  %v5820_v12 = vpop.f32.mrb[14].mxu0  ;;  %v4720_v24 = vmul.f32 %v18852_v55, %v18851_v50 }
 0x611   :  { %18844 = vst [vmem:[#allocation73_spill] sm:$0xff] %v15996_v22  ;;  %18847 = vst [vmem:[#allocation68_spill] sm:$0xff] %v16006_v53  ;;  %v16008_v38 = vadd.f32 %v10457_v56, %v5820_v12  ;;  %v10461_v22 = vpop.f32.mrb[78].mxu1  ;;  %v5822_v21 = vpop.f32.mrb[15].mxu0  ;;  %v18853_v56 = vld [vmem:[#allocation80_spill] sm:$0xff] }
 0x612   :  { %v4721_v12 = vmul.f32 %v18852_v55, %v18853_v56  ;;  %v16027_v16 = vadd.f32 %v18855_v6, %v4720_v24 }
 0x613   :  { %18848 = vst [vmem:[#allocation30_spill] sm:$0xff] %v16008_v38 }
 0x614   :  { %9551 = vmatmul.mubr.msk.bf16.gmra.mrb[176].mxu1 %vm11713_vm5, %v15769_v31  ;;  %v18849_v31 = vld [vmem:[#allocation106_spill] sm:$0xff] }
 0x615   :  { %6818 = vmatprep.mubr.bf16.mxu1 %v15777_v60  ;;  %v6117_v60 = vpop.f32.mrb[79].mxu1 }
 0x616   :  { %9409 = vmatmul.mubr.msk.bf16.gmra.mrb[120].mxu0 %vm11713_vm5, %v18849_v31  ;;  %v5825_v21 = vpop.f32.mrb[16].mxu0 }
 0x617   :  { %v16022_v38 = vadd.f32 %v6114_v32, %v5825_v21  ;;  %v16024_v53 = vpop.f32.mrb[80].mxu1  ;;  %v4997_v32 = vrot.slane %v16027_v16, 7 }
 0x619   :  { %18854 = vst [vmem:[#allocation70_spill] sm:$0xff] %v16022_v38 }
 0x61c   :  { %9555 = vmatmul.mubr.msk.bf16.gmra.mrb[180].mxu1 %vm11713_vm5, %v15798_v0  ;;  %v5827_v0 = vpop.f32.mrb[17].mxu0 }
 0x61d   :  { %6826 = vmatprep.mubr.bf16.mxu1 %v15807_v19  ;;  %v18850_v19 = vld [vmem:[#allocation96_spill] sm:$0xff] }
 0x61e   :  { %6039 = vmatprep.mubr.bf16.mxu0 %v18850_v19  ;;  %v6130_v19 = vpop.f32.mrb[81].mxu1 }
 0x61f   :  { %v16034_v50 = vpop.f32.mrb[82].mxu1  ;;  %9413 = vmatmul.mubr.msk.bf16.gmra.mrb[124].mxu0 %vm11713_vm5, %v18857_v52 }
 0x620   :  { %v6133_v56 = vpop.f32.mrb[83].mxu1 }
 0x624   :  { %9559 = vmatmul.mubr.msk.bf16.gmra.mrb[184].mxu1 %vm11713_vm5, %v15828_v39  ;;  %v16030_v39 = vadd.f32 %v18855_v6, %v4721_v12  ;;  %v10822_v6 = vld [vmem:[#allocation3 + $0x180] sm:$0xff]  }
 0x625   :  { %6834 = vmatprep.mubr.bf16.mxu1 %v15836_v58  ;;  %v5828_v58 = vpop.f32.mrb[18].mxu0 }
 0x626   :  { %v16032_v31 = vadd.f32 %v6117_v60, %v5828_v58  ;;  %v5830_v49 = vpop.f32.mrb[19].mxu0  ;;  %v16041_v0 = vpack.c.bf16 %v16030_v39, %v16027_v16  ;;  %v4998_v24 = vrot.slane %v16030_v39, 7  ;;  %v18859_v60 = vld [vmem:[#allocation54_spill] sm:$0xff] }
 0x627   :  { %10530 = vmatprep.mubr.msk.bf16.mxu0 %vm11722_vm6, %v18859_v60  ;;  %v10841_v58 = vld [vmem:[#allocation3 + $0x220] sm:$0xff]   ;;  %v5833_v49 = vpop.f32.mrb[20].mxu0 }
 0x628   :  { %18856 = vst [vmem:[#allocation21_spill] sm:$0xff] %v16032_v31  ;;  %18858 = vst [vmem:[#allocation67_spill] sm:$0xff] %v16041_v0  ;;  %10602 = vmatprep.subr.bf16.mxu1 %v10841_v58  ;;  %v4999_v12 = vsel %vm683_vm1, %v4997_v32, %v4998_v24  ;;  %v16053_v21 = vadd.f32 %v10460_v29, %v5833_v49  ;;  %v16055_v31 = vpop.f32.mrb[84].mxu1  ;;  %v5835_v38 = vpop.f32.mrb[21].mxu0  ;;  %v18863_v24 = vld [vmem:[#allocation126_spill] sm:$0xff]  ;;  %v10823_v29 = vld [vmem:[#allocation3 + $0x188] sm:$0xff]  }
 0x629   :  { %10603 = vmatpush3.bf16.msra.mxu1 %v10841_v58  ;;  %v16057_v52 = vpop.f32.mrb[85].mxu1  ;;  %v16063_v55 = vpack.c.bf16 %v4999_v12, %v4997_v32  ;;  %10531 = vmatmul.mubr.msk.bf16.vlgmr.msra.gmra.mrb[128].mxu0 %vm11722_vm6, %v18863_v24 }
 0x62a   :  { %18860 = vst [vmem:[#allocation119_spill] sm:$0xff] %v16053_v21  ;;  %v16061_v60 = vpop.f32.mrb[86].mxu1  ;;  %7622 = vmatpush1.bf16.msra.mxu0 %v10822_v6  ;;  %v10844_v21 = vld [vmem:[#allocation3 + $0x238] sm:$0xff]  }
 0x62b   :  { %18862 = vst [vmem:[#allocation34_spill] sm:$0xff] %v16063_v55  ;;  %v6149_v20 = vpop.f32.mrb[87].mxu1  ;;  %7623 = vmatprep.subr.bf16.mxu0 %v18712_v28 }
 0x62c   :  { %9563 = vmatmul.mubr.msk.bf16.gmra.mrb[188].mxu1 %vm11713_vm5, %v15857_v27  ;;  %v5836_v27 = vpop.f32.mrb[22].mxu0  ;;  %v16078_v32 = vpop.f32.mrb[88].mxu1 }
 0x62d   :  { %6842 = vmatprep.mubr.bf16.mxu1 %v16041_v0  ;;  %v16059_v63 = vadd.f32 %v10461_v22, %v5836_v27  ;;  %v5838_v54 = vpop.f32.mrb[23].mxu0  ;;  %v10842_v0 = vld [vmem:[#allocation3 + $0x228] sm:$0xff]   ;;  %v10843_v27 = vld [vmem:[#allocation3 + $0x230] sm:$0xff]   ;;  %v16080_v49 = vpop.f32.mrb[89].mxu1 }
 0x62e   :  { %10604 = vmatprep.subr.bf16.mxu1 %v10842_v0  ;;  %v18864_v22 = vld [vmem:[#allocation12_spill] sm:$0xff]  ;;  %v5841_v54 = vpop.f32.mrb[24].mxu0  ;;  %7624 = vmatpush1.bf16.msra.mxu0 %v10823_v29 }
 0x62f   :  { %18861 = vst [vmem:[#allocation61_spill] sm:$0xff] %v16059_v63  ;;  %10534 = vmatprep.mubr.msk.bf16.mxu0 %vm11722_vm6, %v18864_v22  ;;  %10605 = vmatpush3.bf16.msra.mxu1 %v10842_v0  ;;  %v16076_v38 = vadd.f32 %v6130_v19, %v5841_v54  ;;  %v5843_v58 = vpop.f32.mrb[25].mxu0  ;;  %v10824_v63 = vld [vmem:[#allocation3 + $0x190] sm:$0xff]   ;;  %v18867_v19 = vld [vmem:[#allocation59_spill] sm:$0xff] }
 0x630   :  { %10606 = vmatprep.subr.bf16.mxu1 %v10843_v27  ;;  %v5844_v6 = vpop.f32.mrb[26].mxu0  ;;  %7625 = vmatprep.subr.bf16.mxu0 %v18712_v28 }
 0x631   :  { %18865 = vst [vmem:[#allocation77_spill] sm:$0xff] %v16076_v38  ;;  %v16082_v12 = vadd.f32 %v6133_v56, %v5844_v6  ;;  %10535 = vmatmul.mubr.msk.bf16.gmra.mrb[132].mxu0 %vm11722_vm6, %v18867_v19  ;;  %v18868_v56 = vld [vmem:[#allocation18_spill] sm:$0xff] }
 0x632   :  { %10538 = vmatprep.mubr.msk.bf16.mxu0 %vm11722_vm6, %v18868_v56  ;;  %7626 = vmatpush1.bf16.msra.mxu0 %v10824_v63 }
 0x633   :  { %18866 = vst [vmem:[#allocation46_spill] sm:$0xff] %v16082_v12  ;;  %10607 = vmatpush3.bf16.msra.mxu1 %v10843_v27  ;;  %7627 = vmatprep.subr.bf16.mxu0 %v18712_v28 }
 0x634   :  { %9567 = vmatmul.mubr.msk.bf16.gmra.mrb[192].mxu1 %vm11713_vm5, %v16063_v55  ;;  %v5846_v55 = vpop.f32.mrb[27].mxu0  ;;  %10608 = vmatprep.subr.bf16.mxu1 %v10844_v21 }
 0x635   :  { %6850 = vmatprep.mubr.bf16.mxu1 %v15880_v8  ;;  %v16084_v8 = vpop.f32.mrb[90].mxu1  ;;  %v10825_v55 = vld [vmem:[#allocation3 + $0x198] sm:$0xff]   ;;  %v5849_v29 = vpop.f32.mrb[28].mxu0 }
 0x636   :  { %v16087_v0 = vpop.f32.mrb[91].mxu1  ;;  %v16101_v27 = vadd.f32 %v16024_v53, %v5849_v29  ;;  %v5851_v58 = vpop.f32.mrb[29].mxu0  ;;  %7628 = vmatpush1.bf16.msra.mxu0 %v10825_v55  ;;  %v18871_v53 = vld [vmem:[#allocation60_spill] sm:$0xff] }
 0x637   :  { %10609 = vmatpush3.bf16.msra.mxu1 %v10844_v21  ;;  %v16103_v54 = vpop.f32.mrb[92].mxu1  ;;  %7629 = vmatprep.subr.bf16.mxu0 %v18712_v28  ;;  %v18872_v21 = vld [vmem:[#allocation102_spill] sm:$0xff] }
 0x638   :  { %18869 = vst [vmem:[#allocation35_spill] sm:$0xff] %v16101_v27  ;;  %v16105_v6 = vpop.f32.mrb[93].mxu1 }
 0x639   :  { %v16110_v38 = vpop.f32.mrb[94].mxu1  ;;  %10539 = vmatmul.mubr.msk.bf16.gmra.mrb[136].mxu0 %vm11722_vm6, %v18871_v53  ;;  %v18875_v53 = vld [vmem:[#allocation63_spill] sm:$0xff] }
 0x63a   :  { %v16112_v56 = vpop.f32.mrb[95].mxu1  ;;  %10542 = vmatprep.mubr.msk.bf16.mxu0 %vm11722_vm6, %v18872_v21 }
 0x63b   :  { %v16129_v58 = vpop.f32.mrb[96].mxu1 }
 0x63c   :  { %9571 = vmatmul.mubr.msk.bf16.gmra.mrb[196].mxu1 %vm11713_vm5, %v18804_v4  ;;  %v5852_v4 = vpop.f32.mrb[30].mxu0 }
 0x63d   :  { %6858 = vmatprep.mubr.bf16.mxu1 %v15470_v45  ;;  %v16108_v12 = vadd.f32 %v16034_v50, %v5852_v4  ;;  %v5854_v63 = vpop.f32.mrb[31].mxu0  ;;  %v10827_v45 = vld [vmem:[#allocation3 + $0x1a0] sm:$0xff]   ;;  %v10828_v50 = vld [vmem:[#allocation3 + $0x1a8] sm:$0xff]  }
 0x63e   :  { %7630 = vmatpush1.bf16.msra.mxu0 %v10827_v45  ;;  %v5857_v55 = vpop.f32.mrb[32].mxu0  ;;  %v16131_v63 = vpop.f32.mrb[97].mxu1  ;;  %v10829_v45 = vld [vmem:[#allocation3 + $0x1b0] sm:$0xff]  }
 0x63f   :  { %18870 = vst [vmem:[#allocation9_spill] sm:$0xff] %v16108_v12  ;;  %7631 = vmatprep.subr.bf16.mxu0 %v18712_v28  ;;  %v16127_v29 = vadd.f32 %v16057_v52, %v5857_v55  ;;  %v5859_v4 = vpop.f32.mrb[33].mxu0  ;;  %v16135_v27 = vpop.f32.mrb[98].mxu1  ;;  %v18876_v52 = vld [vmem:[#allocation112_spill] sm:$0xff] }
 0x641   :  { %18873 = vst [vmem:[#allocation50_spill] sm:$0xff] %v16127_v29  ;;  %10543 = vmatmul.mubr.msk.bf16.gmra.mrb[140].mxu0 %vm11722_vm6, %v18875_v53  ;;  %v5254_v53 = vrot.slane %v16030_v39, 1  ;;  %v10838_v39 = vld [vmem:[#allocation3 + $0x1e8] sm:$0xff]  }
 0x642   :  { %7632 = vmatpush1.bf16.msra.mxu0 %v10828_v50  ;;  %10546 = vmatprep.mubr.msk.bf16.mxu0 %vm11722_vm6, %v18876_v52 }
 0x643   :  { %7633 = vmatprep.subr.bf16.mxu0 %v18712_v28 }
 0x644   :  { %9575 = vmatmul.mubr.msk.bf16.gmra.mrb[200].mxu1 %vm11713_vm5, %v18807_v13  ;;  %v5860_v13 = vpop.f32.mrb[34].mxu0 }
 0x645   :  { %6866 = vmatprep.mubr.bf16.mxu1 %v15474_v41  ;;  %v16133_v12 = vadd.f32 %v6149_v20, %v5860_v13  ;;  %v5862_v21 = vpop.f32.mrb[35].mxu0  ;;  %v16137_v41 = vpop.f32.mrb[99].mxu1  ;;  %v10830_v20 = vld [vmem:[#allocation3 + $0x1b8] sm:$0xff]  }
 0x646   :  { %7634 = vmatpush1.bf16.msra.mxu0 %v10829_v45  ;;  %v5865_v13 = vpop.f32.mrb[36].mxu0  ;;  %v16154_v50 = vpop.f32.mrb[100].mxu1  ;;  %v10832_v45 = vld [vmem:[#allocation3 + $0x1c0] sm:$0xff]  }
 0x647   :  { %18874 = vst [vmem:[#allocation51_spill] sm:$0xff] %v16133_v12  ;;  %7635 = vmatprep.subr.bf16.mxu0 %v18712_v28  ;;  %v16152_v21 = vadd.f32 %v16055_v31, %v5865_v13  ;;  %v5867_v55 = vpop.f32.mrb[37].mxu0  ;;  %v16156_v4 = vpop.f32.mrb[101].mxu1  ;;  %v18879_v31 = vld [vmem:[#allocation105_spill] sm:$0xff]  ;;  %v18880_v13 = vld [vmem:[#allocation16_spill] sm:$0xff] }
 0x648   :  { %v16161_v29 = vpop.f32.mrb[102].mxu1 }
 0x649   :  { %18877 = vst [vmem:[#allocation83_spill] sm:$0xff] %v16152_v21  ;;  %v16163_v52 = vpop.f32.mrb[103].mxu1  ;;  %10547 = vmatmul.mubr.msk.bf16.gmra.mrb[144].mxu0 %vm11722_vm6, %v18879_v31 }
 0x64a   :  { %7636 = vmatpush1.bf16.msra.mxu0 %v10830_v20  ;;  %10550 = vmatprep.mubr.msk.bf16.mxu0 %vm11722_vm6, %v18880_v13  ;;  %v16180_v20 = vpop.f32.mrb[104].mxu1 }
 0x64b   :  { %7637 = vmatprep.subr.bf16.mxu0 %v18712_v28 }
 0x64c   :  { %9579 = vmatmul.mubr.msk.bf16.gmra.mrb[204].mxu1 %vm11713_vm5, %v18810_v3  ;;  %v5868_v3 = vpop.f32.mrb[38].mxu0 }
 0x64d   :  { %6874 = vmatprep.mubr.bf16.mxu1 %v18812_v62  ;;  %v16159_v12 = vadd.f32 %v16061_v60, %v5868_v3  ;;  %v5870_v62 = vpop.f32.mrb[39].mxu0  ;;  %v10833_v3 = vld [vmem:[#allocation3 + $0x1c8] sm:$0xff]  }
 0x64e   :  { %7638 = vmatpush1.bf16.msra.mxu0 %v10832_v45  ;;  %v5873_v62 = vpop.f32.mrb[40].mxu0  ;;  %v10834_v45 = vld [vmem:[#allocation3 + $0x1d0] sm:$0xff]  }
 0x64f   :  { %18878 = vst [vmem:[#allocation81_spill] sm:$0xff] %v16159_v12  ;;  %7639 = vmatprep.subr.bf16.mxu0 %v18712_v28  ;;  %v16178_v60 = vadd.f32 %v16080_v49, %v5873_v62  ;;  %v5875_v55 = vpop.f32.mrb[41].mxu0  ;;  %v16182_v12 = vpop.f32.mrb[105].mxu1  ;;  %v18883_v49 = vld [vmem:[#allocation31_spill] sm:$0xff] }
 0x650   :  { %v16187_v13 = vpop.f32.mrb[106].mxu1  ;;  %v18884_v62 = vld [vmem:[#allocation11_spill] sm:$0xff] }
 0x651   :  { %18881 = vst [vmem:[#allocation55_spill] sm:$0xff] %v16178_v60  ;;  %v16189_v31 = vpop.f32.mrb[107].mxu1  ;;  %10551 = vmatmul.mubr.msk.bf16.gmra.mrb[148].mxu0 %vm11722_vm6, %v18883_v49  ;;  %v5253_v49 = vrot.slane %v16027_v16, 1 }
 0x652   :  { %7640 = vmatpush1.bf16.msra.mxu0 %v10833_v3  ;;  %10554 = vmatprep.mubr.msk.bf16.mxu0 %vm11722_vm6, %v18884_v62  ;;  %v16206_v3 = vpop.f32.mrb[108].mxu1 }
 0x653   :  { %7641 = vmatprep.subr.bf16.mxu0 %v18712_v28  ;;  %v5255_v16 = vsel %vm940_vm2, %v5253_v49, %v5254_v53 }
 0x654   :  { %9583 = vmatmul.mubr.msk.bf16.gmra.mrb[208].mxu1 %vm11713_vm5, %v18814_v14  ;;  %v5876_v14 = vpop.f32.mrb[42].mxu0 }
 0x655   :  { %6882 = vmatprep.mubr.bf16.mxu1 %v18816_v57  ;;  %v16185_v21 = vadd.f32 %v16087_v0, %v5876_v14  ;;  %v5878_v57 = vpop.f32.mrb[43].mxu0  ;;  %v10835_v14 = vld [vmem:[#allocation3 + $0x1d8] sm:$0xff]  }
 0x656   :  { %7642 = vmatpush1.bf16.msra.mxu0 %v10834_v45  ;;  %v5881_v57 = vpop.f32.mrb[44].mxu0  ;;  %v10837_v45 = vld [vmem:[#allocation3 + $0x1e0] sm:$0xff]  }
 0x657   :  { %18882 = vst [vmem:[#allocation6_spill] sm:$0xff] %v16185_v21  ;;  %7643 = vmatprep.subr.bf16.mxu0 %v18712_v28  ;;  %v16204_v0 = vadd.f32 %v16078_v32, %v5881_v57  ;;  %v5883_v55 = vpop.f32.mrb[45].mxu0  ;;  %v16208_v21 = vpop.f32.mrb[109].mxu1  ;;  %v18887_v57 = vld [vmem:[#allocation98_spill] sm:$0xff] }
 0x658   :  { %v16213_v62 = vpop.f32.mrb[110].mxu1 }
 0x659   :  { %18885 = vst [vmem:[#allocation85_spill] sm:$0xff] %v16204_v0  ;;  %v16217_v32 = vpop.f32.mrb[111].mxu1  ;;  %10555 = vmatmul.mubr.msk.bf16.gmra.mrb[152].mxu0 %vm11722_vm6, %v18887_v57  ;;  %v16239_v0 = vpack.c.bf16 %v5254_v53, %v5255_v16 }
 0x65a   :  { %7644 = vmatpush1.bf16.msra.mxu0 %v10835_v14 }
 0x65b   :  { %7645 = vmatprep.subr.bf16.mxu0 %v18712_v28 }
 0x65c   :  { %9587 = vmatmul.mubr.msk.bf16.gmra.mrb[212].mxu1 %vm11713_vm5, %v18818_v7  ;;  %v5884_v7 = vpop.f32.mrb[46].mxu0 }
 0x65d   :  { %6890 = vmatprep.mubr.bf16.mxu1 %v18820_v18  ;;  %v16211_v60 = vadd.f32 %v16084_v8, %v5884_v7  ;;  %v5886_v18 = vpop.f32.mrb[47].mxu0  ;;  %v18888_v7 = vld [vmem:[#allocation41_spill] sm:$0xff] }
 0x65e   :  { %10558 = vmatprep.mubr.msk.bf16.mxu0 %vm11722_vm6, %v18888_v7  ;;  %7646 = vmatpush1.bf16.msra.mxu0 %v10837_v45  ;;  %v5889_v18 = vpop.f32.mrb[48].mxu0  ;;  %v10839_v7 = vld [vmem:[#allocation3 + $0x1f0] sm:$0xff]  }
 0x65f   :  { %18886 = vst [vmem:[#allocation23_spill] sm:$0xff] %v16211_v60  ;;  %7647 = vmatprep.subr.bf16.mxu0 %v18712_v28  ;;  %v16233_v8 = vadd.f32 %v16105_v6, %v5889_v18  ;;  %v5891_v55 = vpop.f32.mrb[49].mxu0 }
 0x660   :  { %v5892_v60 = vpop.f32.mrb[50].mxu0 }
 0x661   :  { %18889 = vst [vmem:[#allocation76_spill] sm:$0xff] %v16233_v8  ;;  %v5894_v49 = vpop.f32.mrb[51].mxu0  ;;  %10559 = vmatmul.mubr.msk.bf16.gmra.mrb[156].mxu0 %vm11722_vm6, %v16239_v0 }
 0x662   :  { %7648 = vmatpush1.bf16.msra.mxu0 %v10838_v39  ;;  %10562 = vmatprep.mubr.msk.bf16.mxu0 %vm11722_vm6, %v15681_v2  ;;  %v5897_v6 = vpop.f32.mrb[52].mxu0 }
 0x663   :  { %7649 = vmatprep.subr.bf16.mxu0 %v18712_v28  ;;  %v16261_v53 = vadd.f32 %v16103_v54, %v5897_v6  ;;  %v5899_v39 = vpop.f32.mrb[53].mxu0 }
 0x664   :  { %9591 = vmatmul.mubr.msk.bf16.gmra.mrb[216].mxu1 %vm11713_vm5, %v18822_v48  ;;  %v5900_v18 = vpop.f32.mrb[54].mxu0 }
 0x665   :  { %6898 = vmatprep.mubr.bf16.mxu1 %v18824_v17  ;;  %v16242_v17 = vadd.f32 %v16112_v56, %v5892_v60  ;;  %v10840_v56 = vld [vmem:[#allocation3 + $0x1f8] sm:$0xff]   ;;  %18891 = vst [vmem:[#allocation78_spill] sm:$0xff] %v16261_v53  ;;  %v16268_v55 = vadd.f32 %v16110_v38, %v5900_v18  ;;  %v5902_v49 = vpop.f32.mrb[55].mxu0 }
 0x666   :  { %7650 = vmatpush1.bf16.msra.mxu0 %v10839_v7 }
 0x667   :  { %v16235_v14 = vpop.f32.mrb[112].mxu1  ;;  %18890 = vst [vmem:[#allocation72_spill] sm:$0xff] %v16242_v17  ;;  %7651 = vmatprep.subr.bf16.mxu0 %v18712_v28  ;;  %18892 = vst [vmem:[#allocation74_spill] sm:$0xff] %v16268_v55 }
 0x668   :  { %v16237_v48 = vpop.f32.mrb[113].mxu1 }
 0x669   :  { %v16244_v45 = vpop.f32.mrb[114].mxu1  ;;  %10563 = vmatmul.mubr.msk.bf16.gmra.mrb[160].mxu0 %vm11722_vm6, %v15693_v36  ;;  %v5905_v38 = vpop.f32.mrb[56].mxu0 }
 0x66a   :  { %v16246_v57 = vpop.f32.mrb[115].mxu1  ;;  %7652 = vmatpush1.bf16.msra.mxu0 %v10840_v56  ;;  %10566 = vmatprep.mubr.msk.bf16.mxu0 %vm11722_vm6, %v15713_v46  ;;  %v16285_v54 = vadd.f32 %v16131_v63, %v5905_v38  ;;  %v5907_v6 = vpop.f32.mrb[57].mxu0 }
 0x66b   :  { %v5908_v18 = vpop.f32.mrb[58].mxu0 }
 0x66c   :  { %9595 = vmatmul.mubr.msk.bf16.gmra.mrb[220].mxu1 %vm11713_vm5, %v18826_v44  ;;  %18893 = vst [vmem:[#allocation33_spill] sm:$0xff] %v16285_v54  ;;  %v16292_v49 = vadd.f32 %v16137_v41, %v5908_v18 }
 0x66d   :  { %6906 = vmatprep.mubr.bf16.mxu1 %v18827_v59  ;;  %v5910_v59 = vpop.f32.mrb[59].mxu0 }
 0x66e   :  { %18894 = vst [vmem:[#allocation40_spill] sm:$0xff] %v16292_v49 }
 0x66f   :  { %v16263_v60 = vpop.f32.mrb[116].mxu1 }
 0x670   :  { %v16265_v16 = vpop.f32.mrb[117].mxu1 }
 0x671   :  { %v16270_v2 = vpop.f32.mrb[118].mxu1  ;;  %10567 = vmatmul.mubr.msk.bf16.gmra.mrb[164].mxu0 %vm11722_vm6, %v15724_v33  ;;  %v5913_v41 = vpop.f32.mrb[60].mxu0 }
 0x672   :  { %v16272_v7 = vpop.f32.mrb[119].mxu1  ;;  %10570 = vmatprep.mubr.msk.bf16.mxu0 %vm11722_vm6, %v15743_v42  ;;  %v16309_v63 = vadd.f32 %v16129_v58, %v5913_v41  ;;  %v5915_v38 = vpop.f32.mrb[61].mxu0 }
 0x673   :  { %v5916_v18 = vpop.f32.mrb[62].mxu0 }
 0x674   :  { %9599 = vmatmul.mubr.msk.bf16.gmra.mrb[224].mxu1 %vm11713_vm5, %v18828_v23  ;;  %18895 = vst [vmem:[#allocation17_spill] sm:$0xff] %v16309_v63  ;;  %v5918_v49 = vpop.f32.mrb[63].mxu0 }
 0x675   :  { %6914 = vmatprep.mubr.bf16.mxu1 %v18829_v61  ;;  %v16316_v61 = vadd.f32 %v16135_v27, %v5916_v18 }
 0x677   :  { %v16287_v56 = vpop.f32.mrb[120].mxu1  ;;  %18896 = vst [vmem:[#allocation42_spill] sm:$0xff] %v16316_v61 }
 0x678   :  { %v16289_v39 = vpop.f32.mrb[121].mxu1 }
 0x679   :  { %v16294_v23 = vpop.f32.mrb[122].mxu1  ;;  %10571 = vmatmul.mubr.msk.bf16.gmra.mrb[168].mxu0 %vm11722_vm6, %v15755_v1  ;;  %v5921_v27 = vpop.f32.mrb[64].mxu0 }
 0x67a   :  { %v16296_v44 = vpop.f32.mrb[123].mxu1  ;;  %10574 = vmatprep.mubr.msk.bf16.mxu0 %vm11722_vm6, %v15773_v47  ;;  %v16333_v58 = vadd.f32 %v16156_v4, %v5921_v27  ;;  %v5923_v41 = vpop.f32.mrb[65].mxu0 }
 0x67b   :  { %v5924_v18 = vpop.f32.mrb[66].mxu0 }
 0x67c   :  { %9603 = vmatmul.mubr.msk.bf16.gmra.mrb[228].mxu1 %vm11713_vm5, %v18831_v37  ;;  %18897 = vst [vmem:[#allocation56_spill] sm:$0xff] %v16333_v58  ;;  %v5926_v61 = vpop.f32.mrb[67].mxu0 }
 0x67d   :  { %6922 = vmatprep.mubr.bf16.mxu1 %v18832_v40  ;;  %v16340_v40 = vadd.f32 %v16163_v52, %v5924_v18 }
 0x67f   :  { %v16311_v59 = vpop.f32.mrb[124].mxu1  ;;  %18898 = vst [vmem:[#allocation79_spill] sm:$0xff] %v16340_v40 }
 0x680   :  { %v16313_v6 = vpop.f32.mrb[125].mxu1 }
 0x681   :  { %v16318_v37 = vpop.f32.mrb[126].mxu1  ;;  %10575 = vmatmul.mubr.msk.bf16.gmra.mrb[172].mxu0 %vm11722_vm6, %v15784_v43  ;;  %v5929_v52 = vpop.f32.mrb[68].mxu0 }
 0x682   :  { %v16320_v54 = vpop.f32.mrb[127].mxu1  ;;  %10578 = vmatprep.mubr.msk.bf16.mxu0 %vm11722_vm6, %v15802_v35  ;;  %v16357_v4 = vadd.f32 %v16154_v50, %v5929_v52  ;;  %v5931_v27 = vpop.f32.mrb[69].mxu0 }
 0x683   :  { %v5932_v18 = vpop.f32.mrb[70].mxu0 }
 0x684   :  { %9607 = vmatmul.mubr.msk.bf16.gmra.mrb[232].mxu1 %vm11713_vm5, %v18833_v34  ;;  %18899 = vst [vmem:[#allocation7_spill] sm:$0xff] %v16357_v4  ;;  %v18905_v4 = vld [vmem:[#allocation52_spill] sm:$0xff] }
 0x685   :  { %6930 = vmatprep.mubr.bf16.mxu1 %v18834_v15  ;;  %v16362_v15 = vadd.f32 %v16161_v29, %v5932_v18 }
 0x687   :  { %v16335_v49 = vpop.f32.mrb[128].mxu1  ;;  %18900 = vst [vmem:[#allocation99_spill] sm:$0xff] %v16362_v15  ;;  %v18903_v15 = vld [vmem:[#allocation125_spill] sm:$0xff] }
 0x688   :  { %v16337_v38 = vpop.f32.mrb[129].mxu1 }
 0x689   :  { %v16342_v34 = vpop.f32.mrb[130].mxu1  ;;  %10579 = vmatmul.mubr.msk.bf16.gmra.mrb[176].mxu0 %vm11722_vm6, %v15814_v5 }
 0x68a   :  { %v16344_v63 = vpop.f32.mrb[131].mxu1  ;;  %10582 = vmatprep.mubr.msk.bf16.mxu0 %vm11722_vm6, %v15832_v25 }
 0x68c   :  { %9611 = vmatmul.mubr.msk.bf16.gmra.mrb[236].mxu1 %vm11713_vm5, %v18835_v26  ;;  %v5934_v26 = vpop.f32.mrb[71].mxu0 }
 0x68d   :  { %6938 = vmatprep.mubr.bf16.mxu1 %v18836_v51  ;;  %v5937_v29 = vpop.f32.mrb[72].mxu0 }
 0x68e   :  { %v16377_v50 = vadd.f32 %v16182_v12, %v5937_v29  ;;  %v18906_v29 = vld [vmem:[#allocation47_spill] sm:$0xff] }
 0x68f   :  { %v16359_v61 = vpop.f32.mrb[132].mxu1 }
 0x690   :  { %v6726_v41 = vpop.f32.mrb[133].mxu1  ;;  %18901 = vst [vmem:[#allocation57_spill] sm:$0xff] %v16377_v50  ;;  %v4753_v50 = vmul.f32 %v18905_v4, %v18906_v29 }
 0x691   :  { %v16364_v40 = vpop.f32.mrb[134].mxu1  ;;  %10583 = vmatmul.mubr.msk.bf16.gmra.mrb[180].mxu0 %vm11722_vm6, %v18903_v15  ;;  %v18913_v15 = vld [vmem:[#allocation75_spill] sm:$0xff] }
 0x692   :  { %v6729_v58 = vpop.f32.mrb[135].mxu1 }
 0x693   :  { %v5939_v58 = vpop.f32.mrb[73].mxu0 }
 0x694   :  { %9615 = vmatmul.mubr.msk.bf16.gmra.mrb[240].mxu1 %vm11713_vm5, %v18841_v9  ;;  %v5940_v27 = vpop.f32.mrb[74].mxu0  ;;  %v18907_v58 = vld [vmem:[#allocation14_spill] sm:$0xff] }
 0x695   :  { %6946 = vmatprep.mubr.bf16.mxu1 %v18842_v10  ;;  %v16382_v41 = vadd.f32 %v16189_v31, %v5940_v27  ;;  %v5942_v9 = vpop.f32.mrb[75].mxu0  ;;  %v18904_v10 = vld [vmem:[#allocation43_spill] sm:$0xff]  ;;  %v18908_v31 = vld [vmem:[#allocation29_spill] sm:$0xff] }
 0x696   :  { %v4752_v12 = vmul.f32 %v18905_v4, %v18904_v10  ;;  %10586 = vmatprep.mubr.msk.bf16.mxu0 %vm11722_vm6, %v18908_v31  ;;  %v18909_v9 = vld [vmem:[#allocation101_spill] sm:$0xff] }
 0x697   :  { %v16379_v26 = vpop.f32.mrb[136].mxu1  ;;  %18902 = vst [vmem:[#allocation100_spill] sm:$0xff] %v16382_v41  ;;  %v5945_v41 = vpop.f32.mrb[76].mxu0 }
 0x698   :  { %v6734_v52 = vpop.f32.mrb[137].mxu1  ;;  %v16403_v10 = vadd.f32 %v16180_v20, %v5945_v41  ;;  %v5947_v4 = vpop.f32.mrb[77].mxu0  ;;  %v18914_v20 = vld [vmem:[#allocation106_spill] sm:$0xff] }
 0x699   :  { %v16384_v18 = vpop.f32.mrb[138].mxu1  ;;  %v5948_v55 = vpop.f32.mrb[78].mxu0  ;;  %10587 = vmatmul.mubr.msk.bf16.gmra.mrb[184].mxu0 %vm11722_vm6, %v18913_v15 }
 0x69a   :  { %v6737_v51 = vpop.f32.mrb[139].mxu1  ;;  %18911 = vst [vmem:[#allocation38_spill] sm:$0xff] %v16403_v10  ;;  %v5950_v53 = vpop.f32.mrb[79].mxu0 }
 0x69b   :  { %v18910_v51 = vld [vmem:[#allocation82_spill] sm:$0xff]  ;;  %v5953_v53 = vpop.f32.mrb[80].mxu0 }
 0x69c   :  { %9619 = vmatmul.mubr.msk.bf16.gmra.mrb[244].mxu1 %vm11713_vm5, %v18907_v58  ;;  %v4822_v52 = vadd.f32 %v18910_v51, %v4752_v12  ;;  %v4823_v27 = vadd.f32 %v18910_v51, %v4753_v50  ;;  %v16408_v58 = vadd.f32 %v16187_v13, %v5948_v55  ;;  %v18915_v50 = vld [vmem:[#allocation32_spill] sm:$0xff]  ;;  %v16424_v41 = vadd.f32 %v16208_v21, %v5953_v53  ;;  %v5955_v4 = vpop.f32.mrb[81].mxu0  ;;  %v18919_v53 = vld [vmem:[#allocation95_spill] sm:$0xff] }
 0x69d   :  { %6954 = vmatprep.mubr.bf16.mxu1 %v18909_v9  ;;  %10590 = vmatprep.mubr.msk.bf16.mxu0 %vm11722_vm6, %v18915_v50  ;;  %v18916_v13 = vld [vmem:[#allocation96_spill] sm:$0xff] }
 0x69e   :  { %18912 = vst [vmem:[#allocation80_spill] sm:$0xff] %v16408_v58  ;;  %v5301_v9 = vrot.slane %v4822_v52, 1  ;;  %v5302_v31 = vrot.slane %v4823_v27, 1  ;;  %v5045_v15 = vrot.slane %v4822_v52, 7  ;;  %v16438_v21 = vpack.c.bf16 %v4823_v27, %v4822_v52 }
 0x69f   :  { %v16405_v17 = vpop.f32.mrb[140].mxu1 }
 0x6a0   :  { %v6742_v29 = vpop.f32.mrb[141].mxu1  ;;  %v5303_v55 = vsel %vm940_vm2, %v5301_v9, %v5302_v31  ;;  %v5046_v9 = vrot.slane %v4823_v27, 7  ;;  %18918 = vst [vmem:[#allocation126_spill] sm:$0xff] %v16438_v21 }
 0x6a1   :  { %v16410_v8 = vpop.f32.mrb[142].mxu1  ;;  %v16428_v58 = vpack.c.bf16 %v5302_v31, %v5303_v55  ;;  %v18920_v31 = vld [vmem:[#allocation97_spill] sm:$0xff] }
 0x6a2   :  { %v6745_v12 = vpop.f32.mrb[143].mxu1 }
 0x6a3   :  { %v5956_v12 = vpop.f32.mrb[82].mxu0  ;;  %10591 = vmatmul.mubr.msk.bf16.gmra.mrb[188].mxu0 %vm11722_vm6, %v16428_v58 }
 0x6a4   :  { %9623 = vmatmul.mubr.msk.bf16.gmra.mrb[248].mxu1 %vm11713_vm5, %v18914_v20  ;;  %v16431_v20 = vadd.f32 %v16217_v32, %v5956_v12  ;;  %v5958_v50 = vpop.f32.mrb[83].mxu0  ;;  %7653 = vmatprep.mubr.bf16.mxu0 %v18920_v31 }
 0x6a5   :  { %6962 = vmatprep.mubr.bf16.mxu1 %v18916_v13  ;;  %v5961_v32 = vpop.f32.mrb[84].mxu0  ;;  %v5047_v50 = vsel %vm683_vm1, %v5045_v15, %v5046_v9  ;;  %vm8327_vm1 = vcmask 64512  }
 0x6a6   :  { %18917 = vst [vmem:[#allocation54_spill] sm:$0xff] %v16431_v20  ;;  %v5963_v4 = vpop.f32.mrb[85].mxu0  ;;  %v16456_v31 = vpack.c.bf16 %v5047_v50, %v5045_v15  ;;  %v18922_v20 = vld [vmem:[#allocation58_spill] sm:$0xff] }
 0x6a7   :  { %v16426_v51 = vpop.f32.mrb[144].mxu1  ;;  %v5964_v52 = vpop.f32.mrb[86].mxu0 }
 0x6a8   :  { %v6750_v29 = vpop.f32.mrb[145].mxu1  ;;  %v16452_v27 = vadd.f32 %v16213_v62, %v5964_v52  ;;  %18921 = vst [vmem:[#allocation12_spill] sm:$0xff] %v16456_v31  ;;  %v18924_v52 = vld [vmem:[#allocation13_spill] sm:$0xff] }
 0x6a9   :  { %v16433_v10 = vpop.f32.mrb[146].mxu1 }
 0x6aa   :  { %v6753_v13 = vpop.f32.mrb[147].mxu1 }
 0x6ab   :  { %v16447_v13 = vadd.f32 %v16206_v3, %v5961_v32  ;;  %9731 = vmatmul.mubr.msk.bf16.vlgmr.msra.gmra.mrb[192].mxu0 %vm11713_vm5, %v18922_v20  ;;  %v18923_v3 = vld [vmem:[#allocation64_spill] sm:$0xff] }
 0x6ac   :  { %9627 = vmatmul.mubr.msk.bf16.gmra.mrb[252].mxu1 %vm11713_vm5, %v18919_v53  ;;  %v5966_v53 = vpop.f32.mrb[87].mxu0  ;;  %7661 = vmatprep.mubr.bf16.mxu0 %v18923_v3 }
 0x6ad   :  { %6970 = vmatprep.mubr.bf16.mxu1 %v16438_v21  ;;  %v5969_v62 = vpop.f32.mrb[88].mxu0 }
 0x6ae   :  { %v16469_v9 = vadd.f32 %v16237_v48, %v5969_v62  ;;  %v18925_v48 = vld [vmem:[#allocation15_spill] sm:$0xff] }
 0x6af   :  { %v16449_v55 = vpop.f32.mrb[148].mxu1 }
 0x6b0   :  { %v6758_v29 = vpop.f32.mrb[149].mxu1 }
 0x6b1   :  { %v16454_v12 = vpop.f32.mrb[150].mxu1 }
 0x6b2   :  { %v6761_v21 = vpop.f32.mrb[151].mxu1 }
 0x6b3   :  { %v5971_v21 = vpop.f32.mrb[89].mxu0  ;;  %9735 = vmatmul.mubr.msk.bf16.gmra.mrb[196].mxu0 %vm11713_vm5, %v18924_v52  ;;  %v18926_v52 = vld [vmem:[#allocation86_spill] sm:$0xff] }
 0x6b4   :  { %9631 = vmatmul.mubr.msk.bf16.gmra.mrb[0].mxu1 %vm11713_vm5, %v16456_v31  ;;  %v5972_v32 = vpop.f32.mrb[90].mxu0  ;;  %7669 = vmatprep.mubr.bf16.mxu0 %v18925_v48  ;;  %v18929_v48 = vld [vmem:[#allocation60_spill] sm:$0xff]  ;;  %v18932_v31 = vld [vmem:[#allocation103_spill] sm:$0xff] }
 0x6b5   :  { %10610 = vmatprep.mubr.msk.bf16.mxu1 %vm11722_vm6, %v18863_v24  ;;  %v16474_v20 = vadd.f32 %v16246_v57, %v5972_v32  ;;  %v5974_v4 = vpop.f32.mrb[91].mxu0 }
 0x6b6   :  { %v5977_v24 = vpop.f32.mrb[92].mxu0 }
 0x6b7   :  { %v16471_v15 = vpop.f32.mrb[152].mxu1  ;;  %v16489_v57 = vadd.f32 %v16235_v14, %v5977_v24  ;;  %v5979_v62 = vpop.f32.mrb[93].mxu0  ;;  %v18928_v14 = vld [vmem:[#allocation62_spill] sm:$0xff] }
 0x6b8   :  { %v6766_v53 = vpop.f32.mrb[153].mxu1 }
 0x6b9   :  { %v16476_v50 = vpop.f32.mrb[154].mxu1  ;;  %v5980_v53 = vpop.f32.mrb[94].mxu0 }
 0x6ba   :  { %v6769_v29 = vpop.f32.mrb[155].mxu1  ;;  %v16494_v32 = vadd.f32 %v16244_v45, %v5980_v53 }
 0x6bb   :  { %9739 = vmatmul.mubr.msk.bf16.gmra.mrb[200].mxu0 %vm11713_vm5, %v18926_v52 }
 0x6bc   :  { %10611 = vmatmul.mubr.msk.bf16.vlgmr.msra.gmra.mrb[4].mxu1 %vm11722_vm6, %v18864_v22  ;;  %v5982_v22 = vpop.f32.mrb[95].mxu0  ;;  %7677 = vmatprep.mubr.bf16.mxu0 %v18928_v14 }
 0x6bd   :  { %10614 = vmatprep.mubr.msk.bf16.mxu1 %vm11722_vm6, %v18867_v19  ;;  %v18927_v19 = vld [vmem:[#allocation18_spill] sm:$0xff]  ;;  %v5985_v45 = vpop.f32.mrb[96].mxu0 }
 0x6be   :  { %v16509_v24 = vadd.f32 %v16265_v16, %v5985_v45  ;;  %v18934_v16 = vld [vmem:[#allocation84_spill] sm:$0xff]  ;;  %v18935_v45 = vld [vmem:[#allocation63_spill] sm:$0xff] }
 0x6bf   :  { %v16491_v3 = vpop.f32.mrb[156].mxu1 }
 0x6c0   :  { %v6774_v21 = vpop.f32.mrb[157].mxu1  ;;  %18930 = vst [vmem:[#allocation59_spill] sm:$0xff] %v16509_v24  ;;  %v18938_v24 = vld [vmem:[#allocation44_spill] sm:$0xff] }
 0x6c1   :  { %v16496_v4 = vpop.f32.mrb[158].mxu1  ;;  %v5987_v21 = vpop.f32.mrb[97].mxu0 }
 0x6c2   :  { %v6777_v29 = vpop.f32.mrb[159].mxu1  ;;  %v5988_v22 = vpop.f32.mrb[98].mxu0 }
 0x6c3   :  { %v16514_v29 = vadd.f32 %v16272_v7, %v5988_v22  ;;  %9743 = vmatmul.mubr.msk.bf16.gmra.mrb[204].mxu0 %vm11713_vm5, %v18932_v31 }
 0x6c4   :  { %10615 = vmatmul.mubr.msk.bf16.gmra.mrb[8].mxu1 %vm11722_vm6, %v18927_v19  ;;  %v5990_v19 = vpop.f32.mrb[99].mxu0  ;;  %7685 = vmatprep.mubr.bf16.mxu0 %v18934_v16 }
 0x6c5   :  { %10618 = vmatprep.mubr.msk.bf16.mxu1 %vm11722_vm6, %v18929_v48  ;;  %18931 = vst [vmem:[#allocation43_spill] sm:$0xff] %v16514_v29  ;;  %v18933_v48 = vld [vmem:[#allocation102_spill] sm:$0xff]  ;;  %v5993_v7 = vpop.f32.mrb[100].mxu0 }
 0x6c6   :  { %v16529_v21 = vadd.f32 %v16263_v60, %v5993_v7  ;;  %v5995_v22 = vpop.f32.mrb[101].mxu0  ;;  %v18940_v60 = vld [vmem:[#allocation115_spill] sm:$0xff]  ;;  %v18941_v7 = vld [vmem:[#allocation105_spill] sm:$0xff] }
 0x6c7   :  { %v16511_v62 = vpop.f32.mrb[160].mxu1 }
 0x6c8   :  { %v6782_v53 = vpop.f32.mrb[161].mxu1  ;;  %18936 = vst [vmem:[#allocation52_spill] sm:$0xff] %v16529_v21  ;;  %v18944_v21 = vld [vmem:[#allocation111_spill] sm:$0xff] }
 0x6c9   :  { %v16516_v52 = vpop.f32.mrb[162].mxu1 }
 0x6ca   :  { %v6785_v14 = vpop.f32.mrb[163].mxu1 }
 0x6cb   :  { %v5996_v14 = vpop.f32.mrb[102].mxu0  ;;  %9747 = vmatmul.mubr.msk.bf16.gmra.mrb[208].mxu0 %vm11713_vm5, %v18938_v24 }
 0x6cc   :  { %10619 = vmatmul.mubr.msk.bf16.gmra.mrb[12].mxu1 %vm11722_vm6, %v18933_v48  ;;  %v16534_v31 = vadd.f32 %v16270_v2, %v5996_v14  ;;  %v5998_v48 = vpop.f32.mrb[103].mxu0  ;;  %7693 = vmatprep.mubr.bf16.mxu0 %v18940_v60 }
 0x6cd   :  { %10622 = vmatprep.mubr.msk.bf16.mxu1 %vm11722_vm6, %v18935_v45  ;;  %v18939_v45 = vld [vmem:[#allocation112_spill] sm:$0xff]  ;;  %v6001_v2 = vpop.f32.mrb[104].mxu0 }
 0x6ce   :  { %18937 = vst [vmem:[#allocation47_spill] sm:$0xff] %v16534_v31  ;;  %v16549_v22 = vadd.f32 %v16289_v39, %v6001_v2  ;;  %v6003_v14 = vpop.f32.mrb[105].mxu0  ;;  %v18946_v39 = vld [vmem:[#allocation92_spill] sm:$0xff]  ;;  %v18947_v2 = vld [vmem:[#allocation31_spill] sm:$0xff] }
 0x6cf   :  { %v16531_v53 = vpop.f32.mrb[164].mxu1 }
 0x6d0   :  { %v6790_v19 = vpop.f32.mrb[165].mxu1  ;;  %18942 = vst [vmem:[#allocation82_spill] sm:$0xff] %v16549_v22  ;;  %v18950_v22 = vld [vmem:[#allocation93_spill] sm:$0xff] }
 0x6d1   :  { %v16536_v29 = vpop.f32.mrb[166].mxu1 }
 0x6d2   :  { %v6793_v16 = vpop.f32.mrb[167].mxu1 }
 0x6d3   :  { %v6004_v16 = vpop.f32.mrb[106].mxu0  ;;  %9751 = vmatmul.mubr.msk.bf16.gmra.mrb[212].mxu0 %vm11713_vm5, %v18944_v21 }
 0x6d4   :  { %10623 = vmatmul.mubr.msk.bf16.gmra.mrb[16].mxu1 %vm11722_vm6, %v18939_v45  ;;  %v16554_v24 = vadd.f32 %v16296_v44, %v6004_v16  ;;  %v6006_v45 = vpop.f32.mrb[107].mxu0  ;;  %7701 = vmatprep.mubr.bf16.mxu0 %v18946_v39 }
 0x6d5   :  { %10626 = vmatprep.mubr.msk.bf16.mxu1 %vm11722_vm6, %v18941_v7  ;;  %v18945_v7 = vld [vmem:[#allocation16_spill] sm:$0xff]  ;;  %v6009_v44 = vpop.f32.mrb[108].mxu0 }
 0x6d6   :  { %18943 = vst [vmem:[#allocation97_spill] sm:$0xff] %v16554_v24  ;;  %v16569_v14 = vadd.f32 %v16287_v56, %v6009_v44  ;;  %v6011_v16 = vpop.f32.mrb[109].mxu0  ;;  %v18952_v56 = vld [vmem:[#allocation37_spill] sm:$0xff]  ;;  %v18953_v44 = vld [vmem:[#allocation98_spill] sm:$0xff] }
 0x6d7   :  { %v16551_v19 = vpop.f32.mrb[168].mxu1 }
 0x6d8   :  { %v6798_v48 = vpop.f32.mrb[169].mxu1  ;;  %18948 = vst [vmem:[#allocation58_spill] sm:$0xff] %v16569_v14  ;;  %v18956_v14 = vld [vmem:[#allocation66_spill] sm:$0xff] }
 0x6d9   :  { %v16556_v31 = vpop.f32.mrb[170].mxu1 }
 0x6da   :  { %v6801_v60 = vpop.f32.mrb[171].mxu1 }
 0x6db   :  { %v6012_v60 = vpop.f32.mrb[110].mxu0  ;;  %9755 = vmatmul.mubr.msk.bf16.gmra.mrb[216].mxu0 %vm11713_vm5, %v18950_v22 }
 0x6dc   :  { %10627 = vmatmul.mubr.msk.bf16.gmra.mrb[20].mxu1 %vm11722_vm6, %v18945_v7  ;;  %v16574_v21 = vadd.f32 %v16294_v23, %v6012_v60  ;;  %v6014_v7 = vpop.f32.mrb[111].mxu0  ;;  %7709 = vmatprep.mubr.bf16.mxu0 %v18952_v56 }
 0x6dd   :  { %10630 = vmatprep.mubr.msk.bf16.mxu1 %vm11722_vm6, %v18947_v2  ;;  %v18951_v2 = vld [vmem:[#allocation11_spill] sm:$0xff]  ;;  %v6017_v23 = vpop.f32.mrb[112].mxu0 }
 0x6de   :  { %18949 = vst [vmem:[#allocation64_spill] sm:$0xff] %v16574_v21  ;;  %v16589_v16 = vadd.f32 %v16313_v6, %v6017_v23  ;;  %v6019_v60 = vpop.f32.mrb[113].mxu0  ;;  %v18958_v6 = vld [vmem:[#allocation109_spill] sm:$0xff] }
 0x6df   :  { %v16571_v48 = vpop.f32.mrb[172].mxu1 }
 0x6e0   :  { %v6806_v45 = vpop.f32.mrb[173].mxu1  ;;  %18954 = vst [vmem:[#allocation13_spill] sm:$0xff] %v16589_v16  ;;  %v18974_v16 = vld [vmem:[#allocation124_spill] sm:$0xff] }
 0x6e1   :  { %v16576_v24 = vpop.f32.mrb[174].mxu1 }
 0x6e2   :  { %v6809_v39 = vpop.f32.mrb[175].mxu1 }
 0x6e3   :  { %v6020_v39 = vpop.f32.mrb[114].mxu0  ;;  %9759 = vmatmul.mubr.msk.bf16.gmra.mrb[220].mxu0 %vm11713_vm5, %v18956_v14 }
 0x6e4   :  { %10631 = vmatmul.mubr.msk.bf16.gmra.mrb[24].mxu1 %vm11722_vm6, %v18951_v2  ;;  %v16594_v22 = vadd.f32 %v16320_v54, %v6020_v39  ;;  %v6022_v2 = vpop.f32.mrb[115].mxu0  ;;  %7717 = vmatprep.mubr.bf16.mxu0 %v18958_v6 }
 0x6e5   :  { %10634 = vmatprep.mubr.msk.bf16.mxu1 %vm11722_vm6, %v18953_v44  ;;  %v18957_v44 = vld [vmem:[#allocation41_spill] sm:$0xff]  ;;  %v6025_v54 = vpop.f32.mrb[116].mxu0 }
 0x6e6   :  { %18955 = vst [vmem:[#allocation15_spill] sm:$0xff] %v16594_v22  ;;  %v16609_v23 = vadd.f32 %v16311_v59, %v6025_v54  ;;  %v18961_v22 = vld [vmem:[#allocation48_spill] sm:$0xff] }
 0x6e7   :  { %v16591_v45 = vpop.f32.mrb[176].mxu1 }
 0x6e8   :  { %v6814_v7 = vpop.f32.mrb[177].mxu1  ;;  %18959 = vst [vmem:[#allocation86_spill] sm:$0xff] %v16609_v23 }
 0x6e9   :  { %v16596_v21 = vpop.f32.mrb[178].mxu1  ;;  %v6027_v7 = vpop.f32.mrb[117].mxu0 }
 0x6ea   :  { %v6817_v56 = vpop.f32.mrb[179].mxu1  ;;  %v6028_v2 = vpop.f32.mrb[118].mxu0 }
 0x6eb   :  { %v16614_v14 = vadd.f32 %v16318_v37, %v6028_v2  ;;  %9763 = vmatmul.mubr.msk.bf16.gmra.mrb[224].mxu0 %vm11713_vm5, %v18961_v22 }
 0x6ec   :  { %10635 = vmatmul.mubr.msk.bf16.gmra.mrb[28].mxu1 %vm11722_vm6, %v18957_v44  ;;  %v6030_v44 = vpop.f32.mrb[119].mxu0 }
 0x6ed   :  { %10638 = vmatprep.mubr.msk.bf16.mxu1 %vm11722_vm6, %v16239_v0  ;;  %18960 = vst [vmem:[#allocation18_spill] sm:$0xff] %v16614_v14  ;;  %v18962_v0 = vld [vmem:[#allocation49_spill] sm:$0xff]  ;;  %v6033_v59 = vpop.f32.mrb[120].mxu0  ;;  %v18965_v14 = vld [vmem:[#allocation110_spill] sm:$0xff] }
 0x6ee   :  { %7725 = vmatprep.mubr.bf16.mxu0 %v18962_v0  ;;  %v16627_v37 = vadd.f32 %v16337_v38, %v6033_v59  ;;  %v6035_v7 = vpop.f32.mrb[121].mxu0 }
 0x6ef   :  { %v16611_v60 = vpop.f32.mrb[180].mxu1  ;;  %v6036_v2 = vpop.f32.mrb[122].mxu0 }
 0x6f0   :  { %v6822_v39 = vpop.f32.mrb[181].mxu1  ;;  %18963 = vst [vmem:[#allocation62_spill] sm:$0xff] %v16627_v37  ;;  %v16632_v44 = vadd.f32 %v16344_v63, %v6036_v2 }
 0x6f1   :  { %v16616_v56 = vpop.f32.mrb[182].mxu1 }
 0x6f2   :  { %v6825_v6 = vpop.f32.mrb[183].mxu1  ;;  %18964 = vst [vmem:[#allocation60_spill] sm:$0xff] %v16632_v44 }
 0x6f3   :  { %v6038_v6 = vpop.f32.mrb[123].mxu0  ;;  %9767 = vmatmul.mubr.msk.bf16.gmra.mrb[228].mxu0 %vm11713_vm5, %v18965_v14 }
 0x6f4   :  { %10639 = vmatmul.mubr.bf16.gmra.mrb[32].mxu1 %v18712_v28  ;;  %v6041_v63 = vpop.f32.mrb[124].mxu0 }
 0x6f5   :  { %10642 = vmatprep.mubr.msk.bf16.mxu1 %vm11722_vm6, %v15693_v36  ;;  %v18966_v36 = vld [vmem:[#allocation113_spill] sm:$0xff]  ;;  %v16647_v38 = vadd.f32 %v16335_v49, %v6041_v63  ;;  %v6043_v7 = vpop.f32.mrb[125].mxu0  ;;  %v18970_v49 = vld [vmem:[#allocation114_spill] sm:$0xff]  ;;  %v18971_v63 = vld [vmem:[#allocation120_spill] sm:$0xff] }
 0x6f6   :  { %7733 = vmatprep.mubr.bf16.mxu0 %v18966_v36  ;;  %v6044_v2 = vpop.f32.mrb[126].mxu0  ;;  %v18969_v36 = vld [vmem:[#allocation53_spill] sm:$0xff] }
 0x6f7   :  { %v16629_v54 = vpop.f32.mrb[184].mxu1  ;;  %18967 = vst [vmem:[#allocation103_spill] sm:$0xff] %v16647_v38  ;;  %v16652_v14 = vadd.f32 %v16342_v34, %v6044_v2  ;;  %v18973_v38 = vld [vmem:[#allocation121_spill] sm:$0xff] }
 0x6f8   :  { %v6830_v39 = vpop.f32.mrb[185].mxu1 }
 0x6f9   :  { %v16634_v22 = vpop.f32.mrb[186].mxu1  ;;  %18968 = vst [vmem:[#allocation102_spill] sm:$0xff] %v16652_v14 }
 0x6fa   :  { %v6833_v0 = vpop.f32.mrb[187].mxu1 }
 0x6fb   :  { %9771 = vmatmul.mubr.msk.bf16.gmra.mrb[232].mxu0 %vm11713_vm5, %v18969_v36 }
 0x6fc   :  { %10643 = vmatmul.mubr.msk.bf16.gmra.mrb[36].mxu1 %vm11722_vm6, %v15713_v46  ;;  %v6046_v46 = vpop.f32.mrb[127].mxu0  ;;  %7741 = vmatprep.mubr.bf16.mxu0 %v18970_v49 }
 0x6fd   :  { %10646 = vmatprep.mubr.msk.bf16.mxu1 %vm11722_vm6, %v15724_v33  ;;  %v16662_v33 = vld [vmem:[%s17591_s12] ss:$0 sm:$0xff]  ;;  %v10532_v34 = vpop.f32.mrb[128].mxu0 }
 0x6fe   :  { %v6339_v7 = vadd.f32 %v16662_v33, %v18971_v63  ;;  %v7022_v2 = vadd.f32 %v10532_v34, %v16379_v26  ;;  %v7013_v46 = vpop.f32.mrb[129].mxu0  ;;  %v6340_v44 = vadd.f32 %v16662_v33, %v18973_v38  ;;  %v6338_v26 = vadd.f32 %v16662_v33, %v18974_v16 }
 0x6ff   :  { %v16649_v59 = vpop.f32.mrb[188].mxu1  ;;  %v10533_v49 = vpop.f32.mrb[130].mxu0 }
 0x700   :  { %v6838_v39 = vpop.f32.mrb[189].mxu1  ;;  %v7025_v63 = vadd.f32 %v10533_v49, %v16384_v18  ;;  %v7016_v23 = vpop.f32.mrb[131].mxu0  ;;  %v18976_v18 = vld [vmem:[#allocation118_spill] sm:$0xff] }
 0x701   :  { %v16654_v6 = vpop.f32.mrb[190].mxu1 }
 0x702   :  { %v6841_v0 = vpop.f32.mrb[191].mxu1 }
 0x703   :  { %v18972_v0 = vld [vmem:[#allocation90_spill] sm:$0xff] }
 0x704   :  { %10647 = vmatmul.mubr.msk.bf16.gmra.mrb[40].mxu1 %vm11722_vm6, %v15743_v42  ;;  %v6337_v36 = vadd.f32 %v16662_v33, %v18972_v0  ;;  %v7014_v42 = vadd.f32 %v7013_v46, %v16359_v61  ;;  %v16691_v61 = vadd.f32 %v7025_v63, %v6340_v44  ;;  %v18975_v46 = vld [vmem:[#allocation116_spill] sm:$0xff]  ;;  %v10536_v16 = vpop.f32.mrb[132].mxu0 }
 0x705   :  { %10650 = vmatprep.mubr.msk.bf16.mxu1 %vm11722_vm6, %v15755_v1  ;;  %v16681_v1 = vadd.f32 %v7022_v2, %v6339_v7  ;;  %9775 = vmatmul.mubr.msk.bf16.gmra.mrb[236].mxu0 %vm11713_vm5, %v18975_v46  ;;  %v7038_v7 = vadd.f32 %v10536_v16, %v16426_v51  ;;  %v7029_v2 = vpop.f32.mrb[133].mxu0 }
 0x706   :  { %v16688_v34 = vadd.f32 %v7014_v42, %v6337_v36  ;;  %7749 = vmatprep.mubr.bf16.mxu0 %v18976_v18  ;;  %v18978_v36 = vld [vmem:[#allocation122_spill] sm:$0xff]  ;;  %v10537_v63 = vpop.f32.mrb[134].mxu0 }
 0x707   :  { %v16673_v39 = vpop.f32.mrb[192].mxu1  ;;  %v6341_v42 = vadd.f32 %v16662_v33, %v18978_v36  ;;  %v7041_v46 = vadd.f32 %v10537_v63, %v16433_v10  ;;  %v7032_v18 = vpop.f32.mrb[135].mxu0  ;;  %v18982_v10 = vld [vmem:[#allocation22_spill] sm:$0xff] }
 0x708   :  { %v6846_v14 = vpop.f32.mrb[193].mxu1 }
 0x709   :  { %v16683_v37 = vpop.f32.mrb[194].mxu1  ;;  %v7017_v14 = vadd.f32 %v7016_v23, %v16364_v40  ;;  %v18977_v23 = vld [vmem:[#allocation68_spill] sm:$0xff] }
 0x70a   :  { %v6849_v0 = vpop.f32.mrb[195].mxu1  ;;  %v6343_v44 = vadd.f32 %v16662_v33, %v18977_v23  ;;  %v18980_v23 = vld [vmem:[#allocation73_spill] sm:$0xff] }
 0x70b   :  { %v16696_v38 = vadd.f32 %v7017_v14, %v6338_v26  ;;  %v6342_v51 = vadd.f32 %v16662_v33, %v18980_v23 }
 0x70c   :  { %10651 = vmatmul.mubr.msk.bf16.gmra.mrb[44].mxu1 %vm11722_vm6, %v15773_v47  ;;  %v7030_v47 = vadd.f32 %v7029_v2, %v16405_v17  ;;  %v16713_v26 = vadd.f32 %v7038_v7, %v6343_v44  ;;  %v18981_v44 = vld [vmem:[#allocation69_spill] sm:$0xff]  ;;  %v10540_v2 = vpop.f32.mrb[136].mxu0 }
 0x70d   :  { %10654 = vmatprep.mubr.msk.bf16.mxu1 %vm11722_vm6, %v15784_v43  ;;  %v18979_v43 = vld [vmem:[#allocation30_spill] sm:$0xff]  ;;  %9779 = vmatmul.mubr.msk.bf16.gmra.mrb[240].mxu0 %vm11713_vm5, %v18981_v44  ;;  %v7054_v63 = vadd.f32 %v10540_v2, %v16471_v15  ;;  %v18986_v2 = vld [vmem:[#allocation21_spill] sm:$0xff] }
 0x70e   :  { %v6344_v14 = vadd.f32 %v16662_v33, %v18979_v43  ;;  %v16722_v16 = vadd.f32 %v7030_v47, %v6341_v42  ;;  %7757 = vmatprep.mubr.bf16.mxu0 %v18982_v10  ;;  %v18983_v42 = vld [vmem:[#allocation119_spill] sm:$0xff]  ;;  %v7045_v43 = vpop.f32.mrb[137].mxu0 }
 0x70f   :  { %v16705_v40 = vpop.f32.mrb[196].mxu1  ;;  %v6347_v47 = vadd.f32 %v16662_v33, %v18983_v42  ;;  %v10541_v23 = vpop.f32.mrb[138].mxu0 }
 0x710   :  { %v6854_v49 = vpop.f32.mrb[197].mxu1  ;;  %v16725_v17 = vadd.f32 %v7041_v46, %v6344_v14  ;;  %v18984_v46 = vld [vmem:[#allocation70_spill] sm:$0xff]  ;;  %v7057_v44 = vadd.f32 %v10541_v23, %v16476_v50  ;;  %v7048_v10 = vpop.f32.mrb[139].mxu0  ;;  %v18989_v50 = vld [vmem:[#allocation67_spill] sm:$0xff] }
 0x711   :  { %v16715_v0 = vpop.f32.mrb[198].mxu1  ;;  %v7033_v49 = vadd.f32 %v7032_v18, %v16410_v8  ;;  %v6345_v18 = vadd.f32 %v16662_v33, %v18984_v46  ;;  %v7049_v46 = vadd.f32 %v7048_v10, %v16454_v12  ;;  %v18992_v10 = vld [vmem:[#allocation77_spill] sm:$0xff] }
 0x712   :  { %v6857_v36 = vpop.f32.mrb[199].mxu1 }
 0x713   :  { %v16730_v7 = vadd.f32 %v7033_v49, %v6342_v51  ;;  %v16747_v51 = vadd.f32 %v7054_v63, %v6347_v47  ;;  %v18988_v47 = vld [vmem:[#allocation27_spill] sm:$0xff] }
 0x714   :  { %10655 = vmatmul.mubr.msk.bf16.gmra.mrb[48].mxu1 %vm11722_vm6, %v15802_v35  ;;  %v7046_v35 = vadd.f32 %v7045_v43, %v16449_v55  ;;  %v18990_v43 = vld [vmem:[#allocation125_spill] sm:$0xff] }
 0x715   :  { %10658 = vmatprep.mubr.msk.bf16.mxu1 %vm11722_vm6, %v15814_v5  ;;  %v18985_v5 = vld [vmem:[#allocation61_spill] sm:$0xff]  ;;  %9783 = vmatmul.mubr.msk.bf16.gmra.mrb[244].mxu0 %vm11713_vm5, %v18988_v47 }
 0x716   :  { %v6348_v49 = vadd.f32 %v16662_v33, %v18985_v5  ;;  %v16754_v42 = vadd.f32 %v7046_v35, %v6345_v18  ;;  %7765 = vmatprep.mubr.bf16.mxu0 %v18989_v50  ;;  %v10544_v18 = vpop.f32.mrb[140].mxu0  ;;  %v18991_v35 = vld [vmem:[#allocation35_spill] sm:$0xff]  ;;  %v18994_v47 = vld [vmem:[#allocation9_spill] sm:$0xff] }
 0x717   :  { %v16739_v8 = vpop.f32.mrb[200].mxu1  ;;  %v6351_v23 = vadd.f32 %v16662_v33, %v18991_v35  ;;  %v7070_v5 = vadd.f32 %v10544_v18, %v16511_v62  ;;  %v6352_v50 = vadd.f32 %v16662_v33, %v18994_v47  ;;  %v18995_v18 = vld [vmem:[#allocation46_spill] sm:$0xff] }
 0x718   :  { %v6862_v14 = vpop.f32.mrb[201].mxu1  ;;  %v16759_v55 = vadd.f32 %v7057_v44, %v6348_v49  ;;  %v7061_v49 = vpop.f32.mrb[141].mxu0 }
 0x719   :  { %v16749_v36 = vpop.f32.mrb[202].mxu1  ;;  %v6346_v14 = vadd.f32 %v16662_v33, %v18986_v2  ;;  %v10545_v2 = vpop.f32.mrb[142].mxu0 }
 0x71a   :  { %v6865_v15 = vpop.f32.mrb[203].mxu1  ;;  %18987 = vst [vmem:[#allocation84_spill] sm:$0xff] %v16759_v55  ;;  %v7064_v35 = vpop.f32.mrb[143].mxu0 }
 0x71b   :  { %v16764_v63 = vadd.f32 %v7049_v46, %v6346_v14  ;;  %v6349_v15 = vadd.f32 %v16662_v33, %v18992_v10  ;;  %v16781_v14 = vadd.f32 %v7070_v5, %v6351_v23  ;;  %v7065_v10 = vadd.f32 %v7064_v35, %v16496_v4  ;;  %v18997_v23 = vld [vmem:[#allocation34_spill] sm:$0xff] }
 0x71c   :  { %10659 = vmatmul.mubr.msk.bf16.gmra.mrb[52].mxu1 %vm11722_vm6, %v15832_v25  ;;  %v7062_v25 = vadd.f32 %v7061_v49, %v16491_v3  ;;  %v18998_v49 = vld [vmem:[#allocation29_spill] sm:$0xff]  ;;  %v19001_v35 = vld [vmem:[#allocation50_spill] sm:$0xff] }
 0x71d   :  { %10662 = vmatprep.mubr.msk.bf16.mxu1 %vm11722_vm6, %v18990_v43  ;;  %18993 = vst [vmem:[#allocation63_spill] sm:$0xff] %v16781_v14  ;;  %v7073_v43 = vadd.f32 %v10545_v2, %v16516_v52  ;;  %9787 = vmatmul.mubr.msk.bf16.gmra.mrb[248].mxu0 %vm11713_vm5, %v18997_v23  ;;  %v18999_v52 = vld [vmem:[#allocation75_spill] sm:$0xff] }
 0x71e   :  { %v16788_v55 = vadd.f32 %v7062_v25, %v6349_v15  ;;  %7773 = vmatprep.mubr.bf16.mxu0 %v18712_v28  ;;  %v10548_v15 = vpop.f32.mrb[144].mxu0  ;;  %v19000_v25 = vld [vmem:[#allocation83_spill] sm:$0xff] }
 0x71f   :  { %v16773_v12 = vpop.f32.mrb[204].mxu1  ;;  %v16793_v3 = vadd.f32 %v7073_v43, %v6352_v50  ;;  %v6355_v2 = vadd.f32 %v16662_v33, %v19000_v25  ;;  %v7086_v47 = vadd.f32 %v10548_v15, %v16551_v19  ;;  %v7077_v50 = vpop.f32.mrb[145].mxu0  ;;  %v19003_v15 = vld [vmem:[#allocation51_spill] sm:$0xff] }
 0x720   :  { %v6870_v44 = vpop.f32.mrb[205].mxu1 }
 0x721   :  { %v16783_v46 = vpop.f32.mrb[206].mxu1  ;;  %v6350_v44 = vadd.f32 %v16662_v33, %v18995_v18  ;;  %18996 = vst [vmem:[#allocation44_spill] sm:$0xff] %v16793_v3  ;;  %v7078_v18 = vadd.f32 %v7077_v50, %v16531_v53 }
 0x722   :  { %v6873_v62 = vpop.f32.mrb[207].mxu1 }
 0x723   :  { %v16798_v5 = vadd.f32 %v7065_v10, %v6350_v44  ;;  %v6353_v62 = vadd.f32 %v16662_v33, %v19001_v35  ;;  %v10549_v44 = vpop.f32.mrb[146].mxu0  ;;  %v16815_v10 = vadd.f32 %v7086_v47, %v6355_v2  ;;  %v19004_v47 = vld [vmem:[#allocation32_spill] sm:$0xff] }
 0x724   :  { %10663 = vmatmul.mubr.msk.bf16.gmra.mrb[56].mxu1 %vm11722_vm6, %v18998_v49  ;;  %v19002_v49 = vld [vmem:[#allocation81_spill] sm:$0xff]  ;;  %v7089_v3 = vadd.f32 %v10549_v44, %v16556_v31  ;;  %v7080_v25 = vpop.f32.mrb[147].mxu0  ;;  %v19005_v31 = vld [vmem:[#allocation71_spill] sm:$0xff] }
 0x725   :  { %10666 = vmatprep.mubr.msk.bf16.mxu1 %vm11722_vm6, %v18999_v52  ;;  %v6356_v52 = vadd.f32 %v16662_v33, %v19002_v49  ;;  %v16822_v14 = vadd.f32 %v7078_v18, %v6353_v62  ;;  %v7081_v35 = vadd.f32 %v7080_v25, %v16536_v29  ;;  %7774 = vmatmul.mubr.bf16.gmra.mrb[252].mxu0 %v18712_v28  ;;  %v10552_v50 = vpop.f32.mrb[148].mxu0  ;;  %v19006_v29 = vld [vmem:[#allocation85_spill] sm:$0xff] }
 0x726   :  { %7781 = vmatprep.mubr.bf16.mxu0 %v19005_v31  ;;  %v7102_v18 = vadd.f32 %v10552_v50, %v16591_v45  ;;  %v7093_v44 = vpop.f32.mrb[149].mxu0  ;;  %v19010_v50 = vld [vmem:[#allocation6_spill] sm:$0xff] }
 0x727   :  { %v16807_v4 = vpop.f32.mrb[208].mxu1  ;;  %v16827_v53 = vadd.f32 %v7089_v3, %v6356_v52  ;;  %v6359_v3 = vadd.f32 %v16662_v33, %v19006_v29  ;;  %v19007_v52 = vld [vmem:[#allocation55_spill] sm:$0xff] }
 0x728   :  { %v6878_v43 = vpop.f32.mrb[209].mxu1  ;;  %v6357_v25 = vadd.f32 %v16662_v33, %v19007_v52 }
 0x729   :  { %v16817_v23 = vpop.f32.mrb[210].mxu1  ;;  %v6354_v43 = vadd.f32 %v16662_v33, %v19003_v15  ;;  %v10553_v15 = vpop.f32.mrb[150].mxu0 }
 0x72a   :  { %v6881_v19 = vpop.f32.mrb[211].mxu1  ;;  %v7096_v31 = vpop.f32.mrb[151].mxu0 }
 0x72b   :  { %v16830_v2 = vadd.f32 %v7081_v35, %v6354_v43  ;;  %v7094_v19 = vadd.f32 %v7093_v44, %v16571_v48  ;;  %v16847_v43 = vadd.f32 %v7102_v18, %v6359_v3  ;;  %v7097_v52 = vadd.f32 %v7096_v31, %v16576_v24  ;;  %v19012_v3 = vld [vmem:[#allocation19_spill] sm:$0xff]  ;;  %v19013_v44 = vld [vmem:[#allocation20_spill] sm:$0xff] }
 0x72c   :  { %10667 = vmatmul.mubr.msk.bf16.gmra.mrb[60].mxu1 %vm11722_vm6, %v19004_v47  ;;  %v7105_v47 = vadd.f32 %v10553_v15, %v16596_v21  ;;  %v10556_v21 = vpop.f32.mrb[152].mxu0 }
 0x72d   :  { %10670 = vmatprep.mubr.msk.bf16.mxu1 %vm11722_vm6, %v16428_v58  ;;  %19008 = vst [vmem:[#allocation112_spill] sm:$0xff] %v16847_v43  ;;  %v19009_v58 = vld [vmem:[#allocation23_spill] sm:$0xff]  ;;  %v16854_v29 = vadd.f32 %v7094_v19, %v6357_v25  ;;  %9791 = vmatmul.mubr.msk.bf16.gmra.mrb[0].mxu0 %vm11713_vm5, %v19012_v3  ;;  %v19014_v19 = vld [vmem:[#allocation78_spill] sm:$0xff]  ;;  %v7118_v24 = vadd.f32 %v10556_v21, %v16629_v54  ;;  %v19018_v21 = vld [vmem:[#allocation72_spill] sm:$0xff] }
 0x72e   :  { %v6360_v35 = vadd.f32 %v16662_v33, %v19009_v58  ;;  %7789 = vmatprep.mubr.bf16.mxu0 %v19013_v44  ;;  %v6363_v15 = vadd.f32 %v16662_v33, %v19014_v19  ;;  %v7109_v58 = vpop.f32.mrb[153].mxu0  ;;  %v19017_v3 = vld [vmem:[#allocation74_spill] sm:$0xff] }
 0x72f   :  { %v16839_v62 = vpop.f32.mrb[212].mxu1  ;;  %v6364_v44 = vadd.f32 %v16662_v33, %v19017_v3 }
 0x730   :  { %v6886_v49 = vpop.f32.mrb[213].mxu1  ;;  %v16859_v48 = vadd.f32 %v7105_v47, %v6360_v35  ;;  %v19015_v47 = vld [vmem:[#allocation76_spill] sm:$0xff] }
 0x731   :  { %v16849_v30 = vpop.f32.mrb[214].mxu1  ;;  %v6358_v49 = vadd.f32 %v16662_v33, %v19010_v50  ;;  %v6361_v31 = vadd.f32 %v16662_v33, %v19015_v47  ;;  %v10557_v50 = vpop.f32.mrb[154].mxu0 }
 0x732   :  { %v6889_v45 = vpop.f32.mrb[215].mxu1  ;;  %19011 = vst [vmem:[#allocation115_spill] sm:$0xff] %v16859_v48  ;;  %v7121_v48 = vadd.f32 %v10557_v50, %v16634_v22  ;;  %v7112_v19 = vpop.f32.mrb[155].mxu0 }
 0x733   :  { %v16864_v18 = vadd.f32 %v7097_v52, %v6358_v49  ;;  %v7110_v45 = vadd.f32 %v7109_v58, %v16611_v60  ;;  %v16876_v49 = vadd.f32 %v7118_v24, %v6363_v15  ;;  %v7113_v47 = vadd.f32 %v7112_v19, %v16616_v56  ;;  %v19020_v15 = vld [vmem:[#allocation8_spill] sm:$0xff] }
 0x734   :  { %10671 = vmatmul.mubr.bf16.gmra.mrb[64].mxu1 %v18712_v28  ;;  %v16888_v60 = vadd.f32 %v7121_v48, %v6364_v44  ;;  %v19021_v58 = vld [vmem:[#allocation104_spill] sm:$0xff]  ;;  %v10560_v22 = vpop.f32.mrb[156].mxu0  ;;  %v19023_v48 = vld [vmem:[#allocation33_spill] sm:$0xff] }
 0x735   :  { %19016 = vst [vmem:[#allocation105_spill] sm:$0xff] %v16876_v49  ;;  %v16883_v43 = vadd.f32 %v7110_v45, %v6361_v31  ;;  %9795 = vmatmul.mubr.msk.bf16.gmra.mrb[4].mxu0 %vm11713_vm5, %v19020_v15  ;;  %v19022_v31 = vld [vmem:[#allocation17_spill] sm:$0xff]  ;;  %v7134_v3 = vadd.f32 %v10560_v22, %v16673_v39  ;;  %v6365_v44 = vadd.f32 %v16662_v33, %v19023_v48  ;;  %v19025_v15 = vld [vmem:[#allocation42_spill] sm:$0xff]  ;;  %v19026_v22 = vld [vmem:[#allocation40_spill] sm:$0xff] }
 0x736   :  { %19019 = vst [vmem:[#allocation111_spill] sm:$0xff] %v16888_v60  ;;  %7797 = vmatprep.mubr.bf16.mxu0 %v19021_v58  ;;  %v6367_v45 = vadd.f32 %v16662_v33, %v19022_v31  ;;  %v6368_v58 = vadd.f32 %v16662_v33, %v19025_v15 }
 0x737   :  { %v16868_v25 = vpop.f32.mrb[216].mxu1 }
 0x738   :  { %v6894_v35 = vpop.f32.mrb[217].mxu1 }
 0x739   :  { %v16878_v52 = vpop.f32.mrb[218].mxu1  ;;  %v6362_v35 = vadd.f32 %v16662_v33, %v19018_v21 }
 0x73a   :  { %v6897_v54 = vpop.f32.mrb[219].mxu1 }
 0x73b   :  { %v16893_v24 = vadd.f32 %v7113_v47, %v6362_v35  ;;  %v7125_v54 = vpop.f32.mrb[157].mxu0  ;;  %v16904_v35 = vadd.f32 %v7134_v3, %v6367_v45  ;;  %v19028_v45 = vld [vmem:[#allocation123_spill] sm:$0xff] }
 0x73c   :  { %v7126_v19 = vadd.f32 %v7125_v54, %v16649_v59  ;;  %v10561_v21 = vpop.f32.mrb[158].mxu0  ;;  %v19029_v54 = vld [vmem:[#allocation91_spill] sm:$0xff] }
 0x73d   :  { %19024 = vst [vmem:[#allocation16_spill] sm:$0xff] %v16904_v35  ;;  %v7137_v60 = vadd.f32 %v10561_v21, %v16683_v37  ;;  %v7128_v31 = vpop.f32.mrb[159].mxu0  ;;  %9799 = vmatmul.mubr.msk.bf16.gmra.mrb[8].mxu0 %vm11713_vm5, %v19028_v45  ;;  %v19030_v21 = vld [vmem:[#allocation7_spill] sm:$0xff] }
 0x73e   :  { %v16911_v49 = vadd.f32 %v7126_v19, %v6365_v44  ;;  %v7129_v48 = vadd.f32 %v7128_v31, %v16654_v6  ;;  %7805 = vmatprep.mubr.bf16.mxu0 %v19029_v54  ;;  %v10564_v37 = vpop.f32.mrb[160].mxu0  ;;  %v6371_v44 = vadd.f32 %v16662_v33, %v19030_v21  ;;  %v19031_v6 = vld [vmem:[#allocation56_spill] sm:$0xff]  ;;  %v19034_v35 = vld [vmem:[#allocation79_spill] sm:$0xff] }
 0x73f   :  { %v16896_v50 = vpop.f32.mrb[220].mxu1  ;;  %v16916_v59 = vadd.f32 %v7137_v60, %v6368_v58  ;;  %v7150_v15 = vadd.f32 %v10564_v37, %v16739_v8  ;;  %v6369_v60 = vadd.f32 %v16662_v33, %v19031_v6  ;;  %v6370_v8 = vadd.f32 %v16662_v33, %v19034_v35 }
 0x740   :  { %v6902_v56 = vpop.f32.mrb[221].mxu1 }
 0x741   :  { %v16906_v47 = vpop.f32.mrb[222].mxu1  ;;  %v6366_v56 = vadd.f32 %v16662_v33, %v19026_v22  ;;  %19027 = vst [vmem:[#allocation92_spill] sm:$0xff] %v16916_v59  ;;  %v16934_v45 = vadd.f32 %v7150_v15, %v6371_v44  ;;  %v19037_v15 = vld [vmem:[#allocation94_spill] sm:$0xff] }
 0x742   :  { %v6905_v39 = vpop.f32.mrb[223].mxu1 }
 0x743   :  { %v16921_v3 = vadd.f32 %v7129_v48, %v6366_v56  ;;  %v7141_v39 = vpop.f32.mrb[161].mxu0  ;;  %v19032_v56 = vld [vmem:[#allocation99_spill] sm:$0xff]  ;;  %19033 = vst [vmem:[#allocation31_spill] sm:$0xff] %v16934_v45  ;;  %v19041_v45 = vld [vmem:[#allocation100_spill] sm:$0xff] }
 0x744   :  { %v7142_v31 = vadd.f32 %v7141_v39, %v16705_v40  ;;  %v10565_v22 = vpop.f32.mrb[162].mxu0  ;;  %v6372_v48 = vadd.f32 %v16662_v33, %v19032_v56  ;;  %v19036_v39 = vld [vmem:[#allocation24_spill] sm:$0xff] }
 0x745   :  { %v7153_v21 = vadd.f32 %v10565_v22, %v16749_v36  ;;  %v7144_v59 = vpop.f32.mrb[163].mxu0  ;;  %9803 = vmatmul.mubr.msk.bf16.gmra.mrb[12].mxu0 %vm11713_vm5, %v19036_v39  ;;  %v19038_v22 = vld [vmem:[#allocation38_spill] sm:$0xff] }
 0x746   :  { %v16941_v37 = vadd.f32 %v7142_v31, %v6369_v60  ;;  %7813 = vmatprep.mubr.bf16.mxu0 %v19037_v15  ;;  %v10568_v36 = vpop.f32.mrb[164].mxu0  ;;  %v6375_v56 = vadd.f32 %v16662_v33, %v19038_v22 }
 0x747   :  { %v16926_v19 = vpop.f32.mrb[224].mxu1  ;;  %v16944_v40 = vadd.f32 %v7153_v21, %v6372_v48  ;;  %v7166_v60 = vadd.f32 %v10568_v36, %v16807_v4  ;;  %v7157_v31 = vpop.f32.mrb[165].mxu0  ;;  %v6374_v4 = vadd.f32 %v16662_v33, %v19041_v45 }
 0x748   :  { %v6910_v58 = vpop.f32.mrb[225].mxu1  ;;  %v7158_v21 = vadd.f32 %v7157_v31, %v16773_v12  ;;  %v19042_v31 = vld [vmem:[#allocation45_spill] sm:$0xff] }
 0x749   :  { %v16936_v54 = vpop.f32.mrb[226].mxu1  ;;  %v7145_v58 = vadd.f32 %v7144_v59, %v16715_v0  ;;  %19035 = vst [vmem:[#allocation93_spill] sm:$0xff] %v16944_v40  ;;  %v19039_v0 = vld [vmem:[#allocation57_spill] sm:$0xff]  ;;  %v16962_v39 = vadd.f32 %v7166_v60, %v6375_v56  ;;  %v19043_v60 = vld [vmem:[#allocation88_spill] sm:$0xff] }
 0x74a   :  { %v6913_v6 = vpop.f32.mrb[227].mxu1  ;;  %v6373_v59 = vadd.f32 %v16662_v33, %v19039_v0 }
 0x74b   :  { %v16949_v44 = vadd.f32 %v7145_v58, %v6370_v8  ;;  %v10569_v6 = vpop.f32.mrb[166].mxu0  ;;  %v19040_v8 = vld [vmem:[#allocation80_spill] sm:$0xff] }
 0x74c   :  { %v6376_v58 = vadd.f32 %v16662_v33, %v19040_v8  ;;  %v7169_v22 = vadd.f32 %v10569_v6, %v16817_v23  ;;  %v7160_v40 = vpop.f32.mrb[167].mxu0  ;;  %v16969_v36 = vadd.f32 %v7158_v21, %v6373_v59  ;;  %v6379_v6 = vadd.f32 %v16662_v33, %v16447_v13 }
 0x74d   :  { %9807 = vmatmul.mubr.msk.bf16.gmra.mrb[16].mxu0 %vm11713_vm5, %v19042_v31  ;;  %v10572_v23 = vpop.f32.mrb[168].mxu0  ;;  %v19044_v31 = vld [vmem:[#allocation54_spill] sm:$0xff] }
 0x74e   :  { %v16972_v12 = vadd.f32 %v7169_v22, %v6376_v58  ;;  %7821 = vmatprep.mubr.bf16.mxu0 %v19043_v60  ;;  %v7182_v59 = vadd.f32 %v10572_v23, %v16868_v25  ;;  %v7173_v21 = vpop.f32.mrb[169].mxu0  ;;  %v6380_v22 = vadd.f32 %v16662_v33, %v16452_v27  ;;  %v6378_v25 = vadd.f32 %v16662_v33, %v19044_v31 }
 0x74f   :  { %v16954_v35 = vpop.f32.mrb[228].mxu1  ;;  %v7174_v8 = vadd.f32 %v7173_v21, %v16839_v62  ;;  %v10573_v58 = vpop.f32.mrb[170].mxu0  ;;  %v19045_v62 = vld [vmem:[#allocation25_spill] sm:$0xff] }
 0x750   :  { %v6918_v48 = vpop.f32.mrb[229].mxu1  ;;  %v7176_v13 = vpop.f32.mrb[171].mxu0 }
 0x751   :  { %v16964_v15 = vpop.f32.mrb[230].mxu1  ;;  %v7161_v48 = vadd.f32 %v7160_v40, %v16783_v46  ;;  %v6377_v46 = vadd.f32 %v16662_v33, %v16424_v41  ;;  %v7177_v41 = vadd.f32 %v7176_v13, %v16849_v30  ;;  %v6381_v30 = vadd.f32 %v16662_v33, %v16469_v9 }
 0x752   :  { %v6921_v0 = vpop.f32.mrb[231].mxu1  ;;  %v6384_v13 = vadd.f32 %v16662_v33, %v16494_v32 }
 0x753   :  { %v16977_v56 = vadd.f32 %v7161_v48, %v6374_v4  ;;  %v16988_v4 = vadd.f32 %v7182_v59, %v6379_v6  ;;  %v7185_v48 = vadd.f32 %v10573_v58, %v16878_v52  ;;  %v16993_v60 = vadd.f32 %v7174_v8, %v6377_v46  ;;  %v19046_v6 = vld [vmem:[#allocation89_spill] sm:$0xff] }
 0x754   :  { %v17001_v27 = vadd.f32 %v7177_v41, %v6378_v25  ;;  %v10576_v52 = vpop.f32.mrb[172].mxu0  ;;  %v6383_v59 = vadd.f32 %v16662_v33, %v16489_v57 }
 0x755   :  { %9811 = vmatmul.mubr.msk.bf16.gmra.mrb[20].mxu0 %vm11713_vm5, %v19045_v62  ;;  %v7198_v46 = vadd.f32 %v10576_v52, %v16926_v19  ;;  %v7189_v8 = vpop.f32.mrb[173].mxu0  ;;  %v6382_v19 = vadd.f32 %v16662_v33, %v16474_v20  ;;  %v19048_v52 = vld [vmem:[#allocation36_spill] sm:$0xff] }
 0x756   :  { %7829 = vmatprep.mubr.bf16.mxu0 %v19046_v6 }
 0x757   :  { %v6924_v45 = vpop.f32.mrb[232].mxu1  ;;  %v17012_v31 = vadd.f32 %v7198_v46, %v6383_v59  ;;  %v19049_v59 = vld [vmem:[#allocation52_spill] sm:$0xff] }
 0x758   :  { %v6926_v40 = vpop.f32.mrb[233].mxu1  ;;  %v6387_v46 = vadd.f32 %v16662_v33, %v19049_v59 }
 0x759   :  { %v6927_v0 = vpop.f32.mrb[234].mxu1  ;;  %v16996_v40 = vadd.f32 %v7185_v48, %v6380_v22  ;;  %v7190_v22 = vadd.f32 %v7189_v8, %v16896_v50  ;;  %v10577_v48 = vpop.f32.mrb[174].mxu0  ;;  %v19047_v50 = vld [vmem:[#allocation87_spill] sm:$0xff] }
 0x75a   :  { %v6929_v23 = vpop.f32.mrb[235].mxu1  ;;  %v7192_v57 = vpop.f32.mrb[175].mxu0 }
 0x75b   :  { %v7201_v23 = vadd.f32 %v10577_v48, %v16936_v54  ;;  %v17017_v41 = vadd.f32 %v7190_v22, %v6381_v30  ;;  %v7193_v9 = vadd.f32 %v7192_v57, %v16906_v47 }
 0x75c   :  { %v10580_v54 = vpop.f32.mrb[176].mxu0 }
 0x75d   :  { %v17020_v6 = vadd.f32 %v7201_v23, %v6384_v13  ;;  %9815 = vmatmul.mubr.msk.bf16.gmra.mrb[24].mxu0 %vm11713_vm5, %v19047_v50  ;;  %v17025_v32 = vadd.f32 %v7193_v9, %v6382_v19  ;;  %v7214_v8 = vadd.f32 %v10580_v54, %v6924_v45  ;;  %v7205_v30 = vpop.f32.mrb[177].mxu0  ;;  %v19051_v23 = vld [vmem:[#allocation47_spill] sm:$0xff] }
 0x75e   :  { %7837 = vmatprep.mubr.bf16.mxu0 %v19048_v52  ;;  %v7206_v48 = vadd.f32 %v7205_v30, %v16954_v35  ;;  %v10581_v13 = vpop.f32.mrb[178].mxu0  ;;  %v6388_v57 = vadd.f32 %v16662_v33, %v19051_v23  ;;  %v19053_v52 = vld [vmem:[#allocation43_spill] sm:$0xff]  ;;  %v19056_v35 = vld [vmem:[#allocation26_spill] sm:$0xff] }
 0x75f   :  { %v6932_v21 = vpop.f32.mrb[236].mxu1  ;;  %v17035_v19 = vadd.f32 %v7214_v8, %v6387_v46  ;;  %v7217_v9 = vadd.f32 %v10581_v13, %v6927_v0  ;;  %v7208_v50 = vpop.f32.mrb[179].mxu0  ;;  %v6386_v59 = vadd.f32 %v16662_v33, %v19053_v52  ;;  %v19058_v46 = vld [vmem:[#allocation10_spill] sm:$0xff] }
 0x760   :  { %v6934_v58 = vpop.f32.mrb[237].mxu1  ;;  %v19059_v8 = vld [vmem:[#allocation58_spill] sm:$0xff] }
 0x761   :  { %v6935_v25 = vpop.f32.mrb[238].mxu1  ;;  %v19050_v58 = vld [vmem:[#allocation59_spill] sm:$0xff]  ;;  %19052 = vst [vmem:[#allocation11_spill] sm:$0xff] %v17035_v19  ;;  %v6391_v13 = vadd.f32 %v16662_v33, %v19059_v8  ;;  %v19060_v52 = vld [vmem:[#allocation82_spill] sm:$0xff]  ;;  %v19063_v19 = vld [vmem:[#allocation97_spill] sm:$0xff] }
 0x762   :  { %v6937_v62 = vpop.f32.mrb[239].mxu1  ;;  %v6385_v47 = vadd.f32 %v16662_v33, %v19050_v58  ;;  %v7209_v58 = vadd.f32 %v7208_v50, %v16964_v15  ;;  %v6389_v15 = vadd.f32 %v16662_v33, %v19060_v52  ;;  %v6390_v8 = vadd.f32 %v16662_v33, %v19063_v19  ;;  %v19065_v52 = vld [vmem:[#allocation65_spill] sm:$0xff] }
 0x764   :  { %v17039_v45 = vadd.f32 %v7206_v48, %v6385_v47  ;;  %v17047_v30 = vadd.f32 %v7209_v58, %v6386_v59  ;;  %v10584_v0 = vpop.f32.mrb[180].mxu0 }
 0x765   :  { %9819 = vmatmul.mubr.msk.bf16.gmra.mrb[28].mxu0 %vm11713_vm5, %v19056_v35  ;;  %v7221_v48 = vpop.f32.mrb[181].mxu0 }
 0x766   :  { %19054 = vst [vmem:[#allocation37_spill] sm:$0xff] %v17039_v45  ;;  %19057 = vst [vmem:[#allocation66_spill] sm:$0xff] %v17047_v30  ;;  %7845 = vmatprep.mubr.bf16.mxu0 %v19058_v46  ;;  %v10585_v50 = vpop.f32.mrb[182].mxu0 }
 0x767   :  { %v6940_v20 = vpop.f32.mrb[240].mxu1 }
 0x768   :  { %v6942_v22 = vpop.f32.mrb[241].mxu1  ;;  %v7230_v47 = vadd.f32 %v10584_v0, %v6940_v20 }
 0x769   :  { %v6943_v62 = vpop.f32.mrb[242].mxu1  ;;  %v17042_v22 = vadd.f32 %v7217_v9, %v6388_v57  ;;  %v7222_v9 = vadd.f32 %v7221_v48, %v6932_v21 }
 0x76a   :  { %v6945_v54 = vpop.f32.mrb[243].mxu1  ;;  %v17056_v59 = vadd.f32 %v7230_v47, %v6391_v13  ;;  %v7233_v46 = vadd.f32 %v10585_v50, %v6943_v62  ;;  %v19067_v13 = vld [vmem:[#allocation107_spill] sm:$0xff] }
 0x76b   :  { %19055 = vst [vmem:[#allocation98_spill] sm:$0xff] %v17042_v22  ;;  %v19061_v54 = vld [vmem:[#allocation64_spill] sm:$0xff]  ;;  %v7224_v22 = vpop.f32.mrb[183].mxu0  ;;  %v17060_v30 = vadd.f32 %v7222_v9, %v6389_v15  ;;  %v19069_v15 = vld [vmem:[#allocation86_spill] sm:$0xff] }
 0x76c   :  { %v6392_v35 = vadd.f32 %v16662_v33, %v19061_v54  ;;  %19062 = vst [vmem:[#allocation41_spill] sm:$0xff] %v17056_v59  ;;  %v7225_v0 = vadd.f32 %v7224_v22, %v6935_v25  ;;  %v10588_v47 = vpop.f32.mrb[184].mxu0  ;;  %v6395_v9 = vadd.f32 %v16662_v33, %v19069_v15  ;;  %v19073_v15 = vld [vmem:[#allocation28_spill] sm:$0xff] }
 0x76d   :  { %9823 = vmatmul.mubr.msk.bf16.gmra.mrb[32].mxu0 %vm11713_vm5, %v19065_v52  ;;  %v7237_v48 = vpop.f32.mrb[185].mxu0 }
 0x76e   :  { %v17062_v45 = vadd.f32 %v7233_v46, %v6392_v35  ;;  %v17067_v21 = vadd.f32 %v7225_v0, %v6390_v8  ;;  %7853 = vmatprep.mubr.bf16.mxu0 %v19067_v13  ;;  %v10589_v54 = vpop.f32.mrb[186].mxu0  ;;  %v19070_v35 = vld [vmem:[#allocation15_spill] sm:$0xff]  ;;  %v19071_v8 = vld [vmem:[#allocation18_spill] sm:$0xff] }
 0x76f   :  { %v6948_v23 = vpop.f32.mrb[244].mxu1  ;;  %v6394_v46 = vadd.f32 %v16662_v33, %v19070_v35  ;;  %v7240_v52 = vpop.f32.mrb[187].mxu0 }
 0x770   :  { %v6950_v57 = vpop.f32.mrb[245].mxu1  ;;  %19064 = vst [vmem:[#allocation109_spill] sm:$0xff] %v17062_v45  ;;  %19066 = vst [vmem:[#allocation48_spill] sm:$0xff] %v17067_v21  ;;  %v7238_v50 = vadd.f32 %v7237_v48, %v6948_v23 }
 0x771   :  { %v6951_v58 = vpop.f32.mrb[246].mxu1  ;;  %v19068_v57 = vld [vmem:[#allocation13_spill] sm:$0xff] }
 0x772   :  { %v6953_v20 = vpop.f32.mrb[247].mxu1  ;;  %v6393_v19 = vadd.f32 %v16662_v33, %v19068_v57  ;;  %v7241_v21 = vadd.f32 %v7240_v52, %v6951_v58  ;;  %v19079_v52 = vld [vmem:[#allocation108_spill] sm:$0xff] }
 0x773   :  { %v6396_v20 = vadd.f32 %v16662_v33, %v19071_v8  ;;  %v19077_v8 = vld [vmem:[#allocation60_spill] sm:$0xff] }
 0x774   :  { %v17080_v45 = vadd.f32 %v7238_v50, %v6393_v19 }
 0x775   :  { %9827 = vmatmul.mubr.msk.bf16.gmra.mrb[36].mxu0 %vm11713_vm5, %v19073_v15  ;;  %v19081_v15 = vld [vmem:[#allocation39_spill] sm:$0xff] }
 0x776   :  { %v10592_v48 = vpop.f32.mrb[188].mxu0 }
 0x777   :  { %v6956_v62 = vpop.f32.mrb[248].mxu1  ;;  %v7253_v35 = vpop.f32.mrb[189].mxu0 }
 0x778   :  { %v7246_v25 = vadd.f32 %v10588_v47, %v6956_v62  ;;  %v6958_v22 = vpop.f32.mrb[249].mxu1  ;;  %v17087_v47 = vadd.f32 %v7241_v21, %v6394_v46  ;;  %v19075_v62 = vld [vmem:[#allocation117_spill] sm:$0xff] }
 0x779   :  { %v6959_v0 = vpop.f32.mrb[250].mxu1  ;;  %7861 = vmatprep.mubr.bf16.mxu0 %v19075_v62 }
 0x77a   :  { %v17078_v13 = vadd.f32 %v7246_v25, %v6395_v9  ;;  %v7249_v57 = vadd.f32 %v10589_v54, %v6959_v0  ;;  %v6961_v59 = vpop.f32.mrb[251].mxu1  ;;  %v19076_v9 = vld [vmem:[#allocation62_spill] sm:$0xff]  ;;  %v6398_v0 = vadd.f32 %v16662_v33, %v19077_v8 }
 0x77b   :  { %v6397_v19 = vadd.f32 %v16662_v33, %v19076_v9  ;;  %v10593_v59 = vpop.f32.mrb[190].mxu0  ;;  %v19082_v9 = vld [vmem:[#allocation103_spill] sm:$0xff] }
 0x77c   :  { %19072 = vst [vmem:[#allocation49_spill] sm:$0xff] %v17078_v13  ;;  %v17085_v23 = vadd.f32 %v7249_v57, %v6396_v20  ;;  %v7256_v54 = vpop.f32.mrb[191].mxu0 }
 0x77d   :  { %9831 = vmatmul.mubr.msk.bf16.gmra.mrb[40].mxu0 %vm11713_vm5, %v19079_v52  ;;  %v19084_v52 = vld [vmem:[#allocation14_spill] sm:$0xff] }
 0x77e   :  { %19074 = vst [vmem:[#allocation110_spill] sm:$0xff] %v17085_v23  ;;  %7869 = vmatprep.mubr.bf16.mxu0 %v19081_v15  ;;  %v7655_v62 = vpop.f32.mrb[192].mxu0 }
 0x77f   :  { %v6964_v22 = vpop.f32.mrb[252].mxu1 }
 0x780   :  { %v6966_v25 = vpop.f32.mrb[253].mxu1  ;;  %v7254_v50 = vadd.f32 %v7253_v35, %v6964_v22  ;;  %v7657_v35 = vpop.f32.mrb[193].mxu0 }
 0x781   :  { %v6967_v58 = vpop.f32.mrb[254].mxu1  ;;  %v6399_v25 = vadd.f32 %v16662_v33, %v19082_v9  ;;  %v19085_v35 = vld [vmem:[#allocation101_spill] sm:$0xff] }
 0x782   :  { %v17094_v20 = vadd.f32 %v7254_v50, %v6397_v19  ;;  %v6969_v21 = vpop.f32.mrb[255].mxu1  ;;  %v7257_v46 = vadd.f32 %v7256_v54, %v6967_v58  ;;  %v7658_v19 = vpop.f32.mrb[194].mxu0  ;;  %v19083_v58 = vld [vmem:[#allocation102_spill] sm:$0xff] }
 0x783   :  { %v7660_v21 = vpop.f32.mrb[195].mxu0  ;;  %v6400_v54 = vadd.f32 %v16662_v33, %v19083_v58 }
 0x784   :  { %19078 = vst [vmem:[#allocation113_spill] sm:$0xff] %v17094_v20  ;;  %v17099_v57 = vadd.f32 %v7257_v46, %v6398_v0 }
 0x785   :  { %9835 = vmatmul.mubr.msk.bf16.gmra.mrb[44].mxu0 %vm11713_vm5, %v19084_v52 }
 0x786   :  { %19080 = vst [vmem:[#allocation53_spill] sm:$0xff] %v17099_v57  ;;  %7877 = vmatprep.mubr.bf16.mxu0 %v19085_v35  ;;  %v19087_v35 = vld [vmem:[#allocation96_spill] sm:$0xff] }
 0x787   :  { %v6972_v22 = vpop.f32.mrb[0].mxu1 }
 0x788   :  { %v7262_v23 = vadd.f32 %v10592_v48, %v6972_v22  ;;  %v6974_v8 = vpop.f32.mrb[1].mxu1  ;;  %v7663_v48 = vpop.f32.mrb[196].mxu0 }
 0x789   :  { %v6975_v50 = vpop.f32.mrb[2].mxu1  ;;  %v7665_v9 = vpop.f32.mrb[197].mxu0 }
 0x78a   :  { %v17106_v20 = vadd.f32 %v7262_v23, %v6399_v25  ;;  %v7265_v0 = vadd.f32 %v10593_v59, %v6975_v50  ;;  %v6977_v46 = vpop.f32.mrb[3].mxu1  ;;  %v7666_v57 = vpop.f32.mrb[198].mxu0 }
 0x78b   :  { %v7668_v23 = vpop.f32.mrb[199].mxu0 }
 0x78c   :  { %v17111_v15 = vadd.f32 %v7265_v0, %v6400_v54  ;;  %v19086_v0 = vld [vmem:[#allocation106_spill] sm:$0xff] }
 0x78d   :  { %9839 = vmatmul.mubr.msk.bf16.gmra.mrb[48].mxu0 %vm11713_vm5, %v19086_v0 }
 0x78e   :  { %7885 = vmatprep.mubr.bf16.mxu0 %v19087_v35 }
 0x78f   :  { %v10612_v22 = vpop.f32.mrb[4].mxu1 }
 0x790   :  { %v7953_v8 = vadd.f32 %v10612_v22, %v7663_v48  ;;  %v7944_v21 = vpop.f32.mrb[5].mxu1 }
 0x791   :  { %v7945_v13 = vadd.f32 %v7944_v21, %v7655_v62  ;;  %v10613_v33 = vpop.f32.mrb[6].mxu1 }
 0x792   :  { %v8201_v59 = vadd.f32 %v7953_v8, %v16681_v1  ;;  %v7956_v25 = vadd.f32 %v10613_v33, %v7666_v57  ;;  %v7947_v50 = vpop.f32.mrb[7].mxu1 }
 0x793   :  { %v8199_v58 = vadd.f32 %v7945_v13, %v16688_v34  ;;  %v7948_v54 = vadd.f32 %v7947_v50, %v7658_v19  ;;  %v7671_v34 = vpop.f32.mrb[200].mxu0 }
 0x794   :  { %v8265_v46 = vmax.f32 %v8201_v59, 0.0  ;;  %v8202_v52 = vadd.f32 %v7956_v25, %v16691_v61  ;;  %v7673_v61 = vpop.f32.mrb[201].mxu0  ;;  %v19088_v59 = vld [vmem:[#allocation95_spill] sm:$0xff]  ;;  %v19089_v25 = vld [vmem:[#allocation126_spill] sm:$0xff] }
 0x795   :  { %v8263_v62 = vmax.f32 %v8199_v58, 0.0  ;;  %v8200_v48 = vadd.f32 %v7948_v54, %v16696_v38  ;;  %v7674_v19 = vpop.f32.mrb[202].mxu0  ;;  %9843 = vmatmul.mubr.msk.bf16.gmra.mrb[52].mxu0 %vm11713_vm5, %v19088_v59 }
 0x796   :  { %8330 = vst.msk [vmem:[%s17592_s13 + $0x10] sm:$0xff] %vm8327_vm1, %v8265_v46  ;;  %v8266_v1 = vmax.f32 %v8202_v52, 0.0  ;;  %v7676_v8 = vpop.f32.mrb[203].mxu0  ;;  %7893 = vmatprep.mubr.bf16.mxu0 %v19089_v25 }
 0x797   :  { %8328 = vst.msk [vmem:[%s17592_s13] sm:$0xff] %vm8327_vm1, %v8263_v62  ;;  %v8264_v13 = vmax.f32 %v8200_v48, 0.0  ;;  %v10616_v57 = vpop.f32.mrb[8].mxu1  ;;  %v7679_v54 = vpop.f32.mrb[204].mxu0 }
 0x798   :  { %8331 = vst.msk [vmem:[%s17592_s13 + $0x18] sm:$0xff] %vm8327_vm1, %v8266_v1  ;;  %v7960_v38 = vpop.f32.mrb[9].mxu1  ;;  %v7969_v46 = vadd.f32 %v10616_v57, %v7679_v54 }
 0x799   :  { %8329 = vst.msk [vmem:[%s17592_s13 + $0x8] sm:$0xff] %vm8327_vm1, %v8264_v13  ;;  %v7961_v22 = vadd.f32 %v7960_v38, %v7671_v34  ;;  %v10617_v9 = vpop.f32.mrb[10].mxu1 }
 0x79a   :  { %v7963_v21 = vpop.f32.mrb[11].mxu1  ;;  %v8205_v48 = vadd.f32 %v7969_v46, %v16713_v26 }
 0x79b   :  { %v8203_v33 = vadd.f32 %v7961_v22, %v16722_v16  ;;  %v7964_v23 = vadd.f32 %v7963_v21, %v7674_v19  ;;  %v7681_v16 = vpop.f32.mrb[205].mxu0  ;;  %v19090_v19 = vld [vmem:[#allocation12_spill] sm:$0xff] }
 0x79c   :  { %v7682_v62 = vpop.f32.mrb[206].mxu0  ;;  %v8269_v61 = vmax.f32 %v8205_v48, 0.0 }
 0x79d   :  { %v8267_v50 = vmax.f32 %v8203_v33, 0.0  ;;  %v8204_v58 = vadd.f32 %v7964_v23, %v16730_v7  ;;  %v7972_v7 = vadd.f32 %v10617_v9, %v7682_v62  ;;  %v7684_v34 = vpop.f32.mrb[207].mxu0  ;;  %9847 = vmatmul.mubr.msk.bf16.gmra.mrb[56].mxu0 %vm11713_vm5, %v19090_v19 }
 0x79e   :  { %7901 = vmatprep.mubr.bf16.mxu0 %v18712_v28  ;;  %8334 = vst.msk [vmem:[%s17592_s13 + $0x30] sm:$0xff] %vm8327_vm1, %v8269_v61  ;;  %v7687_v26 = vpop.f32.mrb[208].mxu0  ;;  %v19091_v61 = vld [vmem:[#allocation84_spill] sm:$0xff] }
 0x79f   :  { %8332 = vst.msk [vmem:[%s17592_s13 + $0x20] sm:$0xff] %vm8327_vm1, %v8267_v50  ;;  %v8268_v0 = vmax.f32 %v8204_v58, 0.0  ;;  %v10620_v52 = vpop.f32.mrb[12].mxu1  ;;  %v8206_v38 = vadd.f32 %v7972_v7, %v16725_v17  ;;  %v7689_v9 = vpop.f32.mrb[209].mxu0 }
 0x7a0   :  { %v7976_v35 = vpop.f32.mrb[13].mxu1  ;;  %v7690_v11 = vpop.f32.mrb[210].mxu0 }
 0x7a1   :  { %8333 = vst.msk [vmem:[%s17592_s13 + $0x28] sm:$0xff] %vm8327_vm1, %v8268_v0  ;;  %v10621_v1 = vpop.f32.mrb[14].mxu1  ;;  %v8270_v57 = vmax.f32 %v8206_v38, 0.0  ;;  %v7977_v22 = vadd.f32 %v7976_v35, %v7687_v26  ;;  %v7692_v59 = vpop.f32.mrb[211].mxu0 }
 0x7a2   :  { %v7979_v13 = vpop.f32.mrb[15].mxu1 }
 0x7a3   :  { %8335 = vst.msk [vmem:[%s17592_s13 + $0x38] sm:$0xff] %vm8327_vm1, %v8270_v57  ;;  %v8207_v21 = vadd.f32 %v7977_v22, %v16754_v42  ;;  %v7980_v33 = vadd.f32 %v7979_v13, %v7690_v11 }
 0x7a5   :  { %v8271_v50 = vmax.f32 %v8207_v21, 0.0  ;;  %v8208_v58 = vadd.f32 %v7980_v33, %v16764_v63  ;;  %7902 = vmatmul.mubr.bf16.gmra.mrb[60].mxu0 %v18712_v28 }
 0x7a6   :  { %v7695_v0 = vpop.f32.mrb[212].mxu0 }
 0x7a7   :  { %v10624_v17 = vpop.f32.mrb[16].mxu1  ;;  %8336 = vst.msk [vmem:[%s17592_s13 + $0x40] sm:$0xff] %vm8327_vm1, %v8271_v50  ;;  %v8272_v54 = vmax.f32 %v8208_v58, 0.0  ;;  %v7985_v42 = vadd.f32 %v10620_v52, %v7695_v0  ;;  %v7697_v16 = vpop.f32.mrb[213].mxu0 }
 0x7a8   :  { %v7992_v8 = vpop.f32.mrb[17].mxu1  ;;  %v7698_v63 = vpop.f32.mrb[214].mxu0 }
 0x7a9   :  { %v10625_v23 = vpop.f32.mrb[18].mxu1  ;;  %8337 = vst.msk [vmem:[%s17592_s13 + $0x48] sm:$0xff] %vm8327_vm1, %v8272_v54  ;;  %v8209_v28 = vadd.f32 %v7985_v42, %v16747_v51  ;;  %v7988_v62 = vadd.f32 %v10621_v1, %v7698_v63  ;;  %v7700_v7 = vpop.f32.mrb[215].mxu0 }
 0x7aa   :  { %v7995_v25 = vpop.f32.mrb[19].mxu1 }
 0x7ab   :  { %v8273_v13 = vmax.f32 %v8209_v28, 0.0  ;;  %v8210_v38 = vadd.f32 %v7988_v62, %v19091_v61 }
 0x7ad   :  { %8338 = vst.msk [vmem:[%s17592_s13 + $0x50] sm:$0xff] %vm8327_vm1, %v8273_v13  ;;  %v8274_v52 = vmax.f32 %v8210_v38, 0.0  ;;  %v19093_v38 = vld [vmem:[#allocation44_spill] sm:$0xff] }
 0x7ae   :  { %v7703_v19 = vpop.f32.mrb[216].mxu0 }
 0x7af   :  { %v17177_v46 = vpop.f32.mrb[20].mxu1  ;;  %8339 = vst.msk [vmem:[%s17592_s13 + $0x58] sm:$0xff] %vm8327_vm1, %v8274_v52  ;;  %v7993_v51 = vadd.f32 %v7992_v8, %v7703_v19  ;;  %v7705_v57 = vpop.f32.mrb[217].mxu0 }
 0x7b0   :  { %v8008_v35 = vpop.f32.mrb[21].mxu1  ;;  %v7706_v22 = vpop.f32.mrb[218].mxu0 }
 0x7b1   :  { %v17180_v48 = vpop.f32.mrb[22].mxu1  ;;  %v8211_v9 = vadd.f32 %v7993_v51, %v16788_v55  ;;  %v7996_v11 = vadd.f32 %v7995_v25, %v7706_v22  ;;  %v7708_v33 = vpop.f32.mrb[219].mxu0 }
 0x7b2   :  { %v8011_v34 = vpop.f32.mrb[23].mxu1 }
 0x7b3   :  { %v8275_v50 = vmax.f32 %v8211_v9, 0.0  ;;  %v8212_v58 = vadd.f32 %v7996_v11, %v16798_v5  ;;  %v19092_v5 = vld [vmem:[#allocation63_spill] sm:$0xff] }
 0x7b5   :  { %8340 = vst.msk [vmem:[%s17592_s13 + $0x60] sm:$0xff] %vm8327_vm1, %v8275_v50  ;;  %v8276_v8 = vmax.f32 %v8212_v58, 0.0 }
 0x7b6   :  { %v7711_v54 = vpop.f32.mrb[220].mxu0 }
 0x7b7   :  { %v17191_v1 = vpop.f32.mrb[24].mxu1  ;;  %8341 = vst.msk [vmem:[%s17592_s13 + $0x68] sm:$0xff] %vm8327_vm1, %v8276_v8  ;;  %v8001_v55 = vadd.f32 %v10624_v17, %v7711_v54  ;;  %v7713_v0 = vpop.f32.mrb[221].mxu0 }
 0x7b8   :  { %v8024_v26 = vpop.f32.mrb[25].mxu1  ;;  %v7714_v16 = vpop.f32.mrb[222].mxu0 }
 0x7b9   :  { %v17194_v21 = vpop.f32.mrb[26].mxu1  ;;  %v8213_v63 = vadd.f32 %v8001_v55, %v19092_v5  ;;  %v8004_v28 = vadd.f32 %v10625_v23, %v7714_v16  ;;  %v7716_v7 = vpop.f32.mrb[223].mxu0 }
 0x7ba   :  { %v8027_v59 = vpop.f32.mrb[27].mxu1 }
 0x7bb   :  { %v8277_v61 = vmax.f32 %v8213_v63, 0.0  ;;  %v8214_v52 = vadd.f32 %v8004_v28, %v19093_v38 }
 0x7bd   :  { %8342 = vst.msk [vmem:[%s17592_s13 + $0x70] sm:$0xff] %vm8327_vm1, %v8277_v61  ;;  %v8278_v17 = vmax.f32 %v8214_v52, 0.0 }
 0x7be   :  { %v7719_v19 = vpop.f32.mrb[224].mxu0 }
 0x7bf   :  { %v17205_v25 = vpop.f32.mrb[28].mxu1  ;;  %8343 = vst.msk [vmem:[%s17592_s13 + $0x78] sm:$0xff] %vm8327_vm1, %v8278_v17  ;;  %v8009_v23 = vadd.f32 %v8008_v35, %v7719_v19  ;;  %v7721_v51 = vpop.f32.mrb[225].mxu0 }
 0x7c0   :  { %v17207_v42 = vpop.f32.mrb[29].mxu1  ;;  %v7722_v22 = vpop.f32.mrb[226].mxu0 }
 0x7c1   :  { %v17210_v62 = vpop.f32.mrb[30].mxu1  ;;  %v8215_v11 = vadd.f32 %v8009_v23, %v16822_v14  ;;  %v8012_v33 = vadd.f32 %v8011_v34, %v7722_v22  ;;  %v7724_v50 = vpop.f32.mrb[227].mxu0 }
 0x7c2   :  { %v17212_v13 = vpop.f32.mrb[31].mxu1 }
 0x7c3   :  { %v8279_v54 = vmax.f32 %v8215_v11, 0.0  ;;  %v8216_v55 = vadd.f32 %v8012_v33, %v16830_v2 }
 0x7c5   :  { %8344 = vst.msk [vmem:[%s17592_s13 + $0x80] sm:$0xff] %vm8327_vm1, %v8279_v54  ;;  %v8280_v35 = vmax.f32 %v8216_v55, 0.0 }
 0x7c6   :  { %v7727_v0 = vpop.f32.mrb[228].mxu0 }
 0x7c7   :  { %v17223_v57 = vpop.f32.mrb[32].mxu1  ;;  %8345 = vst.msk [vmem:[%s17592_s13 + $0x88] sm:$0xff] %vm8327_vm1, %v8280_v35  ;;  %v8017_v14 = vadd.f32 %v17177_v46, %v7727_v0  ;;  %v7729_v16 = vpop.f32.mrb[229].mxu0 }
 0x7c8   :  { %v17225_v9 = vpop.f32.mrb[33].mxu1  ;;  %v7730_v2 = vpop.f32.mrb[230].mxu0 }
 0x7c9   :  { %v17228_v58 = vpop.f32.mrb[34].mxu1  ;;  %v8217_v63 = vadd.f32 %v8017_v14, %v16815_v10  ;;  %v8020_v28 = vadd.f32 %v17180_v48, %v7730_v2  ;;  %v7732_v61 = vpop.f32.mrb[231].mxu0  ;;  %v19094_v2 = vld [vmem:[#allocation112_spill] sm:$0xff] }
 0x7ca   :  { %v17230_v8 = vpop.f32.mrb[35].mxu1 }
 0x7cb   :  { %v8281_v52 = vmax.f32 %v8217_v63, 0.0  ;;  %v8218_v17 = vadd.f32 %v8020_v28, %v16827_v53 }
 0x7cd   :  { %8346 = vst.msk [vmem:[%s17592_s13 + $0x90] sm:$0xff] %vm8327_vm1, %v8281_v52  ;;  %v8282_v46 = vmax.f32 %v8218_v17, 0.0 }
 0x7ce   :  { %v7735_v19 = vpop.f32.mrb[232].mxu0 }
 0x7cf   :  { %v17242_v34 = vpop.f32.mrb[36].mxu1  ;;  %8347 = vst.msk [vmem:[%s17592_s13 + $0x98] sm:$0xff] %vm8327_vm1, %v8282_v46  ;;  %v8025_v10 = vadd.f32 %v8024_v26, %v7735_v19  ;;  %v7737_v23 = vpop.f32.mrb[233].mxu0  ;;  %v19095_v19 = vld [vmem:[#allocation115_spill] sm:$0xff] }
 0x7d0   :  { %v17244_v5 = vpop.f32.mrb[37].mxu1  ;;  %v7738_v22 = vpop.f32.mrb[234].mxu0 }
 0x7d1   :  { %v17248_v7 = vpop.f32.mrb[38].mxu1  ;;  %v8219_v53 = vadd.f32 %v8025_v10, %v16854_v29  ;;  %v8028_v11 = vadd.f32 %v8027_v59, %v7738_v22  ;;  %v7740_v50 = vpop.f32.mrb[235].mxu0 }
 0x7d2   :  { %v17250_v38 = vpop.f32.mrb[39].mxu1 }
 0x7d3   :  { %v8283_v55 = vmax.f32 %v8219_v53, 0.0  ;;  %v8220_v35 = vadd.f32 %v8028_v11, %v16864_v18 }
 0x7d5   :  { %8348 = vst.msk [vmem:[%s17592_s13 + $0xa0] sm:$0xff] %vm8327_vm1, %v8283_v55  ;;  %v8284_v26 = vmax.f32 %v8220_v35, 0.0 }
 0x7d7   :  { %v17261_v48 = vpop.f32.mrb[40].mxu1  ;;  %8349 = vst.msk [vmem:[%s17592_s13 + $0xa8] sm:$0xff] %vm8327_vm1, %v8284_v26 }
 0x7d8   :  { %v17263_v51 = vpop.f32.mrb[41].mxu1  ;;  %v7743_v0 = vpop.f32.mrb[236].mxu0 }
 0x7d9   :  { %v17266_v33 = vpop.f32.mrb[42].mxu1  ;;  %v8033_v29 = vadd.f32 %v17191_v1, %v7743_v0  ;;  %v7745_v14 = vpop.f32.mrb[237].mxu0 }
 0x7da   :  { %v17268_v54 = vpop.f32.mrb[43].mxu1  ;;  %v7746_v18 = vpop.f32.mrb[238].mxu0 }
 0x7db   :  { %v8221_v63 = vadd.f32 %v8033_v29, %v19094_v2  ;;  %v8036_v28 = vadd.f32 %v17194_v21, %v7746_v18  ;;  %v7748_v52 = vpop.f32.mrb[239].mxu0 }
 0x7dc   :  { %v19096_v52 = vld [vmem:[#allocation105_spill] sm:$0xff] }
 0x7dd   :  { %v8285_v46 = vmax.f32 %v8221_v63, 0.0  ;;  %v8222_v10 = vadd.f32 %v8036_v28, %v19095_v19 }
 0x7df   :  { %v17280_v59 = vpop.f32.mrb[44].mxu1  ;;  %8350 = vst.msk [vmem:[%s17592_s13 + $0xb0] sm:$0xff] %vm8327_vm1, %v8285_v46  ;;  %v8286_v1 = vmax.f32 %v8222_v10, 0.0 }
 0x7e0   :  { %v17282_v16 = vpop.f32.mrb[45].mxu1  ;;  %v7751_v23 = vpop.f32.mrb[240].mxu0 }
 0x7e1   :  { %v17286_v61 = vpop.f32.mrb[46].mxu1  ;;  %8351 = vst.msk [vmem:[%s17592_s13 + $0xb8] sm:$0xff] %vm8327_vm1, %v8286_v1  ;;  %v8041_v21 = vadd.f32 %v17207_v42, %v7751_v23  ;;  %v7753_v53 = vpop.f32.mrb[241].mxu0 }
 0x7e2   :  { %v17288_v17 = vpop.f32.mrb[47].mxu1  ;;  %v7754_v50 = vpop.f32.mrb[242].mxu0  ;;  %v19097_v53 = vld [vmem:[#allocation111_spill] sm:$0xff] }
 0x7e3   :  { %v8223_v55 = vadd.f32 %v8041_v21, %v16883_v43  ;;  %v8044_v35 = vadd.f32 %v17212_v13, %v7754_v50  ;;  %v7756_v0 = vpop.f32.mrb[243].mxu0 }
 0x7e5   :  { %v8287_v14 = vmax.f32 %v8223_v55, 0.0  ;;  %v8224_v18 = vadd.f32 %v8044_v35, %v16893_v24 }
 0x7e7   :  { %v17300_v22 = vpop.f32.mrb[48].mxu1  ;;  %8352 = vst.msk [vmem:[%s17592_s13 + $0xc0] sm:$0xff] %vm8327_vm1, %v8287_v14  ;;  %v8288_v42 = vmax.f32 %v8224_v18, 0.0 }
 0x7e8   :  { %v17302_v11 = vpop.f32.mrb[49].mxu1  ;;  %v7759_v2 = vpop.f32.mrb[244].mxu0 }
 0x7e9   :  { %v17306_v26 = vpop.f32.mrb[50].mxu1  ;;  %8353 = vst.msk [vmem:[%s17592_s13 + $0xc8] sm:$0xff] %vm8327_vm1, %v8288_v42  ;;  %v8049_v43 = vadd.f32 %v17205_v25, %v7759_v2  ;;  %v7761_v63 = vpop.f32.mrb[245].mxu0 }
 0x7ea   :  { %v17308_v29 = vpop.f32.mrb[51].mxu1  ;;  %v7762_v24 = vpop.f32.mrb[246].mxu0 }
 0x7eb   :  { %v8225_v46 = vadd.f32 %v8049_v43, %v19096_v52  ;;  %v8052_v19 = vadd.f32 %v17210_v62, %v7762_v24  ;;  %v7764_v1 = vpop.f32.mrb[247].mxu0 }
 0x7ed   :  { %v8289_v21 = vmax.f32 %v8225_v46, 0.0  ;;  %v8226_v50 = vadd.f32 %v8052_v19, %v19097_v53  ;;  %v19098_v53 = vld [vmem:[#allocation16_spill] sm:$0xff] }
 0x7ef   :  { %v17320_v13 = vpop.f32.mrb[52].mxu1  ;;  %8354 = vst.msk [vmem:[%s17592_s13 + $0xd0] sm:$0xff] %vm8327_vm1, %v8289_v21  ;;  %v8290_v25 = vmax.f32 %v8226_v50, 0.0 }
 0x7f0   :  { %v17322_v28 = vpop.f32.mrb[53].mxu1  ;;  %v7767_v55 = vpop.f32.mrb[248].mxu0 }
 0x7f1   :  { %v17326_v10 = vpop.f32.mrb[54].mxu1  ;;  %8355 = vst.msk [vmem:[%s17592_s13 + $0xd8] sm:$0xff] %vm8327_vm1, %v8290_v25  ;;  %v8057_v62 = vadd.f32 %v17225_v9, %v7767_v55  ;;  %v7769_v0 = vpop.f32.mrb[249].mxu0 }
 0x7f2   :  { %v17328_v23 = vpop.f32.mrb[55].mxu1  ;;  %v7770_v18 = vpop.f32.mrb[250].mxu0 }
 0x7f3   :  { %v8227_v42 = vadd.f32 %v8057_v62, %v16911_v49  ;;  %v8060_v2 = vadd.f32 %v17230_v8, %v7770_v18  ;;  %v7772_v63 = vpop.f32.mrb[251].mxu0 }
 0x7f5   :  { %v8291_v52 = vmax.f32 %v8227_v42, 0.0  ;;  %v8228_v46 = vadd.f32 %v8060_v2, %v16921_v3  ;;  %v19099_v42 = vld [vmem:[#allocation92_spill] sm:$0xff] }
 0x7f7   :  { %v17340_v35 = vpop.f32.mrb[56].mxu1  ;;  %8356 = vst.msk [vmem:[%s17592_s13 + $0xe0] sm:$0xff] %vm8327_vm1, %v8291_v52  ;;  %v8292_v9 = vmax.f32 %v8228_v46, 0.0 }
 0x7f8   :  { %v17342_v14 = vpop.f32.mrb[57].mxu1  ;;  %v7775_v19 = vpop.f32.mrb[252].mxu0 }
 0x7f9   :  { %v17346_v43 = vpop.f32.mrb[58].mxu1  ;;  %8357 = vst.msk [vmem:[%s17592_s13 + $0xe8] sm:$0xff] %vm8327_vm1, %v8292_v9  ;;  %v8065_v49 = vadd.f32 %v17223_v57, %v7775_v19  ;;  %v7777_v1 = vpop.f32.mrb[253].mxu0 }
 0x7fa   :  { %v17348_v24 = vpop.f32.mrb[59].mxu1  ;;  %v7778_v3 = vpop.f32.mrb[254].mxu0 }
 0x7fb   :  { %v8229_v50 = vadd.f32 %v8065_v49, %v19098_v53  ;;  %v8068_v25 = vadd.f32 %v17228_v58, %v7778_v3  ;;  %v7780_v62 = vpop.f32.mrb[255].mxu0 }
 0x7fd   :  { %v8293_v18 = vmax.f32 %v8229_v50, 0.0  ;;  %v8230_v2 = vadd.f32 %v8068_v25, %v19099_v42 }
 0x7ff   :  { %v17360_v8 = vpop.f32.mrb[60].mxu1  ;;  %8358 = vst.msk [vmem:[%s17592_s13 + $0xf0] sm:$0xff] %vm8327_vm1, %v8293_v18  ;;  %v8294_v57 = vmax.f32 %v8230_v2, 0.0  ;;  %v19100_v2 = vld [vmem:[#allocation31_spill] sm:$0xff] }
 0x800   :  { %v17362_v21 = vpop.f32.mrb[61].mxu1  ;;  %v7783_v63 = vpop.f32.mrb[0].mxu0 }
 0x801   :  { %v17366_v55 = vpop.f32.mrb[62].mxu1  ;;  %8359 = vst.msk [vmem:[%s17592_s13 + $0xf8] sm:$0xff] %vm8327_vm1, %v8294_v57  ;;  %v8073_v58 = vadd.f32 %v17244_v5, %v7783_v63  ;;  %v7785_v52 = vpop.f32.mrb[1].mxu0 }
 0x802   :  { %v17368_v0 = vpop.f32.mrb[63].mxu1  ;;  %v7786_v9 = vpop.f32.mrb[2].mxu0  ;;  %v19101_v52 = vld [vmem:[#allocation93_spill] sm:$0xff] }
 0x803   :  { %v8231_v49 = vadd.f32 %v8073_v58, %v16941_v37  ;;  %v8076_v1 = vadd.f32 %v17250_v38, %v7786_v9  ;;  %v7788_v3 = vpop.f32.mrb[3].mxu0 }
 0x805   :  { %v8295_v25 = vmax.f32 %v8231_v49, 0.0  ;;  %v8232_v62 = vadd.f32 %v8076_v1, %v16949_v44 }
 0x807   :  { %v17380_v46 = vpop.f32.mrb[64].mxu1  ;;  %8360 = vst.msk [vmem:[%s17592_s13 + $0x100] sm:$0xff] %vm8327_vm1, %v8295_v25  ;;  %v8296_v5 = vmax.f32 %v8232_v62, 0.0 }
 0x808   :  { %v17382_v19 = vpop.f32.mrb[65].mxu1  ;;  %v7791_v18 = vpop.f32.mrb[4].mxu0 }
 0x809   :  { %v17386_v53 = vpop.f32.mrb[66].mxu1  ;;  %8361 = vst.msk [vmem:[%s17592_s13 + $0x108] sm:$0xff] %vm8327_vm1, %v8296_v5  ;;  %v8081_v37 = vadd.f32 %v17242_v34, %v7791_v18  ;;  %v7793_v38 = vpop.f32.mrb[5].mxu0 }
 0x80a   :  { %v17388_v50 = vpop.f32.mrb[67].mxu1  ;;  %v7794_v42 = vpop.f32.mrb[6].mxu0 }
 0x80b   :  { %v8233_v57 = vadd.f32 %v8081_v37, %v19100_v2  ;;  %v8084_v44 = vadd.f32 %v17248_v7, %v7794_v42  ;;  %v7796_v63 = vpop.f32.mrb[7].mxu0 }
 0x80d   :  { %v8297_v58 = vmax.f32 %v8233_v57, 0.0  ;;  %v8234_v9 = vadd.f32 %v8084_v44, %v19101_v52 }
 0x80f   :  { %8362 = vst.msk [vmem:[%s17592_s13 + $0x110] sm:$0xff] %vm8327_vm1, %v8297_v58  ;;  %v8298_v49 = vmax.f32 %v8234_v9, 0.0 }
 0x810   :  { %v7799_v1 = vpop.f32.mrb[8].mxu0 }
 0x811   :  { %8363 = vst.msk [vmem:[%s17592_s13 + $0x118] sm:$0xff] %vm8327_vm1, %v8298_v49  ;;  %v8089_v34 = vadd.f32 %v17263_v51, %v7799_v1  ;;  %v7801_v3 = vpop.f32.mrb[9].mxu0 }
 0x812   :  { %v7802_v7 = vpop.f32.mrb[10].mxu0 }
 0x813   :  { %v8235_v25 = vadd.f32 %v8089_v34, %v16969_v36  ;;  %v8092_v62 = vadd.f32 %v17268_v54, %v7802_v7  ;;  %v7804_v5 = vpop.f32.mrb[11].mxu0 }
 0x815   :  { %v8299_v18 = vmax.f32 %v8235_v25, 0.0  ;;  %v8236_v37 = vadd.f32 %v8092_v62, %v16977_v56 }
 0x817   :  { %8364 = vst.msk [vmem:[%s17592_s13 + $0x120] sm:$0xff] %vm8327_vm1, %v8299_v18  ;;  %v8300_v38 = vmax.f32 %v8236_v37, 0.0 }
 0x818   :  { %v7807_v42 = vpop.f32.mrb[12].mxu0 }
 0x819   :  { %8365 = vst.msk [vmem:[%s17592_s13 + $0x128] sm:$0xff] %vm8327_vm1, %v8300_v38  ;;  %v8097_v36 = vadd.f32 %v17261_v48, %v7807_v42  ;;  %v7809_v51 = vpop.f32.mrb[13].mxu0 }
 0x81a   :  { %v7810_v54 = vpop.f32.mrb[14].mxu0 }
 0x81b   :  { %v8237_v2 = vadd.f32 %v8097_v36, %v16962_v39  ;;  %v8100_v56 = vadd.f32 %v17266_v33, %v7810_v54  ;;  %v7812_v57 = vpop.f32.mrb[15].mxu0 }
 0x81d   :  { %v8301_v44 = vmax.f32 %v8237_v2, 0.0  ;;  %v8238_v63 = vadd.f32 %v8100_v56, %v16972_v12 }
 0x81f   :  { %8366 = vst.msk [vmem:[%s17592_s13 + $0x130] sm:$0xff] %vm8327_vm1, %v8301_v44  ;;  %v8302_v58 = vmax.f32 %v8238_v63, 0.0 }
 0x820   :  { %v7815_v52 = vpop.f32.mrb[16].mxu0 }
 0x821   :  { %8367 = vst.msk [vmem:[%s17592_s13 + $0x138] sm:$0xff] %vm8327_vm1, %v8302_v58  ;;  %v8105_v39 = vadd.f32 %v17282_v16, %v7815_v52  ;;  %v7817_v48 = vpop.f32.mrb[17].mxu0 }
 0x822   :  { %v7818_v33 = vpop.f32.mrb[18].mxu0  ;;  %v19102_v48 = vld [vmem:[#allocation37_spill] sm:$0xff] }
 0x823   :  { %v8239_v9 = vadd.f32 %v8105_v39, %v16993_v60  ;;  %v8108_v12 = vadd.f32 %v17288_v17, %v7818_v33  ;;  %v7820_v49 = vpop.f32.mrb[19].mxu0 }
 0x824   :  { %v19103_v49 = vld [vmem:[#allocation66_spill] sm:$0xff] }
 0x825   :  { %v8303_v1 = vmax.f32 %v8239_v9, 0.0  ;;  %v8240_v34 = vadd.f32 %v8108_v12, %v17001_v27 }
 0x827   :  { %8368 = vst.msk [vmem:[%s17592_s13 + $0x140] sm:$0xff] %vm8327_vm1, %v8303_v1  ;;  %v8304_v3 = vmax.f32 %v8240_v34, 0.0 }
 0x828   :  { %v7823_v7 = vpop.f32.mrb[20].mxu0 }
 0x829   :  { %8369 = vst.msk [vmem:[%s17592_s13 + $0x148] sm:$0xff] %vm8327_vm1, %v8304_v3  ;;  %v8113_v60 = vadd.f32 %v17280_v59, %v7823_v7  ;;  %v7825_v16 = vpop.f32.mrb[21].mxu0 }
 0x82a   :  { %v7826_v17 = vpop.f32.mrb[22].mxu0 }
 0x82b   :  { %v8241_v25 = vadd.f32 %v8113_v60, %v16988_v4  ;;  %v8116_v27 = vadd.f32 %v17286_v61, %v7826_v17  ;;  %v7828_v62 = vpop.f32.mrb[23].mxu0  ;;  %v19104_v60 = vld [vmem:[#allocation11_spill] sm:$0xff] }
 0x82c   :  { %v19105_v62 = vld [vmem:[#allocation98_spill] sm:$0xff] }
 0x82d   :  { %v8305_v5 = vmax.f32 %v8241_v25, 0.0  ;;  %v8242_v18 = vadd.f32 %v8116_v27, %v16996_v40 }
 0x82f   :  { %8370 = vst.msk [vmem:[%s17592_s13 + $0x150] sm:$0xff] %vm8327_vm1, %v8305_v5  ;;  %v8306_v37 = vmax.f32 %v8242_v18, 0.0 }
 0x830   :  { %v7831_v38 = vpop.f32.mrb[24].mxu0 }
 0x831   :  { %8371 = vst.msk [vmem:[%s17592_s13 + $0x158] sm:$0xff] %vm8327_vm1, %v8306_v37  ;;  %v8121_v4 = vadd.f32 %v17302_v11, %v7831_v38  ;;  %v7833_v59 = vpop.f32.mrb[25].mxu0 }
 0x832   :  { %v7834_v61 = vpop.f32.mrb[26].mxu0 }
 0x833   :  { %v8243_v42 = vadd.f32 %v8121_v4, %v17017_v41  ;;  %v8124_v40 = vadd.f32 %v17308_v29, %v7834_v61  ;;  %v7836_v36 = vpop.f32.mrb[27].mxu0 }
 0x835   :  { %v8307_v51 = vmax.f32 %v8243_v42, 0.0  ;;  %v8244_v54 = vadd.f32 %v8124_v40, %v17025_v32  ;;  %v19106_v40 = vld [vmem:[#allocation48_spill] sm:$0xff] }
 0x837   :  { %8372 = vst.msk [vmem:[%s17592_s13 + $0x160] sm:$0xff] %vm8327_vm1, %v8307_v51  ;;  %v8308_v2 = vmax.f32 %v8244_v54, 0.0 }
 0x838   :  { %v7839_v56 = vpop.f32.mrb[28].mxu0 }
 0x839   :  { %8373 = vst.msk [vmem:[%s17592_s13 + $0x168] sm:$0xff] %vm8327_vm1, %v8308_v2  ;;  %v8129_v41 = vadd.f32 %v17300_v22, %v7839_v56  ;;  %v7841_v11 = vpop.f32.mrb[29].mxu0  ;;  %v19107_v2 = vld [vmem:[#allocation41_spill] sm:$0xff] }
 0x83a   :  { %v7842_v29 = vpop.f32.mrb[30].mxu0 }
 0x83b   :  { %v8245_v57 = vadd.f32 %v8129_v41, %v17012_v31  ;;  %v8132_v32 = vadd.f32 %v17306_v26, %v7842_v29  ;;  %v7844_v44 = vpop.f32.mrb[31].mxu0 }
 0x83d   :  { %v8309_v63 = vmax.f32 %v8245_v57, 0.0  ;;  %v8246_v58 = vadd.f32 %v8132_v32, %v17020_v6  ;;  %v19108_v57 = vld [vmem:[#allocation109_spill] sm:$0xff] }
 0x83f   :  { %8374 = vst.msk [vmem:[%s17592_s13 + $0x170] sm:$0xff] %vm8327_vm1, %v8309_v63  ;;  %v8310_v52 = vmax.f32 %v8246_v58, 0.0 }
 0x840   :  { %v7847_v39 = vpop.f32.mrb[32].mxu0 }
 0x841   :  { %8375 = vst.msk [vmem:[%s17592_s13 + $0x178] sm:$0xff] %vm8327_vm1, %v8310_v52  ;;  %v8137_v31 = vadd.f32 %v17322_v28, %v7847_v39  ;;  %v7849_v22 = vpop.f32.mrb[33].mxu0 }
 0x842   :  { %v7850_v26 = vpop.f32.mrb[34].mxu0 }
 0x843   :  { %v8247_v33 = vadd.f32 %v8137_v31, %v19102_v48  ;;  %v8140_v6 = vadd.f32 %v17328_v23, %v7850_v26  ;;  %v7852_v9 = vpop.f32.mrb[35].mxu0 }
 0x845   :  { %v8311_v12 = vmax.f32 %v8247_v33, 0.0  ;;  %v8248_v1 = vadd.f32 %v8140_v6, %v19103_v49  ;;  %v19109_v6 = vld [vmem:[#allocation49_spill] sm:$0xff] }
 0x847   :  { %8376 = vst.msk [vmem:[%s17592_s13 + $0x180] sm:$0xff] %vm8327_vm1, %v8311_v12  ;;  %v8312_v34 = vmax.f32 %v8248_v1, 0.0  ;;  %v19110_v1 = vld [vmem:[#allocation110_spill] sm:$0xff] }
 0x848   :  { %v7855_v3 = vpop.f32.mrb[36].mxu0 }
 0x849   :  { %8377 = vst.msk [vmem:[%s17592_s13 + $0x188] sm:$0xff] %vm8327_vm1, %v8312_v34  ;;  %v8145_v28 = vadd.f32 %v17320_v13, %v7855_v3  ;;  %v7857_v7 = vpop.f32.mrb[37].mxu0 }
 0x84a   :  { %v7858_v23 = vpop.f32.mrb[38].mxu0 }
 0x84b   :  { %v8249_v16 = vadd.f32 %v8145_v28, %v19104_v60  ;;  %v8148_v17 = vadd.f32 %v17326_v10, %v7858_v23  ;;  %v7860_v25 = vpop.f32.mrb[39].mxu0  ;;  %v19111_v23 = vld [vmem:[#allocation113_spill] sm:$0xff] }
 0x84d   :  { %v8313_v27 = vmax.f32 %v8249_v16, 0.0  ;;  %v8250_v5 = vadd.f32 %v8148_v17, %v19105_v62 }
 0x84f   :  { %8378 = vst.msk [vmem:[%s17592_s13 + $0x190] sm:$0xff] %vm8327_vm1, %v8313_v27  ;;  %v8314_v18 = vmax.f32 %v8250_v5, 0.0  ;;  %v19112_v27 = vld [vmem:[#allocation53_spill] sm:$0xff] }
 0x850   :  { %v7863_v37 = vpop.f32.mrb[40].mxu0 }
 0x851   :  { %8379 = vst.msk [vmem:[%s17592_s13 + $0x198] sm:$0xff] %vm8327_vm1, %v8314_v18  ;;  %v8153_v13 = vadd.f32 %v17342_v14, %v7863_v37  ;;  %v7865_v38 = vpop.f32.mrb[41].mxu0 }
 0x852   :  { %v7866_v10 = vpop.f32.mrb[42].mxu0 }
 0x853   :  { %v8251_v4 = vadd.f32 %v8153_v13, %v17060_v30  ;;  %v8156_v59 = vadd.f32 %v17348_v24, %v7866_v10  ;;  %v7868_v61 = vpop.f32.mrb[43].mxu0 }
 0x855   :  { %v8315_v42 = vmax.f32 %v8251_v4, 0.0  ;;  %v8252_v36 = vadd.f32 %v8156_v59, %v19106_v40 }
 0x857   :  { %8380 = vst.msk [vmem:[%s17592_s13 + $0x1a0] sm:$0xff] %vm8327_vm1, %v8315_v42  ;;  %v8316_v51 = vmax.f32 %v8252_v36, 0.0 }
 0x858   :  { %v7871_v54 = vpop.f32.mrb[44].mxu0 }
 0x859   :  { %8381 = vst.msk [vmem:[%s17592_s13 + $0x1a8] sm:$0xff] %vm8327_vm1, %v8316_v51  ;;  %v8161_v30 = vadd.f32 %v17340_v35, %v7871_v54  ;;  %v7873_v14 = vpop.f32.mrb[45].mxu0 }
 0x85a   :  { %v7874_v24 = vpop.f32.mrb[46].mxu0 }
 0x85b   :  { %v8253_v56 = vadd.f32 %v8161_v30, %v19107_v2  ;;  %v8164_v41 = vadd.f32 %v17346_v43, %v7874_v24  ;;  %v7876_v11 = vpop.f32.mrb[47].mxu0 }
 0x85d   :  { %v8317_v29 = vmax.f32 %v8253_v56, 0.0  ;;  %v8254_v32 = vadd.f32 %v8164_v41, %v19108_v57 }
 0x85f   :  { %8382 = vst.msk [vmem:[%s17592_s13 + $0x1b0] sm:$0xff] %vm8327_vm1, %v8317_v29  ;;  %v8318_v44 = vmax.f32 %v8254_v32, 0.0 }
 0x860   :  { %v7879_v63 = vpop.f32.mrb[48].mxu0 }
 0x861   :  { %8383 = vst.msk [vmem:[%s17592_s13 + $0x1b8] sm:$0xff] %vm8327_vm1, %v8318_v44  ;;  %v8169_v35 = vadd.f32 %v17362_v21, %v7879_v63  ;;  %v7881_v58 = vpop.f32.mrb[49].mxu0 }
 0x862   :  { %v7882_v43 = vpop.f32.mrb[50].mxu0 }
 0x863   :  { %v8255_v52 = vadd.f32 %v8169_v35, %v17080_v45  ;;  %v8172_v39 = vadd.f32 %v17368_v0, %v7882_v43  ;;  %v7884_v31 = vpop.f32.mrb[51].mxu0 }
 0x865   :  { %v8319_v22 = vmax.f32 %v8255_v52, 0.0  ;;  %v8256_v26 = vadd.f32 %v8172_v39, %v17087_v47 }
 0x867   :  { %8384 = vst.msk [vmem:[%s17592_s13 + $0x1c0] sm:$0xff] %vm8327_vm1, %v8319_v22  ;;  %v8320_v48 = vmax.f32 %v8256_v26, 0.0 }
 0x868   :  { %v7887_v33 = vpop.f32.mrb[52].mxu0 }
 0x869   :  { %8385 = vst.msk [vmem:[%s17592_s13 + $0x1c8] sm:$0xff] %vm8327_vm1, %v8320_v48  ;;  %v8177_v45 = vadd.f32 %v17360_v8, %v7887_v33  ;;  %v7889_v21 = vpop.f32.mrb[53].mxu0 }
 0x86a   :  { %v7890_v0 = vpop.f32.mrb[54].mxu0 }
 0x86b   :  { %v8257_v9 = vadd.f32 %v8177_v45, %v19109_v6  ;;  %v8180_v47 = vadd.f32 %v17366_v55, %v7890_v0  ;;  %v7892_v12 = vpop.f32.mrb[55].mxu0 }
 0x86d   :  { %v8321_v49 = vmax.f32 %v8257_v9, 0.0  ;;  %v8258_v34 = vadd.f32 %v8180_v47, %v19110_v1 }
 0x86f   :  { %8386 = vst.msk [vmem:[%s17592_s13 + $0x1d0] sm:$0xff] %vm8327_vm1, %v8321_v49  ;;  %v8322_v3 = vmax.f32 %v8258_v34, 0.0 }
 0x870   :  { %v7895_v28 = vpop.f32.mrb[56].mxu0 }
 0x871   :  { %8387 = vst.msk [vmem:[%s17592_s13 + $0x1d8] sm:$0xff] %vm8327_vm1, %v8322_v3  ;;  %v8185_v8 = vadd.f32 %v17382_v19, %v7895_v28  ;;  %v7897_v7 = vpop.f32.mrb[57].mxu0 }
 0x872   :  { %v7898_v55 = vpop.f32.mrb[58].mxu0 }
 0x873   :  { %v8259_v60 = vadd.f32 %v8185_v8, %v19111_v23  ;;  %v8188_v16 = vadd.f32 %v17388_v50, %v7898_v55  ;;  %v7900_v17 = vpop.f32.mrb[59].mxu0 }
 0x875   :  { %v8323_v25 = vmax.f32 %v8259_v60, 0.0  ;;  %v8260_v62 = vadd.f32 %v8188_v16, %v19112_v27 }
 0x877   :  { %8388 = vst.msk [vmem:[%s17592_s13 + $0x1e0] sm:$0xff] %vm8327_vm1, %v8323_v25  ;;  %v8324_v5 = vmax.f32 %v8260_v62, 0.0 }
 0x878   :  { %v7903_v18 = vpop.f32.mrb[60].mxu0 }
 0x879   :  { %8389 = vst.msk [vmem:[%s17592_s13 + $0x1e8] sm:$0xff] %vm8327_vm1, %v8324_v5  ;;  %v8193_v19 = vadd.f32 %v17380_v46, %v7903_v18  ;;  %v7905_v37 = vpop.f32.mrb[61].mxu0 }
 0x87a   :  { %v7906_v50 = vpop.f32.mrb[62].mxu0 }
 0x87b   :  { %v8261_v13 = vadd.f32 %v8193_v19, %v17106_v20  ;;  %v8196_v38 = vadd.f32 %v17386_v53, %v7906_v50  ;;  %v7908_v10 = vpop.f32.mrb[63].mxu0 }
 0x87d   :  { %v8325_v4 = vmax.f32 %v8261_v13, 0.0  ;;  %v8262_v59 = vadd.f32 %v8196_v38, %v17111_v15 }
 0x87f   :  { %8390 = vst.msk [vmem:[%s17592_s13 + $0x1f0] sm:$0xff] %vm8327_vm1, %v8325_v4  ;;  %v8326_v61 = vmax.f32 %v8262_v59, 0.0 }
 0x881   :  { %8391 = vst.msk [vmem:[%s17592_s13 + $0x1f8] sm:$0xff] %vm8327_vm1, %v8326_v61 }
 0x882   :  { %8396 = vsyncpa [#allocation4], 1 }

</bundles_post_ra>
